<compile_context>
chip_gen: v5e
topology: v5e:2x2
jax: 0.10.0
libtpu: 0.0.40
codegen_flags: <defaults>
</compile_context>

<pallas_src>
import math
from functools import partial

import jax
import jax.numpy as jnp
from jax.experimental import pallas as pl
from jax.experimental.pallas import tpu as pltpu


def _recip(x):
    """EUP approximate reciprocal refined by one Newton step (~f32 accuracy)."""
    r = pl.reciprocal(x, approx=True)
    return r * (2.0 - x * r)


# ----------------------------------------------------------------------------
# Pallas kernel: H-blocked Cauchy + rank-1 Woodbury + bilinear factor
# ----------------------------------------------------------------------------
def _nplr_kernel(v_ref, w_ref, zf_ref, out_ref, rhs_re_ref, rhs_im_ref, *,
                 n_chan, n_state):
    N = n_state
    c = n_chan
    lh = zf_ref.shape[-1]

    # Fourier nodes z and hoisted bilinear factor f = 2/(1+omega), (1, 1, Lh)
    zr = zf_ref[0:1, :].reshape(1, 1, lh)
    zi = zf_ref[1:2, :].reshape(1, 1, lh)
    fr = zf_ref[2:3, :].reshape(1, 1, lh)
    fi = zf_ref[3:4, :].reshape(1, 1, lh)

    # w*dt split into real / imag halves, (TH, N, 1)
    wr = w_ref[:, 0:N, :]
    wi = w_ref[:, N:2 * N, :]

    # a = 1/(z - w), b = 1/(z - conj(w))        (TH, N, Lh)
    dr = zr - wr
    di = zi - wi
    inv1 = _recip(dr * dr + di * di)
    a_re = dr * inv1
    a_im = -(di * inv1)
    d2i = zi + wi
    inv2 = _recip(dr * dr + d2i * d2i)
    b_re = dr * inv2
    b_im = -(d2i * inv2)

    # Packed RHS for the fused (re|im) contraction (LHS is [vr | vi]):
    #   r_re = [vr|vi] @ [[a_re+b_re],[b_im-a_im]]
    #   r_im = [vr|vi] @ [[a_im+b_im],[a_re-b_re]]
    rhs_re_ref[:, 0:N, :] = a_re + b_re
    rhs_re_ref[:, N:2 * N, :] = b_im - a_im
    rhs_im_ref[:, 0:N, :] = a_im + b_im
    rhs_im_ref[:, N:2 * N, :] = a_re - b_re

    v2 = v_ref[...]                                     # (TH, M_pad, 2N)
    r_re = jnp.einsum('hmk,hkl->hml', v2, rhs_re_ref[...],
                      preferred_element_type=jnp.float32)
    r_im = jnp.einsum('hmk,hkl->hml', v2, rhs_im_ref[...],
                      preferred_element_type=jnp.float32)

    # rank-1 Woodbury:  k_f = r00 - r01 * r10 / (1 + r11)
    r00_re = r_re[:, 0:c, :];              r00_im = r_im[:, 0:c, :]
    r01_re = r_re[:, c:c + 1, :];          r01_im = r_im[:, c:c + 1, :]
    r10_re = r_re[:, c + 1:2 * c + 1, :];  r10_im = r_im[:, c + 1:2 * c + 1, :]
    r11_re = r_re[:, 2 * c + 1:2 * c + 2, :]
    r11_im = r_im[:, 2 * c + 1:2 * c + 2, :]

    num_re = r01_re * r10_re - r01_im * r10_im
    num_im = r01_re * r10_im + r01_im * r10_re
    den_re = 1.0 + r11_re
    den_im = r11_im
    den_inv = _recip(den_re * den_re + den_im * den_im)
    frac_re = (num_re * den_re + num_im * den_im) * den_inv
    frac_im = (num_im * den_re - num_re * den_im) * den_inv
    kf_re = r00_re - frac_re
    kf_im = r00_im - frac_im

    # k_f <- k_f * 2/(1+omega)  (factor precomputed in the wrapper)
    out_ref[0] = kf_re * fr - kf_im * fi
    out_ref[1] = kf_re * fi + kf_im * fr


def _sskernel_pallas(v2, w_pack, zf, *, n_chan, n_state, block_h):
    H_pad, M_pad, twoN = v2.shape
    Lh_pad = zf.shape[-1]
    TH = block_h
    kernel = partial(_nplr_kernel, n_chan=n_chan, n_state=n_state)

    grid_spec = pltpu.PrefetchScalarGridSpec(
        num_scalar_prefetch=0,
        grid=(H_pad // TH,),
        in_specs=[
            pl.BlockSpec((TH, M_pad, twoN), lambda h: (h, 0, 0)),   # packed v*dt
            pl.BlockSpec((TH, twoN, 1), lambda h: (h, 0, 0)),       # packed w*dt
            pl.BlockSpec((4, Lh_pad), lambda h: (0, 0)),            # z / f table
        ],
        out_specs=pl.BlockSpec((2, TH, n_chan, Lh_pad),
                               lambda h: (0, h, 0, 0)),
        scratch_shapes=[pltpu.VMEM((TH, twoN, Lh_pad), jnp.float32),
                        pltpu.VMEM((TH, twoN, Lh_pad), jnp.float32)],
    )
    return pl.pallas_call(
        kernel,
        out_shape=jax.ShapeDtypeStruct((2, H_pad, n_chan, Lh_pad), jnp.float32),
        grid_spec=grid_spec,
        compiler_params=pltpu.CompilerParams(
            dimension_semantics=("parallel",)),
    )(v2, w_pack, zf)


# ----------------------------------------------------------------------------
# Parameter init (deterministic, synthetic) — shapes match SSKernelNPLR.__init__
# ----------------------------------------------------------------------------
def init_sskernel_params(key, *, H, N, n_chan, rank, L):
    k_b, k_p, k_c, k_dt = jax.random.split(key, 4)

    # w: HiPPO-like diagonal (negative real part), repeated over H
    w = (-0.5 * jnp.ones((N,), jnp.float32)
         + 1j * math.pi * jnp.arange(N, dtype=jnp.float32)).astype(jnp.complex64)
    w = jnp.broadcast_to(w, (H, N))

    b = jax.random.normal(k_b, (N, 2), jnp.float32) * 0.5
    B = jnp.broadcast_to((b[:, 0] + 1j * b[:, 1]).astype(jnp.complex64), (1, H, N))

    p = jax.random.normal(k_p, (rank, N, 2), jnp.float32) * 0.5
    P = jnp.broadcast_to((p[..., 0] + 1j * p[..., 1]).astype(jnp.complex64)[:, None, :],
                         (rank, H, N))
    Q = P  # Q = _resolve_conj(P.clone()) -> same numerical values

    c = jax.random.normal(k_c, (n_chan, H, N, 2), jnp.float32) * 0.5
    C = (c[..., 0] + 1j * c[..., 1]).astype(jnp.complex64)

    log_dt = jax.random.uniform(k_dt, (H,), jnp.float32,
                                minval=math.log(0.001), maxval=math.log(0.1))

    Lh = L // 2 + 1
    omega = (jnp.exp(-2j * jnp.pi / L) ** jnp.arange(Lh)).astype(jnp.complex64)
    z = (2 * (1 - omega) / (1 + omega)).astype(jnp.complex64)

    return dict(w=w, B=B, C=C, P=P, Q=Q, log_dt=log_dt,
                omega=omega, z=z, L=L)


# ----------------------------------------------------------------------------
# Forward pass (rate=1.0, state=None), hot path in Pallas
# ----------------------------------------------------------------------------
def sskernel_nplr_forward(params, *, block_h=8):
    w, B, C, P, Q = params["w"], params["B"], params["C"], params["P"], params["Q"]
    log_dt, omega, z, L = params["log_dt"], params["omega"], params["z"], params["L"]

    rank = P.shape[0]
    assert rank == 1, "only rank-1 Woodbury implemented in the kernel"
    n_chan, H, N = C.shape
    Lh = L // 2 + 1
    f32 = jnp.float32

    dt = jnp.exp(log_dt)                               # (H,)
    # fold dt: r = dt * cauchy(v, z, w*dt) == cauchy(dt*v, z, w*dt)
    wdt = w * dt[:, None]                              # (H, N) complex
    Bc = jnp.concatenate([B, P], axis=0)               # (1+r, H, N)
    Cc = jnp.concatenate([C, Q], axis=0)               # (c+r, H, N)
    v = Bc[:, None, :, :] * Cc[None, :, :, :]          # (1+r, c+r, H, N)
    M = (1 + rank) * (n_chan + rank)
    v_hmn = jnp.transpose(v, (2, 0, 1, 3)).reshape(H, M, N) * dt[:, None, None]

    # pack re/im along the contraction dim -> (H, M, 2N); pad M to mult of 8
    v2 = jnp.concatenate([jnp.real(v_hmn), jnp.imag(v_hmn)], axis=-1).astype(f32)
    M_pad = -(-M // 8) * 8
    if M_pad != M:
        v2 = jnp.pad(v2, ((0, 0), (0, M_pad - M), (0, 0)))

    # packed w*dt -> (H, 2N, 1): rows [re | im]
    w_pack = jnp.concatenate([jnp.real(wdt), jnp.imag(wdt)], axis=-1)
    w_pack = w_pack.astype(f32)[:, :, None]

    # z / f table, padded to a lane-dense multiple of 128 along Lh.
    Lh_pad = -(-Lh // 128) * 128
    pad_l = Lh_pad - Lh
    f = 2.0 / (1.0 + omega)                            # hoisted bilinear factor
    z_re = jnp.pad(jnp.real(z).astype(f32), (0, pad_l), constant_values=1.0)
    z_im = jnp.pad(jnp.imag(z).astype(f32), (0, pad_l), constant_values=0.0)
    f_re = jnp.pad(jnp.real(f).astype(f32), (0, pad_l), constant_values=0.0)
    f_im = jnp.pad(jnp.imag(f).astype(f32), (0, pad_l), constant_values=0.0)
    zf = jnp.stack([z_re, z_im, f_re, f_im], axis=0)   # (4, Lh_pad)

    # pad H to a multiple of the H-block size (padded rows produce exact zeros)
    TH = block_h
    H_pad = -(-H // TH) * TH
    if H_pad != H:
        v2 = jnp.pad(v2, ((0, H_pad - H), (0, 0), (0, 0)))
        w_pack = jnp.pad(w_pack, ((0, H_pad - H), (0, 0), (0, 0)),
                         constant_values=-1.0)

    out = _sskernel_pallas(v2, w_pack, zf, n_chan=n_chan, n_state=N,
                           block_h=TH)                 # (2, H_pad, c, Lh_pad)

    k_f = out[0, :H, :, :Lh] + 1j * out[1, :H, :, :Lh]  # (H, c, Lh) complex
    k = jnp.fft.irfft(k_f, axis=-1)[..., :L]            # (H, c, L) real
    k_B = jnp.transpose(k, (1, 0, 2))                   # (c, H, L) — torch k_B
    return k_B, None


# ----------------------------------------------------------------------------
# Pure-JAX reference (same math, complex arithmetic) for verification
# ----------------------------------------------------------------------------
def sskernel_nplr_forward_ref(params):
    w, B, C, P, Q = params["w"], params["B"], params["C"], params["P"], params["Q"]
    log_dt, omega, z, L = params["log_dt"], params["omega"], params["z"], params["L"]

    dt = jnp.exp(log_dt)
    wdt = w * dt[:, None]                               # (H, N)
    Bc = jnp.concatenate([B, P], axis=0)
    Cc = jnp.concatenate([C, Q], axis=0)
    v = Bc[:, None] * Cc[None, :]                       # (1+r, c+r, H, N)

    den = z[None, None, None, None, :] - wdt[None, None, :, :, None]
    den_c = z[None, None, None, None, :] - jnp.conj(wdt)[None, None, :, :, None]
    r = ((v[..., None] / den).sum(-2)
         + (jnp.conj(v)[..., None] / den_c).sum(-2))    # (1+r, c+r, H, Lh)
    r = r * dt[None, None, :, None]

    k_f = r[:-1, :-1] - r[:-1, -1:] * r[-1:, :-1] / (1 + r[-1:, -1:])
    k_f = k_f * 2 / (1 + omega)
    k = jnp.fft.irfft(k_f, axis=-1)[..., :L]
    return k[-1], None                                   # (c, H, L)


# ----------------------------------------------------------------------------
if __name__ == "__main__":
    H, N, n_chan, rank, L = 12, 32, 2, 1, 256

    params = init_sskernel_params(jax.random.PRNGKey(0),
                                  H=H, N=N, n_chan=n_chan, rank=rank, L=L)

    k_B, k_state = sskernel_nplr_forward(params)
    k_B = jax.block_until_ready(k_B)

    k_ref, _ = sskernel_nplr_forward_ref(params)
    k_ref = jax.block_until_ready(k_ref)

    assert k_B.shape == (n_chan, H, L), k_B.shape
    assert k_state is None

    err = float(jnp.max(jnp.abs(k_B - k_ref)))
    scale = float(jnp.max(jnp.abs(k_ref))) + 1e-6
    if not (err / scale < 5e-3):
        raise AssertionError(f"kernel mismatch: max_abs_err={err}, scale={scale}")

    print("KERNEL_OK")
</pallas_src>

<mosaic_0001>
module attributes {stable_mosaic.version = 11 : i64} {
  func.func @_nplr_kernel(%arg0: i32, %arg1: memref<8x8x64xf32, #tpu.memory_space<vmem>>, %arg2: memref<8x64x1xf32, #tpu.memory_space<vmem>>, %arg3: memref<4x256xf32, #tpu.memory_space<vmem>>, %arg4: memref<2x8x2x256xf32, #tpu.memory_space<vmem>>, %arg5: memref<8x64x256xf32, #tpu.memory_space<vmem>>, %arg6: memref<8x64x256xf32, #tpu.memory_space<vmem>>) attributes {dimension_semantics = [#tpu.dimension_semantics<parallel>], iteration_bounds = array<i64: 2>, scalar_prefetch = 0 : i64, scratch_operands = 2 : i64, tpu.core_type = #tpu.core_type<tc>, window_params = [{transform_indices = @transform_0, window_bounds = array<i64: 8, 8, 64>}, {transform_indices = @transform_1, window_bounds = array<i64: 8, 64, 1>}, {pipeline_mode = #tpu.pipeline_mode<synchronous>, transform_indices = @transform_2, window_bounds = array<i64: 4, 256>}, {transform_indices = @transform_3, window_bounds = array<i64: 2, 8, 2, 256>}]} {
    %c0 = arith.constant 0 : index
    %c0_0 = arith.constant 0 : index
    %0 = vector.load %arg3[%c0, %c0_0] : memref<4x256xf32, #tpu.memory_space<vmem>>, vector<1x256xf32>
    %1 = vector.shape_cast %0 : vector<1x256xf32> to vector<1x1x256xf32>
    %c1 = arith.constant 1 : index
    %c0_1 = arith.constant 0 : index
    %2 = vector.load %arg3[%c1, %c0_1] : memref<4x256xf32, #tpu.memory_space<vmem>>, vector<1x256xf32>
    %3 = vector.shape_cast %2 : vector<1x256xf32> to vector<1x1x256xf32>
    %c2 = arith.constant 2 : index
    %c0_2 = arith.constant 0 : index
    %4 = vector.load %arg3[%c2, %c0_2] : memref<4x256xf32, #tpu.memory_space<vmem>>, vector<1x256xf32>
    %5 = vector.shape_cast %4 : vector<1x256xf32> to vector<1x1x256xf32>
    %c3 = arith.constant 3 : index
    %c0_3 = arith.constant 0 : index
    %6 = vector.load %arg3[%c3, %c0_3] : memref<4x256xf32, #tpu.memory_space<vmem>>, vector<1x256xf32>
    %7 = vector.shape_cast %6 : vector<1x256xf32> to vector<1x1x256xf32>
    %c0_4 = arith.constant 0 : index
    %c0_5 = arith.constant 0 : index
    %c0_6 = arith.constant 0 : index
    %8 = vector.load %arg2[%c0_4, %c0_5, %c0_6] : memref<8x64x1xf32, #tpu.memory_space<vmem>>, vector<8x32x1xf32>
    %c0_7 = arith.constant 0 : index
    %c32 = arith.constant 32 : index
    %c0_8 = arith.constant 0 : index
    %9 = vector.load %arg2[%c0_7, %c32, %c0_8] : memref<8x64x1xf32, #tpu.memory_space<vmem>>, vector<8x32x1xf32>
    %10 = vector.broadcast %1 : vector<1x1x256xf32> to vector<8x32x256xf32>
    %11 = vector.broadcast %8 : vector<8x32x1xf32> to vector<8x32x256xf32>
    %12 = arith.subf %10, %11 : vector<8x32x256xf32>
    %13 = vector.broadcast %3 : vector<1x1x256xf32> to vector<8x32x256xf32>
    %14 = vector.broadcast %9 : vector<8x32x1xf32> to vector<8x32x256xf32>
    %15 = arith.subf %13, %14 : vector<8x32x256xf32>
    %16 = arith.mulf %12, %12 : vector<8x32x256xf32>
    %17 = arith.mulf %15, %15 : vector<8x32x256xf32>
    %18 = arith.addf %16, %17 : vector<8x32x256xf32>
    %19 = tpu.reciprocal %18 {approx = true} : vector<8x32x256xf32> -> vector<8x32x256xf32>
    %20 = arith.mulf %18, %19 : vector<8x32x256xf32>
    %cst = arith.constant 2.000000e+00 : f32
    %21 = vector.broadcast %cst : f32 to vector<8x32x256xf32>
    %22 = arith.subf %21, %20 : vector<8x32x256xf32>
    %23 = arith.mulf %19, %22 : vector<8x32x256xf32>
    %24 = arith.mulf %12, %23 : vector<8x32x256xf32>
    %25 = arith.mulf %15, %23 : vector<8x32x256xf32>
    %cst_9 = arith.constant 0.000000e+00 : f32
    %26 = vector.broadcast %cst_9 : f32 to vector<8x32x256xf32>
    %27 = arith.subf %26, %25 : vector<8x32x256xf32>
    %28 = vector.broadcast %3 : vector<1x1x256xf32> to vector<8x32x256xf32>
    %29 = vector.broadcast %9 : vector<8x32x1xf32> to vector<8x32x256xf32>
    %30 = arith.addf %28, %29 : vector<8x32x256xf32>
    %31 = arith.mulf %12, %12 : vector<8x32x256xf32>
    %32 = arith.mulf %30, %30 : vector<8x32x256xf32>
    %33 = arith.addf %31, %32 : vector<8x32x256xf32>
    %34 = tpu.reciprocal %33 {approx = true} : vector<8x32x256xf32> -> vector<8x32x256xf32>
    %35 = arith.mulf %33, %34 : vector<8x32x256xf32>
    %cst_10 = arith.constant 2.000000e+00 : f32
    %36 = vector.broadcast %cst_10 : f32 to vector<8x32x256xf32>
    %37 = arith.subf %36, %35 : vector<8x32x256xf32>
    %38 = arith.mulf %34, %37 : vector<8x32x256xf32>
    %39 = arith.mulf %12, %38 : vector<8x32x256xf32>
    %40 = arith.mulf %30, %38 : vector<8x32x256xf32>
    %cst_11 = arith.constant 0.000000e+00 : f32
    %41 = vector.broadcast %cst_11 : f32 to vector<8x32x256xf32>
    %42 = arith.subf %41, %40 : vector<8x32x256xf32>
    %43 = arith.addf %24, %39 : vector<8x32x256xf32>
    %c0_12 = arith.constant 0 : index
    %c0_13 = arith.constant 0 : index
    %c0_14 = arith.constant 0 : index
    %44 = vector.load %arg5[%c0_12, %c0_13, %c0_14] : memref<8x64x256xf32, #tpu.memory_space<vmem>>, vector<8x32x256xf32>
    tpu.vector_store %arg5[%c0_12, %c0_13, %c0_14], %43 {strides = array<i32>} : memref<8x64x256xf32, #tpu.memory_space<vmem>>, vector<8x32x256xf32>,
    %45 = arith.subf %42, %27 : vector<8x32x256xf32>
    %c0_15 = arith.constant 0 : index
    %c32_16 = arith.constant 32 : index
    %c0_17 = arith.constant 0 : index
    %46 = vector.load %arg5[%c0_15, %c32_16, %c0_17] : memref<8x64x256xf32, #tpu.memory_space<vmem>>, vector<8x32x256xf32>
    tpu.vector_store %arg5[%c0_15, %c32_16, %c0_17], %45 {strides = array<i32>} : memref<8x64x256xf32, #tpu.memory_space<vmem>>, vector<8x32x256xf32>,
    %47 = arith.addf %27, %42 : vector<8x32x256xf32>
    %c0_18 = arith.constant 0 : index
    %c0_19 = arith.constant 0 : index
    %c0_20 = arith.constant 0 : index
    %48 = vector.load %arg6[%c0_18, %c0_19, %c0_20] : memref<8x64x256xf32, #tpu.memory_space<vmem>>, vector<8x32x256xf32>
    tpu.vector_store %arg6[%c0_18, %c0_19, %c0_20], %47 {strides = array<i32>} : memref<8x64x256xf32, #tpu.memory_space<vmem>>, vector<8x32x256xf32>,
    %49 = arith.subf %24, %39 : vector<8x32x256xf32>
    %c0_21 = arith.constant 0 : index
    %c32_22 = arith.constant 32 : index
    %c0_23 = arith.constant 0 : index
    %50 = vector.load %arg6[%c0_21, %c32_22, %c0_23] : memref<8x64x256xf32, #tpu.memory_space<vmem>>, vector<8x32x256xf32>
    tpu.vector_store %arg6[%c0_21, %c32_22, %c0_23], %49 {strides = array<i32>} : memref<8x64x256xf32, #tpu.memory_space<vmem>>, vector<8x32x256xf32>,
    %c0_24 = arith.constant 0 : index
    %c0_25 = arith.constant 0 : index
    %c0_26 = arith.constant 0 : index
    %51 = vector.load %arg1[%c0_24, %c0_25, %c0_26] : memref<8x8x64xf32, #tpu.memory_space<vmem>>, vector<8x8x64xf32>
    %c0_27 = arith.constant 0 : index
    %c0_28 = arith.constant 0 : index
    %c0_29 = arith.constant 0 : index
    %52 = vector.load %arg5[%c0_27, %c0_28, %c0_29] : memref<8x64x256xf32, #tpu.memory_space<vmem>>, vector<8x64x256xf32>
    "tpu.trace_start"() <{level = 10 : i32, message = "hmk,hkl->hml"}> : () -> ()
    %cst_30 = arith.constant dense<0.000000e+00> : vector<8x8x256xf32>
    %53 = tpu.matmul %51, %52, %cst_30 {dimension_numbers = #tpu.dot_dimension_numbers<[2], [1], [1], [2], [0, 0, 0, 1, 1, 2], [0], [0]>} : vector<8x8x64xf32>, vector<8x64x256xf32>, vector<8x8x256xf32> -> vector<8x8x256xf32>
    "tpu.trace_stop"() : () -> ()
    %c0_31 = arith.constant 0 : index
    %c0_32 = arith.constant 0 : index
    %c0_33 = arith.constant 0 : index
    %54 = vector.load %arg6[%c0_31, %c0_32, %c0_33] : memref<8x64x256xf32, #tpu.memory_space<vmem>>, vector<8x64x256xf32>
    "tpu.trace_start"() <{level = 10 : i32, message = "hmk,hkl->hml"}> : () -> ()
    %cst_34 = arith.constant dense<0.000000e+00> : vector<8x8x256xf32>
    %55 = tpu.matmul %51, %54, %cst_34 {dimension_numbers = #tpu.dot_dimension_numbers<[2], [1], [1], [2], [0, 0, 0, 1, 1, 2], [0], [0]>} : vector<8x8x64xf32>, vector<8x64x256xf32>, vector<8x8x256xf32> -> vector<8x8x256xf32>
    "tpu.trace_stop"() : () -> ()
    %56 = vector.extract_strided_slice %53 {offsets = [0, 0, 0], sizes = [8, 2, 256], strides = [1, 1, 1]} : vector<8x8x256xf32> to vector<8x2x256xf32>
    %57 = vector.extract_strided_slice %55 {offsets = [0, 0, 0], sizes = [8, 2, 256], strides = [1, 1, 1]} : vector<8x8x256xf32> to vector<8x2x256xf32>
    %58 = vector.extract_strided_slice %53 {offsets = [0, 2, 0], sizes = [8, 1, 256], strides = [1, 1, 1]} : vector<8x8x256xf32> to vector<8x1x256xf32>
    %59 = vector.extract_strided_slice %55 {offsets = [0, 2, 0], sizes = [8, 1, 256], strides = [1, 1, 1]} : vector<8x8x256xf32> to vector<8x1x256xf32>
    %60 = vector.extract_strided_slice %53 {offsets = [0, 3, 0], sizes = [8, 2, 256], strides = [1, 1, 1]} : vector<8x8x256xf32> to vector<8x2x256xf32>
    %61 = vector.extract_strided_slice %55 {offsets = [0, 3, 0], sizes = [8, 2, 256], strides = [1, 1, 1]} : vector<8x8x256xf32> to vector<8x2x256xf32>
    %62 = vector.extract_strided_slice %53 {offsets = [0, 5, 0], sizes = [8, 1, 256], strides = [1, 1, 1]} : vector<8x8x256xf32> to vector<8x1x256xf32>
    %63 = vector.extract_strided_slice %55 {offsets = [0, 5, 0], sizes = [8, 1, 256], strides = [1, 1, 1]} : vector<8x8x256xf32> to vector<8x1x256xf32>
    %64 = vector.broadcast %58 : vector<8x1x256xf32> to vector<8x2x256xf32>
    %65 = arith.mulf %64, %60 : vector<8x2x256xf32>
    %66 = vector.broadcast %59 : vector<8x1x256xf32> to vector<8x2x256xf32>
    %67 = arith.mulf %66, %61 : vector<8x2x256xf32>
    %68 = arith.subf %65, %67 : vector<8x2x256xf32>
    %69 = vector.broadcast %58 : vector<8x1x256xf32> to vector<8x2x256xf32>
    %70 = arith.mulf %69, %61 : vector<8x2x256xf32>
    %71 = vector.broadcast %59 : vector<8x1x256xf32> to vector<8x2x256xf32>
    %72 = arith.mulf %71, %60 : vector<8x2x256xf32>
    %73 = arith.addf %70, %72 : vector<8x2x256xf32>
    %cst_35 = arith.constant 1.000000e+00 : f32
    %74 = vector.broadcast %cst_35 : f32 to vector<8x1x256xf32>
    %75 = arith.addf %74, %62 : vector<8x1x256xf32>
    %76 = arith.mulf %75, %75 : vector<8x1x256xf32>
    %77 = arith.mulf %63, %63 : vector<8x1x256xf32>
    %78 = arith.addf %76, %77 : vector<8x1x256xf32>
    %79 = tpu.reciprocal %78 {approx = true} : vector<8x1x256xf32> -> vector<8x1x256xf32>
    %80 = arith.mulf %78, %79 : vector<8x1x256xf32>
    %cst_36 = arith.constant 2.000000e+00 : f32
    %81 = vector.broadcast %cst_36 : f32 to vector<8x1x256xf32>
    %82 = arith.subf %81, %80 : vector<8x1x256xf32>
    %83 = arith.mulf %79, %82 : vector<8x1x256xf32>
    %84 = vector.broadcast %75 : vector<8x1x256xf32> to vector<8x2x256xf32>
    %85 = arith.mulf %68, %84 : vector<8x2x256xf32>
    %86 = vector.broadcast %63 : vector<8x1x256xf32> to vector<8x2x256xf32>
    %87 = arith.mulf %73, %86 : vector<8x2x256xf32>
    %88 = arith.addf %85, %87 : vector<8x2x256xf32>
    %89 = vector.broadcast %83 : vector<8x1x256xf32> to vector<8x2x256xf32>
    %90 = arith.mulf %88, %89 : vector<8x2x256xf32>
    %91 = vector.broadcast %75 : vector<8x1x256xf32> to vector<8x2x256xf32>
    %92 = arith.mulf %73, %91 : vector<8x2x256xf32>
    %93 = vector.broadcast %63 : vector<8x1x256xf32> to vector<8x2x256xf32>
    %94 = arith.mulf %68, %93 : vector<8x2x256xf32>
    %95 = arith.subf %92, %94 : vector<8x2x256xf32>
    %96 = vector.broadcast %83 : vector<8x1x256xf32> to vector<8x2x256xf32>
    %97 = arith.mulf %95, %96 : vector<8x2x256xf32>
    %98 = arith.subf %56, %90 : vector<8x2x256xf32>
    %99 = arith.subf %57, %97 : vector<8x2x256xf32>
    %100 = vector.broadcast %5 : vector<1x1x256xf32> to vector<8x2x256xf32>
    %101 = arith.mulf %98, %100 : vector<8x2x256xf32>
    %102 = vector.broadcast %7 : vector<1x1x256xf32> to vector<8x2x256xf32>
    %103 = arith.mulf %99, %102 : vector<8x2x256xf32>
    %104 = arith.subf %101, %103 : vector<8x2x256xf32>
    %c0_37 = arith.constant 0 : index
    %c0_38 = arith.constant 0 : index
    %c0_39 = arith.constant 0 : index
    %c0_40 = arith.constant 0 : index
    %105 = vector.load %arg4[%c0_37, %c0_38, %c0_39, %c0_40] : memref<2x8x2x256xf32, #tpu.memory_space<vmem>>, vector<1x8x2x256xf32>
    %106 = vector.shape_cast %105 : vector<1x8x2x256xf32> to vector<8x2x256xf32>
    %107 = vector.shape_cast %104 : vector<8x2x256xf32> to vector<1x8x2x256xf32>
    tpu.vector_store %arg4[%c0_37, %c0_38, %c0_39, %c0_40], %107 {strides = array<i32>} : memref<2x8x2x256xf32, #tpu.memory_space<vmem>>, vector<1x8x2x256xf32>,
    %108 = vector.broadcast %7 : vector<1x1x256xf32> to vector<8x2x256xf32>
    %109 = arith.mulf %98, %108 : vector<8x2x256xf32>
    %110 = vector.broadcast %5 : vector<1x1x256xf32> to vector<8x2x256xf32>
    %111 = arith.mulf %99, %110 : vector<8x2x256xf32>
    %112 = arith.addf %109, %111 : vector<8x2x256xf32>
    %c1_41 = arith.constant 1 : index
    %c0_42 = arith.constant 0 : index
    %c0_43 = arith.constant 0 : index
    %c0_44 = arith.constant 0 : index
    %113 = vector.load %arg4[%c1_41, %c0_42, %c0_43, %c0_44] : memref<2x8x2x256xf32, #tpu.memory_space<vmem>>, vector<1x8x2x256xf32>
    %114 = vector.shape_cast %113 : vector<1x8x2x256xf32> to vector<8x2x256xf32>
    %115 = vector.shape_cast %112 : vector<8x2x256xf32> to vector<1x8x2x256xf32>
    tpu.vector_store %arg4[%c1_41, %c0_42, %c0_43, %c0_44], %115 {strides = array<i32>} : memref<2x8x2x256xf32, #tpu.memory_space<vmem>>, vector<1x8x2x256xf32>,
    return
  }
  func.func @transform_0(%arg0: i32) -> (i32, i32, i32) {
    %c0_i32 = arith.constant 0 : i32
    %c0_i32_0 = arith.constant 0 : i32
    %c0_i32_1 = arith.constant 0 : i32
    return %arg0, %c0_i32, %c0_i32_0 : i32, i32, i32
  }
  func.func @transform_1(%arg0: i32) -> (i32, i32, i32) {
    %c0_i32 = arith.constant 0 : i32
    %c0_i32_0 = arith.constant 0 : i32
    %c0_i32_1 = arith.constant 0 : i32
    return %arg0, %c0_i32, %c0_i32_0 : i32, i32, i32
  }
  func.func @transform_2(%arg0: i32) -> (i32, i32) {
    %c0_i32 = arith.constant 0 : i32
    %c0_i32_0 = arith.constant 0 : i32
    %c0_i32_1 = arith.constant 0 : i32
    return %c0_i32, %c0_i32_0 : i32, i32
  }
  func.func @transform_3(%arg0: i32) -> (i32, i32, i32, i32) {
    %c0_i32 = arith.constant 0 : i32
    %c0_i32_0 = arith.constant 0 : i32
    %c0_i32_1 = arith.constant 0 : i32
    %c0_i32_2 = arith.constant 0 : i32
    return %c0_i32, %arg0, %c0_i32_0, %c0_i32_1 : i32, i32, i32, i32
  }
}

</mosaic_0001>

<bundles_post_ra>
// kernel: tpu_custom_call.1
= control target key start
LH: loop header
LB: loop body
LE: loop exit
PB: predicated region body
PF: predicated region fallthrough
CT: control target
= control target key end

     0   :  { %8 = vsyncpa [#allocation5], 0  ;;  %s9989_s0 = inlined_call_operand.vmem [shape: f32[16,8,64], index: 0, kind: input, shape index: {}]   ;;  %s9990_s1 = inlined_call_operand.vmem [shape: f32[16,64,1], index: 1, kind: input, shape index: {}]   ;;  %s9991_s2 = inlined_call_operand.vmem [shape: f32[4,256], index: 2, kind: input, shape index: {}]   ;;  %s9992_s3 = inlined_call_operand.hbm [shape: f32[2,16,2,256], index: 3, kind: output, shape index: {}]  }
   0x1   :  { %10 = vsyncpa [#allocation5 + $0x1], 0  ;;  %s4798_s12 = smov 0   ;;  %s4800_s13 = smov 0  }
   0x2   :  { %s4802_s14 = smov 0   ;;  %s4804_s15 = smov 0  }
   0x3 LB: > { %s4819_s16 = sadd.s32 4294967295, %s4768_s15   ;;  %s4325_s17 = sadd.s32 4294967294, %s4768_s15   ;;  %s4768_s15 = sphi %s4804_s15, %s11986_s15   ;;  %s4764_s14 = sphi %s4802_s14, %s11985_s14   ;;  %s4760_s13 = sphi %s4800_s13, %s11984_s13   ;;  %s4756_s12 = sphi %s4798_s12, %s11983_s12  }
   0x4   : > { %s4823_s18 = sadd.s32 1, %s4768_s15   ;;  %s96_s19 = sadd.s32 1, %s4764_s14 }
   0x5   : > { %s93_s20 = ssub.s32 %s4768_s15, %s4823_s18  ;;  %p106_p0 = scmp.ne.s32.totalorder %s4764_s14, %s4760_s13 }
   0x6   : > { %p94_p1 = scmp.eq.s32.totalorder %s93_s20, 0  ;;  %p107_p2 = scmp.eq.s32.totalorder %s4819_s16, 1 }
   0x7   : > { %p112_p3 = scmp.ne.s32.totalorder %s4760_s13, %s4756_s12  ;;  %p113_p4 = scmp.eq.s32.totalorder %s4325_s17, 1 }
   0x8   : > { %s4834_s21 = scalar_select %p94_p1, %s4764_s14, %s96_s19  }
   0x9   : > { %p4836_p5 = por %p107_p2, %p106_p0  ;;  %p4840_p6 = por %p113_p4, %p112_p3 }
   0xa   : > { %p4328_p7 = scmp.ge.s32.totalorder %s4768_s15, 1  ;;  %p153_p8 = scmp.lt.s32.totalorder %s4768_s15, 3 }
   0xc   : > { %p154_p9 = pnand %p4328_p7, %p153_p8 }
   0xe   : > { %157 = sbr.rel (%p154_p9) target bundleno = 1009 (0x3f1), region = 32 }
  0x13   : > { %s4330_s24 = sshll.u32 %s4819_s16, 3  ;;  %v4770_v0 = vmov 0   ;;  %v197_v58 = vld [vmem:[%s9991_s2] ss:$4 sm:$0x3]  ;;  %vm2654_vm0 = vcmask 523264  }
  0x14   : > { %4442 = vset.pattern.permute.xlu2 %v4770_v0  ;;  %4441 = vset.pattern.permute.xlu1 %v4770_v0  ;;  %p184_p10 = scmp.lt.s32.totalorder %s4330_s24, 15  ;;  %v4909_v62 = vperm.slane %v197_v58, 0  ;;  %v4911_v63 = vperm.slane %v197_v58, 1  ;;  %s180_s10 = sand.u32 1, %s4760_s13   ;;  %vm4089_vm1 = vcmask 1041408  }
  0x15   : > { %4440 = vset.pattern.permute.xlu0 %v4770_v0  ;;  %v4335_v0 = vld [vmem:[%s9991_s2 + $0x1] ss:$4 sm:$0x3]  ;;  %s4212_s26 = scalar_lea.sflag [#allocation5], %s180_s10 }
  0x16   : > { %s11988_s24 = smov (!%p184_p10, %s4330_s24), 15  ;;  %10641 = vst [vmem:[#allocation9_spill] sm:$0xff] %v4909_v62 }
  0x17   : > { %s4384_s25 = sshll.u32 %s11988_s24, 6  ;;  %s4331_s6 = sshll.u32 %s11988_s24, 3 }
  0x18   : > { %s4853_s28 = scalar_lea.vmem %s9990_s1, %s4384_s25  ;;  %s6867_s9 = scalar_lea.vmem %s9989_s0, %s4331_s6 }
  0x19   : > { %v208_v1 = vld [vmem:[%s4853_s28 + $0x40] sm:$0xff]  ;;  %v206_v2 = vld [vmem:[%s4853_s28 + $0x10] sm:$0xff]  ;;  %v209_v4 = vld [vmem:[%s4853_s28 + $0x48] sm:$0xff]  ;;  %s4329_s24 = sshll.u32 %s180_s10, 6 }
  0x1a   : > { %v204_v3 = vld [vmem:[%s4853_s28] sm:$0xff]  ;;  %295 = vperm.xlu2 %4442, %v208_v1   ;;  %285 = vperm.xlu1 %4441, %v206_v2   ;;  %v207_v5 = vld [vmem:[%s4853_s28 + $0x18] sm:$0xff]  ;;  %v205_v6 = vld [vmem:[%s4853_s28 + $0x8] sm:$0xff]  ;;  %s9623_s25 = scalar_lea.vmem [#allocation4], %s4329_s24 }
  0x1b   : > { %275 = vperm.xlu0 %4440, %v204_v3   ;;  %v212_v7 = vld [vmem:[%s4853_s28 + $0x80] sm:$0xff]  ;;  %v211_v8 = vld [vmem:[%s4853_s28 + $0x58] sm:$0xff]  ;;  %v210_v9 = vld [vmem:[%s4853_s28 + $0x50] sm:$0xff] }
  0x1c   : > { %v215_v10 = vld [vmem:[%s4853_s28 + $0x98] sm:$0xff]  ;;  %v214_v11 = vld [vmem:[%s4853_s28 + $0x90] sm:$0xff]  ;;  %v213_v12 = vld [vmem:[%s4853_s28 + $0x88] sm:$0xff] }
  0x1d   : > { %v218_v13 = vld [vmem:[%s4853_s28 + $0xd0] sm:$0xff]  ;;  %v217_v14 = vld [vmem:[%s4853_s28 + $0xc8] sm:$0xff]  ;;  %v216_v15 = vld [vmem:[%s4853_s28 + $0xc0] sm:$0xff] }
  0x1e   : > { %v241_v16 = vld [vmem:[%s4853_s28 + $0x68] sm:$0xff]  ;;  %v242_v17 = vld [vmem:[%s4853_s28 + $0x70] sm:$0xff]  ;;  %v243_v18 = vld [vmem:[%s4853_s28 + $0x78] sm:$0xff] }
  0x1f   : > { %v219_v19 = vld [vmem:[%s4853_s28 + $0xd8] sm:$0xff]  ;;  %v240_v20 = vld [vmem:[%s4853_s28 + $0x60] sm:$0xff]  ;;  %v237_v22 = vld [vmem:[%s4853_s28 + $0x28] sm:$0xff] }
  0x20   : > { %v239_v21 = vld [vmem:[%s4853_s28 + $0x38] sm:$0xff]  ;;  %v238_v24 = vld [vmem:[%s4853_s28 + $0x30] sm:$0xff]  ;;  %v249_v25 = vld [vmem:[%s4853_s28 + $0xe8] sm:$0xff] }
  0x21   : > { %v251_v23 = vld [vmem:[%s4853_s28 + $0xf8] sm:$0xff]  ;;  %v236_v26 = vld [vmem:[%s4853_s28 + $0x20] sm:$0xff]  ;;  %v250_v27 = vld [vmem:[%s4853_s28 + $0xf0] sm:$0xff] }
  0x22   : > { %300 = vperm.xlu2 %4442, %v209_v4   ;;  %290 = vperm.xlu1 %4441, %v207_v5   ;;  %v227_v28 = vld [vmem:[%s4853_s28 + $0x158] sm:$0xff]  ;;  %v248_v29 = vld [vmem:[%s4853_s28 + $0xe0] sm:$0xff]  ;;  %v226_v31 = vld [vmem:[%s4853_s28 + $0x150] sm:$0xff] }
  0x23   : > { %280 = vperm.xlu0 %4440, %v205_v6   ;;  %v247_v30 = vld [vmem:[%s4853_s28 + $0xb8] sm:$0xff]  ;;  %v246_v33 = vld [vmem:[%s4853_s28 + $0xb0] sm:$0xff]  ;;  %v225_v34 = vld [vmem:[%s4853_s28 + $0x148] sm:$0xff] }
  0x24   : > { %v259_v32 = vld [vmem:[%s4853_s28 + $0x178] sm:$0xff]  ;;  %v258_v35 = vld [vmem:[%s4853_s28 + $0x170] sm:$0xff]  ;;  %v245_v36 = vld [vmem:[%s4853_s28 + $0xa8] sm:$0xff] }
  0x25   : > { %v223_v38 = vld [vmem:[%s4853_s28 + $0x118] sm:$0xff]  ;;  %v257_v39 = vld [vmem:[%s4853_s28 + $0x168] sm:$0xff]  ;;  %v244_v40 = vld [vmem:[%s4853_s28 + $0xa0] sm:$0xff] }
  0x26   : > { %v256_v42 = vld [vmem:[%s4853_s28 + $0x160] sm:$0xff]  ;;  %v255_v43 = vld [vmem:[%s4853_s28 + $0x138] sm:$0xff]  ;;  %v254_v46 = vld [vmem:[%s4853_s28 + $0x130] sm:$0xff] }
  0x27   : > { %v224_v44 = vld [vmem:[%s4853_s28 + $0x140] sm:$0xff]  ;;  %v235_v47 = vld [vmem:[%s4853_s28 + $0x1d8] sm:$0xff]  ;;  %v222_v48 = vld [vmem:[%s4853_s28 + $0x110] sm:$0xff] }
  0x28   : > { %v234_v52 = vld [vmem:[%s4853_s28 + $0x1d0] sm:$0xff]  ;;  %v221_v53 = vld [vmem:[%s4853_s28 + $0x108] sm:$0xff]  ;;  %v267_v54 = vld [vmem:[%s4853_s28 + $0x1f8] sm:$0xff] }
  0x29   : > { %v220_v59 = vld [vmem:[%s4853_s28 + $0x100] sm:$0xff]  ;;  %v266_v60 = vld [vmem:[%s4853_s28 + $0x1f0] sm:$0xff]  ;;  %v253_v61 = vld [vmem:[%s4853_s28 + $0x128] sm:$0xff] }
  0x2a   : > { %315 = vperm.xlu2 %4442, %v212_v7   ;;  %310 = vperm.xlu1 %4441, %v211_v8  }
  0x2b   : > { %305 = vperm.xlu0 %4440, %v210_v9  }
  0x32   : > { %330 = vperm.xlu2 %4442, %v215_v10   ;;  %325 = vperm.xlu1 %4441, %v214_v11   ;;  %v4934_v10 = vperm.slane %v4335_v0, 0 }
  0x33   : > { %320 = vperm.xlu0 %4440, %v213_v12  }
  0x3a   : > { %345 = vperm.xlu2 %4442, %v218_v13   ;;  %340 = vperm.xlu1 %4441, %v217_v14   ;;  %v4942_v13 = vperm.slane %v4335_v0, 1  ;;  %v265_v14 = vld [vmem:[%s4853_s28 + $0x1e8] sm:$0xff] }
  0x3b   : > { %335 = vperm.xlu0 %4440, %v216_v15   ;;  %v252_v15 = vld [vmem:[%s4853_s28 + $0x120] sm:$0xff] }
  0x42   : > { %529 = vperm.xlu2 %4442, %v241_v16   ;;  %534 = vperm.xlu1 %4441, %v242_v17  }
  0x43   : > { %539 = vperm.xlu0 %4440, %v243_v18  }
  0x4a   : > { %350 = vperm.xlu2 %4442, %v219_v19   ;;  %524 = vperm.xlu1 %4441, %v240_v20   ;;  %v233_v19 = vld [vmem:[%s4853_s28 + $0x1c8] sm:$0xff] }
  0x4b   : > { %519 = vperm.xlu0 %4440, %v239_v21  }
  0x52   : > { %509 = vperm.xlu2 %4442, %v237_v22   ;;  %579 = vperm.xlu1 %4441, %v251_v23  }
  0x53   : > { %514 = vperm.xlu0 %4440, %v238_v24  }
  0x5a   : > { %569 = vperm.xlu2 %4442, %v249_v25   ;;  %504 = vperm.xlu1 %4441, %v236_v26  }
  0x5b   : > { %574 = vperm.xlu0 %4440, %v250_v27  }
  0x62   : > { %390 = vperm.xlu2 %4442, %v227_v28   ;;  %564 = vperm.xlu1 %4441, %v248_v29  }
  0x63   : > { %559 = vperm.xlu0 %4440, %v247_v30  }
  0x6a   : > { %385 = vperm.xlu2 %4442, %v226_v31   ;;  %619 = vperm.xlu1 %4441, %v259_v32  }
  0x6b   : > { %554 = vperm.xlu0 %4440, %v246_v33  }
  0x72   : > { %380 = vperm.xlu2 %4442, %v225_v34   ;;  %614 = vperm.xlu1 %4441, %v258_v35  }
  0x73   : > { %549 = vperm.xlu0 %4440, %v245_v36  }
  0x74   : > { %v296_v37 = vpop.permute.xlu2 %295 }
  0x75   : > { %v4917_v1 = vsub.f32 %v4909_v62, %v296_v37  ;;  %v4920_v4 = vsub.f32 %v4911_v63, %v296_v37 }
  0x77   : > { %10642 = vst [vmem:[#allocation10_spill] sm:$0xff] %v4917_v1  ;;  %v4948_v16 = vmul.f32 %v4917_v1, %v4917_v1  ;;  %v4959_v20 = vmul.f32 %v4920_v4, %v4920_v4 }
  0x78   : > { %10643 = vst [vmem:[#allocation11_spill] sm:$0xff] %v4920_v4 }
  0x7a   : > { %370 = vperm.xlu2 %4442, %v223_v38   ;;  %609 = vperm.xlu1 %4441, %v257_v39  }
  0x7b   : > { %544 = vperm.xlu0 %4440, %v244_v40  }
  0x7c   : > { %v301_v41 = vpop.permute.xlu2 %300 }
  0x7d   : > { %v4923_v5 = vsub.f32 %v4909_v62, %v301_v41  ;;  %v4926_v6 = vsub.f32 %v4911_v63, %v301_v41 }
  0x7f   : > { %10644 = vst [vmem:[#allocation12_spill] sm:$0xff] %v4923_v5  ;;  %v736_v21 = vmul.f32 %v4923_v5, %v4923_v5  ;;  %v4965_v22 = vmul.f32 %v4926_v6, %v4926_v6 }
  0x80   : > { %10645 = vst [vmem:[#allocation13_spill] sm:$0xff] %v4926_v6 }
  0x82   : > { %604 = vperm.xlu2 %4442, %v256_v42   ;;  %599 = vperm.xlu1 %4441, %v255_v43  }
  0x83   : > { %375 = vperm.xlu0 %4440, %v224_v44  }
  0x84   : > { %v316_v45 = vpop.permute.xlu2 %315 }
  0x85   : > { %v4929_v7 = vsub.f32 %v4909_v62, %v316_v45  ;;  %v4932_v9 = vsub.f32 %v4911_v63, %v316_v45 }
  0x87   : > { %10646 = vst [vmem:[#allocation14_spill] sm:$0xff] %v4929_v7  ;;  %v4969_v23 = vmul.f32 %v4929_v7, %v4929_v7  ;;  %v4973_v24 = vmul.f32 %v4932_v9, %v4932_v9 }
  0x88   : > { %10647 = vst [vmem:[#allocation15_spill] sm:$0xff] %v4932_v9 }
  0x89   : > { %10652 = vst [vmem:[#allocation20_spill] sm:$0xff] %v4969_v23  ;;  %v262_v23 = vld [vmem:[%s4853_s28 + $0x1b0] sm:$0xff] }
  0x8a   : > { %594 = vperm.xlu2 %4442, %v254_v46   ;;  %430 = vperm.xlu1 %4441, %v235_v47   ;;  %10653 = vst [vmem:[#allocation21_spill] sm:$0xff] %v4973_v24 }
  0x8b   : > { %365 = vperm.xlu0 %4440, %v222_v48  }
  0x8c   : > { %v331_v49 = vpop.permute.xlu2 %330  ;;  %v286_v50 = vpop.permute.xlu1 %285 }
  0x8d   : > { %v276_v51 = vpop.permute.xlu0 %275  ;;  %v4937_v11 = vsub.f32 %v4909_v62, %v331_v49  ;;  %v4940_v12 = vsub.f32 %v4911_v63, %v331_v49  ;;  %v4951_v17 = vsub.f32 %v4909_v62, %v286_v50  ;;  %v4954_v18 = vsub.f32 %v4911_v63, %v286_v50  ;;  %v263_v50 = vld [vmem:[%s4853_s28 + $0x1b8] sm:$0xff] }
  0x8e   : > { %v4976_v25 = vsub.f32 %v4909_v62, %v276_v51  ;;  %v4990_v29 = vsub.f32 %v4911_v63, %v276_v51  ;;  %v232_v51 = vld [vmem:[%s4853_s28 + $0x1c0] sm:$0xff] }
  0x8f   : > { %10648 = vst [vmem:[#allocation16_spill] sm:$0xff] %v4937_v11  ;;  %v4983_v27 = vmul.f32 %v4937_v11, %v4937_v11  ;;  %v4987_v28 = vmul.f32 %v4940_v12, %v4940_v12  ;;  %v4997_v31 = vmul.f32 %v4951_v17, %v4951_v17  ;;  %v5001_v32 = vmul.f32 %v4954_v18, %v4954_v18 }
  0x90   : > { %10649 = vst [vmem:[#allocation17_spill] sm:$0xff] %v4940_v12  ;;  %v5023_v42 = vmul.f32 %v4976_v25, %v4976_v25 }
  0x91   : > { %10650 = vst [vmem:[#allocation18_spill] sm:$0xff] %v4951_v17 }
  0x92   : > { %425 = vperm.xlu2 %4442, %v234_v52   ;;  %360 = vperm.xlu1 %4441, %v221_v53   ;;  %10651 = vst [vmem:[#allocation19_spill] sm:$0xff] %v4954_v18  ;;  %v5048_v52 = vmul.f32 %v4990_v29, %v4990_v29 }
  0x93   : > { %659 = vperm.xlu0 %4440, %v267_v54   ;;  %10654 = vst [vmem:[#allocation22_spill] sm:$0xff] %v4976_v25 }
  0x94   : > { %v346_v55 = vpop.permute.xlu2 %345  ;;  %v291_v56 = vpop.permute.xlu1 %290  ;;  %10655 = vst [vmem:[#allocation23_spill] sm:$0xff] %v4983_v27 }
  0x95   : > { %v281_v57 = vpop.permute.xlu0 %280  ;;  %10656 = vst [vmem:[#allocation24_spill] sm:$0xff] %v4987_v28  ;;  %v5004_v33 = vsub.f32 %v4909_v62, %v346_v55  ;;  %v5010_v37 = vsub.f32 %v4911_v63, %v346_v55  ;;  %v5013_v38 = vsub.f32 %v4909_v62, %v291_v56  ;;  %v5016_v39 = vsub.f32 %v4911_v63, %v291_v56  ;;  %v231_v56 = vld [vmem:[%s4853_s28 + $0x198] sm:$0xff] }
  0x96   : > { %10657 = vst [vmem:[#allocation25_spill] sm:$0xff] %v4990_v29  ;;  %v5019_v40 = vsub.f32 %v4909_v62, %v281_v57  ;;  %v5026_v43 = vsub.f32 %v4911_v63, %v281_v57 }
  0x97   : > { %10658 = vst [vmem:[#allocation26_spill] sm:$0xff] %v5004_v33  ;;  %v5052_v53 = vmul.f32 %v5004_v33, %v5004_v33  ;;  %v5062_v57 = vmul.f32 %v5010_v37, %v5010_v37  ;;  %v5066_v58 = vmul.f32 %v5013_v38, %v5013_v38 }
  0x98   : > { %10659 = vst [vmem:[#allocation27_spill] sm:$0xff] %v5010_v37 }
  0x99   : > { %10660 = vst [vmem:[#allocation28_spill] sm:$0xff] %v5013_v38 }
  0x9a   : > { %355 = vperm.xlu2 %4442, %v220_v59   ;;  %654 = vperm.xlu1 %4441, %v266_v60   ;;  %10661 = vst [vmem:[#allocation29_spill] sm:$0xff] %v5016_v39  ;;  %v5070_v59 = vmul.f32 %v5016_v39, %v5016_v39  ;;  %v728_v60 = vmul.f32 %v5019_v40, %v5019_v40 }
  0x9b   : > { %589 = vperm.xlu0 %4440, %v253_v61   ;;  %10662 = vst [vmem:[#allocation30_spill] sm:$0xff] %v5019_v40  ;;  %v729_v61 = vmul.f32 %v5026_v43, %v5026_v43 }
  0x9c   : > { %v530_v2 = vpop.permute.xlu2 %529  ;;  %v311_v3 = vpop.permute.xlu1 %310  ;;  %10663 = vst [vmem:[#allocation31_spill] sm:$0xff] %v5026_v43  ;;  %v264_v43 = vld [vmem:[%s4853_s28 + $0x1e0] sm:$0xff] }
  0x9d   : > { %v306_v8 = vpop.permute.xlu0 %305  ;;  %v4979_v26 = vsub.f32 %v4934_v10, %v530_v2  ;;  %v4993_v30 = vsub.f32 %v4942_v13, %v530_v2  ;;  %v5007_v34 = vadd.f32 %v530_v2, %v4934_v10  ;;  %v5031_v45 = vadd.f32 %v530_v2, %v4942_v13  ;;  %10668 = vst [vmem:[#allocation36_spill] sm:$0xff] %v5066_v58 }
  0x9e   : > { %v5036_v47 = vsub.f32 %v4909_v62, %v311_v3  ;;  %v5039_v48 = vsub.f32 %v4911_v63, %v311_v3  ;;  %v5042_v49 = vsub.f32 %v4909_v62, %v306_v8  ;;  %v5057_v55 = vsub.f32 %v4911_v63, %v306_v8  ;;  %10669 = vst [vmem:[#allocation37_spill] sm:$0xff] %v5070_v59 }
  0x9f   : > { %v800_v44 = vmul.f32 %v4979_v26, %v4979_v26  ;;  %v801_v46 = vmul.f32 %v4993_v30, %v4993_v30  ;;  %v1440_v54 = vmul.f32 %v5007_v34, %v5007_v34  ;;  %v1441_v2 = vmul.f32 %v5031_v45, %v5031_v45 }
  0xa0   : > { %10664 = vst [vmem:[#allocation32_spill] sm:$0xff] %v5036_v47  ;;  %v5085_v8 = vmul.f32 %v5036_v47, %v5036_v47 }
  0xa1   : > { %10665 = vst [vmem:[#allocation33_spill] sm:$0xff] %v5039_v48  ;;  %v5076_v0 = vadd.f32 %v800_v44, %v736_v21  ;;  %v5081_v3 = vadd.f32 %v801_v46, %v4965_v22  ;;  %v5099_v44 = vmul.f32 %v5057_v55, %v5057_v55 }
  0xa2   : > { %649 = vperm.xlu2 %4442, %v265_v14   ;;  %584 = vperm.xlu1 %4441, %v252_v15   ;;  %10666 = vst [vmem:[#allocation34_spill] sm:$0xff] %v5042_v49  ;;  %v5089_v14 = vmul.f32 %v5039_v48, %v5039_v48  ;;  %v5093_v15 = vmul.f32 %v5042_v49, %v5042_v49 }
  0xa3   : > { %420 = vperm.xlu0 %4440, %v233_v19   ;;  %10667 = vst [vmem:[#allocation35_spill] sm:$0xff] %v5057_v55  ;;  %v5095_v19 = vadd.f32 %v1440_v54, %v736_v21  ;;  %4443 = vrcp.f32 %v5076_v0 }
  0xa4   : > { %v351_v35 = vpop.permute.xlu2 %350  ;;  %v326_v36 = vpop.permute.xlu1 %325  ;;  %4445 = vrcp.f32 %v5081_v3 }
  0xa5   : > { %v321_v41 = vpop.permute.xlu0 %320  ;;  %v5102_v46 = vsub.f32 %v4909_v62, %v351_v35  ;;  %v5124_v11 = vsub.f32 %v4909_v62, %v326_v36  ;;  %v5127_v37 = vsub.f32 %v4911_v63, %v326_v36  ;;  %4447 = vrcp.f32 %v5095_v19 }
  0xa6   : > { %v5131_v33 = vsub.f32 %v4909_v62, %v321_v41 }
  0xa7   : > { %10670 = vst [vmem:[#allocation38_spill] sm:$0xff] %v5102_v46  ;;  %v5169_v17 = vmul.f32 %v5127_v37, %v5127_v37 }
  0xa8   : > { %10676 = vst [vmem:[#allocation44_spill] sm:$0xff] %v5124_v11 }
  0xa9   : > { %10677 = vst [vmem:[#allocation45_spill] sm:$0xff] %v5127_v37  ;;  %v5187_v37 = vpop.eup %4443 }
  0xaa   : > { %639 = vperm.xlu2 %4442, %v263_v50   ;;  %415 = vperm.xlu1 %4441, %v232_v51   ;;  %v5105_v50 = vsub.f32 %v4911_v63, %v351_v35  ;;  %v5121_v35 = vadd.f32 %v1441_v2, %v4965_v22  ;;  %10678 = vst [vmem:[#allocation46_spill] sm:$0xff] %v5131_v33  ;;  %v230_v22 = vld [vmem:[%s4853_s28 + $0x190] sm:$0xff] }
  0xab   : > { %410 = vperm.xlu0 %4440, %v231_v56   ;;  %10683 = vst [vmem:[#allocation51_spill] sm:$0xff] %v5169_v17  ;;  %v261_v17 = vld [vmem:[%s4853_s28 + $0x1a8] sm:$0xff] }
  0xac   : > { %10671 = vst [vmem:[#allocation39_spill] sm:$0xff] %v5105_v50  ;;  %v510_v51 = vpop.permute.xlu2 %509  ;;  %v341_v9 = vpop.permute.xlu1 %340  ;;  %v5158_v40 = vmul.f32 %v5105_v50, %v5105_v50  ;;  %4449 = vrcp.f32 %v5121_v35  ;;  %v5175_v50 = vmul.f32 %v5131_v33, %v5131_v33 }
  0xad   : > { %v5108_v7 = vsub.f32 %v4934_v10, %v510_v51  ;;  %v5111_v21 = vsub.f32 %v4942_v13, %v510_v51  ;;  %v5114_v54 = vadd.f32 %v510_v51, %v4934_v10  ;;  %v5117_v56 = vadd.f32 %v510_v51, %v4942_v13  ;;  %v336_v12 = vpop.permute.xlu0 %335 }
  0xae   : > { %v5134_v51 = vsub.f32 %v4911_v63, %v321_v41  ;;  %v5145_v29 = vsub.f32 %v4909_v62, %v341_v9  ;;  %v5148_v25 = vsub.f32 %v4911_v63, %v341_v9  ;;  %v5154_v41 = vmul.f32 %v5102_v46, %v5102_v46  ;;  %10685 = vst [vmem:[#allocation53_spill] sm:$0xff] %v5175_v50  ;;  %v5197_v50 = vpop.eup %4445 }
  0xaf   : > { %10672 = vst [vmem:[#allocation40_spill] sm:$0xff] %v5108_v7  ;;  %v792_v24 = vmul.f32 %v5108_v7, %v5108_v7  ;;  %v793_v2 = vmul.f32 %v5111_v21, %v5111_v21  ;;  %v1432_v36 = vmul.f32 %v5114_v54, %v5114_v54  ;;  %v1433_v18 = vmul.f32 %v5117_v56, %v5117_v56  ;;  %v228_v7 = vld [vmem:[%s4853_s28 + $0x180] sm:$0xff] }
  0xb0   : > { %10673 = vst [vmem:[#allocation41_spill] sm:$0xff] %v5111_v21  ;;  %v5165_v9 = vmul.f32 %v5124_v11, %v5124_v11  ;;  %v5179_v46 = vmul.f32 %v5134_v51, %v5134_v51  ;;  %v5182_v38 = vsub.f32 %v4909_v62, %v336_v12  ;;  %v5185_v11 = vsub.f32 %v4911_v63, %v336_v12 }
  0xb1   : > { %10674 = vst [vmem:[#allocation42_spill] sm:$0xff] %v5114_v54  ;;  %v5171_v39 = vadd.f32 %v792_v24, %v728_v60  ;;  %v5189_v24 = vadd.f32 %v793_v2, %v729_v61  ;;  %v5199_v12 = vadd.f32 %v1433_v18, %v729_v61 }
  0xb2   : > { %10675 = vst [vmem:[#allocation43_spill] sm:$0xff] %v5117_v56  ;;  %634 = vperm.xlu2 %4442, %v262_v23   ;;  %405 = vperm.xlu1 %4441, %v230_v22   ;;  %v5191_v23 = vadd.f32 %v1432_v36, %v728_v60  ;;  %v752_v22 = vmul.f32 %v5145_v29, %v5145_v29 }
  0xb3   : > { %10679 = vst [vmem:[#allocation47_spill] sm:$0xff] %v5134_v51  ;;  %644 = vperm.xlu0 %4440, %v264_v43   ;;  %v753_v51 = vmul.f32 %v5148_v25, %v5148_v25  ;;  %4451 = vrcp.f32 %v5171_v39  ;;  %v5257_v5 = vmul.f32 %v5182_v38, %v5182_v38 }
  0xb4   : > { %10680 = vst [vmem:[#allocation48_spill] sm:$0xff] %v5145_v29  ;;  %v570_v33 = vpop.permute.xlu2 %569  ;;  %v5222_v29 = vpop.eup %4447  ;;  %4453 = vrcp.f32 %v5189_v24 }
  0xb5   : > { %10681 = vst [vmem:[#allocation49_spill] sm:$0xff] %v5148_v25  ;;  %v5202_v43 = vsub.f32 %v4934_v10, %v570_v33  ;;  %v5205_v2 = vsub.f32 %v4942_v13, %v570_v33  ;;  %v5208_v60 = vadd.f32 %v570_v33, %v4934_v10  ;;  %v5210_v36 = vpop.permute.xlu0 %539  ;;  %v5214_v25 = vadd.f32 %v570_v33, %v4942_v13 }
  0xb6   : > { %10682 = vst [vmem:[#allocation50_spill] sm:$0xff] %v5165_v9  ;;  %4455 = vrcp.f32 %v5191_v23 }
  0xb7   : > { %10684 = vst [vmem:[#allocation52_spill] sm:$0xff] %v5171_v39  ;;  %v816_v56 = vmul.f32 %v5202_v43, %v5202_v43  ;;  %v817_v21 = vmul.f32 %v5205_v2, %v5205_v2  ;;  %v1456_v54 = vmul.f32 %v5208_v60, %v5208_v60  ;;  %v5234_v39 = vpop.eup %4449  ;;  %v1457_v4 = vmul.f32 %v5214_v25, %v5214_v25 }
  0xb8   : > { %10686 = vst [vmem:[#allocation54_spill] sm:$0xff] %v5179_v46  ;;  %v535_v46 = vpop.permute.xlu1 %534  ;;  %4457 = vrcp.f32 %v5199_v12 }
  0xb9   : > { %10687 = vst [vmem:[#allocation55_spill] sm:$0xff] %v5182_v38  ;;  %v5217_v18 = vsub.f32 %v4934_v10, %v535_v46  ;;  %v5220_v61 = vsub.f32 %v4942_v13, %v535_v46  ;;  %v5231_v33 = vadd.f32 %v535_v46, %v4934_v10  ;;  %v5248_v9 = vadd.f32 %v816_v56, %v752_v22 }
  0xba   : > { %10688 = vst [vmem:[#allocation56_spill] sm:$0xff] %v5185_v11  ;;  %v5250_v6 = vadd.f32 %v817_v21, %v753_v51  ;;  %395 = vperm.xlu2 %4442, %v228_v7   ;;  %v5266_v21 = vadd.f32 %v1456_v54, %v752_v22  ;;  %v5268_v56 = vadd.f32 %v1457_v4, %v753_v51 }
  0xbb   : > { %10689 = vst [vmem:[#allocation57_spill] sm:$0xff] %v5189_v24  ;;  %v802_v1 = vmul.f32 %v5217_v18, %v5217_v18  ;;  %629 = vperm.xlu1 %4441, %v261_v17   ;;  %v5272_v38 = vmul.f32 %v5187_v37, %v5076_v0  ;;  %4459 = vrcp.f32 %v5248_v9  ;;  %v5294_v22 = vsub.f32 %v4934_v10, %v5210_v36 }
  0xbc   : > { %10690 = vst [vmem:[#allocation58_spill] sm:$0xff] %v5191_v23  ;;  %v5274_v23 = vpop.eup %4451  ;;  %v391_v4 = vpop.permute.xlu2 %390  ;;  %4461 = vrcp.f32 %v5250_v6 }
  0xbd   : > { %10691 = vst [vmem:[#allocation59_spill] sm:$0xff] %v5199_v12  ;;  %v5290_v51 = vpop.permute.xlu0 %519  ;;  %4463 = vrcp.f32 %v5266_v21  ;;  %v5319_v12 = vsub.f32 %v4911_v63, %v391_v4 }
  0xbe   : > { %10692 = vst [vmem:[#allocation60_spill] sm:$0xff] %v5202_v43  ;;  %v803_v43 = vmul.f32 %v5220_v61, %v5220_v61  ;;  %4465 = vrcp.f32 %v5268_v56 }
  0xbf   : > { %10693 = vst [vmem:[#allocation61_spill] sm:$0xff] %v5205_v2  ;;  %v5243_v2 = vadd.f32 %v535_v46, %v4942_v13  ;;  %v5261_v46 = vmul.f32 %v5185_v11, %v5185_v11  ;;  %v5278_v11 = vadd.f32 %v802_v1, %v5093_v15  ;;  %v5298_v1 = vadd.f32 %v5210_v36, %v4934_v10 }
  0xc0   : > { %10694 = vst [vmem:[#allocation62_spill] sm:$0xff] %v5208_v60  ;;  %v229_v60 = vld [vmem:[%s4853_s28 + $0x188] sm:$0xff]  ;;  %v5281_v7 = vadd.f32 %v803_v43, %v5099_v44  ;;  %v525_v17 = vpop.permute.xlu1 %524 }
  0xc1   : > { %10695 = vst [vmem:[#allocation63_spill] sm:$0xff] %v5214_v25  ;;  %v1442_v25 = vmul.f32 %v5231_v33, %v5231_v33  ;;  %v1443_v24 = vmul.f32 %v5243_v2, %v5243_v2  ;;  %400 = vperm.xlu0 %4440, %v229_v60   ;;  %v5288_v0 = vsub.f32 %v4934_v10, %v525_v17  ;;  %4467 = vrcp.f32 %v5278_v11 }
  0xc2   : > { %10696 = vst [vmem:[#allocation64_spill] sm:$0xff] %v5248_v9  ;;  %v5307_v43 = vadd.f32 %v525_v17, %v4934_v10  ;;  %v5310_v60 = vadd.f32 %v525_v17, %v4942_v13  ;;  %v5316_v9 = vsub.f32 %v4909_v62, %v391_v4  ;;  %4469 = vrcp.f32 %v5281_v7 }
  0xc3   : > { %10697 = vst [vmem:[#allocation65_spill] sm:$0xff] %v5250_v6  ;;  %v5284_v54 = vadd.f32 %v1442_v25, %v5093_v15  ;;  %v5301_v25 = vadd.f32 %v1443_v24, %v5099_v44  ;;  %v5304_v15 = vsub.f32 %v4942_v13, %v525_v17  ;;  %v5312_v6 = vpop.eup %4453  ;;  %v798_v44 = vmul.f32 %v5288_v0, %v5288_v0 }
  0xc4   : > { %10698 = vst [vmem:[#allocation66_spill] sm:$0xff] %v5266_v21  ;;  %v5323_v24 = vpop.eup %4455  ;;  %v1439_v21 = vmul.f32 %v5310_v60, %v5310_v60 }
  0xc5   : > { %10699 = vst [vmem:[#allocation67_spill] sm:$0xff] %v5268_v56  ;;  %v799_v17 = vmul.f32 %v5304_v15, %v5304_v15  ;;  %v5333_v55 = vpop.eup %4457  ;;  %v5337_v4 = vadd.f32 %v798_v44, %v4948_v16  ;;  %v804_v56 = vmul.f32 %v5294_v22, %v5294_v22  ;;  %4471 = vrcp.f32 %v5284_v54 }
  0xc6   : > { %10700 = vst [vmem:[#allocation68_spill] sm:$0xff] %v5274_v23  ;;  %v260_v23 = vld [vmem:[%s4853_s28 + $0x1a0] sm:$0xff]  ;;  %v5343_v49 = vpop.eup %4459  ;;  %4473 = vrcp.f32 %v5301_v25 }
  0xc7   : > { %10701 = vst [vmem:[#allocation69_spill] sm:$0xff] %v5288_v0  ;;  %v5354_v44 = vpop.eup %4461  ;;  %4475 = vrcp.f32 %v5337_v4 }
  0xc8   : > { %10702 = vst [vmem:[#allocation70_spill] sm:$0xff] %v5290_v51 }
  0xc9   : > { %10703 = vst [vmem:[#allocation71_spill] sm:$0xff] %v5304_v15  ;;  %v5352_v15 = vmul.f32 %v5222_v29, %v5095_v19  ;;  %624 = vperm.xlu0 %4440, %v260_v23   ;;  %v5375_v19 = vmul.f32 %v5319_v12, %v5319_v12  ;;  %v5380_v23 = vpop.eup %4463 }
  0xca   : > { %10704 = vst [vmem:[#allocation72_spill] sm:$0xff] %v5307_v43 }
  0xcb   : > { %10705 = vst [vmem:[#allocation73_spill] sm:$0xff] %v5310_v60  ;;  %v5347_v60 = vadd.f32 %v799_v17, %v4959_v20  ;;  %v5366_v17 = vadd.f32 %v5210_v36, %v4942_v13 }
  0xcc   : > { %10706 = vst [vmem:[#allocation74_spill] sm:$0xff] %v5312_v6  ;;  %v1438_v6 = vmul.f32 %v5307_v43, %v5307_v43  ;;  %v5387_v43 = vadd.f32 %v804_v56, %v5085_v8  ;;  %v386_v56 = vpop.permute.xlu2 %385 }
  0xcd   : > { %10707 = vst [vmem:[#allocation75_spill] sm:$0xff] %v5316_v9  ;;  %4477 = vrcp.f32 %v5347_v60 }
  0xce   : > { %10708 = vst [vmem:[#allocation76_spill] sm:$0xff] %v5319_v12  ;;  %v5358_v48 = vadd.f32 %v1438_v6, %v4948_v16  ;;  %v5378_v6 = vadd.f32 %v1439_v21, %v4959_v20  ;;  %v580_v16 = vpop.permute.xlu1 %579  ;;  %v5392_v12 = vpop.eup %4465 }
  0xcf   : > { %10709 = vst [vmem:[#allocation77_spill] sm:$0xff] %v5323_v24  ;;  %v1444_v24 = vmul.f32 %v5298_v1, %v5298_v1  ;;  %v5396_v20 = vsub.f32 %v4942_v13, %v580_v16  ;;  %v5399_v21 = vadd.f32 %v580_v16, %v4934_v10 }
  0xd0   : > { %10710 = vst [vmem:[#allocation78_spill] sm:$0xff] %v5333_v55  ;;  %v1056_v55 = vsub.f32 2.0, %v5272_v38  ;;  %v5371_v38 = vmul.f32 %v5316_v9, %v5316_v9  ;;  %4479 = vrcp.f32 %v5358_v48 }
  0xd1   : > { %10711 = vst [vmem:[#allocation79_spill] sm:$0xff] %v5337_v4  ;;  %v5390_v9 = vadd.f32 %v1444_v24, %v5085_v8  ;;  %v1460_v0 = vmul.f32 %v5399_v21, %v5399_v21  ;;  %4481 = vrcp.f32 %v5378_v6 }
  0xd2   : > { %10712 = vst [vmem:[#allocation80_spill] sm:$0xff] %v5343_v49  ;;  %v5362_v49 = vsub.f32 %v4942_v13, %v5210_v36  ;;  %v5384_v36 = vsub.f32 %v4934_v10, %v580_v16 }
  0xd3   : > { %10713 = vst [vmem:[#allocation81_spill] sm:$0xff] %v5347_v60 }
  0xd4   : > { %10714 = vst [vmem:[#allocation82_spill] sm:$0xff] %v5354_v44  ;;  %v515_v44 = vpop.permute.xlu0 %514  ;;  %v820_v8 = vmul.f32 %v5384_v36, %v5384_v36 }
  0xd5   : > { %10715 = vst [vmem:[#allocation83_spill] sm:$0xff] %v5358_v48  ;;  %v5410_v24 = vsub.f32 %v4934_v10, %v515_v44  ;;  %v5423_v60 = vsub.f32 %v4942_v13, %v515_v44  ;;  %v5433_v4 = vadd.f32 %v515_v44, %v4934_v10 }
  0xd6   : > { %10716 = vst [vmem:[#allocation84_spill] sm:$0xff] %v5371_v38  ;;  %v5428_v59 = vadd.f32 %v820_v8, %v5154_v41  ;;  %v5447_v8 = vadd.f32 %v1460_v0, %v5154_v41 }
  0xd7   : > { %10717 = vst [vmem:[#allocation85_spill] sm:$0xff] %v5375_v19  ;;  %v5404_v19 = vpop.eup %4467  ;;  %v794_v48 = vmul.f32 %v5410_v24, %v5410_v24  ;;  %v1434_v27 = vmul.f32 %v5433_v4, %v5433_v4 }
  0xd8   : > { %10718 = vst [vmem:[#allocation86_spill] sm:$0xff] %v5378_v6  ;;  %v5414_v38 = vpop.eup %4469  ;;  %4483 = vrcp.f32 %v5428_v59 }
  0xd9   : > { %10719 = vst [vmem:[#allocation87_spill] sm:$0xff] %v5380_v23  ;;  %v5402_v23 = vadd.f32 %v580_v16, %v4942_v13  ;;  %v821_v16 = vmul.f32 %v5396_v20, %v5396_v20  ;;  %v5465_v41 = vadd.f32 %v794_v48, %v4997_v31 }
  0xda   : > { %10720 = vst [vmem:[#allocation88_spill] sm:$0xff] %v5384_v36  ;;  %v5425_v36 = vpop.eup %4471 }
  0xdb   : > { %10721 = vst [vmem:[#allocation89_spill] sm:$0xff] %v5392_v12  ;;  %v805_v12 = vmul.f32 %v5362_v49, %v5362_v49  ;;  %v1461_v47 = vmul.f32 %v5402_v23, %v5402_v23  ;;  %v5444_v58 = vadd.f32 %v821_v16, %v5158_v40  ;;  %v1445_v16 = vmul.f32 %v5366_v17, %v5366_v17 }
  0xdc   : > { %10722 = vst [vmem:[#allocation90_spill] sm:$0xff] %v5396_v20  ;;  %v5436_v20 = vadd.f32 %v515_v44, %v4942_v13 }
  0xdd   : > { %10723 = vst [vmem:[#allocation91_spill] sm:$0xff] %v5399_v21  ;;  %v5438_v21 = vpop.eup %4473  ;;  %v5455_v44 = vadd.f32 %v1461_v47, %v5158_v40  ;;  %v5470_v40 = vmul.f32 %v5187_v37, %v1056_v55  ;;  %4485 = vrcp.f32 %v5444_v58 }
  0xde   : > { %10724 = vst [vmem:[#allocation92_spill] sm:$0xff] %v5402_v23  ;;  %v5441_v23 = vsub.f32 %v4909_v62, %v386_v56  ;;  %v5451_v28 = vpop.eup %4475  ;;  %v1435_v0 = vmul.f32 %v5436_v20, %v5436_v20  ;;  %4487 = vrcp.f32 %v5447_v8 }
  0xdf   : > { %10725 = vst [vmem:[#allocation93_spill] sm:$0xff] %v5410_v24  ;;  %v795_v24 = vmul.f32 %v5423_v60, %v5423_v60  ;;  %v5461_v51 = vpop.eup %4477  ;;  %4489 = vrcp.f32 %v5455_v44 }
  0xe0   : > { %10726 = vst [vmem:[#allocation94_spill] sm:$0xff] %v5423_v60  ;;  %v505_v60 = vpop.permute.xlu1 %504  ;;  %v5472_v47 = vpop.eup %4479  ;;  %4491 = vrcp.f32 %v5465_v41 }
  0xe1   : > { %10727 = vst [vmem:[#allocation95_spill] sm:$0xff] %v5428_v59  ;;  %v5479_v6 = vadd.f32 %v795_v24, %v5001_v32  ;;  %v5484_v59 = vmul.f32 %v5441_v23, %v5441_v23  ;;  %v5488_v37 = vsub.f32 %v4934_v10, %v505_v60  ;;  %v5491_v55 = vsub.f32 %v4942_v13, %v505_v60 }
  0xe2   : > { %10728 = vst [vmem:[#allocation96_spill] sm:$0xff] %v5433_v4  ;;  %v5475_v4 = vsub.f32 %v4911_v63, %v386_v56  ;;  %v575_v56 = vpop.permute.xlu0 %574  ;;  %v5495_v24 = vadd.f32 %v1434_v27, %v4997_v31  ;;  %v5498_v48 = vadd.f32 %v505_v60, %v4934_v10 }
  0xe3   : > { %10729 = vst [vmem:[#allocation97_spill] sm:$0xff] %v5436_v20  ;;  %4493 = vrcp.f32 %v5479_v6 }
  0xe4   : > { %10730 = vst [vmem:[#allocation98_spill] sm:$0xff] %v5441_v23  ;;  %v5501_v23 = vadd.f32 %v505_v60, %v4942_v13  ;;  %v5515_v27 = vmul.f32 %v5475_v4, %v5475_v4  ;;  %v1430_v31 = vmul.f32 %v5498_v48, %v5498_v48  ;;  %4495 = vrcp.f32 %v5495_v24 }
  0xe5   : > { %10731 = vst [vmem:[#allocation99_spill] sm:$0xff] %v5444_v58  ;;  %v790_v58 = vmul.f32 %v5488_v37, %v5488_v37 }
  0xe6   : > { %10732 = vst [vmem:[#allocation100_spill] sm:$0xff] %v5447_v8  ;;  %v5511_v8 = vpop.eup %4481 }
  0xe7   : > { %10733 = vst [vmem:[#allocation101_spill] sm:$0xff] %v5455_v44  ;;  %v791_v44 = vmul.f32 %v5491_v55, %v5491_v55  ;;  %v5523_v60 = vpop.eup %4483 }
  0xe8   : > { %10734 = vst [vmem:[#allocation102_spill] sm:$0xff] %v5475_v4  ;;  %v1431_v4 = vmul.f32 %v5501_v23, %v5501_v23 }
  0xe9   : > { %10735 = vst [vmem:[#allocation103_spill] sm:$0xff] %v5479_v6  ;;  %v994_v6 = vmul.f32 %v5404_v19, %v5278_v11 }
  0xea   : > { %10736 = vst [vmem:[#allocation104_spill] sm:$0xff] %v5484_v59  ;;  %v5505_v59 = vadd.f32 %v1435_v0, %v5001_v32  ;;  %v5521_v32 = vsub.f32 %v4934_v10, %v575_v56  ;;  %v5526_v0 = vadd.f32 %v790_v58, %v5023_v42  ;;  %v5542_v58 = vadd.f32 %v575_v56, %v4934_v10 }
  0xeb   : > { %10737 = vst [vmem:[#allocation105_spill] sm:$0xff] %v5488_v37  ;;  %v5534_v37 = vsub.f32 %v4942_v13, %v575_v56  ;;  %v5575_v11 = vadd.f32 %v1431_v4, %v5048_v52  ;;  %v1635_v4 = vmul.f32 %v5438_v21, %v5301_v25 }
  0xec   : > { %10738 = vst [vmem:[#allocation106_spill] sm:$0xff] %v5491_v55  ;;  %v5529_v55 = vadd.f32 %v791_v44, %v5048_v52  ;;  %v5545_v44 = vadd.f32 %v805_v12, %v5089_v14  ;;  %4497 = vrcp.f32 %v5505_v59 }
  0xed   : > { %10739 = vst [vmem:[#allocation107_spill] sm:$0xff] %v5498_v48  ;;  %v381_v48 = vpop.permute.xlu2 %380  ;;  %4499 = vrcp.f32 %v5526_v0  ;;  %v819_v12 = vmul.f32 %v5534_v37, %v5534_v37  ;;  %v1699_v25 = vsub.f32 2.0, %v1635_v4  ;;  %v565_v4 = vpop.permute.xlu1 %564 }
  0xee   : > { %10740 = vst [vmem:[#allocation108_spill] sm:$0xff] %v5501_v23  ;;  %v5551_v23 = vadd.f32 %v1430_v31, %v5023_v42  ;;  %v1634_v42 = vmul.f32 %v5425_v36, %v5284_v54  ;;  %4501 = vrcp.f32 %v5529_v55 }
  0xef   : > { %10741 = vst [vmem:[#allocation109_spill] sm:$0xff] %v5505_v59  ;;  %v5587_v59 = vsub.f32 %v4911_v63, %v381_v48 }
  0xf0   : > { %10742 = vst [vmem:[#allocation110_spill] sm:$0xff] %v5515_v27  ;;  %v5536_v27 = vpop.eup %4485  ;;  %v1698_v54 = vsub.f32 2.0, %v1634_v42  ;;  %4503 = vrcp.f32 %v5551_v23 }
  0xf1   : > { %10743 = vst [vmem:[#allocation111_spill] sm:$0xff] %v5521_v32  ;;  %v5547_v20 = vpop.eup %4487  ;;  %4505 = vrcp.f32 %v5575_v11 }
  0xf2   : > { %10744 = vst [vmem:[#allocation112_spill] sm:$0xff] %v5523_v60  ;;  %v818_v60 = vmul.f32 %v5521_v32, %v5521_v32  ;;  %v5558_v32 = vpop.eup %4489 }
  0xf3   : > { %10745 = vst [vmem:[#allocation113_spill] sm:$0xff] %v5526_v0  ;;  %v5568_v31 = vpop.eup %4491 }
  0xf4   : > { %10746 = vst [vmem:[#allocation114_spill] sm:$0xff] %v5529_v55  ;;  %v5577_v0 = vpop.eup %4493 }
  0xf5   : > { %10747 = vst [vmem:[#allocation115_spill] sm:$0xff] %v5534_v37  ;;  %v5580_v37 = vadd.f32 %v818_v60, %v5052_v53  ;;  %v5598_v60 = vadd.f32 %v819_v12, %v5062_v57 }
  0xf6   : > { %10748 = vst [vmem:[#allocation116_spill] sm:$0xff] %v5536_v27  ;;  %v5554_v27 = vadd.f32 %v1445_v16, %v5089_v14  ;;  %v5571_v14 = vsub.f32 %v4909_v62, %v381_v48  ;;  %v1058_v16 = vsub.f32 2.0, %v994_v6  ;;  %v5595_v6 = vpop.eup %4495 }
  0xf7   : > { %10749 = vst [vmem:[#allocation117_spill] sm:$0xff] %v5542_v58  ;;  %4507 = vrcp.f32 %v5580_v37 }
  0xf8   : > { %10750 = vst [vmem:[#allocation118_spill] sm:$0xff] %v5547_v20  ;;  %v5564_v20 = vadd.f32 %v575_v56, %v4942_v13  ;;  %v1458_v56 = vmul.f32 %v5542_v58, %v5542_v58  ;;  %v5591_v52 = vmul.f32 %v5404_v19, %v1058_v16  ;;  %v5605_v58 = vpop.eup %4497  ;;  %v10758_v16 = vsub.f32 2.0, %v5352_v15 }
  0xf9   : > { %10751 = vst [vmem:[#allocation119_spill] sm:$0xff] %v5558_v32  ;;  %v995_v32 = vmul.f32 %v5414_v38, %v5281_v7  ;;  %v5603_v7 = vmul.f32 %v5425_v36, %v1698_v54  ;;  %v5617_v55 = vpop.eup %4499  ;;  %4509 = vrcp.f32 %v5387_v43  ;;  %v5638_v15 = vmul.f32 %v5470_v40, %v4979_v26 }
  0xfa   : > { %10752 = vst [vmem:[#allocation120_spill] sm:$0xff] %v5564_v20  ;;  %v1459_v42 = vmul.f32 %v5564_v20, %v5564_v20  ;;  %v5610_v19 = vmul.f32 %v5591_v52, %v5217_v18  ;;  %v5615_v12 = vmul.f32 %v5222_v29, %v10758_v16  ;;  %v5621_v36 = vadd.f32 %v1458_v56, %v5052_v53  ;;  %v5630_v54 = vpop.eup %4501 }
  0xfb   : > { %10753 = vst [vmem:[#allocation121_spill] sm:$0xff] %v5571_v14  ;;  %v1059_v48 = vsub.f32 2.0, %v995_v32  ;;  %v5625_v32 = vmul.f32 %v5603_v7, %v5231_v33  ;;  %v5634_v29 = vmul.f32 %v5438_v21, %v1699_v25  ;;  %4511 = vrcp.f32 %v5390_v9  ;;  %v5651_v21 = vpop.eup %4503 }
  0xfc   : > { %10754 = vst [vmem:[#allocation122_spill] sm:$0xff] %v5580_v37  ;;  %v5642_v53 = vmul.f32 %v5615_v12, %v5007_v34  ;;  %v5645_v33 = vadd.f32 %v1459_v42, %v5062_v57  ;;  %v993_v56 = vmul.f32 %v5197_v50, %v5081_v3  ;;  %4513 = vrcp.f32 %v5545_v44  ;;  %v5670_v25 = vpop.eup %4505 }
  0xfd   : > { %10755 = vst [vmem:[#allocation123_spill] sm:$0xff] %v5587_v59  ;;  %v5628_v18 = vmul.f32 %v5414_v38, %v1059_v48  ;;  %v1633_v57 = vmul.f32 %v5234_v39, %v5121_v35  ;;  %v5663_v42 = vmul.f32 %v5571_v14, %v5571_v14  ;;  %4515 = vrcp.f32 %v5554_v27  ;;  %v5675_v26 = vpop.eup %4507 }
  0xfe   : > { %10756 = vst [vmem:[#allocation124_spill] sm:$0xff] %v5598_v60  ;;  %v5668_v3 = vmul.f32 %v5634_v29, %v5243_v2  ;;  %v1057_v48 = vsub.f32 2.0, %v993_v56  ;;  %4517 = vrcp.f32 %v5598_v60  ;;  %v5679_v38 = vmul.f32 %v5587_v59, %v5587_v59 }
  0xff   : > { %10757 = vst [vmem:[#allocation125_spill] sm:$0xff] %v5610_v19  ;;  %v5657_v34 = vmul.f32 %v5628_v18, %v5220_v61  ;;  %v1697_v16 = vsub.f32 2.0, %v1633_v57  ;;  %4519 = vrcp.f32 %v5621_v36  ;;  %v5686_v56 = vsub.f32 %v4934_v10, %v565_v4  ;;  %v4510_v14 = vpop.eup %4509 }
 0x100   : > { %10759 = vst [vmem:[#allocation126_spill] sm:$0xff] %v5621_v36  ;;  %v5683_v2 = vmul.f32 %v5197_v50, %v1057_v48  ;;  %4521 = vrcp.f32 %v5645_v33  ;;  %v10770_v35 = vsub.f32 0.0, %v5610_v19  ;;  %v10771_v57 = vsub.f32 0.0, %v5625_v32 }
 0x101   : > { %10760 = vst [vmem:[#allocation127_spill] sm:$0xff] %v5625_v32  ;;  %v996_v50 = vmul.f32 %v4510_v14, %v5387_v43  ;;  %v5706_v19 = vsub.f32 %v4942_v13, %v565_v4  ;;  %v10774_v59 = vsub.f32 0.0, %v5638_v15  ;;  %v5723_v36 = vadd.f32 %v565_v4, %v4934_v10 }
 0x102   : > { %10761 = vst [vmem:[#allocation128_spill] sm:$0xff] %v5638_v15  ;;  %v5693_v61 = vsub.f32 %v10771_v57, %v10770_v35  ;;  %v5703_v20 = vmul.f32 %v5683_v2, %v4993_v30  ;;  %v814_v30 = vmul.f32 %v5686_v56, %v5686_v56  ;;  %v10789_v37 = vsub.f32 0.0, %v5668_v3 }
 0x103   : > { %10762 = vst [vmem:[#allocation129_spill] sm:$0xff] %v5642_v53  ;;  %v1060_v32 = vsub.f32 2.0, %v996_v50 }
 0x104   : > { %10763 = vst [vmem:[#allocation130_spill] sm:$0xff] %v5645_v33  ;;  %v371_v33 = vpop.permute.xlu2 %370 }
 0x105   : > { %10764 = vst [vmem:[#allocation131_spill] sm:$0xff] %v5657_v34  ;;  %v5735_v15 = vsub.f32 %v4911_v63, %v371_v33 }
 0x106   : > { %10765 = vst [vmem:[#allocation132_spill] sm:$0xff] %v5663_v42  ;;  %v4512_v42 = vpop.eup %4511 }
 0x107   : > { %10766 = vst [vmem:[#allocation133_spill] sm:$0xff] %v5668_v3  ;;  %v4514_v35 = vpop.eup %4513  ;;  %v1636_v57 = vmul.f32 %v4512_v42, %v5390_v9  ;;  %v5726_v9 = vadd.f32 %v565_v4, %v4942_v13  ;;  %v815_v4 = vmul.f32 %v5706_v19, %v5706_v19 }
 0x108   : > { %10767 = vst [vmem:[#allocation134_spill] sm:$0xff] %v5675_v26  ;;  %v4516_v48 = vpop.eup %4515  ;;  %v997_v60 = vmul.f32 %v4514_v35, %v5545_v44  ;;  %v5739_v44 = vmul.f32 %v4510_v14, %v1060_v32  ;;  %v1454_v32 = vmul.f32 %v5723_v36, %v5723_v36 }
 0x109   : > { %10768 = vst [vmem:[#allocation135_spill] sm:$0xff] %v5679_v38  ;;  %v5697_v38 = vmul.f32 %v5234_v39, %v1697_v16  ;;  %v10775_v39 = vsub.f32 0.0, %v5642_v53  ;;  %v5728_v53 = vpop.eup %4517  ;;  %v1455_v26 = vmul.f32 %v5726_v9, %v5726_v9 }
 0x10a   : > { %10769 = vst [vmem:[#allocation136_spill] sm:$0xff] %v5686_v56  ;;  %v5737_v50 = vpop.eup %4519  ;;  %v1061_v56 = vsub.f32 2.0, %v997_v60  ;;  %v5754_v14 = vmul.f32 %v5739_v44, %v5294_v22 }
 0x10b   : > { %10772 = vst [vmem:[#allocation137_spill] sm:$0xff] %v5703_v20  ;;  %v5713_v16 = vsub.f32 %v10775_v39, %v10774_v59  ;;  %v5717_v43 = vmul.f32 %v5697_v38, %v5031_v45  ;;  %v1700_v59 = vsub.f32 2.0, %v1636_v57  ;;  %v1637_v39 = vmul.f32 %v4516_v48, %v5554_v27  ;;  %v5744_v57 = vpop.eup %4521 }
 0x10c   : > { %10773 = vst [vmem:[#allocation138_spill] sm:$0xff] %v5706_v19  ;;  %v5732_v45 = vsub.f32 %v4909_v62, %v371_v33  ;;  %v5750_v33 = vadd.f32 %v814_v30, %v5257_v5  ;;  %v5756_v60 = vmul.f32 %v4514_v35, %v1061_v56 }
 0x10d   : > { %10776 = vst [vmem:[#allocation139_spill] sm:$0xff] %v5717_v43  ;;  %v5746_v27 = vmul.f32 %v4512_v42, %v1700_v59  ;;  %v1701_v62 = vsub.f32 2.0, %v1637_v39  ;;  %v10788_v39 = vsub.f32 0.0, %v5657_v34 }
 0x10e   : > { %10777 = vst [vmem:[#allocation140_spill] sm:$0xff] %v5723_v36  ;;  %v5777_v35 = vmul.f32 %v5756_v60, %v5362_v49  ;;  %v5793_v56 = vmul.f32 %v5732_v45, %v5732_v45  ;;  %4523 = vrcp.f32 %v5750_v33 }
 0x10f   : > { %10778 = vst [vmem:[#allocation141_spill] sm:$0xff] %v5726_v9  ;;  %v5764_v42 = vmul.f32 %v5746_v27, %v5298_v1  ;;  %v5766_v59 = vmul.f32 %v4516_v48, %v1701_v62  ;;  %v2147_v1 = vsub.f32 %v10789_v37, %v10788_v39  ;;  %v5784_v62 = vadd.f32 %v815_v4, %v5261_v46 }
 0x110   : > { %10779 = vst [vmem:[#allocation142_spill] sm:$0xff] %v5728_v53  ;;  %v560_v53 = vpop.permute.xlu0 %559  ;;  %v5800_v37 = vadd.f32 %v1454_v32, %v5257_v5  ;;  %v10799_v32 = vld [vmem:[#allocation70_spill] sm:$0xff] }
 0x111   : > { %10780 = vst [vmem:[#allocation143_spill] sm:$0xff] %v5732_v45  ;;  %v5769_v30 = vsub.f32 %v4934_v10, %v560_v53  ;;  %v5772_v22 = vsub.f32 %v4942_v13, %v560_v53  ;;  %v10167_v48 = vsub.f32 0.0, %v5764_v42  ;;  %v5789_v9 = vmul.f32 %v5766_v59, %v5366_v17 }
 0x112   : > { %10781 = vst [vmem:[#allocation144_spill] sm:$0xff] %v5735_v15  ;;  %v10794_v17 = vsub.f32 0.0, %v5754_v14  ;;  %v10795_v45 = vsub.f32 0.0, %v5703_v20  ;;  %4525 = vrcp.f32 %v5784_v62  ;;  %v5818_v5 = vadd.f32 %v560_v53, %v4934_v10  ;;  %v10803_v20 = vld [vmem:[#allocation24_spill] sm:$0xff] }
 0x113   : > { %10782 = vst [vmem:[#allocation145_spill] sm:$0xff] %v5750_v33  ;;  %v812_v49 = vmul.f32 %v5769_v30, %v5769_v30  ;;  %v813_v4 = vmul.f32 %v5772_v22, %v5772_v22  ;;  %v10171_v3 = vsub.f32 0.0, %v5789_v9  ;;  %4527 = vrcp.f32 %v5800_v37 }
 0x114   : > { %10783 = vst [vmem:[#allocation146_spill] sm:$0xff] %v5754_v14  ;;  %v2148_v39 = vsub.f32 %v10167_v48, %v10794_v17  ;;  %v5822_v14 = vsub.f32 %v4934_v10, %v10799_v32  ;;  %v5826_v17 = vadd.f32 %v10799_v32, %v4934_v10  ;;  %v10800_v48 = vsub.f32 0.0, %v5777_v35 }
 0x115   : > { %10784 = vst [vmem:[#allocation147_spill] sm:$0xff] %v5764_v42  ;;  %v10808_v42 = vld [vmem:[#allocation79_spill] sm:$0xff] }
 0x116   : > { %10785 = vst [vmem:[#allocation148_spill] sm:$0xff] %v5769_v30  ;;  %v5814_v30 = vadd.f32 %v1455_v26, %v5261_v46  ;;  %2709 = vmatpush.msra.mxu2 %v2148_v39  ;;  %v2149_v46 = vsub.f32 %v10171_v3, %v10800_v48  ;;  %v10801_v26 = vld [vmem:[#allocation23_spill] sm:$0xff]  ;;  %v5845_v39 = vadd.f32 %v813_v4, %v10803_v20  ;;  %v5860_v3 = vpop.eup %4523 }
 0x117   : > { %10786 = vst [vmem:[#allocation149_spill] sm:$0xff] %v5772_v22  ;;  %v796_v48 = vmul.f32 %v5822_v14, %v5822_v14  ;;  %v10809_v22 = vld [vmem:[#allocation83_spill] sm:$0xff] }
 0x118   : > { %10787 = vst [vmem:[#allocation150_spill] sm:$0xff] %v5777_v35  ;;  %v5848_v35 = vadd.f32 %v560_v53, %v4942_v13  ;;  %2729 = vmatpush.msra.mxu3 %v2149_v46  ;;  %2710 = vmatpush.msra.mxu2 %v5693_v61  ;;  %4529 = vrcp.f32 %v5814_v30  ;;  %v1452_v53 = vmul.f32 %v5818_v5, %v5818_v5 }
 0x119   : > { %10790 = vst [vmem:[#allocation151_spill] sm:$0xff] %v5784_v62  ;;  %v990_v61 = vmul.f32 %v5451_v28, %v10808_v42  ;;  %v1630_v19 = vmul.f32 %v5472_v47, %v10809_v22  ;;  %v10812_v42 = vld [vmem:[#allocation81_spill] sm:$0xff]  ;;  %v10813_v22 = vld [vmem:[#allocation86_spill] sm:$0xff] }
 0x11a   : > { %10791 = vst [vmem:[#allocation152_spill] sm:$0xff] %v5789_v9  ;;  %v10807_v9 = vld [vmem:[#allocation36_spill] sm:$0xff]  ;;  %2730 = vmatpush.msra.mxu3 %v2147_v1  ;;  %2711 = vmatpush.msra.mxu2 %v5713_v16  ;;  %v991_v33 = vmul.f32 %v5461_v51, %v10812_v42  ;;  %v1631_v16 = vmul.f32 %v5511_v8, %v10813_v22  ;;  %v10820_v42 = vld [vmem:[#allocation69_spill] sm:$0xff] }
 0x11b   : > { %10792 = vst [vmem:[#allocation153_spill] sm:$0xff] %v5793_v56  ;;  %v10796_v56 = vsub.f32 0.0, %v5717_v43  ;;  %v5841_v43 = vadd.f32 %v10799_v32, %v4942_v13  ;;  %v860_v46 = vadd.f32 %v796_v48, %v10807_v9  ;;  %v1054_v48 = vsub.f32 2.0, %v990_v61  ;;  %v10814_v1 = vld [vmem:[#allocation32_spill] sm:$0xff] }
 0x11c   : > { %10793 = vst [vmem:[#allocation154_spill] sm:$0xff] %v5800_v37  ;;  %v1695_v61 = vsub.f32 2.0, %v1631_v16  ;;  %v1453_v16 = vmul.f32 %v5848_v35, %v5848_v35 }
 0x11d   : > { %v2145_v34 = vsub.f32 %v10796_v56, %v10795_v45  ;;  %10797 = vst [vmem:[#allocation155_spill] sm:$0xff] %v5814_v30  ;;  %v5833_v45 = vadd.f32 %v812_v49, %v10801_v26  ;;  %v5837_v56 = vsub.f32 %v4942_v13, %v10799_v32  ;;  %v1436_v49 = vmul.f32 %v5826_v17, %v5826_v17  ;;  %v10810_v30 = vld [vmem:[#allocation37_spill] sm:$0xff] }
 0x11e   : > { %10798 = vst [vmem:[#allocation156_spill] sm:$0xff] %v5818_v5  ;;  %v1437_v4 = vmul.f32 %v5841_v43, %v5841_v43  ;;  %v5874_v5 = vpop.eup %4525 }
 0x11f   : > { %10802 = vst [vmem:[#allocation70_spill] sm:$0xff] %v5833_v45  ;;  %v797_v32 = vmul.f32 %v5837_v56, %v5837_v56  ;;  %4531 = vrcp.f32 %v5833_v45  ;;  %v1500_v36 = vadd.f32 %v1436_v49, %v10807_v9  ;;  %2731 = vmatpush.msra.mxu3 %v2145_v34  ;;  %v5882_v9 = vmul.f32 %v5739_v44, %v10814_v1  ;;  %v5888_v49 = vpop.eup %4527 }
 0x120   : > { %10804 = vst [vmem:[#allocation23_spill] sm:$0xff] %v5845_v39  ;;  %v1501_v37 = vadd.f32 %v1437_v4, %v10810_v30  ;;  %4533 = vrcp.f32 %v860_v46  ;;  %v5896_v4 = vpop.eup %4529  ;;  %v5900_v44 = vmul.f32 %v5735_v15, %v5735_v15  ;;  %v10828_v15 = vld [vmem:[#allocation71_spill] sm:$0xff] }
 0x121   : > { %10805 = vst [vmem:[#allocation24_spill] sm:$0xff] %v5848_v35  ;;  %v861_v62 = vadd.f32 %v797_v32, %v10810_v30  ;;  %4535 = vrcp.f32 %v1500_v36  ;;  %v5886_v30 = vmul.f32 %v5746_v27, %v10814_v1  ;;  %v1055_v32 = vsub.f32 2.0, %v991_v33  ;;  %v10824_v33 = vld [vmem:[#allocation33_spill] sm:$0xff] }
 0x122   : > { %10806 = vst [vmem:[#allocation157_spill] sm:$0xff] %v5860_v3  ;;  %v1694_v3 = vsub.f32 2.0, %v1630_v19  ;;  %v5891_v19 = vmul.f32 %v5451_v28, %v1054_v48  ;;  %v10822_v28 = vld [vmem:[#allocation72_spill] sm:$0xff]  ;;  %v5917_v48 = vmul.f32 %v5756_v60, %v10824_v33 }
 0x123   : > { %10811 = vst [vmem:[#allocation36_spill] sm:$0xff] %v5874_v5  ;;  %4537 = vrcp.f32 %v861_v62 }
 0x124   : > { %10815 = vst [vmem:[#allocation79_spill] sm:$0xff] %v5882_v9  ;;  %v5894_v34 = vmul.f32 %v5472_v47, %v1694_v3  ;;  %4539 = vrcp.f32 %v1501_v37  ;;  %v5906_v22 = vmul.f32 %v5891_v19, %v10820_v42  ;;  %v5913_v3 = vmul.f32 %v5461_v51, %v1055_v32 }
 0x125   : > { %10816 = vst [vmem:[#allocation83_spill] sm:$0xff] %v5886_v30  ;;  %v5919_v1 = vpop.eup %4531  ;;  %4541 = vrcp.f32 %v5845_v39  ;;  %v5925_v42 = vmul.f32 %v5511_v8, %v1695_v61  ;;  %v5932_v32 = vadd.f32 %v1452_v53, %v10801_v26  ;;  %v10830_v8 = vld [vmem:[#allocation73_spill] sm:$0xff] }
 0x126   : > { %10817 = vst [vmem:[#allocation37_spill] sm:$0xff] %v5888_v49  ;;  %v5910_v47 = vmul.f32 %v5894_v34, %v10822_v28  ;;  %v5929_v28 = vmul.f32 %v5766_v59, %v10824_v33  ;;  %v4534_v51 = vpop.eup %4533  ;;  %v10832_v33 = vld [vmem:[#allocation34_spill] sm:$0xff]  ;;  %v10834_v27 = vsub.f32 0.0, %v5906_v22  ;;  %v5960_v59 = vadd.f32 %v1453_v16, %v10803_v20  ;;  %v620_v16 = vpop.permute.xlu1 %619 }
 0x127   : > { %10818 = vst [vmem:[#allocation81_spill] sm:$0xff] %v5896_v4  ;;  %v4536_v35 = vpop.eup %4535  ;;  %v988_v39 = vmul.f32 %v4534_v51, %v860_v46  ;;  %v5942_v61 = vmul.f32 %v5925_v42, %v10830_v8  ;;  %v5948_v26 = vmul.f32 %v5591_v52, %v10832_v33  ;;  %v5957_v8 = vmul.f32 %v5603_v7, %v10832_v33  ;;  %v5969_v7 = vpop.permute.xlu2 %604 }
 0x128   : > { %10819 = vst [vmem:[#allocation86_spill] sm:$0xff] %v5900_v44  ;;  %v5938_v44 = vmul.f32 %v5913_v3, %v10828_v15  ;;  %v1628_v60 = vmul.f32 %v4536_v35, %v1500_v36  ;;  %v10835_v15 = vsub.f32 0.0, %v5910_v47  ;;  %4543 = vrcp.f32 %v5932_v32 }
 0x129   : > { %10821 = vst [vmem:[#allocation32_spill] sm:$0xff] %v5906_v22  ;;  %v4538_v53 = vpop.eup %4537  ;;  %v1052_v4 = vsub.f32 2.0, %v988_v39  ;;  %v10193_v5 = vsub.f32 0.0, %v5942_v61 }
 0x12a   : > { %10823 = vst [vmem:[#allocation69_spill] sm:$0xff] %v5910_v47  ;;  %v4540_v45 = vpop.eup %4539  ;;  %v989_v52 = vmul.f32 %v4538_v53, %v861_v62  ;;  %v1692_v36 = vsub.f32 2.0, %v1628_v60  ;;  %v10839_v62 = vsub.f32 0.0, %v5938_v44 }
 0x12b   : > { %10825 = vst [vmem:[#allocation72_spill] sm:$0xff] %v5917_v48  ;;  %v1629_v49 = vmul.f32 %v4540_v45, %v1501_v37  ;;  %v5971_v33 = vpop.eup %4541  ;;  %v5973_v20 = vmul.f32 %v4534_v51, %v1052_v4  ;;  %v2018_v4 = vadd.f32 %v5957_v8, %v5948_v26 }
 0x12c   : > { %10826 = vst [vmem:[#allocation33_spill] sm:$0xff] %v5919_v1  ;;  %v2142_v1 = vsub.f32 %v10835_v15, %v10834_v27  ;;  %v2020_v27 = vadd.f32 %v5886_v30, %v5882_v9  ;;  %v10837_v15 = vld [vmem:[#allocation35_spill] sm:$0xff]  ;;  %v1053_v39 = vsub.f32 2.0, %v989_v52  ;;  %v2143_v37 = vsub.f32 %v10193_v5, %v10839_v62  ;;  %v10847_v5 = vld [vmem:[#allocation12_spill] sm:$0xff] }
 0x12d   : > { %10827 = vst [vmem:[#allocation158_spill] sm:$0xff] %v5929_v28  ;;  %v5967_v46 = vmul.f32 %v5628_v18, %v10837_v15  ;;  %v5984_v18 = vmul.f32 %v4536_v35, %v1692_v36  ;;  %v1693_v60 = vsub.f32 2.0, %v1629_v49  ;;  %v5990_v51 = vmul.f32 %v5973_v20, %v5822_v14 }
 0x12e   : > { %10829 = vst [vmem:[#allocation71_spill] sm:$0xff] %v5938_v44  ;;  %2712 = vmatpush.msra.mxu2 %v2142_v1  ;;  %v5981_v1 = vmul.f32 %v5634_v29, %v10837_v15  ;;  %v5992_v52 = vmul.f32 %v4538_v53, %v1053_v39  ;;  %2732 = vmatpush.msra.mxu3 %v2143_v37  ;;  %v6043_v36 = vpop.eup %4543 }
 0x12f   : > { %10831 = vst [vmem:[#allocation73_spill] sm:$0xff] %v5942_v61  ;;  %v2021_v29 = vadd.f32 %v5929_v28, %v5917_v48  ;;  %v5998_v15 = vsub.f32 %v4934_v10, %v5969_v7  ;;  %v6002_v35 = vmul.f32 %v5984_v18, %v5826_v17  ;;  %v6004_v49 = vmul.f32 %v4540_v45, %v1693_v60  ;;  %v10851_v60 = vld [vmem:[#allocation84_spill] sm:$0xff]  ;;  %v10852_v28 = vld [vmem:[#allocation85_spill] sm:$0xff] }
 0x130   : > { %10833 = vst [vmem:[#allocation34_spill] sm:$0xff] %v5948_v26  ;;  %2713 = vmatpush.msra.mxu2 %v2020_v27  ;;  %v6007_v14 = vsub.f32 %v4934_v10, %v620_v16  ;;  %v6010_v53 = vsub.f32 %v4942_v13, %v620_v16  ;;  %v6015_v27 = vmul.f32 %v5992_v52, %v5837_v56  ;;  %v10849_v61 = vsub.f32 0.0, %v5990_v51 }
 0x131   : > { %10836 = vst [vmem:[#allocation159_spill] sm:$0xff] %v5957_v8  ;;  %2733 = vmatpush.msra.mxu3 %v2021_v29  ;;  %v2019_v17 = vadd.f32 %v5981_v1, %v5967_v46  ;;  %v6021_v45 = vsub.f32 %v4942_v13, %v5969_v7  ;;  %v6026_v62 = vmul.f32 %v6004_v49, %v5841_v43  ;;  %v555_v43 = vpop.permute.xlu0 %554  ;;  %v10850_v44 = vsub.f32 0.0, %v6002_v35 }
 0x132   : > { %10838 = vst [vmem:[#allocation35_spill] sm:$0xff] %v5967_v46  ;;  %2714 = vmatpush.msra.mxu2 %v2018_v4  ;;  %v836_v37 = vmul.f32 %v6007_v14, %v6007_v14  ;;  %v837_v56 = vmul.f32 %v6010_v53, %v6010_v53  ;;  %v6034_v4 = vadd.f32 %v620_v16, %v4934_v10 }
 0x133   : > { %10840 = vst [vmem:[#allocation160_spill] sm:$0xff] %v5981_v1  ;;  %2734 = vmatpush.msra.mxu3 %v2019_v17  ;;  %v6037_v29 = vadd.f32 %v620_v16, %v4942_v13  ;;  %v6041_v39 = vmul.f32 %v5470_v40, %v10847_v5  ;;  %v2140_v47 = vsub.f32 %v10850_v44, %v10849_v61  ;;  %v10203_v17 = vsub.f32 0.0, %v6026_v62 }
 0x134   : > { %10841 = vst [vmem:[#allocation161_spill] sm:$0xff] %v5990_v51  ;;  %v900_v22 = vadd.f32 %v836_v37, %v10851_v60  ;;  %v901_v48 = vadd.f32 %v837_v56, %v10852_v28  ;;  %v1476_v16 = vmul.f32 %v6034_v4, %v6034_v4  ;;  %v6058_v30 = vmul.f32 %v5615_v12, %v10847_v5  ;;  %v10854_v51 = vld [vmem:[#allocation13_spill] sm:$0xff] }
 0x135   : > { %10842 = vst [vmem:[#allocation162_spill] sm:$0xff] %v5998_v15  ;;  %v1477_v40 = vmul.f32 %v6037_v29, %v6037_v29  ;;  %2666 = vmatpush.msra.mxu0 %v2140_v47  ;;  %v10856_v44 = vsub.f32 0.0, %v6015_v27  ;;  %v6070_v37 = vmul.f32 %v5697_v38, %v10854_v51  ;;  %v6073_v56 = vsub.f32 %v4934_v10, %v555_v43 }
 0x136   : > { %10843 = vst [vmem:[#allocation163_spill] sm:$0xff] %v6002_v35  ;;  %v6062_v35 = vmul.f32 %v5683_v2, %v10854_v51  ;;  %4545 = vrcp.f32 %v900_v22  ;;  %v1540_v12 = vadd.f32 %v1476_v16, %v10851_v60  ;;  %v2016_v5 = vadd.f32 %v6058_v30, %v6041_v39 }
 0x137   : > { %10844 = vst [vmem:[#allocation164_spill] sm:$0xff] %v6015_v27  ;;  %v2141_v61 = vsub.f32 %v10203_v17, %v10856_v44  ;;  %4547 = vrcp.f32 %v901_v48  ;;  %v1541_v2 = vadd.f32 %v1477_v40, %v10852_v28  ;;  %v6082_v47 = vadd.f32 %v5969_v7, %v4934_v10 }
 0x138   : > { %10845 = vst [vmem:[#allocation165_spill] sm:$0xff] %v6021_v45  ;;  %4549 = vrcp.f32 %v5960_v59  ;;  %v2017_v38 = vadd.f32 %v6070_v37, %v6062_v35  ;;  %v6087_v51 = vsub.f32 %v4942_v13, %v555_v43  ;;  %2715 = vmatpush.msra.mxu2 %v2016_v5  ;;  %v6090_v28 = vadd.f32 %v555_v43, %v4934_v10 }
 0x139   : > { %10846 = vst [vmem:[#allocation166_spill] sm:$0xff] %v6026_v62  ;;  %2686 = vmatpush.msra.mxu1 %v2141_v61  ;;  %4551 = vrcp.f32 %v1540_v12  ;;  %v986_v60 = vmul.f32 %v5568_v31, %v5465_v41  ;;  %v1626_v16 = vmul.f32 %v5595_v6, %v5495_v24  ;;  %v6098_v40 = vmul.f32 %v5998_v15, %v5998_v15  ;;  %v10865_v62 = vld [vmem:[#allocation103_spill] sm:$0xff]  ;;  %v10870_v15 = vld [vmem:[#allocation93_spill] sm:$0xff] }
 0x13a   : > { %10848 = vst [vmem:[#allocation12_spill] sm:$0xff] %v6041_v39  ;;  %v6102_v44 = vmul.f32 %v6021_v45, %v6021_v45  ;;  %4553 = vrcp.f32 %v1541_v2  ;;  %2735 = vmatpush.msra.mxu3 %v2017_v38  ;;  %v6105_v61 = vadd.f32 %v555_v43, %v4942_v13  ;;  %v810_v5 = vmul.f32 %v6073_v56, %v6073_v56  ;;  %v10868_v38 = vld [vmem:[#allocation109_spill] sm:$0xff] }
 0x13b   : > { %10853 = vst [vmem:[#allocation84_spill] sm:$0xff] %v6058_v30  ;;  %v1050_v41 = vsub.f32 2.0, %v986_v60  ;;  %v1690_v17 = vsub.f32 2.0, %v1626_v16  ;;  %v987_v24 = vmul.f32 %v5577_v0, %v10865_v62  ;;  %v811_v43 = vmul.f32 %v6087_v51, %v6087_v51 }
 0x13c   : > { %10855 = vst [vmem:[#allocation85_spill] sm:$0xff] %v6062_v35  ;;  %v4546_v27 = vpop.eup %4545  ;;  %v6113_v35 = vadd.f32 %v5969_v7, %v4942_v13  ;;  %v1627_v39 = vmul.f32 %v5605_v58, %v10868_v38  ;;  %v1450_v62 = vmul.f32 %v6090_v28, %v6090_v28  ;;  %v1451_v1 = vmul.f32 %v6105_v61, %v6105_v61 }
 0x13d   : > { %10857 = vst [vmem:[#allocation13_spill] sm:$0xff] %v6070_v37  ;;  %v6117_v37 = vmul.f32 %v6082_v47, %v6082_v47  ;;  %v4548_v60 = vpop.eup %4547  ;;  %v1028_v16 = vmul.f32 %v4546_v27, %v900_v22  ;;  %v6126_v30 = vmul.f32 %v5568_v31, %v1050_v41  ;;  %v6129_v7 = vmul.f32 %v5595_v6, %v1690_v17  ;;  %v10869_v22 = vld [vmem:[#allocation50_spill] sm:$0xff]  ;;  %v10872_v41 = vld [vmem:[#allocation96_spill] sm:$0xff] }
 0x13e   : > { %10858 = vst [vmem:[#allocation167_spill] sm:$0xff] %v6073_v56  ;;  %v6131_v9 = vpop.eup %4549  ;;  %v1029_v46 = vmul.f32 %v4548_v60, %v901_v48  ;;  %v1051_v26 = vsub.f32 2.0, %v987_v24  ;;  %v1691_v8 = vsub.f32 2.0, %v1627_v39  ;;  %v6148_v48 = vmul.f32 %v6113_v35, %v6113_v35  ;;  %v10875_v39 = vld [vmem:[#allocation51_spill] sm:$0xff] }
 0x13f   : > { %10859 = vst [vmem:[#allocation168_spill] sm:$0xff] %v6082_v47  ;;  %v4552_v38 = vpop.eup %4551  ;;  %v1092_v45 = vsub.f32 2.0, %v1028_v16  ;;  %v6136_v47 = vadd.f32 %v810_v5, %v10869_v22  ;;  %v6140_v31 = vmul.f32 %v6126_v30, %v10870_v15  ;;  %v6144_v6 = vmul.f32 %v6129_v7, %v10872_v41 }
 0x140   : > { %10860 = vst [vmem:[#allocation169_spill] sm:$0xff] %v6087_v51  ;;  %v4554_v17 = vpop.eup %4553  ;;  %v1668_v24 = vmul.f32 %v4552_v38, %v1540_v12  ;;  %v6154_v5 = vmul.f32 %v5577_v0, %v1051_v26  ;;  %v6157_v15 = vadd.f32 %v1450_v62, %v10869_v22  ;;  %v6162_v56 = vadd.f32 %v1451_v1, %v10875_v39  ;;  %v10885_v62 = vld [vmem:[#allocation11_spill] sm:$0xff] }
 0x141   : > { %10861 = vst [vmem:[#allocation170_spill] sm:$0xff] %v6090_v28  ;;  %v1669_v16 = vmul.f32 %v4554_v17, %v1541_v2  ;;  %v10224_v51 = vsub.f32 0.0, %v6140_v31  ;;  %v10223_v41 = vsub.f32 0.0, %v6144_v6  ;;  %v1093_v28 = vsub.f32 2.0, %v1029_v46  ;;  %v10880_v46 = vld [vmem:[#allocation10_spill] sm:$0xff] }
 0x142   : > { %10862 = vst [vmem:[#allocation171_spill] sm:$0xff] %v6098_v40  ;;  %v6171_v0 = vmul.f32 %v4546_v27, %v1092_v45  ;;  %4555 = vrcp.f32 %v6136_v47  ;;  %v6180_v1 = vmul.f32 %v5891_v19, %v10880_v46  ;;  %v1732_v2 = vsub.f32 2.0, %v1668_v24 }
 0x143   : > { %10863 = vst [vmem:[#allocation172_spill] sm:$0xff] %v6102_v44  ;;  %v2138_v26 = vsub.f32 %v10223_v41, %v10224_v51  ;;  %v1733_v27 = vsub.f32 2.0, %v1669_v16  ;;  %v6191_v45 = vmul.f32 %v5894_v34, %v10880_v46  ;;  %v6195_v19 = vmul.f32 %v5913_v3, %v10885_v62  ;;  %v10891_v3 = vld [vmem:[#allocation112_spill] sm:$0xff] }
 0x144   : > { %10864 = vst [vmem:[#allocation173_spill] sm:$0xff] %v6105_v61  ;;  %v6151_v61 = vadd.f32 %v811_v43, %v10875_v39  ;;  %v6169_v43 = vmul.f32 %v5605_v58, %v1691_v8  ;;  %v10882_v58 = vld [vmem:[#allocation97_spill] sm:$0xff]  ;;  %v6197_v22 = vmul.f32 %v4548_v60, %v1093_v28  ;;  %v6203_v39 = vmul.f32 %v5925_v42, %v10885_v62  ;;  %v10892_v28 = vld [vmem:[#allocation100_spill] sm:$0xff]  ;;  %v10893_v60 = vld [vmem:[#allocation118_spill] sm:$0xff] }
 0x145   : > { %10866 = vst [vmem:[#allocation103_spill] sm:$0xff] %v6113_v35  ;;  %v10877_v35 = vld [vmem:[#allocation94_spill] sm:$0xff]  ;;  %2667 = vmatpush.msra.mxu0 %v2138_v26  ;;  %v6207_v16 = vmul.f32 %v6171_v0, %v6007_v14  ;;  %v2014_v34 = vadd.f32 %v6191_v45, %v6180_v1  ;;  %v10890_v26 = vld [vmem:[#allocation95_spill] sm:$0xff]  ;;  %v6215_v41 = vmul.f32 %v4552_v38, %v1732_v2  ;;  %v10896_v51 = vld [vmem:[#allocation116_spill] sm:$0xff] }
 0x146   : > { %10867 = vst [vmem:[#allocation174_spill] sm:$0xff] %v6117_v37  ;;  %v6166_v12 = vmul.f32 %v6154_v5, %v10877_v35  ;;  %4557 = vrcp.f32 %v6151_v61  ;;  %v6186_v8 = vmul.f32 %v6169_v43, %v10882_v58  ;;  %v1012_v46 = vmul.f32 %v10891_v3, %v10890_v26  ;;  %v10895_v62 = vld [vmem:[#allocation99_spill] sm:$0xff]  ;;  %v10898_v38 = vld [vmem:[#allocation101_spill] sm:$0xff]  ;;  %v10909_v37 = vld [vmem:[#allocation88_spill] sm:$0xff] }
 0x147   : > { %10871 = vst [vmem:[#allocation109_spill] sm:$0xff] %v6140_v31  ;;  %4559 = vrcp.f32 %v6157_v15  ;;  %v1652_v58 = vmul.f32 %v10893_v60, %v10892_v28  ;;  %v2015_v14 = vadd.f32 %v6203_v39, %v6195_v19  ;;  %2716 = vmatpush.msra.mxu2 %v2014_v34  ;;  %v10899_v2 = vld [vmem:[#allocation119_spill] sm:$0xff] }
 0x148   : > { %10873 = vst [vmem:[#allocation50_spill] sm:$0xff] %v6144_v6  ;;  %v10231_v35 = vsub.f32 0.0, %v6166_v12  ;;  %4561 = vrcp.f32 %v6162_v56  ;;  %v10230_v24 = vsub.f32 0.0, %v6186_v8  ;;  %v1013_v6 = vmul.f32 %v10896_v51, %v10895_v62  ;;  %v6225_v31 = vpop.eup %4555  ;;  %v10903_v62 = vld [vmem:[#allocation77_spill] sm:$0xff] }
 0x149   : > { %10874 = vst [vmem:[#allocation93_spill] sm:$0xff] %v6148_v48  ;;  %v1076_v26 = vsub.f32 2.0, %v1012_v46  ;;  %v1716_v28 = vsub.f32 2.0, %v1652_v58  ;;  %2736 = vmatpush.msra.mxu3 %v2015_v14  ;;  %v10906_v14 = vld [vmem:[#allocation59_spill] sm:$0xff] }
 0x14a   : > { %10876 = vst [vmem:[#allocation96_spill] sm:$0xff] %v6162_v56  ;;  %v2139_v42 = vsub.f32 %v10230_v24, %v10231_v35  ;;  %v1077_v24 = vsub.f32 2.0, %v1013_v6  ;;  %v10900_v35 = vld [vmem:[#allocation52_spill] sm:$0xff]  ;;  %v10904_v56 = vld [vmem:[#allocation57_spill] sm:$0xff]  ;;  %v10907_v6 = vld [vmem:[#allocation78_spill] sm:$0xff] }
 0x14b   : > { %10878 = vst [vmem:[#allocation51_spill] sm:$0xff] %v6166_v12  ;;  %v6242_v46 = vmul.f32 %v10891_v3, %v1076_v26  ;;  %v6245_v58 = vmul.f32 %v10893_v60, %v1716_v28  ;;  %v10911_v3 = vld [vmem:[#allocation91_spill] sm:$0xff]  ;;  %v10913_v28 = vld [vmem:[#allocation90_spill] sm:$0xff] }
 0x14c   : > { %10879 = vst [vmem:[#allocation94_spill] sm:$0xff] %v6171_v0  ;;  %v6231_v12 = vpop.eup %4557  ;;  %2687 = vmatpush.msra.mxu1 %v2139_v42 }
 0x14d   : > { %10881 = vst [vmem:[#allocation10_spill] sm:$0xff] %v6180_v1  ;;  %v6227_v1 = vmul.f32 %v4554_v17, %v1733_v27  ;;  %v10905_v17 = vld [vmem:[#allocation74_spill] sm:$0xff]  ;;  %v6239_v34 = vpop.eup %4559  ;;  %v6256_v40 = vmul.f32 %v6242_v46, %v10909_v37  ;;  %v6260_v60 = vmul.f32 %v6245_v58, %v10911_v3  ;;  %v6302_v3 = vmul.f32 %v6197_v22, %v6010_v53 }
 0x14e   : > { %10883 = vst [vmem:[#allocation97_spill] sm:$0xff] %v6186_v8  ;;  %v10901_v8 = vld [vmem:[#allocation68_spill] sm:$0xff]  ;;  %v985_v27 = vmul.f32 %v10905_v17, %v10904_v56  ;;  %v6249_v48 = vpop.eup %4561 }
 0x14f   : > { %10884 = vst [vmem:[#allocation175_spill] sm:$0xff] %v6191_v45  ;;  %v1653_v45 = vmul.f32 %v10899_v2, %v10898_v38  ;;  %v1625_v38 = vmul.f32 %v10907_v6, %v10906_v14 }
 0x150   : > { %10886 = vst [vmem:[#allocation11_spill] sm:$0xff] %v6195_v19  ;;  %v984_v19 = vmul.f32 %v10901_v8, %v10900_v35  ;;  %v6252_v35 = vmul.f32 %v10896_v51, %v1077_v24  ;;  %v1049_v56 = vsub.f32 2.0, %v985_v27  ;;  %v10239_v24 = vsub.f32 0.0, %v6260_v60 }
 0x151   : > { %10887 = vst [vmem:[#allocation176_spill] sm:$0xff] %v6197_v22  ;;  %v1717_v42 = vsub.f32 2.0, %v1653_v45  ;;  %v1689_v26 = vsub.f32 2.0, %v1625_v38  ;;  %v10917_v38 = vld [vmem:[#allocation40_spill] sm:$0xff] }
 0x152   : > { %10888 = vst [vmem:[#allocation177_spill] sm:$0xff] %v6203_v39  ;;  %v10902_v39 = vld [vmem:[#allocation58_spill] sm:$0xff]  ;;  %v6267_v14 = vmul.f32 %v6252_v35, %v10913_v28  ;;  %v6276_v37 = vmul.f32 %v10905_v17, %v1049_v56  ;;  %v10924_v28 = vld [vmem:[#allocation43_spill] sm:$0xff] }
 0x153   : > { %10889 = vst [vmem:[#allocation178_spill] sm:$0xff] %v6207_v16  ;;  %v1624_v0 = vmul.f32 %v10903_v62, %v10902_v39  ;;  %v1048_v39 = vsub.f32 2.0, %v984_v19  ;;  %v6263_v45 = vmul.f32 %v10899_v2, %v1717_v42  ;;  %v10240_v19 = vsub.f32 0.0, %v6256_v40  ;;  %v10915_v2 = vld [vmem:[#allocation92_spill] sm:$0xff] }
 0x154   : > { %10894 = vst [vmem:[#allocation95_spill] sm:$0xff] %v6215_v41  ;;  %v6285_v42 = vmul.f32 %v10907_v6, %v1689_v26  ;;  %v10977_v16 = vld [vmem:[#allocation28_spill] sm:$0xff] }
 0x155   : > { %10897 = vst [vmem:[#allocation112_spill] sm:$0xff] %v6227_v1  ;;  %v1688_v44 = vsub.f32 2.0, %v1624_v0  ;;  %v6270_v51 = vmul.f32 %v10901_v8, %v1048_v39  ;;  %v6282_v27 = vmul.f32 %v6263_v45, %v10915_v2  ;;  %v10921_v39 = vld [vmem:[#allocation41_spill] sm:$0xff]  ;;  %v2164_v6 = vsub.f32 %v10239_v24, %v10240_v19  ;;  %v550_v8 = vpop.permute.xlu0 %549 }
 0x156   : > { %10908 = vst [vmem:[#allocation100_spill] sm:$0xff] %v6249_v48  ;;  %v6298_v56 = vmul.f32 %v6276_v37, %v10921_v39  ;;  %v6311_v2 = vmul.f32 %v6285_v42, %v10924_v28  ;;  %v6323_v24 = vmul.f32 %v6227_v1, %v6037_v29  ;;  %v10928_v28 = vsub.f32 0.0, %v6267_v14 }
 0x157   : > { %10910 = vst [vmem:[#allocation118_spill] sm:$0xff] %v6256_v40  ;;  %v6273_v0 = vmul.f32 %v10903_v62, %v1688_v44  ;;  %v6290_v44 = vmul.f32 %v6270_v51, %v10917_v38  ;;  %v10919_v62 = vld [vmem:[#allocation42_spill] sm:$0xff]  ;;  %v10242_v26 = vsub.f32 0.0, %v6282_v27  ;;  %v595_v38 = vpop.permute.xlu2 %594  ;;  %2795 = vmatpush.msrb.mxu2 %v2164_v6  ;;  %v6503_v48 = vmul.f32 %v5973_v20, %v10977_v16 }
 0x158   : > { %10912 = vst [vmem:[#allocation99_spill] sm:$0xff] %v6260_v60  ;;  %v6319_v60 = vmul.f32 %v6215_v41, %v6034_v4  ;;  %v10246_v39 = vsub.f32 0.0, %v6311_v2  ;;  %v6335_v4 = vsub.f32 %v4934_v10, %v595_v38  ;;  %v6338_v29 = vsub.f32 %v4942_v13, %v595_v38  ;;  %v10949_v41 = vld [vmem:[#allocation110_spill] sm:$0xff] }
 0x159   : > { %10914 = vst [vmem:[#allocation116_spill] sm:$0xff] %v6267_v14  ;;  %v6294_v17 = vmul.f32 %v6273_v0, %v10919_v62  ;;  %v615_v62 = vpop.permute.xlu1 %614  ;;  %v2165_v19 = vsub.f32 %v10242_v26, %v10928_v28  ;;  %v10929_v53 = vsub.f32 0.0, %v6290_v44  ;;  %v10934_v28 = vsub.f32 0.0, %v6298_v56  ;;  %v10943_v14 = vld [vmem:[#allocation104_spill] sm:$0xff] }
 0x15a   : > { %10916 = vst [vmem:[#allocation101_spill] sm:$0xff] %v6282_v27  ;;  %v6341_v6 = vsub.f32 %v4934_v10, %v615_v62 }
 0x15b   : > { %10918 = vst [vmem:[#allocation119_spill] sm:$0xff] %v6290_v44  ;;  %v10930_v22 = vsub.f32 0.0, %v6294_v17  ;;  %2815 = vmatpush.msrb.mxu3 %v2165_v19  ;;  %v2137_v26 = vsub.f32 %v10246_v39, %v10934_v28  ;;  %v6348_v44 = vadd.f32 %v595_v38, %v4934_v10  ;;  %v6365_v28 = vsub.f32 %v4934_v10, %v550_v8 }
 0x15c   : > { %10920 = vst [vmem:[#allocation52_spill] sm:$0xff] %v6294_v17  ;;  %v6357_v17 = vadd.f32 %v595_v38, %v4942_v13  ;;  %v834_v19 = vmul.f32 %v6341_v6, %v6341_v6  ;;  %v6375_v38 = vadd.f32 %v550_v8, %v4934_v10 }
 0x15d   : > { %10922 = vst [vmem:[#allocation68_spill] sm:$0xff] %v6298_v56  ;;  %v2136_v40 = vsub.f32 %v10930_v22, %v10929_v53  ;;  %v6351_v22 = vsub.f32 %v4942_v13, %v615_v62  ;;  %v6354_v53 = vadd.f32 %v615_v62, %v4934_v10  ;;  %v6362_v56 = vadd.f32 %v615_v62, %v4942_v13 }
 0x15e   : > { %10923 = vst [vmem:[#allocation58_spill] sm:$0xff] %v6302_v3  ;;  %2688 = vmatpush.msra.mxu1 %v2137_v26  ;;  %v6380_v1 = vadd.f32 %v834_v19, %v10943_v14  ;;  %v808_v27 = vmul.f32 %v6365_v28, %v6365_v28  ;;  %v6397_v19 = vmul.f32 %v6348_v44, %v6348_v44 }
 0x15f   : > { %10925 = vst [vmem:[#allocation77_spill] sm:$0xff] %v6311_v2  ;;  %2668 = vmatpush.msra.mxu0 %v2136_v40  ;;  %v835_v39 = vmul.f32 %v6351_v22, %v6351_v22  ;;  %v1474_v2 = vmul.f32 %v6354_v53, %v6354_v53  ;;  %v6372_v40 = vsub.f32 %v4942_v13, %v550_v8 }
 0x160   : > { %10926 = vst [vmem:[#allocation57_spill] sm:$0xff] %v6319_v60  ;;  %v1475_v26 = vmul.f32 %v6362_v56, %v6362_v56  ;;  %v6401_v62 = vmul.f32 %v6357_v17, %v6357_v17  ;;  %4563 = vrcp.f32 %v6380_v1 }
 0x161   : > { %10927 = vst [vmem:[#allocation74_spill] sm:$0xff] %v6323_v24 }
 0x162   : > { %10931 = vst [vmem:[#allocation59_spill] sm:$0xff] %v6335_v4 }
 0x163   : > { %10932 = vst [vmem:[#allocation78_spill] sm:$0xff] %v6338_v29 }
 0x164   : > { %10933 = vst [vmem:[#allocation88_spill] sm:$0xff] %v6341_v6  ;;  %v809_v6 = vmul.f32 %v6372_v40, %v6372_v40 }
 0x165   : > { %10935 = vst [vmem:[#allocation91_spill] sm:$0xff] %v6348_v44  ;;  %v1448_v44 = vmul.f32 %v6375_v38, %v6375_v38 }
 0x166   : > { %10936 = vst [vmem:[#allocation90_spill] sm:$0xff] %v6351_v22  ;;  %v6387_v22 = vmul.f32 %v6335_v4, %v6335_v4  ;;  %v6407_v4 = vadd.f32 %v550_v8, %v4942_v13  ;;  %v1622_v8 = vmul.f32 %v5651_v21, %v5551_v23  ;;  %v10958_v23 = vld [vmem:[#allocation126_spill] sm:$0xff] }
 0x167   : > { %10937 = vst [vmem:[#allocation92_spill] sm:$0xff] %v6354_v53  ;;  %v6391_v53 = vmul.f32 %v6338_v29, %v6338_v29  ;;  %v6410_v29 = vadd.f32 %v1474_v2, %v10943_v14  ;;  %v10955_v2 = vld [vmem:[#allocation53_spill] sm:$0xff]  ;;  %v1650_v24 = vmul.f32 %v5737_v50, %v10958_v23 }
 0x168   : > { %10938 = vst [vmem:[#allocation40_spill] sm:$0xff] %v6357_v17  ;;  %v10954_v17 = vld [vmem:[#allocation114_spill] sm:$0xff]  ;;  %v10960_v23 = vld [vmem:[#allocation105_spill] sm:$0xff] }
 0x169   : > { %10939 = vst [vmem:[#allocation42_spill] sm:$0xff] %v6362_v56  ;;  %v6404_v56 = vadd.f32 %v835_v39, %v10949_v41  ;;  %v6420_v39 = vadd.f32 %v1475_v26, %v10949_v41  ;;  %v983_v14 = vmul.f32 %v5630_v54, %v10954_v17  ;;  %v6435_v41 = vmul.f32 %v6407_v4, %v6407_v4 }
 0x16a   : > { %10940 = vst [vmem:[#allocation41_spill] sm:$0xff] %v6365_v28  ;;  %v10952_v28 = vld [vmem:[#allocation113_spill] sm:$0xff]  ;;  %v1686_v26 = vsub.f32 2.0, %v1622_v8  ;;  %v1714_v8 = vsub.f32 2.0, %v1650_v24 }
 0x16b   : > { %10941 = vst [vmem:[#allocation43_spill] sm:$0xff] %v6372_v40  ;;  %4565 = vrcp.f32 %v6404_v56 }
 0x16c   : > { %10942 = vst [vmem:[#allocation179_spill] sm:$0xff] %v6375_v38  ;;  %v1623_v38 = vmul.f32 %v5670_v25, %v5575_v11  ;;  %v10959_v11 = vld [vmem:[#allocation54_spill] sm:$0xff]  ;;  %4567 = vrcp.f32 %v6410_v29 }
 0x16d   : > { %10944 = vst [vmem:[#allocation104_spill] sm:$0xff] %v6380_v1  ;;  %v1047_v1 = vsub.f32 2.0, %v983_v14  ;;  %v6444_v3 = vadd.f32 %v809_v6, %v10959_v11  ;;  %v6453_v14 = vadd.f32 %v1448_v44, %v10955_v2  ;;  %v6476_v44 = vmul.f32 %v5737_v50, %v1714_v8  ;;  %v10974_v8 = vld [vmem:[#allocation117_spill] sm:$0xff] }
 0x16e   : > { %10945 = vst [vmem:[#allocation180_spill] sm:$0xff] %v6387_v22  ;;  %v1687_v17 = vsub.f32 2.0, %v1623_v38  ;;  %v10968_v38 = vld [vmem:[#allocation142_spill] sm:$0xff]  ;;  %4569 = vrcp.f32 %v6420_v39 }
 0x16f   : > { %10946 = vst [vmem:[#allocation181_spill] sm:$0xff] %v6391_v53  ;;  %v10956_v53 = vld [vmem:[#allocation122_spill] sm:$0xff] }
 0x170   : > { %10947 = vst [vmem:[#allocation182_spill] sm:$0xff] %v6397_v19  ;;  %v982_v19 = vmul.f32 %v5617_v55, %v10952_v28  ;;  %v10957_v28 = vld [vmem:[#allocation134_spill] sm:$0xff] }
 0x171   : > { %10948 = vst [vmem:[#allocation183_spill] sm:$0xff] %v6401_v62  ;;  %v6427_v62 = vadd.f32 %v808_v27, %v10955_v2  ;;  %v1010_v22 = vmul.f32 %v10957_v28, %v10956_v53  ;;  %v6447_v53 = vmul.f32 %v5651_v21, %v1686_v26  ;;  %v10963_v21 = vld [vmem:[#allocation107_spill] sm:$0xff] }
 0x172   : > { %10950 = vst [vmem:[#allocation110_spill] sm:$0xff] %v6404_v56  ;;  %v1046_v40 = vsub.f32 2.0, %v982_v19 }
 0x173   : > { %10951 = vst [vmem:[#allocation184_spill] sm:$0xff] %v6407_v4  ;;  %v1074_v19 = vsub.f32 2.0, %v1010_v22  ;;  %v6450_v4 = vmul.f32 %v5630_v54, %v1047_v1  ;;  %v6465_v22 = vpop.eup %4563  ;;  %v6469_v54 = vmul.f32 %v6447_v53, %v10963_v21  ;;  %v10965_v1 = vld [vmem:[#allocation106_spill] sm:$0xff]  ;;  %4571 = vrcp.f32 %v6427_v62 }
 0x174   : > { %10953 = vst [vmem:[#allocation113_spill] sm:$0xff] %v6420_v39  ;;  %v6441_v27 = vmul.f32 %v5617_v55, %v1046_v40  ;;  %v6460_v55 = vmul.f32 %v5670_v25, %v1687_v17  ;;  %v10967_v40 = vld [vmem:[#allocation124_spill] sm:$0xff]  ;;  %v10971_v17 = vld [vmem:[#allocation111_spill] sm:$0xff]  ;;  %4573 = vrcp.f32 %v6444_v3 }
 0x175   : > { %v6463_v6 = vmul.f32 %v10957_v28, %v1074_v19  ;;  %10962 = vst [vmem:[#allocation53_spill] sm:$0xff] %v6465_v22  ;;  %v6473_v24 = vmul.f32 %v6450_v4, %v10965_v1  ;;  %v1011_v25 = vmul.f32 %v10968_v38, %v10967_v40  ;;  %v10969_v28 = vld [vmem:[#allocation108_spill] sm:$0xff]  ;;  %v10278_v1 = vsub.f32 0.0, %v6469_v54  ;;  %v6497_v22 = vpop.eup %4565 }
 0x176   : > { %v6457_v56 = vmul.f32 %v6441_v27, %v10960_v23  ;;  %10964 = vst [vmem:[#allocation122_spill] sm:$0xff] %v6469_v54  ;;  %v6483_v26 = vmul.f32 %v6460_v55, %v10969_v28  ;;  %v10973_v23 = vld [vmem:[#allocation130_spill] sm:$0xff]  ;;  %v6495_v40 = vmul.f32 %v6476_v44, %v10974_v8  ;;  %v6515_v28 = vmul.f32 %v5984_v18, %v10977_v16  ;;  %v10997_v54 = vld [vmem:[#allocation67_spill] sm:$0xff] }
 0x177   : > { %10966 = vst [vmem:[#allocation134_spill] sm:$0xff] %v6473_v24  ;;  %v6487_v19 = vmul.f32 %v6463_v6, %v10971_v17  ;;  %v1651_v21 = vmul.f32 %v5744_v57, %v10973_v23  ;;  %v1075_v2 = vsub.f32 2.0, %v1011_v25  ;;  %4575 = vrcp.f32 %v6453_v14 }
 0x178   : > { %10961 = vst [vmem:[#allocation114_spill] sm:$0xff] %v6457_v56  ;;  %v10979_v23 = vsub.f32 0.0, %v6457_v56  ;;  %v10279_v8 = vsub.f32 0.0, %v6495_v40  ;;  %v10982_v60 = vsub.f32 0.0, %v6483_v26  ;;  %v10983_v56 = vld [vmem:[#allocation29_spill] sm:$0xff] }
 0x179   : > { %10970 = vst [vmem:[#allocation126_spill] sm:$0xff] %v6483_v26  ;;  %v1715_v17 = vsub.f32 2.0, %v1651_v21  ;;  %v6511_v25 = vmul.f32 %v10968_v38, %v1075_v2  ;;  %v10981_v21 = vsub.f32 0.0, %v6473_v24  ;;  %v6530_v38 = vmul.f32 %v6004_v49, %v10983_v56  ;;  %v10987_v2 = vld [vmem:[#allocation115_spill] sm:$0xff]  ;;  %v10995_v26 = vld [vmem:[#allocation65_spill] sm:$0xff]  ;;  %v10996_v24 = vld [vmem:[#allocation82_spill] sm:$0xff] }
 0x17a   : > { %10972 = vst [vmem:[#allocation54_spill] sm:$0xff] %v6487_v19  ;;  %v2134_v50 = vsub.f32 %v10278_v1, %v10979_v23  ;;  %v6526_v23 = vmul.f32 %v5992_v52, %v10983_v56  ;;  %v10986_v18 = vsub.f32 0.0, %v6487_v19  ;;  %v10994_v52 = vld [vmem:[#allocation87_spill] sm:$0xff] }
 0x17b   : > { %10975 = vst [vmem:[#allocation105_spill] sm:$0xff] %v6495_v40  ;;  %v2135_v20 = vsub.f32 %v10982_v60, %v10981_v21  ;;  %v6538_v60 = vmul.f32 %v6511_v25, %v10987_v2  ;;  %v10991_v21 = vld [vmem:[#allocation64_spill] sm:$0xff]  ;;  %v10998_v40 = vld [vmem:[#allocation89_spill] sm:$0xff] }
 0x17c   : > { %10976 = vst [vmem:[#allocation107_spill] sm:$0xff] %v6497_v22  ;;  %v6522_v22 = vmul.f32 %v5744_v57, %v1715_v17  ;;  %2669 = vmatpush.msra.mxu0 %v2134_v50  ;;  %v2162_v16 = vsub.f32 %v10279_v8, %v10986_v18  ;;  %v2012_v57 = vadd.f32 %v6515_v28, %v6503_v48  ;;  %v10989_v17 = vld [vmem:[#allocation120_spill] sm:$0xff]  ;;  %v10993_v8 = vld [vmem:[#allocation66_spill] sm:$0xff] }
 0x17d   : > { %10978 = vst [vmem:[#allocation106_spill] sm:$0xff] %v6503_v48  ;;  %2689 = vmatpush.msra.mxu1 %v2135_v20  ;;  %v2013_v56 = vadd.f32 %v6530_v38, %v6526_v23  ;;  %v10992_v18 = vld [vmem:[#allocation80_spill] sm:$0xff]  ;;  %v1648_v20 = vmul.f32 %v10994_v52, %v10993_v8  ;;  %v1649_v19 = vmul.f32 %v10998_v40, %v10997_v54  ;;  %v11004_v54 = vsub.f32 0.0, %v6538_v60 }
 0x17e   : > { %10980 = vst [vmem:[#allocation124_spill] sm:$0xff] %v6515_v28  ;;  %v6546_v49 = vmul.f32 %v6522_v22, %v10989_v17  ;;  %v1008_v2 = vmul.f32 %v10992_v18, %v10991_v21  ;;  %2796 = vmatpush.msrb.mxu2 %v2162_v16  ;;  %2670 = vmatpush.msra.mxu0 %v2012_v57 }
 0x17f   : > { %10984 = vst [vmem:[#allocation142_spill] sm:$0xff] %v6526_v23  ;;  %v1009_v17 = vmul.f32 %v10996_v24, %v10995_v26  ;;  %2690 = vmatpush.msra.mxu1 %v2013_v56  ;;  %v1712_v57 = vsub.f32 2.0, %v1648_v20  ;;  %v1713_v1 = vsub.f32 2.0, %v1649_v19  ;;  %v11002_v23 = vld [vmem:[#allocation19_spill] sm:$0xff]  ;;  %v6600_v20 = vadd.f32 %v6435_v41, %v10959_v11 }
 0x180   : > { %10985 = vst [vmem:[#allocation108_spill] sm:$0xff] %v6530_v38  ;;  %v10288_v28 = vsub.f32 0.0, %v6546_v49  ;;  %v1072_v50 = vsub.f32 2.0, %v1008_v2  ;;  %v10999_v38 = vld [vmem:[#allocation18_spill] sm:$0xff]  ;;  %v6572_v26 = vmul.f32 %v6154_v5, %v11002_v23  ;;  %v11012_v41 = vld [vmem:[#allocation63_spill] sm:$0xff] }
 0x181   : > { %10988 = vst [vmem:[#allocation111_spill] sm:$0xff] %v6538_v60  ;;  %v6564_v21 = vmul.f32 %v6126_v30, %v10999_v38  ;;  %v6568_v16 = vmul.f32 %v6129_v7, %v10999_v38  ;;  %v1073_v8 = vsub.f32 2.0, %v1009_v17  ;;  %v6585_v7 = vmul.f32 %v6169_v43, %v11002_v23  ;;  %v11006_v43 = vld [vmem:[#allocation60_spill] sm:$0xff] }
 0x182   : > { %10990 = vst [vmem:[#allocation130_spill] sm:$0xff] %v6546_v49  ;;  %v2163_v56 = vsub.f32 %v10288_v28, %v11004_v54  ;;  %v6579_v2 = vmul.f32 %v10992_v18, %v1072_v50  ;;  %v6589_v5 = vmul.f32 %v10994_v52, %v1712_v57  ;;  %v6595_v38 = vmul.f32 %v10998_v40, %v1713_v1  ;;  %v426_v50 = vpop.permute.xlu2 %425  ;;  %v610_v18 = vpop.permute.xlu1 %609  ;;  %v11008_v1 = vld [vmem:[#allocation62_spill] sm:$0xff]  ;;  %v11010_v52 = vld [vmem:[#allocation61_spill] sm:$0xff] }
 0x183   : > { %11000 = vst [vmem:[#allocation117_spill] sm:$0xff] %v6564_v21  ;;  %v2010_v30 = vadd.f32 %v6568_v16, %v6564_v21  ;;  %v6592_v19 = vmul.f32 %v10996_v24, %v1073_v8  ;;  %v2011_v24 = vadd.f32 %v6585_v7, %v6572_v26  ;;  %v11014_v8 = vld [vmem:[#allocation9_spill] sm:$0xff]  ;;  %v6642_v57 = vadd.f32 %v610_v18, %v4942_v13  ;;  %v11020_v49 = vld [vmem:[#allocation30_spill] sm:$0xff] }
 0x184   : > { %11001 = vst [vmem:[#allocation28_spill] sm:$0xff] %v6568_v16  ;;  %2816 = vmatpush.msrb.mxu3 %v2163_v56  ;;  %v6604_v23 = vmul.f32 %v6579_v2, %v11006_v43  ;;  %v6611_v40 = vmul.f32 %v6589_v5, %v11008_v1  ;;  %v6619_v11 = vmul.f32 %v6595_v38, %v11012_v41  ;;  %v6648_v43 = vpop.eup %4567  ;;  %4577 = vrcp.f32 %v6600_v20 }
 0x185   : > { %11003 = vst [vmem:[#allocation29_spill] sm:$0xff] %v6572_v26  ;;  %2671 = vmatpush.msra.mxu0 %v2010_v30  ;;  %v6615_v17 = vmul.f32 %v6592_v19, %v11010_v52  ;;  %2691 = vmatpush.msra.mxu1 %v2011_v24  ;;  %v6623_v54 = vsub.f32 %v11014_v8, %v426_v50 }
 0x186   : > { %11005 = vst [vmem:[#allocation115_spill] sm:$0xff] %v6585_v7  ;;  %v6626_v56 = vsub.f32 %v4934_v10, %v610_v18  ;;  %v6629_v30 = vsub.f32 %v4942_v13, %v610_v18  ;;  %v6635_v41 = vadd.f32 %v610_v18, %v4934_v10  ;;  %v6646_v60 = vmul.f32 %v6270_v51, %v11020_v49  ;;  %v545_v51 = vpop.permute.xlu0 %544 }
 0x187   : > { %11007 = vst [vmem:[#allocation120_spill] sm:$0xff] %v6604_v23  ;;  %v11022_v52 = vsub.f32 0.0, %v6604_v23  ;;  %v11023_v1 = vsub.f32 0.0, %v6611_v40  ;;  %v11024_v7 = vsub.f32 0.0, %v6615_v17  ;;  %v11025_v21 = vsub.f32 0.0, %v6619_v11 }
 0x188   : > { %11009 = vst [vmem:[#allocation64_spill] sm:$0xff] %v6611_v40  ;;  %v832_v24 = vmul.f32 %v6626_v56, %v6626_v56  ;;  %v833_v28 = vmul.f32 %v6629_v30, %v6629_v30  ;;  %v1472_v18 = vmul.f32 %v6635_v41, %v6635_v41  ;;  %v6662_v48 = vmul.f32 %v6273_v0, %v11020_v49  ;;  %v11029_v40 = vld [vmem:[#allocation132_spill] sm:$0xff]  ;;  %v11033_v0 = vld [vmem:[#allocation135_spill] sm:$0xff] }
 0x189   : > { %11011 = vst [vmem:[#allocation80_spill] sm:$0xff] %v6615_v17  ;;  %v2160_v26 = vsub.f32 %v11023_v1, %v11022_v52  ;;  %v2161_v16 = vsub.f32 %v11025_v21, %v11024_v7  ;;  %v6667_v23 = vsub.f32 %v4911_v63, %v426_v50  ;;  %v1473_v52 = vmul.f32 %v6642_v57, %v6642_v57  ;;  %v11031_v21 = vld [vmem:[#allocation31_spill] sm:$0xff] }
 0x18a   : > { %11013 = vst [vmem:[#allocation66_spill] sm:$0xff] %v6619_v11  ;;  %v6670_v1 = vadd.f32 %v832_v24, %v11029_v40  ;;  %v6676_v7 = vmul.f32 %v6276_v37, %v11031_v21  ;;  %v6682_v49 = vadd.f32 %v833_v28, %v11033_v0  ;;  %v2008_v50 = vadd.f32 %v6662_v48, %v6646_v60 }
 0x18b   : > { %11015 = vst [vmem:[#allocation87_spill] sm:$0xff] %v6623_v54  ;;  %2797 = vmatpush.msrb.mxu2 %v2160_v26  ;;  %2817 = vmatpush.msrb.mxu3 %v2161_v16  ;;  %v6688_v24 = vmul.f32 %v6285_v42, %v11031_v21  ;;  %v6692_v37 = vadd.f32 %v1472_v18, %v11029_v40  ;;  %v11043_v21 = vld [vmem:[#allocation22_spill] sm:$0xff] }
 0x18c   : > { %11016 = vst [vmem:[#allocation65_spill] sm:$0xff] %v6626_v56  ;;  %v6695_v17 = vsub.f32 %v4934_v10, %v545_v51  ;;  %v6698_v16 = vsub.f32 %v4942_v13, %v545_v51  ;;  %v6702_v28 = vadd.f32 %v1473_v52, %v11033_v0  ;;  %2672 = vmatpush.msra.mxu0 %v2008_v50  ;;  %4579 = vrcp.f32 %v6670_v1  ;;  %v11055_v56 = vld [vmem:[#allocation36_spill] sm:$0xff] }
 0x18d   : > { %11017 = vst [vmem:[#allocation82_spill] sm:$0xff] %v6629_v30  ;;  %v6664_v30 = vpop.eup %4569  ;;  %v2009_v42 = vadd.f32 %v6688_v24, %v6676_v7  ;;  %v6707_v26 = vadd.f32 %v545_v51, %v4934_v10  ;;  %v6711_v40 = vmul.f32 %v6623_v54, %v6623_v54  ;;  %v6715_v18 = vadd.f32 %v545_v51, %v4942_v13  ;;  %v11047_v51 = vld [vmem:[#allocation25_spill] sm:$0xff] }
 0x18e   : > { %11018 = vst [vmem:[#allocation67_spill] sm:$0xff] %v6635_v41  ;;  %v6678_v11 = vpop.eup %4571  ;;  %v6719_v52 = vmul.f32 %v6441_v27, %v11043_v21  ;;  %v6723_v0 = vmul.f32 %v6667_v23, %v6667_v23  ;;  %4581 = vrcp.f32 %v6682_v49  ;;  %v806_v50 = vmul.f32 %v6695_v17, %v6695_v17  ;;  %v11054_v41 = vld [vmem:[#allocation151_spill] sm:$0xff] }
 0x18f   : > { %11019 = vst [vmem:[#allocation89_spill] sm:$0xff] %v6642_v57  ;;  %2692 = vmatpush.msra.mxu1 %v2009_v42  ;;  %4583 = vrcp.f32 %v6692_v37  ;;  %v807_v27 = vmul.f32 %v6698_v16, %v6698_v16  ;;  %v6743_v42 = vpop.eup %4573 }
 0x190   : > { %11021 = vst [vmem:[#allocation18_spill] sm:$0xff] %v6646_v60  ;;  %v6741_v60 = vmul.f32 %v6460_v55, %v11047_v51  ;;  %4585 = vrcp.f32 %v6702_v28 }
 0x191   : > { %11026 = vst [vmem:[#allocation19_spill] sm:$0xff] %v6662_v48  ;;  %v11050_v48 = vld [vmem:[#allocation145_spill] sm:$0xff] }
 0x192   : > { %11027 = vst [vmem:[#allocation60_spill] sm:$0xff] %v6664_v30 }
 0x193   : > { %11028 = vst [vmem:[#allocation62_spill] sm:$0xff] %v6667_v23  ;;  %v11051_v23 = vld [vmem:[#allocation157_spill] sm:$0xff] }
 0x194   : > { %11030 = vst [vmem:[#allocation61_spill] sm:$0xff] %v6670_v1  ;;  %v1006_v54 = vmul.f32 %v11051_v23, %v11050_v48 }
 0x195   : > { %11032 = vst [vmem:[#allocation63_spill] sm:$0xff] %v6676_v7  ;;  %v6730_v7 = vmul.f32 %v6447_v53, %v11043_v21  ;;  %v1446_v53 = vmul.f32 %v6707_v26, %v6707_v26 }
 0x196   : > { %11034 = vst [vmem:[#allocation30_spill] sm:$0xff] %v6682_v49  ;;  %v1070_v48 = vsub.f32 2.0, %v1006_v54 }
 0x197   : > { %11035 = vst [vmem:[#allocation132_spill] sm:$0xff] %v6688_v24  ;;  %v6737_v24 = vmul.f32 %v6450_v4, %v11047_v51  ;;  %v2006_v21 = vadd.f32 %v6730_v7, %v6719_v52  ;;  %v6756_v4 = vmul.f32 %v6715_v18, %v6715_v18  ;;  %v11052_v51 = vld [vmem:[#allocation154_spill] sm:$0xff] }
 0x198   : > { %11036 = vst [vmem:[#allocation31_spill] sm:$0xff] %v6692_v37  ;;  %v11060_v37 = vld [vmem:[#allocation33_spill] sm:$0xff] }
 0x199   : > { %11037 = vst [vmem:[#allocation135_spill] sm:$0xff] %v6695_v17  ;;  %v2007_v55 = vadd.f32 %v6741_v60, %v6737_v24  ;;  %2673 = vmatpush.msra.mxu0 %v2006_v21  ;;  %v11059_v17 = vld [vmem:[#allocation70_spill] sm:$0xff] }
 0x19a   : > { %11038 = vst [vmem:[#allocation185_spill] sm:$0xff] %v6698_v16  ;;  %v11057_v16 = vld [vmem:[#allocation155_spill] sm:$0xff]  ;;  %v1004_v1 = vmul.f32 %v11060_v37, %v11059_v17 }
 0x19b   : > { %11039 = vst [vmem:[#allocation186_spill] sm:$0xff] %v6702_v28  ;;  %v1007_v28 = vmul.f32 %v11055_v56, %v11054_v41  ;;  %2693 = vmatpush.msra.mxu1 %v2007_v55 }
 0x19c   : > { %11040 = vst [vmem:[#allocation187_spill] sm:$0xff] %v6707_v26  ;;  %v11058_v26 = vld [vmem:[#allocation81_spill] sm:$0xff]  ;;  %v1068_v21 = vsub.f32 2.0, %v1004_v1 }
 0x19d   : > { %11041 = vst [vmem:[#allocation188_spill] sm:$0xff] %v6711_v40  ;;  %v11053_v40 = vld [vmem:[#allocation37_spill] sm:$0xff]  ;;  %v1071_v30 = vsub.f32 2.0, %v1007_v28  ;;  %v11063_v28 = vld [vmem:[#allocation23_spill] sm:$0xff] }
 0x19e   : > { %11042 = vst [vmem:[#allocation189_spill] sm:$0xff] %v6715_v18  ;;  %v1646_v57 = vmul.f32 %v11053_v40, %v11052_v51  ;;  %v1647_v18 = vmul.f32 %v11058_v26, %v11057_v16  ;;  %v6786_v16 = vmul.f32 %v11051_v23, %v1070_v48  ;;  %v1005_v55 = vmul.f32 %v5971_v33, %v11063_v28  ;;  %v11069_v48 = vld [vmem:[#allocation138_spill] sm:$0xff] }
 0x19f   : > { %11044 = vst [vmem:[#allocation22_spill] sm:$0xff] %v6719_v52  ;;  %v11056_v52 = vld [vmem:[#allocation20_spill] sm:$0xff] }
 0x1a0   : > { %11045 = vst [vmem:[#allocation190_spill] sm:$0xff] %v6723_v0  ;;  %v6752_v0 = vpop.eup %4575  ;;  %v1710_v41 = vsub.f32 2.0, %v1646_v57  ;;  %v6783_v54 = vadd.f32 %v1446_v53, %v11056_v52  ;;  %v1711_v17 = vsub.f32 2.0, %v1647_v18  ;;  %v6794_v57 = vmul.f32 %v11055_v56, %v1071_v30  ;;  %v11065_v53 = vld [vmem:[#allocation136_spill] sm:$0xff] }
 0x1a1   : > { %11046 = vst [vmem:[#allocation191_spill] sm:$0xff] %v6730_v7  ;;  %v6764_v49 = vpop.eup %4577  ;;  %v6767_v7 = vadd.f32 %v806_v50, %v11056_v52  ;;  %v1644_v50 = vmul.f32 %v6043_v36, %v5932_v32  ;;  %v6802_v23 = vmul.f32 %v6786_v16, %v11065_v53  ;;  %v1645_v56 = vmul.f32 %v6131_v9, %v5960_v59  ;;  %v11067_v30 = vld [vmem:[#allocation140_spill] sm:$0xff] }
 0x1a2   : > { %11048 = vst [vmem:[#allocation25_spill] sm:$0xff] %v6737_v24  ;;  %v6773_v24 = vpop.eup %4579  ;;  %v6805_v1 = vmul.f32 %v11058_v26, %v1711_v17  ;;  %v1069_v28 = vsub.f32 2.0, %v1005_v55  ;;  %v11072_v17 = vld [vmem:[#allocation141_spill] sm:$0xff] }
 0x1a3   : > { %11049 = vst [vmem:[#allocation192_spill] sm:$0xff] %v6741_v60  ;;  %v11062_v60 = vld [vmem:[#allocation21_spill] sm:$0xff]  ;;  %v6780_v39 = vpop.eup %4581  ;;  %v1708_v32 = vsub.f32 2.0, %v1644_v50  ;;  %v1709_v53 = vsub.f32 2.0, %v1645_v56  ;;  %v11078_v56 = vld [vmem:[#allocation38_spill] sm:$0xff]  ;;  %4587 = vrcp.f32 %v6767_v7 }
 0x1a4   : > { %11061 = vst [vmem:[#allocation145_spill] sm:$0xff] %v6773_v24  ;;  %v6776_v51 = vadd.f32 %v807_v27, %v11062_v60  ;;  %v6788_v24 = vpop.eup %4583  ;;  %v6791_v27 = vmul.f32 %v11053_v40, %v1710_v41  ;;  %v6808_v40 = vmul.f32 %v11060_v37, %v1068_v21  ;;  %v6818_v41 = vmul.f32 %v6794_v57, %v11069_v48  ;;  %v11074_v21 = vld [vmem:[#allocation148_spill] sm:$0xff] }
 0x1a5   : > { %v6798_v52 = vpop.eup %4585  ;;  %11066 = vst [vmem:[#allocation154_spill] sm:$0xff] %v6802_v23  ;;  %v6821_v50 = vmul.f32 %v6043_v36, %v1708_v32  ;;  %v6826_v37 = vmul.f32 %v6805_v1, %v11072_v17  ;;  %v6840_v32 = vmul.f32 %v5971_v33, %v1069_v28  ;;  %v6849_v26 = vmul.f32 %v6242_v46, %v11078_v56  ;;  %v11081_v33 = vld [vmem:[#allocation149_spill] sm:$0xff] }
 0x1a6   : > { %11064 = vst [vmem:[#allocation157_spill] sm:$0xff] %v6798_v52  ;;  %v6814_v18 = vmul.f32 %v6791_v27, %v11067_v30  ;;  %v6830_v59 = vmul.f32 %v6808_v40, %v11074_v21  ;;  %v11076_v52 = vld [vmem:[#allocation156_spill] sm:$0xff]  ;;  %v6845_v21 = vmul.f32 %v6131_v9, %v1709_v53  ;;  %v11080_v48 = vsub.f32 0.0, %v6802_v23 }
 0x1a7   : > { %11070 = vst [vmem:[#allocation151_spill] sm:$0xff] %v6818_v41  ;;  %v6837_v36 = vmul.f32 %v6821_v50, %v11076_v52  ;;  %v10333_v55 = vsub.f32 0.0, %v6826_v37  ;;  %v6858_v28 = vmul.f32 %v6840_v32, %v11081_v33  ;;  %v6862_v17 = vmul.f32 %v6245_v58, %v11078_v56  ;;  %v11085_v53 = vld [vmem:[#allocation24_spill] sm:$0xff]  ;;  %v11087_v33 = vld [vmem:[#allocation39_spill] sm:$0xff] }
 0x1a8   : > { %11068 = vst [vmem:[#allocation37_spill] sm:$0xff] %v6814_v18  ;;  %v10331_v30 = vsub.f32 0.0, %v6814_v18  ;;  %v11084_v9 = vsub.f32 0.0, %v6818_v41  ;;  %v6883_v58 = vmul.f32 %v6263_v45, %v11087_v33  ;;  %v11090_v56 = vsub.f32 0.0, %v6830_v59 }
 0x1a9   : > { %11071 = vst [vmem:[#allocation36_spill] sm:$0xff] %v6821_v50  ;;  %v10335_v50 = vsub.f32 0.0, %v6837_v36  ;;  %4589 = vrcp.f32 %v6776_v51 }
 0x1aa   : > { %11073 = vst [vmem:[#allocation20_spill] sm:$0xff] %v6826_v37  ;;  %v2158_v52 = vsub.f32 %v10331_v30, %v11080_v48  ;;  %v2159_v46 = vsub.f32 %v10333_v55, %v11084_v9  ;;  %v6875_v48 = vmul.f32 %v6845_v21, %v11085_v53  ;;  %v6879_v30 = vmul.f32 %v6252_v35, %v11087_v33  ;;  %v600_v35 = vpop.permute.xlu1 %599  ;;  %v11091_v33 = vld [vmem:[#allocation26_spill] sm:$0xff] }
 0x1ab   : > { %11075 = vst [vmem:[#allocation155_spill] sm:$0xff] %v6830_v59  ;;  %v2156_v37 = vsub.f32 %v10335_v50, %v11090_v56  ;;  %v2036_v53 = vadd.f32 %v6862_v17, %v6849_v26  ;;  %v6901_v56 = vmul.f32 %v6463_v6, %v11091_v33  ;;  %v2519_v50 = vld [vmem:[%s6867_s9 + $0x8] sm:$0xff]  ;;  %v6906_v55 = vmul.f32 %v6476_v44, %v11091_v33  ;;  %v11103_v59 = vld [vmem:[#allocation153_spill] sm:$0xff] }
 0x1ac   : > { %11077 = vst [vmem:[#allocation81_spill] sm:$0xff] %v6837_v36  ;;  %2798 = vmatpush.msrb.mxu2 %v2158_v52  ;;  %2818 = vmatpush.msrb.mxu3 %v2159_v46  ;;  %v2037_v45 = vadd.f32 %v6883_v58, %v6879_v30  ;;  %v11094_v46 = vld [vmem:[#allocation27_spill] sm:$0xff]  ;;  %v356_v52 = vpop.permute.xlu2 %355  ;;  %v6919_v6 = vadd.f32 %v6756_v4, %v11062_v60  ;;  %v11098_v44 = vsub.f32 0.0, %v6875_v48  ;;  %v11101_v36 = vld [vmem:[#allocation48_spill] sm:$0xff] }
 0x1ad   : > { %11079 = vst [vmem:[#allocation70_spill] sm:$0xff] %v6849_v26  ;;  %2752 = vmatpush.msrb.mxu0 %v2156_v37  ;;  %v6910_v41 = vmul.f32 %v6511_v25, %v11094_v46  ;;  %v6914_v9 = vmul.f32 %v6522_v22, %v11094_v46  ;;  %v11097_v37 = vsub.f32 0.0, %v6858_v28  ;;  %v6926_v25 = vsub.f32 %v4934_v10, %v600_v35  ;;  %v11117_v26 = vld [vmem:[#allocation100_spill] sm:$0xff] }
 0x1ae   : > { %11082 = vst [vmem:[#allocation33_spill] sm:$0xff] %v6858_v28  ;;  %2799 = vmatpush.msrb.mxu2 %v2036_v53  ;;  %2819 = vmatpush.msrb.mxu3 %v2037_v45  ;;  %v2034_v22 = vadd.f32 %v6906_v55, %v6901_v56  ;;  %v6933_v46 = vsub.f32 %v4942_v13, %v600_v35 }
 0x1af   : > { %11083 = vst [vmem:[#allocation21_spill] sm:$0xff] %v6862_v17  ;;  %v2157_v53 = vsub.f32 %v11098_v44, %v11097_v37  ;;  %v2035_v33 = vadd.f32 %v6914_v9, %v6910_v41  ;;  %v6936_v60 = vadd.f32 %v600_v35, %v4934_v10  ;;  %4340 = vmatmul.msk.f32.vlgmr.msra.gmra.mxu2 %vm2654_vm0, %v2519_v50 }
 0x1b0   : > { %11086 = vst [vmem:[#allocation23_spill] sm:$0xff] %v6875_v48  ;;  %v6940_v4 = vsub.f32 %v11014_v8, %v356_v52  ;;  %v6943_v45 = vsub.f32 %v4911_v63, %v356_v52  ;;  %v828_v37 = vmul.f32 %v6926_v25, %v6926_v25  ;;  %v6948_v44 = vadd.f32 %v600_v35, %v4942_v13  ;;  %v376_v48 = vpop.permute.xlu0 %375 }
 0x1b1   : > { %11088 = vst [vmem:[#allocation136_spill] sm:$0xff] %v6879_v30  ;;  %2772 = vmatpush.msrb.mxu1 %v2157_v53  ;;  %2800 = vmatpush.msrb.mxu2 %v2034_v22  ;;  %v829_v53 = vmul.f32 %v6933_v46, %v6933_v46  ;;  %v1468_v28 = vmul.f32 %v6936_v60, %v6936_v60  ;;  %v11105_v22 = vld [vmem:[#allocation49_spill] sm:$0xff]  ;;  %v6980_v30 = vpop.eup %4587 }
 0x1b2   : > { %11089 = vst [vmem:[#allocation140_spill] sm:$0xff] %v6883_v58  ;;  %2820 = vmatpush.msrb.mxu3 %v2035_v33  ;;  %v6957_v52 = vmul.f32 %v6579_v2, %v11101_v36  ;;  %v892_v18 = vadd.f32 %v828_v37, %v11103_v59  ;;  %v1469_v35 = vmul.f32 %v6948_v44, %v6948_v44 }
 0x1b3   : > { %11092 = vst [vmem:[#allocation138_spill] sm:$0xff] %v6901_v56  ;;  %v6964_v23 = vmul.f32 %v6589_v5, %v11101_v36  ;;  %v6968_v33 = vmul.f32 %v6592_v19, %v11105_v22  ;;  %4341 = vmatmul.msk.f32.vlgmr.msra.gmra.mxu3 %vm2654_vm0, %v2519_v50  ;;  %v1532_v2 = vadd.f32 %v1468_v28, %v11103_v59 }
 0x1b4   : > { %11093 = vst [vmem:[#allocation141_spill] sm:$0xff] %v6906_v55  ;;  %v6975_v37 = vmul.f32 %v6595_v38, %v11105_v22  ;;  %v6978_v58 = vsub.f32 %v11014_v8, %v376_v48  ;;  %4591 = vrcp.f32 %v892_v18  ;;  %v6986_v50 = vsub.f32 %v4911_v63, %v376_v48 }
 0x1b5   : > { %11095 = vst [vmem:[#allocation148_spill] sm:$0xff] %v6910_v41  ;;  %v11107_v41 = vld [vmem:[#allocation86_spill] sm:$0xff]  ;;  %v2032_v19 = vadd.f32 %v6964_v23, %v6957_v52  ;;  %v1002_v36 = vmul.f32 %v6225_v31, %v6136_v47  ;;  %v1642_v28 = vmul.f32 %v6239_v34, %v6157_v15  ;;  %v1003_v48 = vmul.f32 %v6231_v12, %v6151_v61  ;;  %v11116_v61 = vld [vmem:[#allocation96_spill] sm:$0xff] }
 0x1b6   : > { %11096 = vst [vmem:[#allocation156_spill] sm:$0xff] %v6914_v9  ;;  %v893_v9 = vadd.f32 %v829_v53, %v11107_v41  ;;  %v1533_v5 = vadd.f32 %v1469_v35, %v11107_v41  ;;  %v2033_v59 = vadd.f32 %v6975_v37, %v6968_v33  ;;  %v766_v38 = vmul.f32 %v6978_v58, %v6978_v58  ;;  %v7000_v53 = vpop.eup %4589  ;;  %v11111_v35 = vld [vmem:[#allocation171_spill] sm:$0xff] }
 0x1b7   : > { %11099 = vst [vmem:[#allocation38_spill] sm:$0xff] %v6940_v4  ;;  %2801 = vmatpush.msrb.mxu2 %v2032_v19  ;;  %v767_v41 = vmul.f32 %v6986_v50, %v6986_v50  ;;  %v1066_v47 = vsub.f32 2.0, %v1002_v36  ;;  %v1706_v55 = vsub.f32 2.0, %v1642_v28  ;;  %v1067_v17 = vsub.f32 2.0, %v1003_v48 }
 0x1b8   : > { %11100 = vst [vmem:[#allocation149_spill] sm:$0xff] %v6943_v45  ;;  %4593 = vrcp.f32 %v893_v9  ;;  %2821 = vmatpush.msrb.mxu3 %v2033_v59  ;;  %v894_v22 = vadd.f32 %v11111_v35, %v766_v38  ;;  %v11118_v59 = vld [vmem:[#allocation55_spill] sm:$0xff] }
 0x1b9   : > { %11102 = vst [vmem:[#allocation24_spill] sm:$0xff] %v6957_v52  ;;  %4595 = vrcp.f32 %v1532_v2  ;;  %v11113_v52 = vld [vmem:[#allocation172_spill] sm:$0xff]  ;;  %v7009_v15 = vmul.f32 %v6225_v31, %v1066_v47  ;;  %v7015_v35 = vmul.f32 %v6786_v16, %v11118_v59 }
 0x1ba   : > { %11104 = vst [vmem:[#allocation39_spill] sm:$0xff] %v6964_v23  ;;  %4597 = vrcp.f32 %v1533_v5  ;;  %v895_v19 = vadd.f32 %v11113_v52, %v767_v41  ;;  %v11114_v23 = vld [vmem:[#allocation93_spill] sm:$0xff]  ;;  %v7018_v52 = vmul.f32 %v6239_v34, %v1706_v55  ;;  %v11125_v34 = vld [vmem:[#allocation170_spill] sm:$0xff] }
 0x1bb   : > { %11106 = vst [vmem:[#allocation26_spill] sm:$0xff] %v6968_v33  ;;  %v11112_v33 = vld [vmem:[#allocation174_spill] sm:$0xff]  ;;  %v7006_v56 = vadd.f32 %v11114_v23, %v767_v41  ;;  %4599 = vrcp.f32 %v894_v22  ;;  %v7021_v23 = vmul.f32 %v6231_v12, %v1067_v17  ;;  %v11123_v41 = vld [vmem:[#allocation167_spill] sm:$0xff]  ;;  %v11127_v55 = vld [vmem:[#allocation169_spill] sm:$0xff] }
 0x1bc   : > { %11108 = vst [vmem:[#allocation27_spill] sm:$0xff] %v6975_v37  ;;  %v1534_v37 = vadd.f32 %v11112_v33, %v766_v38  ;;  %v4592_v33 = vpop.eup %4591  ;;  %4601 = vrcp.f32 %v895_v19  ;;  %v7025_v38 = vmul.f32 %v6791_v27, %v11118_v59  ;;  %v7029_v28 = vmul.f32 %v7009_v15, %v11123_v41 }
 0x1bd   : > { %11109 = vst [vmem:[#allocation48_spill] sm:$0xff] %v6978_v58  ;;  %v1020_v36 = vmul.f32 %v4592_v33, %v892_v18  ;;  %v7034_v12 = vmul.f32 %v7018_v52, %v11125_v34  ;;  %v7038_v27 = vmul.f32 %v7021_v23, %v11127_v55 }
 0x1be   : > { %11110 = vst [vmem:[#allocation153_spill] sm:$0xff] %v6986_v50  ;;  %v1643_v50 = vmul.f32 %v11117_v26, %v11116_v61  ;;  %v4594_v31 = vpop.eup %4593  ;;  %4603 = vrcp.f32 %v1534_v37  ;;  %v10362_v59 = vsub.f32 0.0, %v7029_v28 }
 0x1bf   : > { %11115 = vst [vmem:[#allocation49_spill] sm:$0xff] %v7009_v15  ;;  %v4596_v48 = vpop.eup %4595  ;;  %v1021_v47 = vmul.f32 %v4594_v31, %v893_v9  ;;  %4605 = vrcp.f32 %v7006_v56  ;;  %v1084_v18 = vsub.f32 2.0, %v1020_v36  ;;  %v10361_v58 = vsub.f32 0.0, %v7034_v12 }
 0x1c0   : > { %11119 = vst [vmem:[#allocation86_spill] sm:$0xff] %v7015_v35  ;;  %v1707_v16 = vsub.f32 2.0, %v1643_v50  ;;  %v4598_v17 = vpop.eup %4597  ;;  %v1660_v61 = vmul.f32 %v4596_v48, %v1532_v2  ;;  %v10368_v15 = vsub.f32 0.0, %v7038_v27  ;;  %v2030_v2 = vadd.f32 %v7025_v38, %v7015_v35 }
 0x1c1   : > { %11120 = vst [vmem:[#allocation171_spill] sm:$0xff] %v7018_v52  ;;  %v1085_v50 = vsub.f32 2.0, %v1021_v47  ;;  %v1661_v9 = vmul.f32 %v4598_v17, %v1533_v5  ;;  %v7046_v34 = vpop.eup %4599  ;;  %v7048_v52 = vmul.f32 %v4592_v33, %v1084_v18  ;;  %4607 = vrcp.f32 %v6783_v54 }
 0x1c2   : > { %11121 = vst [vmem:[#allocation174_spill] sm:$0xff] %v7021_v23  ;;  %v7042_v41 = vmul.f32 %v11117_v26, %v1707_v16  ;;  %v1724_v55 = vsub.f32 2.0, %v1660_v61  ;;  %v11130_v23 = vld [vmem:[#allocation173_spill] sm:$0xff]  ;;  %v7056_v26 = vpop.eup %4601  ;;  %v2154_v33 = vsub.f32 %v10361_v58, %v10362_v59  ;;  %4609 = vrcp.f32 %v6919_v6  ;;  %2802 = vmatpush.msrb.mxu2 %v2030_v2 }
 0x1c3   : > { %11122 = vst [vmem:[#allocation172_spill] sm:$0xff] %v7025_v38  ;;  %v7059_v5 = vmul.f32 %v4594_v31, %v1085_v50  ;;  %v1725_v16 = vsub.f32 2.0, %v1661_v9  ;;  %v7079_v50 = vmul.f32 %v6940_v4, %v6940_v4  ;;  %v7083_v9 = vmul.f32 %v6943_v45, %v6943_v45 }
 0x1c4   : > { %11124 = vst [vmem:[#allocation93_spill] sm:$0xff] %v7029_v28  ;;  %v7052_v36 = vmul.f32 %v7042_v41, %v11130_v23  ;;  %v7065_v47 = vpop.eup %4603  ;;  %v7070_v23 = vmul.f32 %v7048_v52, %v6926_v25  ;;  %v7072_v18 = vmul.f32 %v4596_v48, %v1724_v55  ;;  %2753 = vmatpush.msrb.mxu0 %v2154_v33  ;;  %v11139_v25 = vld [vmem:[#allocation56_spill] sm:$0xff]  ;;  %v650_v55 = vpop.permute.xlu2 %649  ;;  %v11147_v28 = vld [vmem:[#allocation57_spill] sm:$0xff] }
 0x1c5   : > { %11126 = vst [vmem:[#allocation96_spill] sm:$0xff] %v7034_v12  ;;  %v7075_v31 = vpop.eup %4605  ;;  %v7087_v58 = vmul.f32 %v7059_v5, %v6933_v46  ;;  %v7091_v48 = vmul.f32 %v6794_v57, %v11139_v25  ;;  %v7093_v2 = vmul.f32 %v4598_v17, %v1725_v16  ;;  %v7100_v61 = vmul.f32 %v7046_v34, %v894_v22 }
 0x1c6   : > { %11128 = vst [vmem:[#allocation100_spill] sm:$0xff] %v7038_v27  ;;  %v7097_v59 = vmul.f32 %v7072_v18, %v6936_v60  ;;  %v11143_v46 = vsub.f32 0.0, %v7052_v36  ;;  %v7107_v33 = vmul.f32 %v7056_v26, %v895_v19  ;;  %v7110_v57 = vmul.f32 %v7065_v47, %v1534_v37  ;;  %v11145_v60 = vld [vmem:[#allocation178_spill] sm:$0xff] }
 0x1c7   : > { %11129 = vst [vmem:[#allocation55_spill] sm:$0xff] %v7048_v52  ;;  %v7114_v17 = vmul.f32 %v6805_v1, %v11139_v25  ;;  %v11146_v16 = vsub.f32 0.0, %v11145_v60  ;;  %v11148_v22 = vsub.f32 0.0, %v11147_v28  ;;  %v7126_v37 = vsub.f32 %v4934_v10, %v650_v55  ;;  %v431_v1 = vpop.permute.xlu1 %430  ;;  %v366_v25 = vpop.permute.xlu0 %365 }
 0x1c8   : > { %11131 = vst [vmem:[#allocation167_spill] sm:$0xff] %v7052_v36  ;;  %v2155_v12 = vsub.f32 %v11143_v46, %v10368_v15  ;;  %v11149_v36 = vld [vmem:[#allocation58_spill] sm:$0xff]  ;;  %v7129_v45 = vsub.f32 %v4942_v13, %v650_v55  ;;  %v7131_v60 = vpop.eup %4607  ;;  %v7147_v27 = vmul.f32 %v7093_v2, %v6948_v44  ;;  %v7165_v44 = vsub.f32 %v11014_v8, %v366_v25 }
 0x1c9   : > { %11132 = vst [vmem:[#allocation170_spill] sm:$0xff] %v7059_v5  ;;  %v2180_v35 = vsub.f32 %v11148_v22, %v11146_v16  ;;  %v11150_v46 = vsub.f32 0.0, %v11149_v36  ;;  %v11151_v15 = vld [vmem:[#allocation74_spill] sm:$0xff]  ;;  %v2031_v22 = vadd.f32 %v7114_v17, %v7091_v48  ;;  %v7152_v16 = vmul.f32 %v7126_v37, %v7126_v37  ;;  %v11165_v5 = vld [vmem:[#allocation104_spill] sm:$0xff] }
 0x1ca   : > { %11133 = vst [vmem:[#allocation169_spill] sm:$0xff] %v7070_v23  ;;  %2773 = vmatpush.msrb.mxu1 %v2155_v12  ;;  %v11152_v19 = vsub.f32 0.0, %v11151_v15  ;;  %v7136_v12 = vmul.f32 %v7075_v31, %v7006_v56  ;;  %v7155_v56 = vadd.f32 %v650_v55, %v4942_v13  ;;  %v7162_v36 = vsub.f32 %v11014_v8, %v431_v1 }
 0x1cb   : > { %11134 = vst [vmem:[#allocation173_spill] sm:$0xff] %v7072_v18  ;;  %2881 = vmatpush.msra.mxu2 %v2180_v35  ;;  %2822 = vmatpush.msrb.mxu3 %v2031_v22  ;;  %v7159_v35 = vmul.f32 %v7129_v45, %v7129_v45  ;;  %v7168_v15 = vsub.f32 %v4911_v63, %v366_v25  ;;  %v11166_v18 = vld [vmem:[#allocation53_spill] sm:$0xff] }
 0x1cc   : > { %11135 = vst [vmem:[#allocation193_spill] sm:$0xff] %v7075_v31  ;;  %v2181_v38 = vsub.f32 %v11152_v19, %v11150_v46  ;;  %v7141_v46 = vadd.f32 %v650_v55, %v4934_v10  ;;  %v7143_v19 = vpop.eup %4609  ;;  %v7175_v55 = vsub.f32 %v4911_v63, %v431_v1  ;;  %v1000_v22 = vmul.f32 %v6678_v11, %v6427_v62 }
 0x1cd   : > { %11136 = vst [vmem:[#allocation194_spill] sm:$0xff] %v7079_v50  ;;  %v763_v25 = vmul.f32 %v7168_v15, %v7168_v15  ;;  %v1641_v4 = vmul.f32 %v6764_v49, %v6600_v20  ;;  %v1026_v62 = vmul.f32 %v11166_v18, %v11165_v5 }
 0x1ce   : > { %11137 = vst [vmem:[#allocation195_spill] sm:$0xff] %v7083_v9  ;;  %2901 = vmatpush.msra.mxu3 %v2181_v38  ;;  %v7172_v28 = vmul.f32 %v7141_v46, %v7141_v46  ;;  %v1001_v38 = vmul.f32 %v6743_v42, %v6444_v3  ;;  %v1064_v1 = vsub.f32 2.0, %v1000_v22  ;;  %v11172_v9 = vld [vmem:[#allocation107_spill] sm:$0xff] }
 0x1cf   : > { %11138 = vst [vmem:[#allocation196_spill] sm:$0xff] %v7087_v58  ;;  %v1705_v22 = vsub.f32 2.0, %v1641_v4  ;;  %v1090_v5 = vsub.f32 2.0, %v1026_v62  ;;  %v11179_v62 = vld [vmem:[#allocation43_spill] sm:$0xff] }
 0x1d0   : > { %11140 = vst [vmem:[#allocation56_spill] sm:$0xff] %v7091_v48  ;;  %v1640_v48 = vmul.f32 %v6752_v0, %v6453_v14  ;;  %v1666_v14 = vmul.f32 %v6648_v43, %v6410_v29  ;;  %v7198_v3 = vmul.f32 %v6678_v11, %v1064_v1  ;;  %v11171_v29 = vld [vmem:[#allocation110_spill] sm:$0xff] }
 0x1d1   : > { %11141 = vst [vmem:[#allocation197_spill] sm:$0xff] %v7093_v2  ;;  %v7217_v4 = vmul.f32 %v6764_v49, %v1705_v22 }
 0x1d2   : > { %11142 = vst [vmem:[#allocation198_spill] sm:$0xff] %v7097_v59  ;;  %v1704_v2 = vsub.f32 2.0, %v1640_v48  ;;  %v1065_v48 = vsub.f32 2.0, %v1001_v38 }
 0x1d3   : > { %11144 = vst [vmem:[#allocation199_spill] sm:$0xff] %v7114_v17  ;;  %v762_v17 = vmul.f32 %v7165_v44, %v7165_v44 }
 0x1d4   : > { %11153 = vst [vmem:[#allocation200_spill] sm:$0xff] %v7126_v37  ;;  %v11169_v37 = vld [vmem:[#allocation182_spill] sm:$0xff]  ;;  %v7201_v20 = vmul.f32 %v6752_v0, %v1704_v2  ;;  %v7214_v0 = vmul.f32 %v6743_v42, %v1065_v48  ;;  %v7220_v2 = vmul.f32 %v11166_v18, %v1090_v5  ;;  %v11183_v48 = vld [vmem:[#allocation88_spill] sm:$0xff] }
 0x1d5   : > { %11154 = vst [vmem:[#allocation201_spill] sm:$0xff] %v7129_v45  ;;  %v11167_v45 = vld [vmem:[#allocation180_spill] sm:$0xff] }
 0x1d6   : > { %11155 = vst [vmem:[#allocation202_spill] sm:$0xff] %v7141_v46  ;;  %v890_v52 = vadd.f32 %v11167_v45, %v762_v17  ;;  %v1027_v45 = vmul.f32 %v11172_v9, %v11171_v29  ;;  %v7229_v42 = vmul.f32 %v7214_v0, %v11179_v62  ;;  %v7237_v18 = vmul.f32 %v7220_v2, %v11183_v48 }
 0x1d7   : > { %11156 = vst [vmem:[#allocation203_spill] sm:$0xff] %v7147_v27 }
 0x1d8   : > { %11157 = vst [vmem:[#allocation204_spill] sm:$0xff] %v7152_v16  ;;  %4611 = vrcp.f32 %v890_v52  ;;  %v1730_v16 = vsub.f32 2.0, %v1666_v14  ;;  %v11181_v14 = vld [vmem:[#allocation184_spill] sm:$0xff]  ;;  %v1091_v22 = vsub.f32 2.0, %v1027_v45 }
 0x1d9   : > { %11158 = vst [vmem:[#allocation205_spill] sm:$0xff] %v7155_v56  ;;  %v7233_v49 = vmul.f32 %v7217_v4, %v11181_v14 }
 0x1da   : > { %11159 = vst [vmem:[#allocation206_spill] sm:$0xff] %v7159_v35 }
 0x1db   : > { %11160 = vst [vmem:[#allocation207_spill] sm:$0xff] %v7162_v36  ;;  %v11196_v45 = vsub.f32 0.0, %v7233_v49 }
 0x1dc   : > { %11161 = vst [vmem:[#allocation208_spill] sm:$0xff] %v7165_v44  ;;  %v11168_v44 = vld [vmem:[#allocation181_spill] sm:$0xff] }
 0x1dd   : > { %11162 = vst [vmem:[#allocation209_spill] sm:$0xff] %v7168_v15  ;;  %v891_v46 = vadd.f32 %v11168_v44, %v763_v25  ;;  %v1530_v15 = vadd.f32 %v11169_v37, %v762_v17  ;;  %v11173_v44 = vld [vmem:[#allocation41_spill] sm:$0xff]  ;;  %v7223_v37 = vmul.f32 %v6648_v43, %v1730_v16  ;;  %v11185_v43 = vld [vmem:[#allocation92_spill] sm:$0xff] }
 0x1de   : > { %11163 = vst [vmem:[#allocation210_spill] sm:$0xff] %v7172_v28  ;;  %v11170_v28 = vld [vmem:[#allocation183_spill] sm:$0xff]  ;;  %v7207_v17 = vmul.f32 %v7198_v3, %v11173_v44  ;;  %v11187_v44 = vld [vmem:[#allocation113_spill] sm:$0xff]  ;;  %v7253_v48 = vpop.eup %4611 }
 0x1df   : > { %11164 = vst [vmem:[#allocation211_spill] sm:$0xff] %v7175_v55  ;;  %v1531_v35 = vadd.f32 %v11170_v28, %v763_v25  ;;  %4613 = vrcp.f32 %v891_v46  ;;  %v11175_v28 = vld [vmem:[#allocation179_spill] sm:$0xff]  ;;  %v640_v25 = vpop.permute.xlu2 %639  ;;  %v7241_v16 = vmul.f32 %v7223_v37, %v11185_v43  ;;  %v7291_v31 = vmul.f32 %v7253_v48, %v890_v52 }
 0x1e0   : > { %11174 = vst [vmem:[#allocation104_spill] sm:$0xff] %v7207_v17  ;;  %v7211_v11 = vmul.f32 %v7201_v20, %v11175_v28  ;;  %4615 = vrcp.f32 %v1530_v15  ;;  %v10391_v38 = vsub.f32 0.0, %v7207_v17  ;;  %v11188_v28 = vld [vmem:[#allocation60_spill] sm:$0xff]  ;;  %v7251_v14 = vsub.f32 %v4934_v10, %v640_v25 }
 0x1e1   : > { %11177 = vst [vmem:[#allocation180_spill] sm:$0xff] %v7220_v2  ;;  %4617 = vrcp.f32 %v1531_v35  ;;  %v1667_v62 = vmul.f32 %v11188_v28, %v11187_v44  ;;  %v7259_v17 = vmul.f32 %v11172_v9, %v1091_v22  ;;  %v788_v44 = vmul.f32 %v7162_v36, %v7162_v36 }
 0x1e2   : > { %11176 = vst [vmem:[#allocation53_spill] sm:$0xff] %v7211_v11  ;;  %v10390_v1 = vsub.f32 0.0, %v7211_v11  ;;  %v7270_v50 = vsub.f32 %v4942_v13, %v640_v25  ;;  %v789_v9 = vmul.f32 %v7175_v55, %v7175_v55  ;;  %v11195_v22 = vsub.f32 0.0, %v7229_v42 }
 0x1e3   : > { %11178 = vst [vmem:[#allocation181_spill] sm:$0xff] %v7223_v37  ;;  %v1731_v29 = vsub.f32 2.0, %v1667_v62  ;;  %v660_v37 = vpop.permute.xlu0 %659 }
 0x1e4   : > { %11180 = vst [vmem:[#allocation182_spill] sm:$0xff] %v7229_v42  ;;  %v2152_v5 = vsub.f32 %v10390_v1, %v10391_v38  ;;  %v7265_v38 = vmul.f32 %v7155_v56, %v7155_v56  ;;  %v2153_v11 = vsub.f32 %v11196_v45, %v11195_v22  ;;  %v11197_v56 = vsub.f32 0.0, %v7237_v18 }
 0x1e5   : > { %11182 = vst [vmem:[#allocation183_spill] sm:$0xff] %v7233_v49  ;;  %v7261_v1 = vpop.eup %4613  ;;  %v7294_v42 = vmul.f32 %v11188_v28, %v1731_v29  ;;  %v7298_v45 = vmul.f32 %v7251_v14, %v7251_v14  ;;  %v7301_v22 = vadd.f32 %v640_v25, %v4934_v10  ;;  %v7314_v29 = vmul.f32 %v7270_v50, %v7270_v50 }
 0x1e6   : > { %11184 = vst [vmem:[#allocation110_spill] sm:$0xff] %v7237_v18  ;;  %2754 = vmatpush.msrb.mxu0 %v2152_v5  ;;  %v7272_v43 = vpop.eup %4615  ;;  %v11199_v5 = vld [vmem:[#allocation90_spill] sm:$0xff]  ;;  %2774 = vmatpush.msrb.mxu1 %v2153_v11  ;;  %v7335_v11 = vsub.f32 %v4942_v13, %v660_v37  ;;  %v7348_v18 = vadd.f32 %v660_v37, %v4942_v13 }
 0x1e7   : > { %11186 = vst [vmem:[#allocation107_spill] sm:$0xff] %v7241_v16  ;;  %v7286_v62 = vmul.f32 %v7259_v17, %v11199_v5  ;;  %v7288_v2 = vpop.eup %4617  ;;  %v7307_v5 = vmul.f32 %v7261_v1, %v891_v46  ;;  %v7310_v52 = vmul.f32 %v7272_v43, %v1530_v15  ;;  %v7325_v46 = vsub.f32 %v4934_v10, %v660_v37 }
 0x1e8   : > { %11189 = vst [vmem:[#allocation41_spill] sm:$0xff] %v7251_v14  ;;  %v7317_v28 = vmul.f32 %v7288_v2, %v1531_v35  ;;  %v7328_v15 = vadd.f32 %v640_v25, %v4942_v13  ;;  %v7338_v35 = vadd.f32 %v660_v37, %v4934_v10  ;;  %v853_v55 = vmul.f32 %v7335_v11, %v7335_v11 }
 0x1e9   : > { %11190 = vst [vmem:[#allocation179_spill] sm:$0xff] %v7253_v48  ;;  %v852_v25 = vmul.f32 %v7325_v46, %v7325_v46  ;;  %v998_v14 = vmul.f32 %v6980_v30, %v6767_v7  ;;  %v1638_v49 = vmul.f32 %v7131_v60, %v6783_v54  ;;  %v1493_v37 = vmul.f32 %v7348_v18, %v7348_v18 }
 0x1ea   : > { %11191 = vst [vmem:[#allocation43_spill] sm:$0xff] %v7261_v1 }
 0x1eb   : > { %11192 = vst [vmem:[#allocation184_spill] sm:$0xff] %v7265_v38  ;;  %v11198_v38 = vsub.f32 0.0, %v7241_v16  ;;  %v11210_v16 = vld [vmem:[#allocation42_spill] sm:$0xff]  ;;  %v1702_v48 = vsub.f32 2.0, %v1638_v49  ;;  %v1557_v7 = vadd.f32 %v1493_v37, %v789_v9 }
 0x1ec   : > { %11193 = vst [vmem:[#allocation88_spill] sm:$0xff] %v7270_v50  ;;  %v1492_v50 = vmul.f32 %v7338_v35, %v7338_v35 }
 0x1ed   : > { %11194 = vst [vmem:[#allocation92_spill] sm:$0xff] %v7272_v43  ;;  %v2178_v36 = vsub.f32 %v11198_v38, %v11197_v56  ;;  %v7303_v56 = vpop.permute.xlu1 %360  ;;  %v7322_v38 = vmul.f32 %v7294_v42, %v11210_v16  ;;  %v7343_v16 = vmul.f32 %v7301_v22, %v7301_v22  ;;  %v1062_v43 = vsub.f32 2.0, %v998_v14  ;;  %v11219_v14 = vld [vmem:[#allocation31_spill] sm:$0xff] }
 0x1ee   : > { %11200 = vst [vmem:[#allocation113_spill] sm:$0xff] %v7286_v62  ;;  %v1556_v1 = vadd.f32 %v1492_v50, %v788_v44 }
 0x1ef   : > { %11201 = vst [vmem:[#allocation60_spill] sm:$0xff] %v7288_v2  ;;  %2882 = vmatpush.msra.mxu2 %v2178_v36  ;;  %v7332_v36 = vsub.f32 %v11014_v8, %v7303_v56  ;;  %v999_v2 = vmul.f32 %v7000_v53, %v6776_v51  ;;  %v11218_v51 = vld [vmem:[#allocation145_spill] sm:$0xff] }
 0x1f0   : > { %11202 = vst [vmem:[#allocation90_spill] sm:$0xff] %v7291_v31 }
 0x1f1   : > { %11203 = vst [vmem:[#allocation212_spill] sm:$0xff] %v7294_v42  ;;  %v1063_v54 = vsub.f32 2.0, %v999_v2  ;;  %v1664_v2 = vmul.f32 %v6788_v24, %v11219_v14  ;;  %v11235_v42 = vld [vmem:[#allocation67_spill] sm:$0xff] }
 0x1f2   : > { %11204 = vst [vmem:[#allocation213_spill] sm:$0xff] %v7298_v45  ;;  %v916_v45 = vadd.f32 %v852_v25, %v788_v44  ;;  %v11217_v25 = vld [vmem:[#allocation61_spill] sm:$0xff] }
 0x1f3   : > { %11205 = vst [vmem:[#allocation214_spill] sm:$0xff] %v7301_v22  ;;  %v11215_v22 = vsub.f32 0.0, %v7286_v62  ;;  %v1639_v62 = vmul.f32 %v7143_v19, %v6919_v6  ;;  %v7377_v50 = vmul.f32 %v7000_v53, %v1063_v54  ;;  %v11220_v6 = vld [vmem:[#allocation135_spill] sm:$0xff] }
 0x1f4   : > { %11206 = vst [vmem:[#allocation215_spill] sm:$0xff] %v7307_v5  ;;  %4619 = vrcp.f32 %v916_v45  ;;  %v11229_v5 = vld [vmem:[#allocation189_spill] sm:$0xff] }
 0x1f5   : > { %11207 = vst [vmem:[#allocation216_spill] sm:$0xff] %v7310_v52  ;;  %v1703_v49 = vsub.f32 2.0, %v1639_v62  ;;  %v1728_v62 = vsub.f32 2.0, %v1664_v2  ;;  %v11233_v52 = vld [vmem:[#allocation65_spill] sm:$0xff] }
 0x1f6   : > { %11208 = vst [vmem:[#allocation217_spill] sm:$0xff] %v7314_v29  ;;  %v11216_v29 = vsub.f32 0.0, %v7322_v38 }
 0x1f7   : > { %11209 = vst [vmem:[#allocation218_spill] sm:$0xff] %v7317_v28  ;;  %v917_v28 = vadd.f32 %v853_v55, %v789_v9  ;;  %v1024_v55 = vmul.f32 %v11218_v51, %v11217_v25  ;;  %v7394_v53 = vmul.f32 %v7143_v19, %v1703_v49  ;;  %v7411_v49 = vmul.f32 %v6788_v24, %v1728_v62 }
 0x1f8   : > { %11211 = vst [vmem:[#allocation42_spill] sm:$0xff] %v7322_v38 }
 0x1f9   : > { %11212 = vst [vmem:[#allocation219_spill] sm:$0xff] %v7328_v15  ;;  %4621 = vrcp.f32 %v917_v28  ;;  %v7408_v19 = vmul.f32 %v7394_v53, %v11229_v5  ;;  %v7424_v24 = vmul.f32 %v7411_v49, %v11235_v42 }
 0x1fa   : > { %11213 = vst [vmem:[#allocation220_spill] sm:$0xff] %v7332_v36  ;;  %4623 = vrcp.f32 %v1556_v1  ;;  %v4620_v38 = vpop.eup %4619 }
 0x1fb   : > { %11214 = vst [vmem:[#allocation221_spill] sm:$0xff] %v7343_v16  ;;  %v2179_v16 = vsub.f32 %v11216_v29, %v11215_v22  ;;  %v7369_v22 = vmul.f32 %v6980_v30, %v1062_v43  ;;  %v7372_v29 = vmul.f32 %v7131_v60, %v1702_v48  ;;  %4625 = vrcp.f32 %v1557_v7  ;;  %v11222_v30 = vld [vmem:[#allocation187_spill] sm:$0xff]  ;;  %v11224_v43 = vld [vmem:[#allocation185_spill] sm:$0xff] }
 0x1fc   : > { %v1088_v48 = vsub.f32 2.0, %v1024_v55  ;;  %v7391_v9 = vmul.f32 %v7377_v50, %v11224_v43  ;;  %v11228_v55 = vld [vmem:[#allocation157_spill] sm:$0xff]  ;;  %11230 = vst [vmem:[#allocation135_spill] sm:$0xff] %v7408_v19  ;;  %v1044_v54 = vmul.f32 %v4620_v38, %v916_v45  ;;  %v11238_v42 = vsub.f32 0.0, %v7408_v19  ;;  %v11265_v19 = vld [vmem:[#allocation174_spill] sm:$0xff] }
 0x1fd   : > { %2902 = vmatpush.msra.mxu3 %v2179_v16  ;;  %v7383_v44 = vmul.f32 %v7369_v22, %v11220_v6  ;;  %v7387_v60 = vmul.f32 %v7372_v29, %v11222_v30  ;;  %v11226_v16 = vld [vmem:[#allocation30_spill] sm:$0xff]  ;;  %11236 = vst [vmem:[#allocation185_spill] sm:$0xff] %v7424_v24 }
 0x1fe   : > { %11225 = vst [vmem:[#allocation31_spill] sm:$0xff] %v7391_v9  ;;  %v1025_v37 = vmul.f32 %v6780_v39, %v11226_v16  ;;  %v7401_v14 = vmul.f32 %v11218_v51, %v1088_v48  ;;  %v11227_v6 = vld [vmem:[#allocation186_spill] sm:$0xff]  ;;  %v11237_v5 = vsub.f32 0.0, %v7391_v9 }
 0x1ff   : > { %11221 = vst [vmem:[#allocation61_spill] sm:$0xff] %v7383_v44  ;;  %v1665_v30 = vmul.f32 %v11228_v55, %v11227_v6  ;;  %v4622_v16 = vpop.eup %4621  ;;  %v11231_v25 = vsub.f32 0.0, %v7383_v44  ;;  %v11232_v51 = vsub.f32 0.0, %v7387_v60  ;;  %v10420_v44 = vsub.f32 0.0, %v7424_v24 }
 0x200   : > { %11223 = vst [vmem:[#allocation145_spill] sm:$0xff] %v7387_v60  ;;  %v1089_v2 = vsub.f32 2.0, %v1025_v37  ;;  %v7419_v6 = vmul.f32 %v7401_v14, %v11233_v52  ;;  %v4624_v31 = vpop.eup %4623  ;;  %v1045_v8 = vmul.f32 %v4622_v16, %v917_v28  ;;  %v1108_v37 = vsub.f32 2.0, %v1044_v54  ;;  %v11240_v54 = vld [vmem:[#allocation82_spill] sm:$0xff] }
 0x201   : > { %v2150_v48 = vsub.f32 %v11232_v51, %v11231_v25  ;;  %v1729_v43 = vsub.f32 2.0, %v1665_v30  ;;  %v4626_v62 = vpop.eup %4625  ;;  %v1684_v25 = vmul.f32 %v4624_v31, %v1556_v1  ;;  %v2151_v60 = vsub.f32 %v11238_v42, %v11237_v5  ;;  %v11245_v5 = vld [vmem:[#allocation16_spill] sm:$0xff] }
 0x202   : > { %11234 = vst [vmem:[#allocation187_spill] sm:$0xff] %v7419_v6  ;;  %v7427_v45 = vmul.f32 %v6780_v39, %v1089_v2  ;;  %v10421_v52 = vsub.f32 0.0, %v7419_v6  ;;  %v1109_v28 = vsub.f32 2.0, %v1045_v8  ;;  %v1685_v51 = vmul.f32 %v4626_v62, %v1557_v7  ;;  %v2518_v8 = vld [vmem:[%s6867_s9] sm:$0xff] }
 0x203   : > { %2755 = vmatpush.msrb.mxu0 %v2150_v48  ;;  %v7431_v30 = vmul.f32 %v11228_v55, %v1729_v43  ;;  %v7438_v39 = vmul.f32 %v4620_v38, %v1108_v37  ;;  %v1748_v2 = vsub.f32 2.0, %v1684_v25  ;;  %v11242_v48 = vld [vmem:[#allocation89_spill] sm:$0xff]  ;;  %2775 = vmatpush.msrb.mxu1 %v2151_v60  ;;  %v7457_v37 = vmul.f32 %v6808_v40, %v11245_v5 }
 0x204   : > { %v7442_v1 = vmul.f32 %v7427_v45, %v11240_v54  ;;  %v7449_v7 = vmul.f32 %v4622_v16, %v1109_v28  ;;  %v1749_v43 = vsub.f32 2.0, %v1685_v51  ;;  %v2176_v38 = vsub.f32 %v10420_v44, %v10421_v52  ;;  %4338 = vmatmul.msk.f32.vlgmr.msra.gmra.mxu0 %vm2654_vm0, %v2518_v8  ;;  %4339 = vmatmul.msk.f32.vlgmr.msra.gmra.mxu1 %vm2654_vm0, %v2518_v8  ;;  %v11251_v51 = vld [vmem:[#allocation36_spill] sm:$0xff]  ;;  %v11262_v52 = vld [vmem:[#allocation171_spill] sm:$0xff] }
 0x205   : > { %11239 = vst [vmem:[#allocation30_spill] sm:$0xff] %v7438_v39  ;;  %v7446_v55 = vmul.f32 %v7431_v30, %v11242_v48  ;;  %v7462_v25 = vsub.f32 %v4911_v63, %v7303_v56  ;;  %v7464_v42 = vmul.f32 %v4624_v31, %v1748_v2  ;;  %v7471_v28 = vmul.f32 %v7438_v39, %v7325_v46  ;;  %v11253_v56 = vld [vmem:[#allocation17_spill] sm:$0xff] }
 0x206   : > { %11241 = vst [vmem:[#allocation186_spill] sm:$0xff] %v7442_v1  ;;  %v10419_v16 = vsub.f32 0.0, %v7442_v1  ;;  %v7473_v40 = vmul.f32 %v4626_v62, %v1749_v43  ;;  %2883 = vmatpush.msra.mxu2 %v2176_v38  ;;  %v7477_v54 = vmul.f32 %v11251_v51, %v11245_v5  ;;  %v7481_v31 = vmul.f32 %v6840_v32, %v11253_v56  ;;  %v635_v43 = vpop.permute.xlu2 %634  ;;  %v11258_v51 = vld [vmem:[#allocation44_spill] sm:$0xff] }
 0x207   : > { %11243 = vst [vmem:[#allocation157_spill] sm:$0xff] %v7446_v55  ;;  %v10418_v60 = vsub.f32 0.0, %v7446_v55  ;;  %v7485_v2 = vmul.f32 %v7449_v7, %v7335_v11  ;;  %v7489_v48 = vmul.f32 %v7464_v42, %v7338_v35  ;;  %v7497_v62 = vmul.f32 %v6845_v21, %v11253_v56  ;;  %v11259_v56 = vld [vmem:[#allocation49_spill] sm:$0xff] }
 0x208   : > { %11244 = vst [vmem:[#allocation189_spill] sm:$0xff] %v7449_v7  ;;  %v7501_v32 = vmul.f32 %v7328_v15, %v7328_v15  ;;  %v7505_v11 = vmul.f32 %v7332_v36, %v7332_v36  ;;  %v2028_v35 = vadd.f32 %v7477_v54, %v7457_v37  ;;  %v7513_v38 = vmul.f32 %v7462_v25, %v7462_v25  ;;  %v11324_v36 = vld [vmem:[#allocation212_spill] sm:$0xff] }
 0x209   : > { %11246 = vst [vmem:[#allocation65_spill] sm:$0xff] %v7457_v37  ;;  %v2177_v46 = vsub.f32 %v10418_v60, %v10419_v16  ;;  %v2029_v21 = vadd.f32 %v7497_v62, %v7481_v31  ;;  %v7521_v60 = vmul.f32 %v11259_v56, %v11258_v51  ;;  %v655_v16 = vpop.permute.xlu1 %654  ;;  %v7525_v44 = vmul.f32 %v7473_v40, %v7348_v18 }
 0x20a   : > { %11247 = vst [vmem:[#allocation67_spill] sm:$0xff] %v7462_v25  ;;  %2756 = vmatpush.msrb.mxu0 %v2028_v35  ;;  %v7529_v8 = vmul.f32 %v11262_v52, %v11258_v51  ;;  %v7543_v35 = vsub.f32 %v4934_v10, %v635_v43  ;;  %v7550_v51 = vsub.f32 %v4934_v10, %v655_v16 }
 0x20b   : > { %11248 = vst [vmem:[#allocation82_spill] sm:$0xff] %v7464_v42  ;;  %2903 = vmatpush.msra.mxu3 %v2177_v46  ;;  %v11264_v46 = vld [vmem:[#allocation45_spill] sm:$0xff]  ;;  %2776 = vmatpush.msrb.mxu1 %v2029_v21  ;;  %v7563_v55 = vadd.f32 %v635_v43, %v4934_v10  ;;  %v7566_v18 = vadd.f32 %v635_v43, %v4942_v13 }
 0x20c   : > { %11249 = vst [vmem:[#allocation89_spill] sm:$0xff] %v7471_v28  ;;  %v7533_v9 = vmul.f32 %v11265_v19, %v11264_v46  ;;  %v7537_v5 = vmul.f32 %v7042_v41, %v11264_v46  ;;  %v2026_v52 = vadd.f32 %v7529_v8, %v7521_v60  ;;  %v7553_v41 = vsub.f32 %v4942_v13, %v655_v16 }
 0x20d   : > { %11250 = vst [vmem:[#allocation16_spill] sm:$0xff] %v7473_v40  ;;  %v7556_v46 = vsub.f32 %v4942_v13, %v635_v43  ;;  %v7560_v21 = vmul.f32 %v7543_v35, %v7543_v35  ;;  %v850_v1 = vmul.f32 %v7550_v51, %v7550_v51  ;;  %v7574_v6 = vadd.f32 %v655_v16, %v4934_v10 }
 0x20e   : > { %11252 = vst [vmem:[#allocation36_spill] sm:$0xff] %v7477_v54  ;;  %v2027_v19 = vadd.f32 %v7537_v5, %v7533_v9  ;;  %2757 = vmatpush.msrb.mxu0 %v2026_v52  ;;  %v851_v24 = vmul.f32 %v7553_v41, %v7553_v41  ;;  %v1086_v40 = vsub.f32 2.0, %v7100_v61  ;;  %v396_v15 = vpop.permute.xlu2 %395 }
 0x20f   : > { %11254 = vst [vmem:[#allocation17_spill] sm:$0xff] %v7481_v31  ;;  %v7577_v31 = vadd.f32 %v655_v16, %v4942_v13  ;;  %v1490_v16 = vmul.f32 %v7574_v6, %v7574_v6 }
 0x210   : > { %11255 = vst [vmem:[#allocation222_spill] sm:$0xff] %v7485_v2  ;;  %2777 = vmatpush.msrb.mxu1 %v2027_v19  ;;  %v11279_v19 = vld [vmem:[#allocation47_spill] sm:$0xff] }
 0x211   : > { %11256 = vst [vmem:[#allocation223_spill] sm:$0xff] %v7489_v48  ;;  %v7589_v56 = vmul.f32 %v7214_v0, %v11279_v19 }
 0x212   : > { %11257 = vst [vmem:[#allocation224_spill] sm:$0xff] %v7497_v62  ;;  %v590_v62 = vpop.permute.xlu0 %589 }
 0x213   : > { %11260 = vst [vmem:[#allocation44_spill] sm:$0xff] %v7521_v60 }
 0x214   : > { %11261 = vst [vmem:[#allocation49_spill] sm:$0xff] %v7525_v44 }
 0x215   : > { %11263 = vst [vmem:[#allocation171_spill] sm:$0xff] %v7529_v8  ;;  %v11282_v8 = vld [vmem:[#allocation190_spill] sm:$0xff] }
 0x216   : > { %11266 = vst [vmem:[#allocation45_spill] sm:$0xff] %v7533_v9  ;;  %v11276_v9 = vld [vmem:[#allocation46_spill] sm:$0xff]  ;;  %v7595_v54 = vadd.f32 %v851_v24, %v11282_v8  ;;  %v7615_v24 = vmul.f32 %v7556_v46, %v7556_v46 }
 0x217   : > { %11267 = vst [vmem:[#allocation174_spill] sm:$0xff] %v7537_v5  ;;  %v7581_v43 = vmul.f32 %v7198_v3, %v11276_v9  ;;  %v7585_v52 = vmul.f32 %v7201_v20, %v11276_v9  ;;  %v11281_v5 = vld [vmem:[#allocation188_spill] sm:$0xff]  ;;  %v7601_v3 = vmul.f32 %v7217_v4, %v11279_v19  ;;  %v1491_v20 = vmul.f32 %v7577_v31, %v7577_v31 }
 0x218   : > { %11268 = vst [vmem:[#allocation225_spill] sm:$0xff] %v7543_v35  ;;  %v7592_v60 = vadd.f32 %v850_v1, %v11281_v5  ;;  %v7608_v9 = vsub.f32 %v4934_v10, %v590_v62  ;;  %v7611_v1 = vsub.f32 %v4942_v13, %v590_v62  ;;  %v7618_v37 = vadd.f32 %v1490_v16, %v11281_v5 }
 0x219   : > { %11269 = vst [vmem:[#allocation226_spill] sm:$0xff] %v7550_v51  ;;  %v2024_v0 = vadd.f32 %v7585_v52, %v7581_v43  ;;  %v2025_v4 = vadd.f32 %v7601_v3, %v7589_v56  ;;  %v7623_v19 = vadd.f32 %v590_v62, %v4934_v10  ;;  %v7635_v16 = vadd.f32 %v590_v62, %v4942_v13 }
 0x21a   : > { %11270 = vst [vmem:[#allocation227_spill] sm:$0xff] %v7553_v41  ;;  %4627 = vrcp.f32 %v7592_v60  ;;  %v825_v5 = vmul.f32 %v7611_v1, %v7611_v1 }
 0x21b   : > { %11271 = vst [vmem:[#allocation228_spill] sm:$0xff] %v7556_v46  ;;  %2758 = vmatpush.msrb.mxu0 %v2024_v0  ;;  %2778 = vmatpush.msrb.mxu1 %v2025_v4  ;;  %4629 = vrcp.f32 %v7595_v54  ;;  %v1465_v0 = vmul.f32 %v7635_v16, %v7635_v16 }
 0x21c   : > { %11272 = vst [vmem:[#allocation229_spill] sm:$0xff] %v7563_v55  ;;  %4631 = vrcp.f32 %v7618_v37  ;;  %v7674_v42 = vadd.f32 %v825_v5, %v7513_v38  ;;  %v11293_v5 = vsub.f32 0.0, %v7070_v23  ;;  %v11301_v23 = vld [vmem:[#allocation94_spill] sm:$0xff] }
 0x21d   : > { %11273 = vst [vmem:[#allocation230_spill] sm:$0xff] %v7566_v18 }
 0x21e   : > { %11274 = vst [vmem:[#allocation231_spill] sm:$0xff] %v7574_v6 }
 0x21f   : > { %11275 = vst [vmem:[#allocation232_spill] sm:$0xff] %v7577_v31 }
 0x220   : > { %11277 = vst [vmem:[#allocation46_spill] sm:$0xff] %v7581_v43  ;;  %v7627_v43 = vadd.f32 %v1491_v20, %v11282_v8  ;;  %v7645_v20 = vmul.f32 %v7563_v55, %v7563_v55  ;;  %v7682_v39 = vpop.eup %4627  ;;  %v421_v55 = vpop.permute.xlu0 %420 }
 0x221   : > { %11278 = vst [vmem:[#allocation233_spill] sm:$0xff] %v7585_v52  ;;  %v824_v52 = vmul.f32 %v7608_v9, %v7608_v9 }
 0x222   : > { %11280 = vst [vmem:[#allocation47_spill] sm:$0xff] %v7589_v56  ;;  %v1464_v56 = vmul.f32 %v7623_v19, %v7623_v19  ;;  %4633 = vrcp.f32 %v7627_v43 }
 0x223   : > { %11283 = vst [vmem:[#allocation188_spill] sm:$0xff] %v7601_v3  ;;  %v11285_v3 = vld [vmem:[#allocation14_spill] sm:$0xff]  ;;  %v7649_v61 = vadd.f32 %v824_v52, %v7505_v11 }
 0x224   : > { %11284 = vst [vmem:[#allocation190_spill] sm:$0xff] %v7635_v16  ;;  %v7641_v8 = vmul.f32 %v7369_v22, %v11285_v3  ;;  %v7653_v62 = vmul.f32 %v7372_v29, %v11285_v3  ;;  %v11288_v22 = vld [vmem:[#allocation15_spill] sm:$0xff]  ;;  %v7670_v29 = vmul.f32 %v7046_v34, %v1086_v40  ;;  %v1726_v3 = vsub.f32 2.0, %v7110_v57  ;;  %v11291_v34 = vld [vmem:[#allocation162_spill] sm:$0xff] }
 0x225   : > { %v7660_v4 = vmul.f32 %v7377_v50, %v11288_v22  ;;  %v7664_v7 = vmul.f32 %v7394_v53, %v11288_v22  ;;  %v7677_v50 = vadd.f32 %v1464_v56, %v7505_v11  ;;  %v1087_v22 = vsub.f32 2.0, %v7107_v33 }
 0x226   : > { %11286 = vst [vmem:[#allocation14_spill] sm:$0xff] %v7641_v8  ;;  %v2022_v52 = vadd.f32 %v7653_v62, %v7641_v8  ;;  %4635 = vrcp.f32 %v7649_v61  ;;  %v7687_v40 = vmul.f32 %v7670_v29, %v11291_v34  ;;  %v7690_v57 = vmul.f32 %v7065_v47, %v1726_v3  ;;  %v7707_v3 = vpop.eup %4629 }
 0x227   : > { %11287 = vst [vmem:[#allocation234_spill] sm:$0xff] %v7653_v62  ;;  %v2023_v53 = vadd.f32 %v7664_v7, %v7660_v4  ;;  %v1727_v11 = vsub.f32 2.0, %v7136_v12  ;;  %v7694_v56 = vadd.f32 %v1465_v0, %v7513_v38  ;;  %v7697_v33 = vmul.f32 %v7056_v26, %v1087_v22  ;;  %v11297_v38 = vld [vmem:[#allocation168_spill] sm:$0xff]  ;;  %v11299_v26 = vld [vmem:[#allocation193_spill] sm:$0xff]  ;;  %v11300_v22 = vld [vmem:[#allocation75_spill] sm:$0xff] }
 0x228   : > { %11289 = vst [vmem:[#allocation15_spill] sm:$0xff] %v7660_v4  ;;  %2759 = vmatpush.msrb.mxu0 %v2022_v52  ;;  %v11294_v52 = vsub.f32 0.0, %v7097_v59  ;;  %v11295_v34 = vsub.f32 0.0, %v7087_v58  ;;  %v7712_v0 = vmul.f32 %v7690_v57, %v11297_v38  ;;  %v7719_v59 = vmul.f32 %v11301_v23, %v11300_v22  ;;  %v11311_v58 = vld [vmem:[#allocation103_spill] sm:$0xff]  ;;  %v11316_v62 = vld [vmem:[#allocation180_spill] sm:$0xff] }
 0x229   : > { %11290 = vst [vmem:[#allocation235_spill] sm:$0xff] %v7664_v7  ;;  %2779 = vmatpush.msrb.mxu1 %v2023_v53  ;;  %v11296_v7 = vsub.f32 0.0, %v7147_v27  ;;  %v7715_v53 = vmul.f32 %v11299_v26, %v1727_v11  ;;  %4637 = vrcp.f32 %v7674_v42  ;;  %v11307_v11 = vld [vmem:[#allocation76_spill] sm:$0xff] }
 0x22a   : > { %11292 = vst [vmem:[#allocation162_spill] sm:$0xff] %v7687_v40  ;;  %v2172_v4 = vsub.f32 %v11294_v52, %v11293_v5  ;;  %v7721_v5 = vpop.eup %4631  ;;  %v11308_v26 = vld [vmem:[#allocation176_spill] sm:$0xff]  ;;  %4639 = vrcp.f32 %v7677_v50 }
 0x22b   : > { %v2173_v47 = vsub.f32 %v11296_v7, %v11295_v34  ;;  %11298 = vst [vmem:[#allocation168_spill] sm:$0xff] %v7712_v0  ;;  %v11303_v7 = vld [vmem:[#allocation165_spill] sm:$0xff]  ;;  %v11305_v34 = vld [vmem:[#allocation95_spill] sm:$0xff]  ;;  %v7734_v12 = vmul.f32 %v11308_v26, %v11307_v11  ;;  %v7736_v23 = vpop.eup %4633  ;;  %v7741_v8 = vmul.f32 %v7715_v53, %v11311_v58  ;;  %v7753_v26 = vmul.f32 %v7566_v18, %v7566_v18 }
 0x22c   : > { %11302 = vst [vmem:[#allocation193_spill] sm:$0xff] %v7719_v59  ;;  %v7726_v52 = vmul.f32 %v7697_v33, %v11303_v7  ;;  %2838 = vmatpush.msra.mxu0 %v2172_v4  ;;  %v7730_v38 = vmul.f32 %v11305_v34, %v11300_v22  ;;  %v11313_v7 = vld [vmem:[#allocation112_spill] sm:$0xff]  ;;  %v585_v34 = vpop.permute.xlu1 %584  ;;  %v11318_v58 = vld [vmem:[#allocation181_spill] sm:$0xff]  ;;  %4641 = vrcp.f32 %v7694_v56 }
 0x22d   : > { %2858 = vmatpush.msra.mxu1 %v2173_v47  ;;  %11309 = vst [vmem:[#allocation165_spill] sm:$0xff] %v7734_v12  ;;  %v7745_v4 = vmul.f32 %v11313_v7, %v11307_v11  ;;  %v11315_v47 = vld [vmem:[#allocation98_spill] sm:$0xff]  ;;  %v7761_v11 = vpop.eup %4635  ;;  %v11321_v7 = vsub.f32 0.0, %v7712_v0  ;;  %v10467_v35 = vsub.f32 0.0, %v7741_v8  ;;  %v7782_v0 = vsub.f32 %v4934_v10, %v585_v34 }
 0x22e   : > { %11304 = vst [vmem:[#allocation75_spill] sm:$0xff] %v7726_v52  ;;  %v7749_v22 = vmul.f32 %v11316_v62, %v11315_v47  ;;  %v7759_v46 = vmul.f32 %v11318_v58, %v11315_v47  ;;  %v11320_v62 = vsub.f32 0.0, %v7687_v40  ;;  %v2052_v27 = vadd.f32 %v7730_v38, %v7719_v59  ;;  %v11322_v58 = vld [vmem:[#allocation102_spill] sm:$0xff] }
 0x22f   : > { %11306 = vst [vmem:[#allocation94_spill] sm:$0xff] %v7730_v38  ;;  %v2053_v47 = vadd.f32 %v7745_v4, %v7734_v12  ;;  %v7775_v25 = vmul.f32 %v7259_v17, %v11322_v58  ;;  %v7779_v31 = vmul.f32 %v11324_v36, %v11322_v58  ;;  %v7791_v12 = vsub.f32 %v4942_v13, %v585_v34  ;;  %v2521_v36 = vld [vmem:[%s6867_s9 + $0x18] sm:$0xff]  ;;  %v7797_v58 = vpop.eup %4637 }
 0x230   : > { %11310 = vst [vmem:[#allocation95_spill] sm:$0xff] %v7736_v23  ;;  %v2174_v18 = vsub.f32 %v11321_v7, %v11320_v62  ;;  %v11327_v62 = vsub.f32 0.0, %v7726_v52  ;;  %v2050_v40 = vadd.f32 %v7759_v46, %v7749_v22  ;;  %v7794_v17 = vadd.f32 %v585_v34, %v4934_v10  ;;  %4344 = vmatmul.msk.f32.vlgmr.msrb.gmra.mxu2 %vm2654_vm0, %v2521_v36  ;;  %v7819_v38 = vpop.eup %4639  ;;  %v11358_v23 = vld [vmem:[#allocation48_spill] sm:$0xff] }
 0x231   : > { %11312 = vst [vmem:[#allocation76_spill] sm:$0xff] %v7741_v8  ;;  %v823_v8 = vmul.f32 %v7791_v12, %v7791_v12  ;;  %4345 = vmatmul.msk.f32.vlgmr.msrb.gmra.mxu3 %vm2654_vm0, %v2521_v36 }
 0x232   : > { %11314 = vst [vmem:[#allocation176_spill] sm:$0xff] %v7745_v4  ;;  %2884 = vmatpush.msra.mxu2 %v2174_v18  ;;  %v2175_v7 = vsub.f32 %v10467_v35, %v11327_v62  ;;  %v11330_v4 = vld [vmem:[#allocation9_spill] sm:$0xff]  ;;  %v7803_v18 = vsub.f32 %v4911_v63, %v396_v15  ;;  %v822_v62 = vmul.f32 %v7782_v0, %v7782_v0 }
 0x233   : > { %11317 = vst [vmem:[#allocation103_spill] sm:$0xff] %v7749_v22  ;;  %v7800_v59 = vsub.f32 %v11330_v4, %v396_v15  ;;  %v7808_v35 = vadd.f32 %v585_v34, %v4942_v13  ;;  %v1462_v52 = vmul.f32 %v7794_v17, %v7794_v17  ;;  %v7816_v22 = vsub.f32 %v11330_v4, %v421_v55  ;;  %v11335_v15 = vld [vmem:[#allocation90_spill] sm:$0xff] }
 0x234   : > { %11319 = vst [vmem:[#allocation112_spill] sm:$0xff] %v7759_v46  ;;  %2904 = vmatpush.msra.mxu3 %v2175_v7  ;;  %2885 = vmatpush.msra.mxu2 %v2052_v27  ;;  %v1082_v46 = vsub.f32 2.0, %v11335_v15  ;;  %v7827_v27 = vsub.f32 %v4911_v63, %v421_v55  ;;  %v11341_v15 = vld [vmem:[#allocation195_spill] sm:$0xff] }
 0x235   : > { %11323 = vst [vmem:[#allocation98_spill] sm:$0xff] %v7775_v25  ;;  %v1463_v7 = vmul.f32 %v7808_v35, %v7808_v35  ;;  %v7839_v6 = vadd.f32 %v823_v8, %v11341_v15  ;;  %v784_v55 = vmul.f32 %v7816_v22, %v7816_v22 }
 0x236   : > { %11325 = vst [vmem:[#allocation180_spill] sm:$0xff] %v7779_v31  ;;  %2905 = vmatpush.msra.mxu3 %v2053_v47  ;;  %2886 = vmatpush.msra.mxu2 %v2050_v40  ;;  %v785_v36 = vmul.f32 %v7827_v27, %v7827_v27  ;;  %v11345_v47 = vld [vmem:[#allocation215_spill] sm:$0xff] }
 0x237   : > { %11326 = vst [vmem:[#allocation181_spill] sm:$0xff] %v7782_v0  ;;  %v11336_v0 = vld [vmem:[#allocation194_spill] sm:$0xff]  ;;  %v7856_v8 = vadd.f32 %v1463_v7, %v11341_v15  ;;  %v411_v7 = vpop.permute.xlu0 %410  ;;  %v11351_v15 = vld [vmem:[#allocation184_spill] sm:$0xff] }
 0x238   : > { %11328 = vst [vmem:[#allocation102_spill] sm:$0xff] %v7791_v12  ;;  %v7822_v34 = vadd.f32 %v822_v62, %v11336_v0  ;;  %v11339_v12 = vld [vmem:[#allocation121_spill] sm:$0xff]  ;;  %v2051_v62 = vadd.f32 %v7779_v31, %v7775_v25  ;;  %v1083_v25 = vsub.f32 2.0, %v11345_v47  ;;  %v11346_v31 = vld [vmem:[#allocation204_spill] sm:$0xff] }
 0x239   : > { %11329 = vst [vmem:[#allocation212_spill] sm:$0xff] %v7794_v17  ;;  %v7831_v41 = vmul.f32 %v7401_v14, %v11339_v12  ;;  %v7834_v17 = vpop.eup %4641  ;;  %v7845_v14 = vadd.f32 %v1462_v52, %v11336_v0  ;;  %v7851_v40 = vmul.f32 %v7411_v49, %v11339_v12  ;;  %v416_v52 = vpop.permute.xlu1 %415  ;;  %v11350_v12 = vld [vmem:[#allocation210_spill] sm:$0xff] }
 0x23a   : > { %11331 = vst [vmem:[#allocation9_spill] sm:$0xff] %v7800_v59  ;;  %2906 = vmatpush.msra.mxu3 %v2051_v62  ;;  %4643 = vrcp.f32 %v7822_v34  ;;  %v7868_v47 = vadd.f32 %v11350_v12, %v784_v55 }
 0x23b   : > { %11332 = vst [vmem:[#allocation236_spill] sm:$0xff] %v7803_v18  ;;  %4645 = vrcp.f32 %v7839_v6  ;;  %v2048_v62 = vadd.f32 %v7851_v40, %v7831_v41 }
 0x23c   : > { %11333 = vst [vmem:[#allocation237_spill] sm:$0xff] %v7808_v35  ;;  %v11343_v35 = vld [vmem:[#allocation216_spill] sm:$0xff] }
 0x23d   : > { %11334 = vst [vmem:[#allocation238_spill] sm:$0xff] %v7816_v22  ;;  %v1722_v51 = vsub.f32 2.0, %v11343_v35  ;;  %v912_v35 = vadd.f32 %v11346_v31, %v784_v55  ;;  %v11347_v22 = vld [vmem:[#allocation123_spill] sm:$0xff]  ;;  %2887 = vmatpush.msra.mxu2 %v2048_v62 }
 0x23e   : > { %11337 = vst [vmem:[#allocation90_spill] sm:$0xff] %v7822_v34  ;;  %v7861_v0 = vmul.f32 %v7427_v45, %v11347_v22  ;;  %v7873_v34 = vadd.f32 %v11351_v15, %v785_v36  ;;  %v7877_v45 = vmul.f32 %v7431_v30, %v11347_v22  ;;  %v11353_v31 = vld [vmem:[#allocation179_spill] sm:$0xff]  ;;  %v7914_v15 = vmul.f32 %v7690_v57, %v11358_v23 }
 0x23f   : > { %11338 = vst [vmem:[#allocation194_spill] sm:$0xff] %v7827_v27  ;;  %v11349_v27 = vld [vmem:[#allocation206_spill] sm:$0xff]  ;;  %v7880_v16 = vmul.f32 %v11353_v31, %v1082_v46  ;;  %4647 = vrcp.f32 %v912_v35  ;;  %v11355_v55 = vld [vmem:[#allocation43_spill] sm:$0xff] }
 0x240   : > { %11340 = vst [vmem:[#allocation121_spill] sm:$0xff] %v7831_v41  ;;  %v7865_v49 = vadd.f32 %v11349_v27, %v785_v36  ;;  %v7886_v12 = vmul.f32 %v11355_v55, %v1083_v25  ;;  %v11357_v41 = vld [vmem:[#allocation218_spill] sm:$0xff]  ;;  %v7891_v36 = vmul.f32 %v7670_v29, %v11358_v23  ;;  %v2049_v30 = vadd.f32 %v7877_v45, %v7861_v0  ;;  %v11360_v46 = vld [vmem:[#allocation59_spill] sm:$0xff]  ;;  %v11366_v29 = vld [vmem:[#allocation60_spill] sm:$0xff]  ;;  %v7916_v31 = vpop.eup %4643 }
 0x241   : > { %11342 = vst [vmem:[#allocation195_spill] sm:$0xff] %v7839_v6  ;;  %v11354_v6 = vld [vmem:[#allocation92_spill] sm:$0xff]  ;;  %v11364_v25 = vld [vmem:[#allocation78_spill] sm:$0xff] }
 0x242   : > { %11344 = vst [vmem:[#allocation216_spill] sm:$0xff] %v7851_v40  ;;  %v7883_v27 = vmul.f32 %v11354_v6, %v1722_v51  ;;  %v1723_v40 = vsub.f32 2.0, %v11357_v41  ;;  %4649 = vrcp.f32 %v7865_v49  ;;  %v7898_v6 = vmul.f32 %v7880_v16, %v11360_v46  ;;  %v11362_v51 = vld [vmem:[#allocation91_spill] sm:$0xff]  ;;  %2907 = vmatpush.msra.mxu3 %v2049_v30 }
 0x243   : > { %11348 = vst [vmem:[#allocation215_spill] sm:$0xff] %v7861_v0  ;;  %4651 = vrcp.f32 %v7868_v47  ;;  %v7907_v41 = vmul.f32 %v7886_v12, %v11364_v25  ;;  %v7925_v0 = vpop.eup %4645  ;;  %v2046_v23 = vadd.f32 %v7914_v15, %v7891_v36 }
 0x244   : > { %11352 = vst [vmem:[#allocation204_spill] sm:$0xff] %v7877_v45  ;;  %v7902_v22 = vmul.f32 %v7883_v27, %v11362_v51  ;;  %v7910_v62 = vmul.f32 %v11366_v29, %v1723_v40  ;;  %4653 = vrcp.f32 %v7873_v34  ;;  %v10497_v55 = vsub.f32 0.0, %v7898_v6  ;;  %v11369_v51 = vld [vmem:[#allocation153_spill] sm:$0xff]  ;;  %v11371_v29 = vld [vmem:[#allocation40_spill] sm:$0xff] }
 0x245   : > { %11356 = vst [vmem:[#allocation123_spill] sm:$0xff] %v7886_v12  ;;  %v7923_v25 = vmul.f32 %v7697_v33, %v11369_v51  ;;  %v7936_v30 = vmul.f32 %v7715_v53, %v11369_v51  ;;  %v7943_v45 = vsub.f32 %v11330_v4, %v416_v52  ;;  %v7946_v40 = vsub.f32 %v4911_v63, %v416_v52 }
 0x246   : > { %11359 = vst [vmem:[#allocation206_spill] sm:$0xff] %v7891_v36  ;;  %v10496_v46 = vsub.f32 0.0, %v7902_v22  ;;  %v7930_v57 = vmul.f32 %v7910_v62, %v11371_v29  ;;  %v7949_v29 = vsub.f32 %v11330_v4, %v411_v7  ;;  %2888 = vmatpush.msra.mxu2 %v2046_v23  ;;  %v7957_v51 = vsub.f32 %v4911_v63, %v411_v7  ;;  %v406_v36 = vpop.permute.xlu1 %405 }
 0x247   : > { %11361 = vst [vmem:[#allocation210_spill] sm:$0xff] %v7898_v6  ;;  %v2047_v53 = vadd.f32 %v7936_v30, %v7923_v25  ;;  %v7967_v6 = vmul.f32 %v7800_v59, %v7800_v59  ;;  %v7971_v23 = vmul.f32 %v7803_v18, %v7803_v18  ;;  %4655 = vrcp.f32 %v7845_v14  ;;  %v11384_v59 = vld [vmem:[#allocation213_spill] sm:$0xff] }
 0x248   : > { %11363 = vst [vmem:[#allocation184_spill] sm:$0xff] %v7902_v22  ;;  %v2170_v33 = vsub.f32 %v10496_v46, %v10497_v55  ;;  %v11378_v46 = vsub.f32 0.0, %v7471_v28  ;;  %v11379_v55 = vsub.f32 0.0, %v7489_v48  ;;  %v780_v7 = vmul.f32 %v7949_v29, %v7949_v29 }
 0x249   : > { %11365 = vst [vmem:[#allocation179_spill] sm:$0xff] %v7907_v41  ;;  %4657 = vrcp.f32 %v7856_v8  ;;  %v11383_v48 = vsub.f32 0.0, %v7930_v57  ;;  %2908 = vmatpush.msra.mxu3 %v2047_v53  ;;  %v782_v18 = vmul.f32 %v7943_v45, %v7943_v45  ;;  %v783_v53 = vmul.f32 %v7946_v40, %v7946_v40 }
 0x24a   : > { %11367 = vst [vmem:[#allocation92_spill] sm:$0xff] %v7910_v62  ;;  %v7951_v62 = vpop.eup %4647  ;;  %v2196_v52 = vsub.f32 %v11379_v55, %v11378_v46  ;;  %2839 = vmatpush.msra.mxu0 %v2170_v33  ;;  %v11382_v46 = vsub.f32 0.0, %v7907_v41  ;;  %v781_v33 = vmul.f32 %v7957_v51, %v7957_v51  ;;  %v11386_v41 = vsub.f32 0.0, %v7485_v2 }
 0x24b   : > { %11368 = vst [vmem:[#allocation43_spill] sm:$0xff] %v7914_v15  ;;  %v7963_v22 = vpop.eup %4649  ;;  %v7980_v55 = vmul.f32 %v7951_v62, %v912_v35  ;;  %v11385_v35 = vld [vmem:[#allocation221_spill] sm:$0xff] }
 0x24c   : > { %11370 = vst [vmem:[#allocation218_spill] sm:$0xff] %v7923_v25  ;;  %v7976_v28 = vpop.eup %4651  ;;  %v2171_v25 = vsub.f32 %v11383_v48, %v11382_v46  ;;  %2967 = vmatpush.msrb.mxu2 %v2196_v52  ;;  %v11388_v52 = vld [vmem:[#allocation217_spill] sm:$0xff] }
 0x24d   : > { %11372 = vst [vmem:[#allocation48_spill] sm:$0xff] %v7930_v57  ;;  %v7988_v15 = vpop.eup %4653  ;;  %v11387_v57 = vsub.f32 0.0, %v7525_v44  ;;  %v909_v46 = vadd.f32 %v11388_v52, %v781_v33 }
 0x24e   : > { %11373 = vst [vmem:[#allocation59_spill] sm:$0xff] %v7936_v30  ;;  %v645_v30 = vpop.permute.xlu0 %644  ;;  %2859 = vmatpush.msra.mxu1 %v2171_v25  ;;  %v8016_v25 = vmul.f32 %v7963_v22, %v7865_v49 }
 0x24f   : > { %11374 = vst [vmem:[#allocation91_spill] sm:$0xff] %v7943_v45  ;;  %v2197_v48 = vsub.f32 %v11387_v57, %v11386_v41  ;;  %v8012_v41 = vsub.f32 %v4942_v13, %v645_v30  ;;  %v8021_v57 = vadd.f32 %v645_v30, %v4934_v10 }
 0x250   : > { %11375 = vst [vmem:[#allocation78_spill] sm:$0xff] %v7946_v40 }
 0x251   : > { %11376 = vst [vmem:[#allocation60_spill] sm:$0xff] %v7949_v29  ;;  %v908_v29 = vadd.f32 %v11384_v59, %v780_v7  ;;  %2987 = vmatpush.msrb.mxu3 %v2197_v48  ;;  %v8006_v59 = vsub.f32 %v4911_v63, %v406_v36  ;;  %v8030_v48 = vadd.f32 %v645_v30, %v4942_v13 }
 0x252   : > { %11377 = vst [vmem:[#allocation153_spill] sm:$0xff] %v7957_v51  ;;  %v1549_v51 = vadd.f32 %v7501_v32, %v781_v33  ;;  %v8023_v33 = vpop.eup %4655  ;;  %v847_v44 = vmul.f32 %v8012_v41, %v8012_v41  ;;  %v1486_v2 = vmul.f32 %v8021_v57, %v8021_v57 }
 0x253   : > { %11380 = vst [vmem:[#allocation40_spill] sm:$0xff] %v7967_v6  ;;  %v8003_v6 = vsub.f32 %v11330_v4, %v406_v36  ;;  %4659 = vrcp.f32 %v908_v29  ;;  %v779_v36 = vmul.f32 %v8006_v59, %v8006_v59  ;;  %v8032_v49 = vpop.eup %4657 }
 0x254   : > { %11381 = vst [vmem:[#allocation239_spill] sm:$0xff] %v7971_v23  ;;  %v1548_v23 = vadd.f32 %v11385_v35, %v780_v7  ;;  %v8009_v7 = vsub.f32 %v4934_v10, %v645_v30  ;;  %4661 = vrcp.f32 %v909_v46 }
 0x255   : > { %11389 = vst [vmem:[#allocation213_spill] sm:$0xff] %v8003_v6  ;;  %v778_v32 = vmul.f32 %v8003_v6, %v8003_v6  ;;  %v8045_v6 = vmul.f32 %v7988_v15, %v7873_v34  ;;  %v907_v30 = vadd.f32 %v7615_v24, %v779_v36  ;;  %v1487_v34 = vmul.f32 %v8030_v48, %v8030_v48 }
 0x256   : > { %11390 = vst [vmem:[#allocation221_spill] sm:$0xff] %v8006_v59  ;;  %4663 = vrcp.f32 %v1548_v23  ;;  %v846_v35 = vmul.f32 %v8009_v7, %v8009_v7  ;;  %v8041_v59 = vmul.f32 %v7976_v28, %v7868_v47  ;;  %v1656_v24 = vmul.f32 %v7819_v38, %v7677_v50 }
 0x257   : > { %11391 = vst [vmem:[#allocation217_spill] sm:$0xff] %v8009_v7  ;;  %4665 = vrcp.f32 %v1549_v51  ;;  %v906_v52 = vadd.f32 %v7560_v21, %v778_v32  ;;  %v8049_v40 = vadd.f32 %v7645_v20, %v778_v32  ;;  %v8052_v21 = vadd.f32 %v7753_v26, %v779_v36 }
 0x258   : > { %11392 = vst [vmem:[#allocation240_spill] sm:$0xff] %v8012_v41  ;;  %v8054_v45 = vadd.f32 %v846_v35, %v782_v18  ;;  %v1016_v41 = vmul.f32 %v7761_v11, %v7649_v61  ;;  %v1017_v20 = vmul.f32 %v7797_v58, %v7674_v42  ;;  %v8071_v36 = vadd.f32 %v847_v44, %v783_v53 }
 0x259   : > { %11393 = vst [vmem:[#allocation241_spill] sm:$0xff] %v8021_v57  ;;  %4667 = vrcp.f32 %v906_v52  ;;  %v8058_v47 = vpop.eup %4659  ;;  %v8073_v61 = vadd.f32 %v1486_v2, %v782_v18  ;;  %v1720_v50 = vsub.f32 2.0, %v1656_v24  ;;  %v1657_v2 = vmul.f32 %v7834_v17, %v7694_v56 }
 0x25a   : > { %11394 = vst [vmem:[#allocation242_spill] sm:$0xff] %v8030_v48  ;;  %4669 = vrcp.f32 %v907_v30  ;;  %v8066_v32 = vpop.eup %4661  ;;  %v8069_v26 = vmul.f32 %v8058_v47, %v908_v29  ;;  %v1080_v35 = vsub.f32 2.0, %v1016_v41  ;;  %v1081_v7 = vsub.f32 2.0, %v1017_v20 }
 0x25b   : > { %11395 = vst [vmem:[#allocation243_spill] sm:$0xff] %v8054_v45  ;;  %v8078_v48 = vmul.f32 %v8066_v32, %v909_v46  ;;  %4671 = vrcp.f32 %v8049_v40  ;;  %v8096_v29 = vadd.f32 %v1487_v34, %v783_v53  ;;  %v8099_v46 = vmul.f32 %v7819_v38, %v1720_v50  ;;  %v630_v53 = vpop.permute.xlu1 %629 }
 0x25c   : > { %11396 = vst [vmem:[#allocation244_spill] sm:$0xff] %v8071_v36  ;;  %v8075_v57 = vpop.eup %4663  ;;  %4673 = vrcp.f32 %v8052_v21  ;;  %v8088_v44 = vmul.f32 %v7761_v11, %v1080_v35  ;;  %v8110_v56 = vmul.f32 %v7797_v58, %v1081_v7  ;;  %v1721_v7 = vsub.f32 2.0, %v1657_v2  ;;  %v11405_v2 = vld [vmem:[#allocation190_spill] sm:$0xff] }
 0x25d   : > { %11397 = vst [vmem:[#allocation245_spill] sm:$0xff] %v8073_v61  ;;  %v8081_v42 = vpop.eup %4665  ;;  %v8084_v12 = vmul.f32 %v8075_v57, %v1548_v23  ;;  %4675 = vrcp.f32 %v8054_v45  ;;  %v8119_v34 = vmul.f32 %v8099_v46, %v7623_v19  ;;  %v1042_v19 = vmul.f32 %v7682_v39, %v7592_v60 }
 0x25e   : > { %v8093_v18 = vmul.f32 %v8081_v42, %v1549_v51  ;;  %4677 = vrcp.f32 %v8071_v36  ;;  %v8107_v11 = vmul.f32 %v8088_v44, %v7608_v9  ;;  %v8125_v58 = vmul.f32 %v8110_v56, %v7611_v1 }
 0x25f   : > { %v8101_v23 = vpop.eup %4667  ;;  %4679 = vrcp.f32 %v8073_v61  ;;  %11400 = vst [vmem:[#allocation248_spill] sm:$0xff] %v8119_v34  ;;  %v1682_v24 = vmul.f32 %v7721_v5, %v7618_v37  ;;  %v8144_v41 = vmul.f32 %v7834_v17, %v1721_v7  ;;  %v11402_v37 = vsub.f32 0.0, %v8119_v34 }
 0x260   : > { %11398 = vst [vmem:[#allocation246_spill] sm:$0xff] %v8107_v11  ;;  %v8112_v51 = vpop.eup %4669  ;;  %v10538_v9 = vsub.f32 0.0, %v8107_v11  ;;  %v8130_v35 = vmul.f32 %v8101_v23, %v906_v52  ;;  %v1043_v52 = vmul.f32 %v7707_v3, %v7595_v54  ;;  %v1106_v36 = vsub.f32 2.0, %v1042_v19 }
 0x261   : > { %11399 = vst [vmem:[#allocation247_spill] sm:$0xff] %v8112_v51  ;;  %v8127_v20 = vpop.eup %4671  ;;  %v8140_v1 = vmul.f32 %v8112_v51, %v907_v30  ;;  %v1746_v61 = vsub.f32 2.0, %v1682_v24  ;;  %v11403_v30 = vld [vmem:[#allocation95_spill] sm:$0xff]  ;;  %v8160_v17 = vmul.f32 %v8144_v41, %v11405_v2  ;;  %v8163_v54 = vsub.f32 %v4934_v10, %v630_v53 }
 0x262   : > { %11401 = vst [vmem:[#allocation249_spill] sm:$0xff] %v8125_v58  ;;  %v8137_v38 = vpop.eup %4673  ;;  %v2168_v60 = vsub.f32 %v11402_v37, %v10538_v9  ;;  %v1683_v45 = vmul.f32 %v11403_v30, %v7627_v43  ;;  %v1107_v7 = vsub.f32 2.0, %v1043_v52  ;;  %v8166_v11 = vsub.f32 %v4942_v13, %v630_v53  ;;  %v401_v52 = vpop.permute.xlu0 %400 }
 0x263   : > { %v8148_v50 = vpop.eup %4675  ;;  %11406 = vst [vmem:[#allocation190_spill] sm:$0xff] %v8160_v17  ;;  %v8171_v24 = vmul.f32 %v7682_v39, %v1106_v36  ;;  %v8174_v43 = vmul.f32 %v7721_v5, %v1746_v61  ;;  %v8177_v2 = vadd.f32 %v630_v53, %v4934_v10  ;;  %v8181_v37 = vmul.f32 %v8127_v20, %v8049_v40  ;;  %v11411_v36 = vld [vmem:[#allocation226_spill] sm:$0xff] }
 0x264   : > { %v8156_v51 = vpop.eup %4677  ;;  %11407 = vst [vmem:[#allocation250_spill] sm:$0xff] %v8163_v54  ;;  %2840 = vmatpush.msra.mxu0 %v2168_v60  ;;  %v1747_v19 = vsub.f32 2.0, %v1683_v45  ;;  %v10544_v9 = vsub.f32 0.0, %v8160_v17  ;;  %v840_v39 = vmul.f32 %v8163_v54, %v8163_v54  ;;  %v11413_v45 = vld [vmem:[#allocation231_spill] sm:$0xff]  ;;  %v841_v40 = vmul.f32 %v8166_v11, %v8166_v11 }
 0x265   : > { %11404 = vst [vmem:[#allocation95_spill] sm:$0xff] %v8156_v51  ;;  %v8168_v34 = vpop.eup %4679  ;;  %v8185_v51 = vmul.f32 %v7707_v3, %v1107_v7  ;;  %v8191_v5 = vmul.f32 %v8171_v24, %v11411_v36  ;;  %v8195_v61 = vmul.f32 %v8174_v43, %v11413_v45  ;;  %v11416_v3 = vsub.f32 0.0, %v8125_v58  ;;  %v11417_v54 = vld [vmem:[#allocation227_spill] sm:$0xff] }
 0x266   : > { %11408 = vst [vmem:[#allocation251_spill] sm:$0xff] %v8166_v11  ;;  %v8198_v60 = vmul.f32 %v11403_v30, %v1747_v19  ;;  %v8211_v36 = vadd.f32 %v630_v53, %v4942_v13  ;;  %v8214_v45 = vsub.f32 %v11330_v4, %v401_v52  ;;  %v11421_v11 = vld [vmem:[#allocation232_spill] sm:$0xff]  ;;  %v8226_v53 = vsub.f32 %v4911_v63, %v401_v52 }
 0x267   : > { %11409 = vst [vmem:[#allocation252_spill] sm:$0xff] %v8168_v34  ;;  %v2169_v7 = vsub.f32 %v10544_v9, %v11416_v3  ;;  %v8208_v34 = vmul.f32 %v8185_v51, %v11417_v54  ;;  %v1480_v3 = vmul.f32 %v8177_v2, %v8177_v2  ;;  %v11423_v9 = vld [vmem:[#allocation90_spill] sm:$0xff]  ;;  %v11424_v19 = vsub.f32 0.0, %v8191_v5  ;;  %v11426_v54 = vld [vmem:[#allocation195_spill] sm:$0xff] }
 0x268   : > { %11410 = vst [vmem:[#allocation253_spill] sm:$0xff] %v8177_v2  ;;  %v8220_v58 = vmul.f32 %v8198_v60, %v11421_v11  ;;  %v776_v4 = vmul.f32 %v8214_v45, %v8214_v45  ;;  %v1014_v30 = vmul.f32 %v7916_v31, %v11423_v9  ;;  %v11425_v11 = vsub.f32 0.0, %v8195_v61 }
 0x269   : > { %11412 = vst [vmem:[#allocation226_spill] sm:$0xff] %v8191_v5  ;;  %2860 = vmatpush.msra.mxu1 %v2169_v7  ;;  %v1654_v7 = vmul.f32 %v8023_v33, %v7845_v14  ;;  %v1015_v63 = vmul.f32 %v7925_v0, %v11426_v54  ;;  %v1481_v52 = vmul.f32 %v8211_v36, %v8211_v36 }
 0x26a   : > { %11414 = vst [vmem:[#allocation231_spill] sm:$0xff] %v8195_v61  ;;  %v2194_v17 = vsub.f32 %v11425_v11, %v11424_v19  ;;  %v904_v9 = vadd.f32 %v840_v39, %v776_v4  ;;  %v1078_v2 = vsub.f32 2.0, %v1014_v30  ;;  %v11427_v61 = vsub.f32 0.0, %v8208_v34 }
 0x26b   : > { %11415 = vst [vmem:[#allocation254_spill] sm:$0xff] %v8198_v60  ;;  %v10553_v60 = vsub.f32 0.0, %v8220_v58  ;;  %v1718_v11 = vsub.f32 2.0, %v1654_v7  ;;  %v1079_v14 = vsub.f32 2.0, %v1015_v63  ;;  %v1655_v54 = vmul.f32 %v8032_v49, %v7856_v8 }
 0x26c   : > { %11418 = vst [vmem:[#allocation227_spill] sm:$0xff] %v8208_v34  ;;  %2968 = vmatpush.msrb.mxu2 %v2194_v17  ;;  %v8253_v5 = vmul.f32 %v8137_v38, %v8052_v21  ;;  %v8257_v39 = vadd.f32 %v1480_v3, %v776_v4  ;;  %v8260_v17 = vmul.f32 %v7916_v31, %v1078_v2  ;;  %4681 = vrcp.f32 %v904_v9  ;;  %v11428_v21 = vld [vmem:[#allocation181_spill] sm:$0xff]  ;;  %v8277_v2 = vld [vmem:[%s6867_s9 + $0x10] sm:$0xff] }
 0x26d   : > { %11419 = vst [vmem:[#allocation255_spill] sm:$0xff] %v8211_v36  ;;  %v2195_v19 = vsub.f32 %v10553_v60, %v11427_v61  ;;  %v8263_v61 = vmul.f32 %v8023_v33, %v1718_v11  ;;  %v8266_v30 = vmul.f32 %v7925_v0, %v1079_v14  ;;  %v1719_v8 = vsub.f32 2.0, %v1655_v54  ;;  %v11431_v33 = vld [vmem:[#allocation212_spill] sm:$0xff]  ;;  %v11433_v0 = vld [vmem:[#allocation102_spill] sm:$0xff]  ;;  %4342 = vmatmul.msk.f32.vlgmr.msrb.gmra.mxu0 %vm2654_vm0, %v8277_v2  ;;  %v11435_v14 = vld [vmem:[#allocation237_spill] sm:$0xff] }
 0x26e   : > { %11420 = vst [vmem:[#allocation256_spill] sm:$0xff] %v8214_v45  ;;  %v777_v45 = vmul.f32 %v8226_v53, %v8226_v53  ;;  %v1104_v3 = vsub.f32 2.0, %v7980_v55  ;;  %v1744_v31 = vsub.f32 2.0, %v8041_v59  ;;  %4683 = vrcp.f32 %v8096_v29  ;;  %4343 = vmatmul.msk.f32.vlgmr.msrb.gmra.mxu1 %vm2654_vm0, %v8277_v2 }
 0x26f   : > { %11422 = vst [vmem:[#allocation232_spill] sm:$0xff] %v8220_v58  ;;  %2988 = vmatpush.msrb.mxu3 %v2195_v19  ;;  %v8282_v4 = vmul.f32 %v8263_v61, %v11431_v33  ;;  %v8289_v63 = vmul.f32 %v8032_v49, %v1719_v8  ;;  %v1105_v19 = vsub.f32 2.0, %v8016_v25  ;;  %v1745_v8 = vsub.f32 2.0, %v8045_v6 }
 0x270   : > { %v8255_v36 = vadd.f32 %v841_v40, %v777_v45  ;;  %v8268_v7 = vadd.f32 %v1481_v52, %v777_v45  ;;  %v8272_v40 = vmul.f32 %v8260_v17, %v11428_v21  ;;  %11430 = vst [vmem:[#allocation195_spill] sm:$0xff] %v8277_v2  ;;  %v8286_v45 = vmul.f32 %v8266_v30, %v11433_v0  ;;  %v11437_v21 = vld [vmem:[#allocation200_spill] sm:$0xff] }
 0x271   : > { %11432 = vst [vmem:[#allocation181_spill] sm:$0xff] %v8282_v4  ;;  %v8297_v59 = vmul.f32 %v7951_v62, %v1104_v3  ;;  %v8300_v52 = vmul.f32 %v7976_v28, %v1744_v31  ;;  %v10554_v11 = vsub.f32 0.0, %v8282_v4  ;;  %v8307_v54 = vmul.f32 %v8289_v63, %v11435_v14  ;;  %v11439_v28 = vld [vmem:[#allocation202_spill] sm:$0xff]  ;;  %v11441_v14 = vld [vmem:[#allocation143_spill] sm:$0xff] }
 0x272   : > { %11429 = vst [vmem:[#allocation90_spill] sm:$0xff] %v8272_v40  ;;  %v10555_v55 = vsub.f32 0.0, %v8272_v40  ;;  %4685 = vrcp.f32 %v8257_v39  ;;  %v8320_v25 = vmul.f32 %v7963_v22, %v1105_v19  ;;  %v8322_v31 = vpop.eup %4681  ;;  %v8330_v0 = vmul.f32 %v7988_v15, %v1745_v8  ;;  %v11448_v19 = vld [vmem:[#allocation173_spill] sm:$0xff] }
 0x273   : > { %11434 = vst [vmem:[#allocation212_spill] sm:$0xff] %v8286_v45  ;;  %v8313_v62 = vmul.f32 %v8297_v59, %v11437_v21  ;;  %v8317_v3 = vmul.f32 %v8300_v52, %v11439_v28  ;;  %v10560_v33 = vsub.f32 0.0, %v8307_v54  ;;  %v11442_v21 = vld [vmem:[#allocation55_spill] sm:$0xff]  ;;  %4687 = vrcp.f32 %v8255_v36  ;;  %v11443_v28 = vld [vmem:[#allocation201_spill] sm:$0xff] }
 0x274   : > { %11436 = vst [vmem:[#allocation102_spill] sm:$0xff] %v8307_v54  ;;  %v2166_v6 = vsub.f32 %v10554_v11, %v10555_v55  ;;  %v8334_v60 = vmul.f32 %v11442_v21, %v11441_v14  ;;  %v8341_v49 = vmul.f32 %v8320_v25, %v11443_v28  ;;  %v8343_v11 = vpop.eup %4683  ;;  %4689 = vrcp.f32 %v8268_v7  ;;  %v11446_v21 = vld [vmem:[#allocation205_spill] sm:$0xff]  ;;  %v625_v28 = vpop.permute.xlu0 %624  ;;  %v11462_v54 = vld [vmem:[#allocation92_spill] sm:$0xff] }
 0x275   : > { %11438 = vst [vmem:[#allocation237_spill] sm:$0xff] %v8313_v62  ;;  %v11445_v15 = vsub.f32 0.0, %v8286_v45  ;;  %v8352_v55 = vmul.f32 %v8330_v0, %v11446_v21  ;;  %v8356_v22 = vmul.f32 %v11448_v19, %v11441_v14  ;;  %v8359_v4 = vmul.f32 %v8322_v31, %v904_v9  ;;  %v11454_v9 = vld [vmem:[#allocation197_spill] sm:$0xff] }
 0x276   : > { %11440 = vst [vmem:[#allocation200_spill] sm:$0xff] %v8317_v3  ;;  %2841 = vmatpush.msra.mxu0 %v2166_v6  ;;  %v11449_v40 = vsub.f32 0.0, %v8313_v62  ;;  %v11450_v6 = vsub.f32 0.0, %v8317_v3  ;;  %v11456_v62 = vld [vmem:[#allocation208_spill] sm:$0xff] }
 0x277   : > { %11444 = vst [vmem:[#allocation202_spill] sm:$0xff] %v8341_v49  ;;  %v2167_v8 = vsub.f32 %v10560_v33, %v11445_v15  ;;  %v11451_v15 = vld [vmem:[#allocation144_spill] sm:$0xff]  ;;  %v11452_v33 = vld [vmem:[#allocation170_spill] sm:$0xff]  ;;  %v2044_v14 = vadd.f32 %v8356_v22, %v8334_v60  ;;  %v8379_v3 = vmul.f32 %v7880_v16, %v11456_v62  ;;  %v11464_v16 = vsub.f32 0.0, %v8341_v49 }
 0x278   : > { %11447 = vst [vmem:[#allocation143_spill] sm:$0xff] %v8352_v55  ;;  %v2192_v45 = vsub.f32 %v11450_v6, %v11449_v40  ;;  %v8368_v58 = vmul.f32 %v11452_v33, %v11451_v15  ;;  %v8375_v19 = vmul.f32 %v11454_v9, %v11451_v15  ;;  %v8381_v40 = vpop.eup %4685  ;;  %v8385_v33 = vmul.f32 %v7883_v27, %v11456_v62  ;;  %v11460_v6 = vld [vmem:[#allocation123_spill] sm:$0xff] }
 0x279   : > { %2861 = vmatpush.msra.mxu1 %v2167_v8  ;;  %11457 = vst [vmem:[#allocation205_spill] sm:$0xff] %v8379_v3  ;;  %v11459_v8 = vld [vmem:[#allocation209_spill] sm:$0xff]  ;;  %v8396_v15 = vsub.f32 %v4934_v10, %v625_v28  ;;  %v11465_v9 = vsub.f32 0.0, %v8352_v55  ;;  %2842 = vmatpush.msra.mxu0 %v2044_v14  ;;  %v8405_v62 = vsub.f32 %v4942_v13, %v625_v28 }
 0x27a   : > { %11453 = vst [vmem:[#allocation55_spill] sm:$0xff] %v8368_v58  ;;  %2969 = vmatpush.msrb.mxu2 %v2192_v45  ;;  %v8389_v21 = vmul.f32 %v11460_v6, %v11459_v8  ;;  %v8393_v34 = vmul.f32 %v11462_v54, %v11459_v8  ;;  %v2045_v27 = vadd.f32 %v8375_v19, %v8368_v58  ;;  %v8410_v54 = vpop.eup %4687 }
 0x27b   : > { %11455 = vst [vmem:[#allocation201_spill] sm:$0xff] %v8375_v19  ;;  %v2193_v45 = vsub.f32 %v11465_v9, %v11464_v16  ;;  %v8408_v6 = vadd.f32 %v625_v28, %v4934_v10  ;;  %v2042_v8 = vadd.f32 %v8385_v33, %v8379_v3  ;;  %v838_v14 = vmul.f32 %v8396_v15, %v8396_v15  ;;  %v8421_v9 = vpop.eup %4689  ;;  %v11466_v3 = vld [vmem:[#allocation220_spill] sm:$0xff] }
 0x27c   : > { %11458 = vst [vmem:[#allocation173_spill] sm:$0xff] %v8385_v33  ;;  %v2043_v49 = vadd.f32 %v8393_v34, %v8389_v21  ;;  %v8419_v16 = vadd.f32 %v625_v28, %v4942_v13  ;;  %2862 = vmatpush.msra.mxu1 %v2045_v27  ;;  %v839_v10 = vmul.f32 %v8405_v62, %v8405_v62  ;;  %v11470_v27 = vld [vmem:[#allocation67_spill] sm:$0xff] }
 0x27d   : > { %11461 = vst [vmem:[#allocation144_spill] sm:$0xff] %v8389_v21  ;;  %2989 = vmatpush.msrb.mxu3 %v2193_v45  ;;  %v1478_v55 = vmul.f32 %v8408_v6, %v8408_v6  ;;  %v8429_v33 = vmul.f32 %v8088_v44, %v11466_v3  ;;  %v1098_v21 = vsub.f32 2.0, %v8130_v35  ;;  %2843 = vmatpush.msra.mxu0 %v2042_v8  ;;  %v11472_v44 = vld [vmem:[#allocation239_spill] sm:$0xff] }
 0x27e   : > { %11463 = vst [vmem:[#allocation170_spill] sm:$0xff] %v8393_v34  ;;  %v11468_v34 = vld [vmem:[#allocation40_spill] sm:$0xff]  ;;  %v1479_v28 = vmul.f32 %v8419_v16, %v8419_v16  ;;  %v8437_v45 = vmul.f32 %v8099_v46, %v11466_v3  ;;  %v8441_v58 = vmul.f32 %v8110_v56, %v11470_v27  ;;  %2863 = vmatpush.msra.mxu1 %v2043_v49  ;;  %v8471_v3 = vld [vmem:[%s6867_s9 + $0x28] sm:$0xff] }
 0x27f   : > { %11467 = vst [vmem:[#allocation197_spill] sm:$0xff] %v8429_v33  ;;  %v902_v13 = vadd.f32 %v838_v14, %v11468_v34  ;;  %v903_v19 = vadd.f32 %v839_v10, %v11472_v44  ;;  %v1542_v35 = vadd.f32 %v1478_v55, %v11468_v34  ;;  %v8447_v8 = vmul.f32 %v8144_v41, %v11470_v27  ;;  %v11474_v14 = vld [vmem:[#allocation38_spill] sm:$0xff]  ;;  %v11477_v41 = vld [vmem:[#allocation149_spill] sm:$0xff] }
 0x280   : > { %11469 = vst [vmem:[#allocation208_spill] sm:$0xff] %v8437_v45  ;;  %v8451_v2 = vmul.f32 %v8260_v17, %v11474_v14  ;;  %v1543_v46 = vadd.f32 %v1479_v28, %v11472_v44  ;;  %v2040_v56 = vadd.f32 %v8437_v45, %v8429_v33  ;;  %v8458_v49 = vmul.f32 %v8263_v61, %v11474_v14 }
 0x281   : > { %11471 = vst [vmem:[#allocation209_spill] sm:$0xff] %v8441_v58  ;;  %4691 = vrcp.f32 %v902_v13  ;;  %v2041_v34 = vadd.f32 %v8447_v8, %v8441_v58  ;;  %v8464_v55 = vmul.f32 %v8266_v30, %v11477_v41  ;;  %v8468_v17 = vmul.f32 %v8289_v63, %v11477_v41  ;;  %4348 = vmatmul.msk.f32.vlgmr.msra.gmra.mxu2 %vm2654_vm0, %v8471_v3  ;;  %v11490_v41 = vld [vmem:[#allocation219_spill] sm:$0xff] }
 0x282   : > { %11473 = vst [vmem:[#allocation123_spill] sm:$0xff] %v8447_v8  ;;  %4693 = vrcp.f32 %v903_v19  ;;  %2844 = vmatpush.msra.mxu0 %v2040_v56  ;;  %v2038_v61 = vadd.f32 %v8458_v49, %v8451_v2  ;;  %v11480_v10 = vsub.f32 2.0, %v8069_v26  ;;  %v11481_v27 = vsub.f32 2.0, %v8084_v12  ;;  %4349 = vmatmul.msk.f32.vlgmr.msra.gmra.mxu3 %vm2654_vm0, %v8471_v3  ;;  %v11486_v56 = vld [vmem:[#allocation214_spill] sm:$0xff] }
 0x283   : > { %11475 = vst [vmem:[#allocation92_spill] sm:$0xff] %v8451_v2  ;;  %4695 = vrcp.f32 %v1542_v35  ;;  %2864 = vmatpush.msra.mxu1 %v2041_v34  ;;  %v2039_v63 = vadd.f32 %v8468_v17, %v8464_v55  ;;  %v11482_v44 = vsub.f32 2.0, %v8078_v48  ;;  %v8510_v48 = vmul.f32 %v8101_v23, %v1098_v21  ;;  %v11492_v21 = vld [vmem:[#allocation225_spill] sm:$0xff] }
 0x284   : > { %11476 = vst [vmem:[#allocation220_spill] sm:$0xff] %v8458_v49  ;;  %v8478_v28 = vmul.f32 %v8058_v47, %v11480_v10  ;;  %v8483_v30 = vmul.f32 %v8075_v57, %v11481_v27  ;;  %4697 = vrcp.f32 %v1543_v46  ;;  %v11483_v47 = vsub.f32 2.0, %v8093_v18  ;;  %2845 = vmatpush.msra.mxu0 %v2038_v61  ;;  %v11484_v57 = vld [vmem:[#allocation41_spill] sm:$0xff] }
 0x285   : > { %11478 = vst [vmem:[#allocation40_spill] sm:$0xff] %v8464_v55  ;;  %v8492_v26 = vmul.f32 %v8066_v32, %v11482_v44  ;;  %v1738_v32 = vsub.f32 2.0, %v8181_v37  ;;  %2865 = vmatpush.msra.mxu1 %v2039_v63  ;;  %v1099_v10 = vsub.f32 2.0, %v8140_v1  ;;  %v1739_v27 = vsub.f32 2.0, %v8253_v5 }
 0x286   : > { %11479 = vst [vmem:[#allocation67_spill] sm:$0xff] %v8468_v17  ;;  %v8497_v12 = vmul.f32 %v8081_v42, %v11483_v47  ;;  %v8503_v14 = vmul.f32 %v8478_v28, %v11484_v57  ;;  %v8507_v34 = vmul.f32 %v8483_v30, %v11486_v56  ;;  %v11488_v42 = vld [vmem:[#allocation88_spill] sm:$0xff]  ;;  %v8527_v37 = vmul.f32 %v8510_v48, %v11492_v21 }
 0x287   : > { %v8515_v18 = vmul.f32 %v8492_v26, %v11488_v42  ;;  %v4692_v44 = vpop.eup %4691  ;;  %v8530_v63 = vmul.f32 %v8127_v20, %v1738_v32  ;;  %v11497_v20 = vld [vmem:[#allocation229_spill] sm:$0xff] }
 0x288   : > { %11485 = vst [vmem:[#allocation239_spill] sm:$0xff] %v8503_v14  ;;  %v8519_v61 = vmul.f32 %v8497_v12, %v11490_v41  ;;  %v4694_v57 = vpop.eup %4693  ;;  %v1030_v56 = vmul.f32 %v4692_v44, %v902_v13  ;;  %v11494_v41 = vld [vmem:[#allocation247_spill] sm:$0xff]  ;;  %v11495_v23 = vsub.f32 0.0, %v8503_v14  ;;  %v11496_v17 = vsub.f32 0.0, %v8507_v34 }
 0x289   : > { %11487 = vst [vmem:[#allocation38_spill] sm:$0xff] %v8507_v34  ;;  %v8535_v5 = vmul.f32 %v11494_v41, %v1099_v10  ;;  %v4696_v55 = vpop.eup %4695  ;;  %v1031_v47 = vmul.f32 %v4694_v57, %v903_v19  ;;  %v8544_v32 = vmul.f32 %v8530_v63, %v11497_v20  ;;  %v11499_v1 = vsub.f32 0.0, %v8515_v18  ;;  %v11501_v19 = vld [vmem:[#allocation228_spill] sm:$0xff] }
 0x28a   : > { %11489 = vst [vmem:[#allocation149_spill] sm:$0xff] %v8515_v18  ;;  %v2188_v21 = vsub.f32 %v11496_v17, %v11495_v23  ;;  %v4698_v13 = vpop.eup %4697  ;;  %v1094_v42 = vsub.f32 2.0, %v1030_v56  ;;  %v1670_v49 = vmul.f32 %v4696_v55, %v1542_v35  ;;  %v11500_v10 = vsub.f32 0.0, %v8519_v61  ;;  %v11528_v18 = vld [vmem:[#allocation194_spill] sm:$0xff] }
 0x28b   : > { %11491 = vst [vmem:[#allocation41_spill] sm:$0xff] %v8519_v61  ;;  %v8552_v14 = vmul.f32 %v8535_v5, %v11501_v19  ;;  %v1095_v34 = vsub.f32 2.0, %v1031_v47  ;;  %v1671_v17 = vmul.f32 %v4698_v13, %v1543_v46  ;;  %v10582_v23 = vsub.f32 0.0, %v8544_v32  ;;  %v11503_v61 = vld [vmem:[#allocation243_spill] sm:$0xff] }
 0x28c   : > { %11493 = vst [vmem:[#allocation214_spill] sm:$0xff] %v8527_v37  ;;  %v2189_v41 = vsub.f32 %v11500_v10, %v11499_v1  ;;  %2924 = vmatpush.msrb.mxu0 %v2188_v21  ;;  %v8556_v20 = vmul.f32 %v8137_v38, %v1739_v27  ;;  %v8558_v2 = vmul.f32 %v4692_v44, %v1094_v42  ;;  %v1734_v35 = vsub.f32 2.0, %v1670_v49  ;;  %v11505_v21 = vld [vmem:[#allocation230_spill] sm:$0xff]  ;;  %v11508_v44 = vld [vmem:[#allocation252_spill] sm:$0xff] }
 0x28d   : > { %11498 = vst [vmem:[#allocation88_spill] sm:$0xff] %v8544_v32  ;;  %v10585_v56 = vsub.f32 0.0, %v8552_v14  ;;  %v1038_v1 = vmul.f32 %v8148_v50, %v11503_v61  ;;  %v8563_v10 = vmul.f32 %v4694_v57, %v1095_v34  ;;  %v1735_v19 = vsub.f32 2.0, %v1671_v17  ;;  %v11507_v34 = vld [vmem:[#allocation245_spill] sm:$0xff]  ;;  %v11514_v32 = vld [vmem:[#allocation30_spill] sm:$0xff] }
 0x28e   : > { %11502 = vst [vmem:[#allocation219_spill] sm:$0xff] %v8552_v14  ;;  %2944 = vmatpush.msrb.mxu1 %v2189_v41  ;;  %v11504_v46 = vsub.f32 0.0, %v8527_v37  ;;  %v8571_v38 = vmul.f32 %v8556_v20, %v11505_v21  ;;  %v1033_v49 = vmul.f32 %v8410_v54, %v8255_v36  ;;  %v1672_v27 = vmul.f32 %v8381_v40, %v8257_v39  ;;  %v11510_v36 = vld [vmem:[#allocation95_spill] sm:$0xff] }
 0x28f   : > { %v1102_v61 = vsub.f32 2.0, %v1038_v1  ;;  %v1678_v57 = vmul.f32 %v11508_v44, %v11507_v34  ;;  %v1673_v42 = vmul.f32 %v8421_v9, %v8268_v7  ;;  %v8583_v41 = vmul.f32 %v8558_v2, %v8396_v15 }
 0x290   : > { %v2186_v47 = vsub.f32 %v10582_v23, %v11504_v46  ;;  %11506 = vst [vmem:[#allocation225_spill] sm:$0xff] %v8571_v38  ;;  %v10584_v17 = vsub.f32 0.0, %v8571_v38  ;;  %v11509_v46 = vld [vmem:[#allocation244_spill] sm:$0xff]  ;;  %v8588_v23 = vmul.f32 %v4696_v55, %v1734_v35  ;;  %v1679_v34 = vmul.f32 %v8343_v11, %v8096_v29  ;;  %v8604_v55 = vld [vmem:[%s6867_s9 + $0x20] sm:$0xff] }
 0x291   : > { %v1039_v21 = vmul.f32 %v11510_v36, %v11509_v46  ;;  %v1166_v39 = vmul.f32 %v8148_v50, %v1102_v61  ;;  %v1742_v1 = vsub.f32 2.0, %v1678_v57  ;;  %v8595_v7 = vmul.f32 %v8563_v10, %v8405_v62  ;;  %11511 = vst [vmem:[#allocation247_spill] sm:$0xff] %v8604_v55  ;;  %v11512_v35 = vld [vmem:[#allocation217_spill] sm:$0xff]  ;;  %v11513_v57 = vld [vmem:[#allocation207_spill] sm:$0xff]  ;;  %4347 = vmatmul.msk.f32.vlgmr.msra.gmra.mxu1 %vm2654_vm0, %v8604_v55 }
 0x292   : > { %2925 = vmatpush.msrb.mxu0 %v2186_v47  ;;  %v8597_v15 = vmul.f32 %v4698_v13, %v1735_v19  ;;  %v2187_v47 = vsub.f32 %v10584_v17, %v10585_v56  ;;  %v1743_v29 = vsub.f32 2.0, %v1679_v34  ;;  %v8612_v62 = vmul.f32 %v11514_v32, %v11513_v57  ;;  %v11515_v19 = vld [vmem:[#allocation82_spill] sm:$0xff]  ;;  %v11518_v32 = vld [vmem:[#allocation16_spill] sm:$0xff]  ;;  %v11519_v56 = vld [vmem:[#allocation241_spill] sm:$0xff] }
 0x293   : > { %v1103_v46 = vsub.f32 2.0, %v1039_v21  ;;  %v8607_v50 = vmul.f32 %v1166_v39, %v11512_v35  ;;  %v1806_v61 = vmul.f32 %v11508_v44, %v1742_v1  ;;  %4346 = vmatmul.msk.f32.vlgmr.msra.gmra.mxu0 %vm2654_vm0, %v8604_v55  ;;  %v8621_v21 = vmul.f32 %v11515_v19, %v11513_v57  ;;  %v11516_v35 = vld [vmem:[#allocation211_spill] sm:$0xff]  ;;  %v11517_v44 = vld [vmem:[#allocation189_spill] sm:$0xff]  ;;  %v11524_v17 = vld [vmem:[#allocation254_spill] sm:$0xff] }
 0x294   : > { %2945 = vmatpush.msrb.mxu1 %v2187_v47  ;;  %v8625_v1 = vmul.f32 %v11517_v44, %v11516_v35  ;;  %v8629_v34 = vmul.f32 %v11518_v32, %v11516_v35  ;;  %v1807_v47 = vmul.f32 %v8343_v11, %v1743_v29  ;;  %v8642_v57 = vmul.f32 %v8588_v23, %v8408_v6  ;;  %v11521_v35 = vld [vmem:[#allocation240_spill] sm:$0xff]  ;;  %v11522_v29 = vld [vmem:[#allocation242_spill] sm:$0xff] }
 0x295   : > { %v1167_v13 = vmul.f32 %v11510_v36, %v1103_v46  ;;  %v8633_v38 = vmul.f32 %v1806_v61, %v11519_v56  ;;  %v11520_v36 = vld [vmem:[#allocation87_spill] sm:$0xff]  ;;  %v8646_v19 = vmul.f32 %v8597_v15, %v8419_v16  ;;  %v11523_v32 = vld [vmem:[#allocation62_spill] sm:$0xff]  ;;  %v2068_v14 = vadd.f32 %v8621_v21, %v8612_v62 }
 0x296   : > { %v8638_v46 = vmul.f32 %v8171_v24, %v11520_v36  ;;  %v8653_v56 = vmul.f32 %v8174_v43, %v11520_v36  ;;  %v8657_v24 = vmul.f32 %v1807_v47, %v11522_v29  ;;  %v8661_v6 = vmul.f32 %v8185_v51, %v11523_v32  ;;  %v11525_v36 = vld [vmem:[#allocation238_spill] sm:$0xff] }
 0x297   : > { %v8649_v44 = vmul.f32 %v1167_v13, %v11521_v35  ;;  %v8665_v16 = vmul.f32 %v11524_v17, %v11523_v32  ;;  %v2069_v43 = vadd.f32 %v8629_v34, %v8625_v1  ;;  %v8674_v29 = vmul.f32 %v8297_v59, %v11525_v36 }
 0x298   : > { %v11526_v11 = vsub.f32 0.0, %v8607_v50  ;;  %v11527_v51 = vsub.f32 0.0, %v8633_v38  ;;  %v10595_v17 = vsub.f32 0.0, %v8657_v24  ;;  %v2066_v32 = vadd.f32 %v8653_v56, %v8638_v46 }
 0x299   : > { %v8685_v35 = vmul.f32 %v8300_v52, %v11525_v36  ;;  %v8689_v55 = vmul.f32 %v8320_v25, %v11528_v18  ;;  %v1096_v59 = vsub.f32 2.0, %v8359_v4  ;;  %v1736_v58 = vsub.f32 2.0, %v1672_v27 }
 0x29a   : > { %v2190_v37 = vsub.f32 %v11527_v51, %v11526_v11  ;;  %v1097_v8 = vsub.f32 2.0, %v1033_v49  ;;  %v11530_v11 = vsub.f32 0.0, %v8649_v44  ;;  %v2067_v33 = vadd.f32 %v8665_v16, %v8661_v6  ;;  %v11531_v49 = vld [vmem:[#allocation91_spill] sm:$0xff] }
 0x29b   : > { %11529 = vst [vmem:[#allocation229_spill] sm:$0xff] %v8689_v55  ;;  %v8700_v52 = vmul.f32 %v8330_v0, %v11528_v18  ;;  %v1737_v36 = vsub.f32 2.0, %v1673_v42  ;;  %v8703_v25 = vmul.f32 %v8322_v31, %v1096_v59  ;;  %v8706_v4 = vmul.f32 %v8381_v40, %v1736_v58  ;;  %v11534_v18 = vld [vmem:[#allocation78_spill] sm:$0xff]  ;;  %v11537_v40 = vld [vmem:[#allocation253_spill] sm:$0xff]  ;;  %v11544_v59 = vld [vmem:[#allocation35_spill] sm:$0xff] }
 0x29c   : > { %2970 = vmatpush.msrb.mxu2 %v2190_v37  ;;  %v2191_v51 = vsub.f32 %v10595_v17, %v11530_v11  ;;  %v8709_v37 = vmul.f32 %v8410_v54, %v1097_v8  ;;  %v8712_v27 = vmul.f32 %v1166_v39, %v11531_v49  ;;  %v8718_v0 = vmul.f32 %v1806_v61, %v11531_v49  ;;  %v11536_v42 = vld [vmem:[#allocation250_spill] sm:$0xff]  ;;  %v11538_v8 = vld [vmem:[#allocation251_spill] sm:$0xff] }
 0x29d   : > { %v8715_v11 = vmul.f32 %v8421_v9, %v1737_v36  ;;  %v8721_v31 = vmul.f32 %v1167_v13, %v11534_v18  ;;  %v8725_v58 = vmul.f32 %v8703_v25, %v11536_v42  ;;  %v8729_v54 = vmul.f32 %v8706_v4, %v11537_v40  ;;  %v11540_v61 = vld [vmem:[#allocation255_spill] sm:$0xff] }
 0x29e   : > { %11532 = vst [vmem:[#allocation228_spill] sm:$0xff] %v8712_v27  ;;  %2990 = vmatpush.msrb.mxu3 %v2191_v51  ;;  %2971 = vmatpush.msrb.mxu2 %v2068_v14  ;;  %v8733_v14 = vmul.f32 %v8709_v37, %v11538_v8  ;;  %v8736_v9 = vmul.f32 %v1807_v47, %v11534_v18  ;;  %v11541_v8 = vld [vmem:[#allocation159_spill] sm:$0xff]  ;;  %v11543_v51 = vld [vmem:[#allocation160_spill] sm:$0xff] }
 0x29f   : > { %11533 = vst [vmem:[#allocation243_spill] sm:$0xff] %v8718_v0  ;;  %v2064_v39 = vadd.f32 %v8685_v35, %v8674_v29  ;;  %v8742_v13 = vmul.f32 %v8715_v11, %v11540_v61  ;;  %v10598_v36 = vsub.f32 0.0, %v8725_v58  ;;  %v10597_v49 = vsub.f32 0.0, %v8729_v54  ;;  %v11542_v61 = vld [vmem:[#allocation34_spill] sm:$0xff] }
 0x2a0   : > { %11535 = vst [vmem:[#allocation230_spill] sm:$0xff] %v8721_v31  ;;  %2991 = vmatpush.msrb.mxu3 %v2069_v43  ;;  %2972 = vmatpush.msrb.mxu2 %v2066_v32  ;;  %v10603_v47 = vsub.f32 0.0, %v8733_v14  ;;  %v2065_v43 = vadd.f32 %v8700_v52, %v8689_v55  ;;  %v2062_v18 = vadd.f32 %v8718_v0, %v8712_v27  ;;  %v11551_v0 = vld [vmem:[#allocation12_spill] sm:$0xff] }
 0x2a1   : > { %11539 = vst [vmem:[#allocation245_spill] sm:$0xff] %v8736_v9  ;;  %v10602_v32 = vsub.f32 0.0, %v8742_v13  ;;  %v2184_v42 = vsub.f32 %v10597_v49, %v10598_v36  ;;  %v2063_v40 = vadd.f32 %v8736_v9, %v8721_v31  ;;  %v2403_v27 = vsub.f32 %v11544_v59, %v11543_v51 }
 0x2a2   : > { %2992 = vmatpush.msrb.mxu3 %v2067_v33  ;;  %2973 = vmatpush.msrb.mxu2 %v2064_v39  ;;  %v2402_v33 = vsub.f32 %v11542_v61, %v11541_v8  ;;  %v11545_v49 = vsub.f32 0.0, %v8583_v41  ;;  %v11546_v36 = vsub.f32 0.0, %v8642_v57  ;;  %v10604_v9 = vsub.f32 0.0, %v8646_v19  ;;  %v11547_v8 = vld [vmem:[#allocation79_spill] sm:$0xff]  ;;  %v11550_v39 = vld [vmem:[#allocation84_spill] sm:$0xff] }
 0x2a3   : > { %v2185_v17 = vsub.f32 %v10602_v32, %v10603_v47  ;;  %2926 = vmatpush.msrb.mxu0 %v2184_v42  ;;  %v2400_v32 = vsub.f32 %v11551_v0, %v11550_v39  ;;  %v11553_v51 = vsub.f32 0.0, %v8595_v7  ;;  %v11556_v39 = vld [vmem:[#allocation158_spill] sm:$0xff] }
 0x2a4   : > { %2993 = vmatpush.msrb.mxu3 %v2065_v43  ;;  %2974 = vmatpush.msrb.mxu2 %v2062_v18  ;;  %v2182_v31 = vsub.f32 %v11546_v36, %v11545_v49  ;;  %v11548_v43 = vld [vmem:[#allocation83_spill] sm:$0xff]  ;;  %v11552_v18 = vld [vmem:[#allocation60_spill] sm:$0xff]  ;;  %v11554_v49 = vld [vmem:[#allocation153_spill] sm:$0xff] }
 0x2a5   : > { %v11549_v61 = vsub.f32 %v11547_v8, %v11548_v43  ;;  %v8781_v47 = vmul.f32 %v8478_v28, %v11552_v18  ;;  %v8785_v59 = vmul.f32 %v8483_v30, %v11552_v18  ;;  %2946 = vmatpush.msrb.mxu1 %v2185_v17  ;;  %v2183_v36 = vsub.f32 %v10604_v9, %v11553_v51  ;;  %v11555_v28 = vld [vmem:[#allocation72_spill] sm:$0xff]  ;;  %v11558_v30 = vld [vmem:[#allocation13_spill] sm:$0xff]  ;;  %v11560_v43 = vld [vmem:[#allocation175_spill] sm:$0xff] }
 0x2a6   : > { %2994 = vmatpush.msrb.mxu3 %v2063_v40  ;;  %v8793_v42 = vmul.f32 %v8492_v26, %v11554_v49  ;;  %v8797_v0 = vmul.f32 %v8497_v12, %v11554_v49  ;;  %v11557_v8 = vsub.f32 %v11555_v28, %v11556_v39  ;;  %v11559_v17 = vld [vmem:[#allocation85_spill] sm:$0xff]  ;;  %v11563_v9 = vld [vmem:[#allocation11_spill] sm:$0xff]  ;;  %v8809_v26 = vld [vmem:[%s6867_s9 + $0x38] sm:$0xff]  ;;  %2927 = vmatpush.msrb.mxu0 %v2182_v31 }
 0x2a7   : > { %3175 = vmatpush.msra.mxu2 %v11549_v61  ;;  %v2401_v40 = vsub.f32 %v11559_v17, %v11558_v30  ;;  %v11561_v61 = vld [vmem:[#allocation10_spill] sm:$0xff]  ;;  %v11562_v51 = vld [vmem:[#allocation177_spill] sm:$0xff]  ;;  %11564 = vst [vmem:[#allocation252_spill] sm:$0xff] %v8809_v26  ;;  %2947 = vmatpush.msrb.mxu1 %v2183_v36  ;;  %v11569_v30 = vld [vmem:[#allocation147_spill] sm:$0xff]  ;;  %v2060_v36 = vadd.f32 %v8785_v59, %v8781_v47 }
 0x2a8   : > { %3195 = vmatpush.msra.mxu3 %v11557_v8  ;;  %v2398_v18 = vsub.f32 %v11561_v61, %v11560_v43  ;;  %v2399_v45 = vsub.f32 %v11563_v9, %v11562_v51  ;;  %v11565_v12 = vld [vmem:[#allocation213_spill] sm:$0xff]  ;;  %v11567_v8 = vld [vmem:[#allocation146_spill] sm:$0xff]  ;;  %v11570_v17 = vsub.f32 0.0, %v11569_v30  ;;  %4352 = vmatmul.msk.f32.vlgmr.msrb.gmra.mxu2 %vm2654_vm0, %v8809_v26  ;;  %v11574_v61 = vld [vmem:[#allocation152_spill] sm:$0xff] }
 0x2a9   : > { %3176 = vmatpush.msra.mxu2 %v2402_v33  ;;  %v8813_v49 = vmul.f32 %v8510_v48, %v11565_v12  ;;  %v8817_v33 = vmul.f32 %v8530_v63, %v11565_v12  ;;  %v11566_v28 = vld [vmem:[#allocation221_spill] sm:$0xff]  ;;  %v11568_v9 = vsub.f32 0.0, %v11567_v8  ;;  %4353 = vmatmul.msk.f32.vlgmr.msrb.gmra.mxu3 %vm2654_vm0, %v8809_v26  ;;  %v2061_v63 = vadd.f32 %v8797_v0, %v8793_v42 }
 0x2aa   : > { %v8821_v39 = vmul.f32 %v8535_v5, %v11566_v28  ;;  %3196 = vmatpush.msra.mxu3 %v2403_v27  ;;  %v8831_v48 = vmul.f32 %v8556_v20, %v11566_v28  ;;  %v11571_v5 = vld [vmem:[#allocation256_spill] sm:$0xff]  ;;  %v11572_v20 = vld [vmem:[#allocation150_spill] sm:$0xff]  ;;  %v11575_v51 = vsub.f32 0.0, %v11574_v61  ;;  %v8853_v28 = vmul.f32 %v8709_v37, %v8226_v53  ;;  %2928 = vmatpush.msrb.mxu0 %v2060_v36 }
 0x2ab   : > { %3177 = vmatpush.msra.mxu2 %v2400_v32  ;;  %v2276_v31 = vadd.f32 %v11570_v17, %v11568_v9  ;;  %v8841_v27 = vmul.f32 %v8703_v25, %v11571_v5  ;;  %v8845_v32 = vmul.f32 %v8706_v4, %v11571_v5  ;;  %v11573_v43 = vsub.f32 0.0, %v11572_v20  ;;  %2948 = vmatpush.msrb.mxu1 %v2061_v63  ;;  %v11576_v25 = vld [vmem:[#allocation125_spill] sm:$0xff]  ;;  %v11578_v9 = vld [vmem:[#allocation127_spill] sm:$0xff]  ;;  %v11581_v5 = vld [vmem:[#allocation236_spill] sm:$0xff] }
 0x2ac   : > { %3197 = vmatpush.msra.mxu3 %v2401_v40  ;;  %v8857_v8 = vmul.f32 %v8715_v11, %v8226_v53  ;;  %v11577_v4 = vsub.f32 0.0, %v11576_v25  ;;  %v11579_v40 = vsub.f32 0.0, %v11578_v9  ;;  %v2058_v30 = vadd.f32 %v8817_v33, %v8813_v49  ;;  %v11580_v53 = vld [vmem:[#allocation9_spill] sm:$0xff] }
 0x2ad   : > { %3178 = vmatpush.msra.mxu2 %v2398_v18  ;;  %v2277_v12 = vadd.f32 %v11575_v51, %v11573_v43  ;;  %v2059_v17 = vadd.f32 %v8831_v48, %v8821_v39  ;;  %v2056_v37 = vadd.f32 %v8845_v32, %v8841_v27  ;;  %v8871_v11 = vmul.f32 %v8558_v2, %v11580_v53  ;;  %v11582_v2 = vld [vmem:[#allocation131_spill] sm:$0xff]  ;;  %v11584_v43 = vld [vmem:[#allocation133_spill] sm:$0xff]  ;;  %v11586_v51 = vld [vmem:[#allocation128_spill] sm:$0xff] }
 0x2ae   : > { %v2274_v18 = vadd.f32 %v11579_v40, %v11577_v4  ;;  %3198 = vmatpush.msra.mxu3 %v2399_v45  ;;  %v8875_v36 = vmul.f32 %v8588_v23, %v11580_v53  ;;  %2929 = vmatpush.msrb.mxu0 %v2058_v30  ;;  %v2057_v63 = vadd.f32 %v8857_v8, %v8853_v28  ;;  %v11583_v20 = vsub.f32 0.0, %v11582_v2  ;;  %v11588_v4 = vld [vmem:[#allocation129_spill] sm:$0xff]  ;;  %v11592_v30 = vld [vmem:[#allocation139_spill] sm:$0xff] }
 0x2af   : > { %3179 = vmatpush.msra.mxu2 %v2276_v31  ;;  %2949 = vmatpush.msrb.mxu1 %v2059_v17  ;;  %v8881_v45 = vmul.f32 %v8563_v10, %v11581_v5  ;;  %v8885_v31 = vmul.f32 %v8597_v15, %v11581_v5  ;;  %v11585_v23 = vsub.f32 0.0, %v11584_v43  ;;  %v11587_v25 = vsub.f32 0.0, %v11586_v51  ;;  %v11594_v5 = vld [vmem:[#allocation32_spill] sm:$0xff]  ;;  %v11600_v51 = vld [vmem:[#allocation73_spill] sm:$0xff] }
 0x2b0   : > { %3199 = vmatpush.msra.mxu3 %v2277_v12  ;;  %v11589_v9 = vsub.f32 0.0, %v11588_v4  ;;  %2930 = vmatpush.msrb.mxu0 %v2056_v37  ;;  %v2054_v10 = vadd.f32 %v8875_v36, %v8871_v11  ;;  %v11590_v12 = vld [vmem:[#allocation137_spill] sm:$0xff]  ;;  %v11593_v17 = vsub.f32 0.0, %v11592_v30  ;;  %v11595_v2 = vsub.f32 0.0, %v11594_v5  ;;  %v11598_v37 = vld [vmem:[#allocation71_spill] sm:$0xff]  ;;  %v4731_v4 = vld [vmem:[%s6867_s9 + $0x8] sm:$0xff] }
 0x2b1   : > { %3180 = vmatpush.msra.mxu2 %v2274_v18  ;;  %v2275_v61 = vadd.f32 %v11585_v23, %v11583_v20  ;;  %2950 = vmatpush.msrb.mxu1 %v2057_v63  ;;  %v2055_v15 = vadd.f32 %v8885_v31, %v8881_v45  ;;  %v11591_v18 = vsub.f32 0.0, %v11590_v12  ;;  %v11596_v20 = vld [vmem:[#allocation69_spill] sm:$0xff]  ;;  %v11599_v63 = vsub.f32 0.0, %v11598_v37  ;;  %v11610_v5 = vld [vmem:[#allocation142_spill] sm:$0xff] }
 0x2b2   : > { %v2272_v40 = vadd.f32 %v11589_v9, %v11587_v25  ;;  %v11597_v43 = vsub.f32 0.0, %v11596_v20  ;;  %2931 = vmatpush.msrb.mxu0 %v2054_v10  ;;  %v11601_v25 = vsub.f32 0.0, %v11600_v51  ;;  %v11602_v9 = vld [vmem:[#allocation106_spill] sm:$0xff]  ;;  %v11606_v30 = vld [vmem:[#allocation21_spill] sm:$0xff] }
 0x2b3   : > { %3200 = vmatpush.msra.mxu3 %v2275_v61  ;;  %v2273_v53 = vadd.f32 %v11593_v17, %v11591_v18  ;;  %2951 = vmatpush.msrb.mxu1 %v2055_v15  ;;  %v11605_v18 = vld [vmem:[#allocation70_spill] sm:$0xff]  ;;  %v11608_v10 = vld [vmem:[#allocation141_spill] sm:$0xff] }
 0x2b4   : > { %3181 = vmatpush.msra.mxu2 %v2272_v40  ;;  %v2270_v23 = vadd.f32 %v11597_v43, %v11595_v2  ;;  %v2271_v61 = vadd.f32 %v11601_v25, %v11599_v63  ;;  %v11603_v40 = vld [vmem:[#allocation124_spill] sm:$0xff]  ;;  %v11607_v17 = vsub.f32 %v11605_v18, %v11606_v30  ;;  %v11609_v15 = vld [vmem:[#allocation138_spill] sm:$0xff]  ;;  %v11615_v63 = vld [vmem:[#allocation115_spill] sm:$0xff] }
 0x2b5   : > { %3201 = vmatpush.msra.mxu3 %v2273_v53  ;;  %v11604_v12 = vsub.f32 %v11602_v9, %v11603_v40  ;;  %v2418_v53 = vsub.f32 %v11609_v15, %v11608_v10  ;;  %v11611_v2 = vld [vmem:[#allocation108_spill] sm:$0xff]  ;;  %v11616_v51 = vld [vmem:[#allocation29_spill] sm:$0xff]  ;;  %v11624_v15 = vld [vmem:[#allocation19_spill] sm:$0xff] }
 0x2b6   : > { %3182 = vmatpush.msra.mxu2 %v2270_v23  ;;  %v11612_v20 = vsub.f32 %v11610_v5, %v11611_v2  ;;  %v11613_v43 = vld [vmem:[#allocation28_spill] sm:$0xff]  ;;  %v11614_v23 = vld [vmem:[#allocation117_spill] sm:$0xff]  ;;  %v2395_v25 = vsub.f32 %v11616_v51, %v11615_v63  ;;  %v11625_v5 = vld [vmem:[#allocation18_spill] sm:$0xff] }
 0x2b7   : > { %4356 = vmatmul.msk.f32.vlgmr.msra.gmra.mxu2 %vm2654_vm0, %v4731_v4  ;;  %3135 = vmatpush.msra.mxu0 %v11604_v12  ;;  %v2394_v37 = vsub.f32 %v11614_v23, %v11613_v43  ;;  %v11618_v9 = vld [vmem:[#allocation140_spill] sm:$0xff]  ;;  %v2392_v2 = vsub.f32 %v11625_v5, %v11624_v15  ;;  %v11627_v43 = vld [vmem:[#allocation63_spill] sm:$0xff]  ;;  %v11629_v51 = vld [vmem:[#allocation26_spill] sm:$0xff] }
 0x2b8   : > { %3202 = vmatpush.msra.mxu3 %v2271_v61  ;;  %3255 = vmatpush.msrb.mxu2 %v11607_v17  ;;  %v11617_v61 = vld [vmem:[#allocation136_spill] sm:$0xff]  ;;  %v11628_v63 = vld [vmem:[#allocation27_spill] sm:$0xff] }
 0x2b9   : > { %4357 = vmatmul.msk.f32.vlgmr.msra.gmra.mxu3 %vm2654_vm0, %v4731_v4  ;;  %3155 = vmatpush.msra.mxu1 %v11612_v20  ;;  %v11619_v40 = vsub.f32 %v11617_v61, %v11618_v9  ;;  %v11620_v12 = vld [vmem:[#allocation156_spill] sm:$0xff]  ;;  %v11622_v4 = vld [vmem:[#allocation39_spill] sm:$0xff]  ;;  %v2417_v61 = vsub.f32 %v11629_v51, %v11628_v63  ;;  %v11631_v9 = vld [vmem:[#allocation86_spill] sm:$0xff] }
 0x2ba   : > { %3256 = vmatpush.msrb.mxu2 %v2418_v53  ;;  %v11621_v18 = vld [vmem:[#allocation148_spill] sm:$0xff]  ;;  %3136 = vmatpush.msra.mxu0 %v2394_v37  ;;  %v8949_v15 = vld [vmem:[%s6867_s9 + $0x30] sm:$0xff] }
 0x2bb   : > { %3275 = vmatpush.msrb.mxu3 %v11619_v40  ;;  %v2419_v30 = vsub.f32 %v11621_v18, %v11620_v12  ;;  %v11623_v17 = vld [vmem:[#allocation24_spill] sm:$0xff]  ;;  %3156 = vmatpush.msra.mxu1 %v2395_v25  ;;  %v11632_v12 = vld [vmem:[#allocation191_spill] sm:$0xff]  ;;  %v11633_v18 = vld [vmem:[#allocation22_spill] sm:$0xff]  ;;  %11636 = vst [vmem:[#allocation244_spill] sm:$0xff] %v8949_v15 }
 0x2bc   : > { %v2416_v10 = vsub.f32 %v11623_v17, %v11622_v4  ;;  %v11626_v20 = vld [vmem:[#allocation132_spill] sm:$0xff]  ;;  %3137 = vmatpush.msra.mxu0 %v2392_v2  ;;  %v2390_v37 = vsub.f32 %v11633_v18, %v11632_v12  ;;  %v11635_v4 = vld [vmem:[#allocation25_spill] sm:$0xff]  ;;  %v11641_v63 = vld [vmem:[#allocation99_spill] sm:$0xff]  ;;  %4351 = vmatmul.msk.f32.vlgmr.msrb.gmra.mxu1 %vm2654_vm0, %v8949_v15 }
 0x2bd   : > { %v2393_v23 = vsub.f32 %v11627_v43, %v11626_v20  ;;  %3276 = vmatpush.msrb.mxu3 %v2419_v30  ;;  %v11630_v53 = vld [vmem:[#allocation172_spill] sm:$0xff]  ;;  %v11637_v30 = vld [vmem:[#allocation199_spill] sm:$0xff]  ;;  %v11639_v20 = vld [vmem:[#allocation118_spill] sm:$0xff]  ;;  %v11642_v2 = vsub.f32 0.0, %v11641_v63  ;;  %4350 = vmatmul.msk.f32.vlgmr.msrb.gmra.mxu0 %vm2654_vm0, %v8949_v15 }
 0x2be   : > { %3257 = vmatpush.msrb.mxu2 %v2416_v10  ;;  %v2414_v40 = vsub.f32 %v11631_v9, %v11630_v53  ;;  %v11634_v25 = vld [vmem:[#allocation192_spill] sm:$0xff]  ;;  %3138 = vmatpush.msra.mxu0 %v2390_v37  ;;  %v11640_v43 = vsub.f32 0.0, %v11639_v20  ;;  %v11645_v9 = vld [vmem:[#allocation101_spill] sm:$0xff] }
 0x2bf   : > { %3157 = vmatpush.msra.mxu1 %v2393_v23  ;;  %v2391_v17 = vsub.f32 %v11635_v4, %v11634_v25  ;;  %3277 = vmatpush.msrb.mxu3 %v2417_v61  ;;  %v11638_v10 = vld [vmem:[#allocation56_spill] sm:$0xff]  ;;  %v11646_v12 = vsub.f32 0.0, %v11645_v9  ;;  %v11649_v25 = vld [vmem:[#allocation163_spill] sm:$0xff] }
 0x2c0   : > { %3258 = vmatpush.msrb.mxu2 %v2414_v40  ;;  %v2415_v5 = vsub.f32 %v11638_v10, %v11637_v30  ;;  %v2292_v23 = vadd.f32 %v11642_v2, %v11640_v43  ;;  %v11643_v51 = vld [vmem:[#allocation116_spill] sm:$0xff]  ;;  %v11647_v40 = vld [vmem:[#allocation161_spill] sm:$0xff]  ;;  %v11650_v4 = vsub.f32 0.0, %v11649_v25  ;;  %v11653_v10 = vld [vmem:[#allocation166_spill] sm:$0xff] }
 0x2c1   : > { %3158 = vmatpush.msra.mxu1 %v2391_v17  ;;  %v11644_v53 = vsub.f32 0.0, %v11643_v51  ;;  %v11648_v18 = vsub.f32 0.0, %v11647_v40  ;;  %v11651_v17 = vld [vmem:[#allocation164_spill] sm:$0xff]  ;;  %v11655_v43 = vld [vmem:[#allocation54_spill] sm:$0xff]  ;;  %v11657_v2 = vld [vmem:[#allocation105_spill] sm:$0xff] }
 0x2c2   : > { %3278 = vmatpush.msrb.mxu3 %v2415_v5  ;;  %3259 = vmatpush.msrb.mxu2 %v2292_v23  ;;  %v11652_v30 = vsub.f32 0.0, %v11651_v17  ;;  %v11654_v5 = vsub.f32 0.0, %v11653_v10  ;;  %v11656_v63 = vsub.f32 0.0, %v11655_v43  ;;  %v11658_v51 = vsub.f32 0.0, %v11657_v2  ;;  %v11661_v40 = vld [vmem:[#allocation130_spill] sm:$0xff] }
 0x2c3   : > { %v2293_v61 = vadd.f32 %v11646_v12, %v11644_v53  ;;  %v2268_v37 = vadd.f32 %v11650_v4, %v11648_v18  ;;  %v11659_v53 = vld [vmem:[#allocation111_spill] sm:$0xff]  ;;  %v11662_v18 = vsub.f32 0.0, %v11661_v40  ;;  %v11663_v4 = vld [vmem:[#allocation109_spill] sm:$0xff]  ;;  %v11665_v23 = vld [vmem:[#allocation50_spill] sm:$0xff] }
 0x2c4   : > { %v2269_v20 = vadd.f32 %v11654_v5, %v11652_v30  ;;  %v2290_v9 = vadd.f32 %v11658_v51, %v11656_v63  ;;  %v11660_v12 = vsub.f32 0.0, %v11659_v53  ;;  %v11664_v15 = vsub.f32 0.0, %v11663_v4  ;;  %v11667_v30 = vld [vmem:[#allocation51_spill] sm:$0xff]  ;;  %v11669_v5 = vld [vmem:[#allocation97_spill] sm:$0xff]  ;;  %v11671_v63 = vld [vmem:[#allocation120_spill] sm:$0xff] }
 0x2c5   : > { %3279 = vmatpush.msrb.mxu3 %v2293_v61  ;;  %3139 = vmatpush.msra.mxu0 %v2268_v37  ;;  %v11666_v26 = vsub.f32 0.0, %v11665_v23  ;;  %v11668_v10 = vsub.f32 0.0, %v11667_v30  ;;  %v11670_v43 = vsub.f32 0.0, %v11669_v5  ;;  %v11672_v61 = vsub.f32 0.0, %v11671_v63  ;;  %v11673_v37 = vld [vmem:[#allocation64_spill] sm:$0xff] }
 0x2c6   : > { %v2291_v25 = vadd.f32 %v11662_v18, %v11660_v12  ;;  %3159 = vmatpush.msra.mxu1 %v2269_v20  ;;  %3260 = vmatpush.msrb.mxu2 %v2290_v9  ;;  %v11674_v51 = vsub.f32 0.0, %v11673_v37  ;;  %v11675_v12 = vld [vmem:[#allocation80_spill] sm:$0xff]  ;;  %v11677_v18 = vld [vmem:[#allocation66_spill] sm:$0xff]  ;;  %v11689_v37 = vld [vmem:[#allocation37_spill] sm:$0xff] }
 0x2c7   : > { %v2266_v17 = vadd.f32 %v11666_v26, %v11664_v15  ;;  %v2267_v2 = vadd.f32 %v11670_v43, %v11668_v10  ;;  %v11676_v40 = vsub.f32 0.0, %v11675_v12  ;;  %v11678_v4 = vsub.f32 0.0, %v11677_v18  ;;  %v11679_v26 = vld [vmem:[#allocation119_spill] sm:$0xff]  ;;  %v11681_v20 = vld [vmem:[#allocation52_spill] sm:$0xff]  ;;  %v11685_v43 = vld [vmem:[#allocation77_spill] sm:$0xff] }
 0x2c8   : > { %v2288_v53 = vadd.f32 %v11674_v51, %v11672_v61  ;;  %3280 = vmatpush.msrb.mxu3 %v2291_v25  ;;  %v11680_v15 = vsub.f32 0.0, %v11679_v26  ;;  %v11682_v9 = vsub.f32 0.0, %v11681_v20  ;;  %v11683_v10 = vld [vmem:[#allocation68_spill] sm:$0xff]  ;;  %v11686_v63 = vsub.f32 0.0, %v11685_v43  ;;  %v11687_v25 = vld [vmem:[#allocation154_spill] sm:$0xff] }
 0x2c9   : > { %3140 = vmatpush.msra.mxu0 %v2266_v17  ;;  %v2289_v23 = vadd.f32 %v11678_v4, %v11676_v40  ;;  %3160 = vmatpush.msra.mxu1 %v2267_v2  ;;  %v11684_v5 = vsub.f32 0.0, %v11683_v10  ;;  %v11688_v17 = vsub.f32 0.0, %v11687_v25  ;;  %v11690_v51 = vsub.f32 0.0, %v11689_v37  ;;  %v11691_v40 = vld [vmem:[#allocation151_spill] sm:$0xff]  ;;  %v11693_v4 = vld [vmem:[#allocation20_spill] sm:$0xff]  ;;  %v11695_v2 = vld [vmem:[#allocation114_spill] sm:$0xff] }
 0x2ca   : > { %v2264_v30 = vadd.f32 %v11682_v9, %v11680_v15  ;;  %3261 = vmatpush.msrb.mxu2 %v2288_v53  ;;  %v11692_v18 = vsub.f32 0.0, %v11691_v40  ;;  %v11694_v26 = vsub.f32 0.0, %v11693_v4  ;;  %v11696_v53 = vsub.f32 0.0, %v11695_v2  ;;  %v11697_v20 = vld [vmem:[#allocation122_spill] sm:$0xff]  ;;  %v11705_v40 = vld [vmem:[#allocation176_spill] sm:$0xff]  ;;  %v11709_v2 = vld [vmem:[#allocation65_spill] sm:$0xff] }
 0x2cb   : > { %v2265_v61 = vadd.f32 %v11686_v63, %v11684_v5  ;;  %v2286_v12 = vadd.f32 %v11690_v51, %v11688_v17  ;;  %3281 = vmatpush.msrb.mxu3 %v2289_v23  ;;  %v11698_v9 = vsub.f32 0.0, %v11697_v20  ;;  %v11699_v5 = vld [vmem:[#allocation134_spill] sm:$0xff]  ;;  %v4732_v51 = vld [vmem:[%s6867_s9 + $0x18] sm:$0xff] }
 0x2cc   : > { %3141 = vmatpush.msra.mxu0 %v2264_v30  ;;  %v2287_v15 = vadd.f32 %v11694_v26, %v11692_v18  ;;  %v11700_v43 = vsub.f32 0.0, %v11699_v5  ;;  %v11701_v63 = vld [vmem:[#allocation126_spill] sm:$0xff]  ;;  %v11704_v30 = vld [vmem:[#allocation193_spill] sm:$0xff]  ;;  %v11708_v26 = vld [vmem:[#allocation103_spill] sm:$0xff] }
 0x2cd   : > { %v2262_v10 = vadd.f32 %v11698_v9, %v11696_v53  ;;  %3161 = vmatpush.msra.mxu1 %v2265_v61  ;;  %3262 = vmatpush.msrb.mxu2 %v2286_v12  ;;  %v11702_v25 = vsub.f32 0.0, %v11701_v63  ;;  %v11703_v23 = vld [vmem:[#allocation94_spill] sm:$0xff]  ;;  %v11706_v18 = vld [vmem:[#allocation165_spill] sm:$0xff]  ;;  %v11707_v12 = vld [vmem:[#allocation112_spill] sm:$0xff] }
 0x2ce   : > { %3282 = vmatpush.msrb.mxu3 %v2287_v15  ;;  %v2436_v37 = vsub.f32 %v11704_v30, %v11703_v23  ;;  %4360 = vmatmul.msk.f32.vlgmr.msrb.gmra.mxu2 %vm2654_vm0, %v4732_v51  ;;  %v2437_v4 = vsub.f32 %v11706_v18, %v11705_v40  ;;  %v4733_v61 = vld [vmem:[%s6867_s9] sm:$0xff]  ;;  %v2434_v15 = vsub.f32 %v11708_v26, %v11707_v12  ;;  %v11710_v53 = vld [vmem:[#allocation36_spill] sm:$0xff]  ;;  %v11724_v26 = vld [vmem:[#allocation215_spill] sm:$0xff] }
 0x2cf   : > { %v2263_v17 = vadd.f32 %v11702_v25, %v11700_v43  ;;  %3142 = vmatpush.msra.mxu0 %v2262_v10  ;;  %4361 = vmatmul.msk.f32.vlgmr.msrb.gmra.mxu3 %vm2654_vm0, %v4732_v51  ;;  %v11711_v20 = vsub.f32 %v11709_v2, %v11710_v53  ;;  %v11712_v9 = vld [vmem:[#allocation180_spill] sm:$0xff]  ;;  %v11713_v10 = vld [vmem:[#allocation98_spill] sm:$0xff]  ;;  %v11714_v43 = vld [vmem:[#allocation171_spill] sm:$0xff] }
 0x2d0   : > { %3335 = vmatpush.msra.mxu2 %v2436_v37  ;;  %3355 = vmatpush.msra.mxu3 %v2437_v4  ;;  %v2435_v5 = vsub.f32 %v11713_v10, %v11712_v9  ;;  %v11715_v63 = vld [vmem:[#allocation44_spill] sm:$0xff]  ;;  %v11717_v23 = vld [vmem:[#allocation45_spill] sm:$0xff] }
 0x2d1   : > { %3162 = vmatpush.msra.mxu1 %v2263_v17  ;;  %4354 = vmatmul.msk.f32.vlgmr.msra.gmra.mxu0 %vm2654_vm0, %v4733_v61  ;;  %v2410_v25 = vsub.f32 %v11715_v63, %v11714_v43  ;;  %v11716_v17 = vld [vmem:[#allocation174_spill] sm:$0xff]  ;;  %v11718_v37 = vld [vmem:[#allocation17_spill] sm:$0xff]  ;;  %v11719_v51 = vld [vmem:[#allocation224_spill] sm:$0xff] }
 0x2d2   : > { %4355 = vmatmul.msk.f32.vlgmr.msra.gmra.mxu1 %vm2654_vm0, %v4733_v61  ;;  %3215 = vmatpush.msrb.mxu0 %v11711_v20  ;;  %v2411_v30 = vsub.f32 %v11717_v23, %v11716_v17  ;;  %v11720_v40 = vsub.f32 %v11718_v37, %v11719_v51  ;;  %v11721_v18 = vld [vmem:[#allocation216_spill] sm:$0xff]  ;;  %v11722_v4 = vld [vmem:[#allocation121_spill] sm:$0xff]  ;;  %v11726_v20 = vld [vmem:[#allocation46_spill] sm:$0xff] }
 0x2d3   : > { %3336 = vmatpush.msra.mxu2 %v2434_v15  ;;  %v2432_v61 = vsub.f32 %v11722_v4, %v11721_v18  ;;  %v11723_v12 = vld [vmem:[#allocation204_spill] sm:$0xff]  ;;  %v11725_v53 = vld [vmem:[#allocation233_spill] sm:$0xff]  ;;  %3356 = vmatpush.msra.mxu3 %v2435_v5  ;;  %v11728_v43 = vld [vmem:[#allocation47_spill] sm:$0xff] }
 0x2d4   : > { %3235 = vmatpush.msrb.mxu1 %v11720_v40  ;;  %v2433_v2 = vsub.f32 %v11724_v26, %v11723_v12  ;;  %v2408_v9 = vsub.f32 %v11726_v20, %v11725_v53  ;;  %3216 = vmatpush.msrb.mxu0 %v2410_v25  ;;  %v11727_v10 = vld [vmem:[#allocation188_spill] sm:$0xff]  ;;  %v11729_v17 = vld [vmem:[#allocation43_spill] sm:$0xff]  ;;  %v11730_v23 = vld [vmem:[#allocation206_spill] sm:$0xff]  ;;  %v11735_v12 = vsub.f32 0.0, %v8607_v50  ;;  %v11736_v26 = vsub.f32 0.0, %v8633_v38 }
 0x2d5   : > { %v2409_v63 = vsub.f32 %v11728_v43, %v11727_v10  ;;  %v2430_v55 = vsub.f32 %v11730_v23, %v11729_v17  ;;  %v11731_v37 = vld [vmem:[#allocation59_spill] sm:$0xff]  ;;  %v11732_v51 = vld [vmem:[#allocation218_spill] sm:$0xff]  ;;  %3337 = vmatpush.msra.mxu2 %v2432_v61  ;;  %v11737_v25 = vsub.f32 0.0, %v8649_v44  ;;  %v11738_v53 = vsub.f32 0.0, %v8657_v24  ;;  %v11743_v44 = vld [vmem:[#allocation57_spill] sm:$0xff] }
 0x2d6   : > { %v2431_v15 = vsub.f32 %v11732_v51, %v11731_v37  ;;  %3236 = vmatpush.msrb.mxu1 %v2411_v30  ;;  %v11733_v40 = vld [vmem:[#allocation234_spill] sm:$0xff]  ;;  %v9063_v5 = vadd.f32 %v11736_v26, %v11735_v12  ;;  %3357 = vmatpush.msra.mxu3 %v2433_v2  ;;  %v11739_v10 = vld [vmem:[#allocation235_spill] sm:$0xff]  ;;  %v2444_v43 = vsub.f32 %v8781_v47, %v8785_v59  ;;  %v11744_v23 = vsub.f32 0.0, %v11743_v44  ;;  %v11751_v26 = vld [vmem:[#allocation81_spill] sm:$0xff] }
 0x2d7   : > { %v11734_v18 = vld [vmem:[#allocation14_spill] sm:$0xff]  ;;  %v9069_v20 = vadd.f32 %v11738_v53, %v11737_v25  ;;  %3217 = vmatpush.msrb.mxu0 %v2408_v9  ;;  %v11740_v30 = vld [vmem:[#allocation15_spill] sm:$0xff]  ;;  %v2445_v50 = vsub.f32 %v8793_v42, %v8797_v0  ;;  %3338 = vmatpush.msra.mxu2 %v2430_v55  ;;  %v2442_v2 = vsub.f32 %v8813_v49, %v8817_v33  ;;  %v11752_v25 = vsub.f32 0.0, %v11751_v26 }
 0x2d8   : > { %v2406_v4 = vsub.f32 %v11734_v18, %v11733_v40  ;;  %v2407_v61 = vsub.f32 %v11740_v30, %v11739_v10  ;;  %3237 = vmatpush.msrb.mxu1 %v2409_v63  ;;  %v11741_v38 = vld [vmem:[#allocation178_spill] sm:$0xff]  ;;  %3358 = vmatpush.msra.mxu3 %v2431_v15  ;;  %v11749_v63 = vld [vmem:[#allocation155_spill] sm:$0xff]  ;;  %v11753_v30 = vld [vmem:[#allocation33_spill] sm:$0xff]  ;;  %v11893_v47 = vsub.f32 %v8853_v28, %v8857_v8 }
 0x2d9   : > { %v11742_v17 = vsub.f32 0.0, %v11741_v38  ;;  %v11745_v37 = vld [vmem:[#allocation58_spill] sm:$0xff]  ;;  %v11750_v55 = vsub.f32 0.0, %v11749_v63  ;;  %v11754_v38 = vsub.f32 0.0, %v11753_v30  ;;  %v11761_v63 = vld [vmem:[#allocation113_spill] sm:$0xff]  ;;  %v11767_v10 = vld [vmem:[#allocation96_spill] sm:$0xff]  ;;  %v11894_v59 = vsub.f32 %v8871_v11, %v8875_v36 }
 0x2da   : > { %3218 = vmatpush.msrb.mxu0 %v2406_v4  ;;  %v11746_v51 = vsub.f32 0.0, %v11745_v37  ;;  %v11747_v40 = vld [vmem:[#allocation74_spill] sm:$0xff]  ;;  %3238 = vmatpush.msrb.mxu1 %v2407_v61  ;;  %v11759_v37 = vld [vmem:[#allocation107_spill] sm:$0xff] }
 0x2db   : > { %v2308_v24 = vadd.f32 %v11744_v23, %v11742_v17  ;;  %v11748_v18 = vsub.f32 0.0, %v11747_v40  ;;  %v2284_v53 = vadd.f32 %v11752_v25, %v11750_v55  ;;  %v11755_v17 = vld [vmem:[#allocation23_spill] sm:$0xff]  ;;  %v11757_v44 = vld [vmem:[#allocation110_spill] sm:$0xff]  ;;  %v11760_v40 = vsub.f32 0.0, %v11759_v37  ;;  %v11765_v25 = vld [vmem:[#allocation93_spill] sm:$0xff] }
 0x2dc   : > { %v11756_v15 = vsub.f32 0.0, %v11755_v17  ;;  %v11758_v23 = vsub.f32 0.0, %v11757_v44  ;;  %v11762_v55 = vsub.f32 0.0, %v11761_v63  ;;  %v11763_v26 = vld [vmem:[#allocation42_spill] sm:$0xff]  ;;  %v11766_v30 = vsub.f32 0.0, %v11765_v25  ;;  %v11769_v44 = vld [vmem:[#allocation100_spill] sm:$0xff] }
 0x2dd   : > { %v2309_v12 = vadd.f32 %v11748_v18, %v11746_v51  ;;  %3339 = vmatpush.msra.mxu2 %v2308_v24  ;;  %3219 = vmatpush.msrb.mxu0 %v2284_v53  ;;  %v11764_v61 = vsub.f32 0.0, %v11763_v26  ;;  %v11768_v17 = vsub.f32 0.0, %v11767_v10  ;;  %v11771_v37 = vld [vmem:[#allocation167_spill] sm:$0xff]  ;;  %v11775_v18 = vld [vmem:[#allocation185_spill] sm:$0xff]  ;;  %v11777_v10 = vld [vmem:[#allocation186_spill] sm:$0xff] }
 0x2de   : > { %v2285_v4 = vadd.f32 %v11756_v15, %v11754_v38  ;;  %v2306_v51 = vadd.f32 %v11760_v40, %v11758_v23  ;;  %v11770_v23 = vsub.f32 0.0, %v11769_v44  ;;  %v11773_v40 = vld [vmem:[#allocation187_spill] sm:$0xff]  ;;  %v11776_v26 = vsub.f32 0.0, %v11775_v18  ;;  %v11783_v15 = vld [vmem:[#allocation53_spill] sm:$0xff]  ;;  %v11897_v49 = vld [vmem:[#allocation38_spill] sm:$0xff] }
 0x2df   : > { %3359 = vmatpush.msra.mxu3 %v2309_v12  ;;  %v2307_v24 = vadd.f32 %v11764_v61, %v11762_v55  ;;  %v2282_v38 = vadd.f32 %v11768_v17, %v11766_v30  ;;  %v11772_v12 = vsub.f32 0.0, %v11771_v37  ;;  %v11774_v63 = vsub.f32 0.0, %v11773_v40  ;;  %v11779_v30 = vld [vmem:[#allocation157_spill] sm:$0xff]  ;;  %v11781_v17 = vld [vmem:[#allocation104_spill] sm:$0xff]  ;;  %v11787_v40 = vld [vmem:[#allocation183_spill] sm:$0xff] }
 0x2e0   : > { %3239 = vmatpush.msrb.mxu1 %v2285_v4  ;;  %3340 = vmatpush.msra.mxu2 %v2306_v51  ;;  %v11778_v25 = vsub.f32 0.0, %v11777_v10  ;;  %v11780_v4 = vsub.f32 0.0, %v11779_v30  ;;  %v11782_v44 = vsub.f32 0.0, %v11781_v17  ;;  %v11784_v37 = vsub.f32 0.0, %v11783_v15  ;;  %v11789_v61 = vld [vmem:[#allocation162_spill] sm:$0xff]  ;;  %v11895_v42 = vld [vmem:[#allocation239_spill] sm:$0xff] }
 0x2e1   : > { %v2283_v53 = vadd.f32 %v11772_v12, %v11770_v23  ;;  %v2304_v55 = vadd.f32 %v11776_v26, %v11774_v63  ;;  %3360 = vmatpush.msra.mxu3 %v2307_v24  ;;  %3220 = vmatpush.msrb.mxu0 %v2282_v38  ;;  %v11785_v12 = vld [vmem:[#allocation182_spill] sm:$0xff]  ;;  %v11788_v63 = vsub.f32 0.0, %v11787_v40  ;;  %v11790_v24 = vsub.f32 0.0, %v11789_v61  ;;  %v11791_v38 = vld [vmem:[#allocation168_spill] sm:$0xff]  ;;  %v11803_v61 = vld [vmem:[#allocation135_spill] sm:$0xff] }
 0x2e2   : > { %v2305_v51 = vadd.f32 %v11780_v4, %v11778_v25  ;;  %v2280_v23 = vadd.f32 %v11784_v37, %v11782_v44  ;;  %v11786_v18 = vsub.f32 0.0, %v11785_v12  ;;  %v11792_v9 = vsub.f32 0.0, %v11791_v38  ;;  %v11793_v25 = vld [vmem:[#allocation75_spill] sm:$0xff]  ;;  %v11795_v4 = vld [vmem:[#allocation76_spill] sm:$0xff]  ;;  %v11797_v44 = vld [vmem:[#allocation61_spill] sm:$0xff] }
 0x2e3   : > { %3240 = vmatpush.msrb.mxu1 %v2283_v53  ;;  %3341 = vmatpush.msra.mxu2 %v2304_v55  ;;  %v11794_v30 = vsub.f32 0.0, %v11793_v25  ;;  %v11796_v17 = vsub.f32 0.0, %v11795_v4  ;;  %v11798_v53 = vsub.f32 0.0, %v11797_v44  ;;  %v11799_v55 = vld [vmem:[#allocation145_spill] sm:$0xff]  ;;  %v11808_v25 = vsub.f32 0.0, %v8742_v13  ;;  %v11904_v28 = vld [vmem:[#allocation214_spill] sm:$0xff] }
 0x2e4   : > { %v2281_v26 = vadd.f32 %v11788_v63, %v11786_v18  ;;  %v2302_v10 = vadd.f32 %v11792_v9, %v11790_v24  ;;  %3361 = vmatpush.msra.mxu3 %v2305_v51  ;;  %3221 = vmatpush.msrb.mxu0 %v2280_v23  ;;  %v11800_v37 = vsub.f32 0.0, %v11799_v55  ;;  %v11801_v18 = vld [vmem:[#allocation31_spill] sm:$0xff]  ;;  %v11804_v63 = vsub.f32 0.0, %v11803_v61  ;;  %v11820_v44 = vld [vmem:[#allocation229_spill] sm:$0xff]  ;;  %v11821_v55 = vld [vmem:[#allocation208_spill] sm:$0xff] }
 0x2e5   : > { %v2303_v15 = vadd.f32 %v11796_v17, %v11794_v30  ;;  %v11802_v40 = vsub.f32 0.0, %v11801_v18  ;;  %v2452_v9 = vsub.f32 %v8612_v62, %v8621_v21  ;;  %v11805_v51 = vsub.f32 0.0, %v8725_v58  ;;  %v11817_v17 = vld [vmem:[#allocation205_spill] sm:$0xff]  ;;  %v11826_v61 = vld [vmem:[#allocation228_spill] sm:$0xff] }
 0x2e6   : > { %v2278_v12 = vadd.f32 %v11800_v37, %v11798_v53  ;;  %3241 = vmatpush.msrb.mxu1 %v2281_v26  ;;  %3342 = vmatpush.msra.mxu2 %v2302_v10  ;;  %v11806_v23 = vsub.f32 0.0, %v8729_v54  ;;  %v2453_v26 = vsub.f32 %v8625_v1, %v8629_v34  ;;  %v11807_v10 = vsub.f32 0.0, %v8733_v14  ;;  %v11811_v1 = vld [vmem:[#allocation195_spill] sm:$0xff]  ;;  %v11812_v34 = vld [vmem:[#allocation201_spill] sm:$0xff] }
 0x2e7   : > { %v2279_v38 = vadd.f32 %v11804_v63, %v11802_v40  ;;  %3362 = vmatpush.msra.mxu3 %v2303_v15  ;;  %4364 = vmatmul.msk.f32.vlgmr.msra.gmra.mxu2 %vm2654_vm0, %v8471_v3  ;;  %v2428_v62 = vsub.f32 %v8334_v60, %v8356_v22  ;;  %v11809_v21 = vsub.f32 0.0, %v8583_v41  ;;  %v11810_v58 = vsub.f32 0.0, %v8642_v57  ;;  %v11813_v14 = vld [vmem:[#allocation55_spill] sm:$0xff]  ;;  %v11816_v57 = vld [vmem:[#allocation173_spill] sm:$0xff] }
 0x2e8   : > { %3222 = vmatpush.msrb.mxu0 %v2278_v12  ;;  %v9159_v24 = vadd.f32 %v11806_v23, %v11805_v51  ;;  %v9169_v30 = vadd.f32 %v11808_v25, %v11807_v10  ;;  %4365 = vmatmul.msk.f32.vlgmr.msra.gmra.mxu3 %vm2654_vm0, %v8471_v3  ;;  %v2429_v13 = vsub.f32 %v11813_v14, %v11812_v34  ;;  %v11814_v4 = vsub.f32 0.0, %v8595_v7  ;;  %v11822_v37 = vld [vmem:[#allocation197_spill] sm:$0xff]  ;;  %v11825_v40 = vld [vmem:[#allocation243_spill] sm:$0xff]  ;;  %v11830_v51 = vld [vmem:[#allocation92_spill] sm:$0xff] }
 0x2e9   : > { %3242 = vmatpush.msrb.mxu1 %v2279_v38  ;;  %3415 = vmatpush.msrb.mxu2 %v2452_v9  ;;  %v9179_v54 = vadd.f32 %v11810_v58, %v11809_v21  ;;  %v2450_v3 = vsub.f32 %v8638_v46, %v8653_v56  ;;  %v11815_v60 = vsub.f32 0.0, %v8646_v19  ;;  %v2451_v41 = vsub.f32 %v8661_v6, %v8665_v16  ;;  %v11818_v46 = vld [vmem:[#allocation170_spill] sm:$0xff]  ;;  %v11819_v56 = vld [vmem:[#allocation144_spill] sm:$0xff]  ;;  %v11823_v16 = vld [vmem:[#allocation123_spill] sm:$0xff] }
 0x2ea   : > { %3435 = vmatpush.msrb.mxu3 %v2453_v26  ;;  %4358 = vmatmul.msk.f32.vlgmr.msrb.gmra.mxu0 %vm2654_vm0, %v11811_v1  ;;  %v2426_v15 = vsub.f32 %v11817_v17, %v11816_v57  ;;  %v2427_v7 = vsub.f32 %v11819_v56, %v11818_v46  ;;  %v2448_v19 = vsub.f32 %v8674_v29, %v8685_v35  ;;  %v11824_v12 = vld [vmem:[#allocation209_spill] sm:$0xff]  ;;  %v11828_v35 = vld [vmem:[#allocation230_spill] sm:$0xff]  ;;  %v11829_v9 = vld [vmem:[#allocation220_spill] sm:$0xff]  ;;  %v11896_v0 = vsub.f32 0.0, %v11895_v42 }
 0x2eb   : > { %v9191_v22 = vadd.f32 %v11815_v60, %v11814_v4  ;;  %4359 = vmatmul.msk.f32.vlgmr.msrb.gmra.mxu1 %vm2654_vm0, %v11811_v1  ;;  %3295 = vmatpush.msra.mxu0 %v2428_v62  ;;  %v2449_v53 = vsub.f32 %v11820_v44, %v8700_v52  ;;  %v2424_v6 = vsub.f32 %v11822_v37, %v11821_v55  ;;  %v11827_v38 = vld [vmem:[#allocation245_spill] sm:$0xff]  ;;  %v11831_v52 = vld [vmem:[#allocation67_spill] sm:$0xff]  ;;  %v11832_v26 = vld [vmem:[#allocation40_spill] sm:$0xff]  ;;  %v11898_v33 = vsub.f32 0.0, %v11897_v49 }
 0x2ec   : > { %3315 = vmatpush.msra.mxu1 %v2429_v13  ;;  %3416 = vmatpush.msrb.mxu2 %v2450_v3  ;;  %v2425_v18 = vsub.f32 %v11824_v12, %v11823_v16  ;;  %v2446_v63 = vsub.f32 %v11826_v61, %v11825_v40  ;;  %v2447_v29 = vsub.f32 %v11828_v35, %v11827_v38  ;;  %v11833_v25 = vld [vmem:[#allocation89_spill] sm:$0xff]  ;;  %v11835_v21 = vld [vmem:[#allocation223_spill] sm:$0xff]  ;;  %v11837_v34 = vld [vmem:[#allocation222_spill] sm:$0xff]  ;;  %v11905_v8 = vsub.f32 0.0, %v11904_v28 }
 0x2ed   : > { %3436 = vmatpush.msrb.mxu3 %v2451_v41  ;;  %3296 = vmatpush.msra.mxu0 %v2426_v15  ;;  %v2422_v23 = vsub.f32 %v11830_v51, %v11829_v9  ;;  %v2423_v10 = vsub.f32 %v11832_v26, %v11831_v52  ;;  %v11834_v62 = vsub.f32 0.0, %v11833_v25  ;;  %v11836_v58 = vsub.f32 0.0, %v11835_v21  ;;  %v11839_v13 = vld [vmem:[#allocation49_spill] sm:$0xff]  ;;  %v11843_v57 = vld [vmem:[#allocation198_spill] sm:$0xff]  ;;  %v11845_v46 = vld [vmem:[#allocation196_spill] sm:$0xff] }
 0x2ee   : > { %3316 = vmatpush.msra.mxu1 %v2427_v7  ;;  %3417 = vmatpush.msrb.mxu2 %v2448_v19  ;;  %v11838_v14 = vsub.f32 0.0, %v11837_v34  ;;  %v11840_v3 = vsub.f32 0.0, %v11839_v13  ;;  %v11841_v60 = vld [vmem:[#allocation169_spill] sm:$0xff]  ;;  %v11844_v17 = vsub.f32 0.0, %v11843_v57  ;;  %v11846_v56 = vsub.f32 0.0, %v11845_v46  ;;  %v11847_v7 = vld [vmem:[#allocation203_spill] sm:$0xff] }
 0x2ef   : > { %3437 = vmatpush.msrb.mxu3 %v2449_v53  ;;  %3297 = vmatpush.msra.mxu0 %v2424_v6  ;;  %v2324_v1 = vadd.f32 %v11836_v58, %v11834_v62  ;;  %v11842_v41 = vsub.f32 0.0, %v11841_v60  ;;  %v11848_v19 = vsub.f32 0.0, %v11847_v7  ;;  %v11849_v53 = vld [vmem:[#allocation226_spill] sm:$0xff]  ;;  %v11851_v37 = vld [vmem:[#allocation231_spill] sm:$0xff]  ;;  %v11855_v40 = vld [vmem:[#allocation232_spill] sm:$0xff] }
 0x2f0   : > { %3317 = vmatpush.msra.mxu1 %v2425_v18  ;;  %3418 = vmatpush.msrb.mxu2 %v2446_v63  ;;  %v2325_v4 = vadd.f32 %v11840_v3, %v11838_v14  ;;  %v11850_v55 = vsub.f32 0.0, %v11849_v53  ;;  %v11852_v6 = vsub.f32 0.0, %v11851_v37  ;;  %v11853_v12 = vld [vmem:[#allocation227_spill] sm:$0xff]  ;;  %v11856_v61 = vsub.f32 0.0, %v11855_v40  ;;  %v11857_v38 = vld [vmem:[#allocation210_spill] sm:$0xff]  ;;  %v11863_v26 = vld [vmem:[#allocation48_spill] sm:$0xff] }
 0x2f1   : > { %3438 = vmatpush.msrb.mxu3 %v2447_v29  ;;  %3298 = vmatpush.msra.mxu0 %v2422_v23  ;;  %v2300_v15 = vadd.f32 %v11844_v17, %v11842_v41  ;;  %v2301_v44 = vadd.f32 %v11848_v19, %v11846_v56  ;;  %v11854_v18 = vsub.f32 0.0, %v11853_v12  ;;  %v11858_v35 = vsub.f32 0.0, %v11857_v38  ;;  %v11859_v29 = vld [vmem:[#allocation184_spill] sm:$0xff]  ;;  %v11861_v23 = vld [vmem:[#allocation179_spill] sm:$0xff]  ;;  %v11865_v62 = vld [vmem:[#allocation237_spill] sm:$0xff] }
 0x2f2   : > { %3318 = vmatpush.msra.mxu1 %v2423_v10  ;;  %3419 = vmatpush.msrb.mxu2 %v2324_v1  ;;  %v2322_v16 = vadd.f32 %v11852_v6, %v11850_v55  ;;  %v11860_v9 = vsub.f32 0.0, %v11859_v29  ;;  %v11862_v52 = vsub.f32 0.0, %v11861_v23  ;;  %v11864_v10 = vsub.f32 0.0, %v11863_v26  ;;  %v11867_v58 = vld [vmem:[#allocation200_spill] sm:$0xff]  ;;  %v11869_v14 = vld [vmem:[#allocation202_spill] sm:$0xff]  ;;  %v11871_v3 = vld [vmem:[#allocation143_spill] sm:$0xff] }
 0x2f3   : > { %3439 = vmatpush.msrb.mxu3 %v2325_v4  ;;  %3299 = vmatpush.msra.mxu0 %v2300_v15  ;;  %v2323_v63 = vadd.f32 %v11856_v61, %v11854_v18  ;;  %v11866_v21 = vsub.f32 0.0, %v11865_v62  ;;  %v11868_v1 = vsub.f32 0.0, %v11867_v58  ;;  %v11870_v13 = vsub.f32 0.0, %v11869_v14  ;;  %v11873_v41 = vld [vmem:[#allocation246_spill] sm:$0xff]  ;;  %v11875_v17 = vld [vmem:[#allocation248_spill] sm:$0xff]  ;;  %v11877_v56 = vld [vmem:[#allocation249_spill] sm:$0xff] }
 0x2f4   : > { %v2298_v51 = vadd.f32 %v11860_v9, %v11858_v35  ;;  %3319 = vmatpush.msra.mxu1 %v2301_v44  ;;  %3420 = vmatpush.msrb.mxu2 %v2322_v16  ;;  %v2299_v25 = vadd.f32 %v11864_v10, %v11862_v52  ;;  %v11872_v4 = vsub.f32 0.0, %v11871_v3  ;;  %v11874_v57 = vsub.f32 0.0, %v11873_v41  ;;  %v11879_v19 = vld [vmem:[#allocation190_spill] sm:$0xff]  ;;  %v11883_v6 = vld [vmem:[#allocation181_spill] sm:$0xff]  ;;  %v11885_v18 = vld [vmem:[#allocation212_spill] sm:$0xff] }
 0x2f5   : > { %v2320_v34 = vadd.f32 %v11868_v1, %v11866_v21  ;;  %3440 = vmatpush.msrb.mxu3 %v2323_v63  ;;  %v11876_v15 = vsub.f32 0.0, %v11875_v17  ;;  %v11878_v7 = vsub.f32 0.0, %v11877_v56  ;;  %v11880_v44 = vsub.f32 0.0, %v11879_v19  ;;  %v11881_v55 = vld [vmem:[#allocation90_spill] sm:$0xff]  ;;  %v11889_v35 = vld [vmem:[#allocation252_spill] sm:$0xff]  ;;  %v11890_v29 = vld [vmem:[#allocation247_spill] sm:$0xff] }
 0x2f6   : > { %3300 = vmatpush.msra.mxu0 %v2298_v51  ;;  %v2321_v60 = vadd.f32 %v11872_v4, %v11870_v13  ;;  %3320 = vmatpush.msra.mxu1 %v2299_v25  ;;  %v11882_v37 = vsub.f32 0.0, %v11881_v55  ;;  %v11884_v16 = vsub.f32 0.0, %v11883_v6  ;;  %v11886_v40 = vsub.f32 0.0, %v11885_v18  ;;  %v11887_v61 = vld [vmem:[#allocation102_spill] sm:$0xff]  ;;  %v11906_v9 = vld [vmem:[#allocation88_spill] sm:$0xff]  ;;  %v11908_v51 = vld [vmem:[#allocation219_spill] sm:$0xff]  ;;  %v9334_v25 = vpop.f32.mrf.mxu3 }
 0x2f7   : > { %v2296_v46 = vadd.f32 %v11876_v15, %v11874_v57  ;;  %3421 = vmatpush.msrb.mxu2 %v2320_v34  ;;  %v2297_v53 = vadd.f32 %v11880_v44, %v11878_v7  ;;  %v11888_v63 = vsub.f32 0.0, %v11887_v61  ;;  %v11907_v11 = vsub.f32 0.0, %v11906_v9  ;;  %v11910_v52 = vld [vmem:[#allocation225_spill] sm:$0xff] }
 0x2f8   : > { %3441 = vmatpush.msrb.mxu3 %v2321_v60  ;;  %v2294_v12 = vadd.f32 %v11884_v16, %v11882_v37  ;;  %v11909_v23 = vsub.f32 0.0, %v11908_v51  ;;  %v11911_v26 = vsub.f32 0.0, %v11910_v52  ;;  %v3450_v13 = vperm.slane %v9334_v25, 2 }
 0x2f9   : > { %3301 = vmatpush.msra.mxu0 %v2296_v46  ;;  %3321 = vmatpush.msra.mxu1 %v2297_v53  ;;  %v2295_v38 = vadd.f32 %v11888_v63, %v11886_v40  ;;  %v2314_v36 = vadd.f32 %v11907_v11, %v11905_v8  ;;  %v9360_v4 = vadd.f32 1.0, %v9334_v25 }
 0x2fa   : > { %3422 = vmatpush.msrb.mxu2 %v9063_v5  ;;  %3442 = vmatpush.msrb.mxu3 %v9069_v20  ;;  %v11891_v5 = vsub.f32 %v8821_v39, %v8831_v48  ;;  %v11892_v20 = vsub.f32 %v8841_v27, %v8845_v32  ;;  %v11899_v39 = vsub.f32 %v8881_v45, %v8885_v31  ;;  %v11900_v48 = vld [vmem:[#allocation149_spill] sm:$0xff]  ;;  %v11912_v45 = vld [vmem:[#allocation244_spill] sm:$0xff]  ;;  %v9332_v31 = vpop.f32.mrf.mxu2 }
 0x2fb   : > { %3302 = vmatpush.msra.mxu0 %v2294_v12  ;;  %3322 = vmatpush.msra.mxu1 %v2295_v38  ;;  %v11901_v27 = vsub.f32 0.0, %v11900_v48  ;;  %v11902_v32 = vld [vmem:[#allocation41_spill] sm:$0xff]  ;;  %v2315_v10 = vadd.f32 %v11911_v26, %v11909_v23  ;;  %v3449_v17 = vperm.slane %v9332_v31, 2  ;;  %v9370_v15 = vadd.f32 1.0, %v9332_v31 }
 0x2fc   : > { %4368 = vmatmul.msk.f32.vlgmr.msrb.gmra.mxu2 %vm2654_vm0, %v11889_v35  ;;  %4369 = vmatmul.msk.f32.vlgmr.msrb.gmra.mxu3 %vm2654_vm0, %v11889_v35  ;;  %v9385_v19 = vmul.f32 %v3450_v13, %v9334_v25  ;;  %v3594_v44 = vmul.f32 %v9360_v4, %v9360_v4 }
 0x2fd   : > { %4362 = vmatmul.msk.f32.vlgmr.msra.gmra.mxu0 %vm2654_vm0, %v11890_v29  ;;  %4363 = vmatmul.msk.f32.vlgmr.msra.gmra.mxu1 %vm2654_vm0, %v11890_v29 }
 0x2fe   : > { %3375 = vmatpush.msrb.mxu0 %v2444_v43  ;;  %3395 = vmatpush.msrb.mxu1 %v2445_v50  ;;  %v2316_v43 = vadd.f32 %v11898_v33, %v11896_v0  ;;  %v11903_v50 = vsub.f32 0.0, %v11902_v32  ;;  %v9338_v21 = vpop.f32.mrf.mxu3 }
 0x2ff   : > { %v10613_v55 = vperm.slane %v9338_v21, 2  ;;  %v9392_v37 = vadd.f32 1.0, %v9338_v21 }
 0x300   : > { %3376 = vmatpush.msrb.mxu0 %v2442_v2  ;;  %3396 = vmatpush.msrb.mxu1 %v11891_v5  ;;  %v2317_v2 = vadd.f32 %v11903_v50, %v11901_v27  ;;  %v3465_v5 = vmul.f32 %v3449_v17, %v9332_v31 }
 0x301   : > { %v9432_v0 = vmul.f32 %v10613_v55, %v9338_v21  ;;  %v9436_v49 = vmul.f32 %v9392_v37, %v9392_v37 }
 0x302   : > { %3377 = vmatpush.msrb.mxu0 %v11892_v20  ;;  %3397 = vmatpush.msrb.mxu1 %v11893_v47  ;;  %v9336_v62 = vpop.f32.mrf.mxu2  ;;  %v3593_v20 = vmul.f32 %v9370_v15, %v9370_v15  ;;  %v3705_v47 = vperm.slane %v9370_v15, 5 }
 0x303   : > { %v10614_v53 = vperm.slane %v9336_v62, 2  ;;  %v9400_v18 = vadd.f32 1.0, %v9336_v62 }
 0x304   : > { %3378 = vmatpush.msrb.mxu0 %v11894_v59  ;;  %3398 = vmatpush.msrb.mxu1 %v11899_v39 }
 0x305   : > { %v9427_v42 = vmul.f32 %v10614_v53, %v9336_v62 }
 0x306   : > { %3379 = vmatpush.msrb.mxu0 %v2316_v43  ;;  %3399 = vmatpush.msrb.mxu1 %v2317_v2  ;;  %v9441_v43 = vmul.f32 %v9400_v18, %v9400_v18 }
 0x308   : > { %3380 = vmatpush.msrb.mxu0 %v2314_v36  ;;  %3400 = vmatpush.msrb.mxu1 %v2315_v10 }
 0x30a   : > { %3381 = vmatpush.msrb.mxu0 %v9159_v24  ;;  %3401 = vmatpush.msrb.mxu1 %v9169_v30  ;;  %v9340_v24 = vpop.f32.mrf.mxu1  ;;  %v9342_v30 = vpop.f32.mrf.mxu0 }
 0x30b   : > { %v10616_v34 = vperm.slane %v9340_v24, 2  ;;  %v9354_v14 = vadd.f32 1.0, %v9340_v24  ;;  %v10617_v41 = vperm.slane %v9342_v30, 2  ;;  %v9366_v57 = vadd.f32 1.0, %v9342_v30 }
 0x30c   : > { %3382 = vmatpush.msrb.mxu0 %v9179_v54  ;;  %3402 = vmatpush.msrb.mxu1 %v9191_v22  ;;  %v9344_v54 = vpop.f32.mrf.mxu2  ;;  %v9346_v22 = vpop.f32.mrf.mxu3 }
 0x30d   : > { %4366 = vmatmul.msk.f32.vlgmr.msrb.gmra.mxu0 %vm2654_vm0, %v11912_v45  ;;  %4367 = vmatmul.msk.f32.vlgmr.msrb.gmra.mxu1 %vm2654_vm0, %v11912_v45  ;;  %11913 = vst [vmem:[#allocation95_spill] sm:$0xff] %v9344_v54  ;;  %v9375_v46 = vmul.f32 %v10616_v34, %v9340_v24  ;;  %v9379_v56 = vmul.f32 %v9354_v14, %v9354_v14  ;;  %v10615_v11 = vperm.slane %v9344_v54, 2  ;;  %v9470_v36 = vadd.f32 1.0, %v9344_v54 }
 0x30e   : > { %11914 = vst [vmem:[#allocation217_spill] sm:$0xff] %v9346_v22  ;;  %v9409_v63 = vmul.f32 %v10617_v41, %v9342_v30  ;;  %v9413_v38 = vmul.f32 %v9366_v57, %v9366_v57  ;;  %v10618_v50 = vperm.slane %v9346_v22, 2 }
 0x30f   : > { %11920 = vst [vmem:[#allocation16_spill] sm:$0xff] %v9470_v36 }
 0x312   : > { %v9348_v58 = vpop.f32.mrf.mxu1  ;;  %v9350_v1 = vpop.f32.mrf.mxu0 }
 0x313   : > { %v10611_v40 = vperm.slane %v9348_v58, 2  ;;  %v9404_v61 = vadd.f32 1.0, %v9348_v58  ;;  %v10612_v29 = vperm.slane %v9350_v1, 2  ;;  %v9422_v59 = vadd.f32 1.0, %v9350_v1 }
 0x315   : > { %11919 = vst [vmem:[#allocation189_spill] sm:$0xff] %v9404_v61  ;;  %v9447_v48 = vmul.f32 %v10611_v40, %v9348_v58  ;;  %v9451_v27 = vmul.f32 %v9404_v61, %v9404_v61  ;;  %v9459_v2 = vmul.f32 %v10612_v29, %v9350_v1  ;;  %v9466_v9 = vmul.f32 %v9422_v59, %v9422_v59 }
 0x316   : > { %v9481_v40 = vadd.f32 1.0, %v9346_v22 }
 0x318   : > { %11921 = vst [vmem:[#allocation241_spill] sm:$0xff] %v9481_v40  ;;  %v9520_v41 = vmul.f32 %v9481_v40, %v9481_v40  ;;  %v11934_v40 = vperm.slane %v9360_v4, 5 }
 0x31a   : > { %v9394_v6 = vpop.f32.mrf.mxu1  ;;  %v9396_v16 = vpop.f32.mrf.mxu0  ;;  %11928 = vst [vmem:[#allocation194_spill] sm:$0xff] %v9520_v41 }
 0x31b   : > { %11917 = vst [vmem:[#allocation82_spill] sm:$0xff] %v9394_v6 }
 0x31c   : > { %11918 = vst [vmem:[#allocation211_spill] sm:$0xff] %v9396_v16 }
 0x32b   : > { %v9357_v3 = vpop.f32.mrf.mxu2 }
 0x32c   : > { %11915 = vst [vmem:[#allocation207_spill] sm:$0xff] %v9357_v3  ;;  %v9362_v60 = vpop.f32.mrf.mxu3 }
 0x32d   : > { %11916 = vst [vmem:[#allocation30_spill] sm:$0xff] %v9362_v60 }
 0x33a   : > { %v9453_v32 = vpop.f32.mrf.mxu2  ;;  %v9486_v39 = vpop.f32.mrf.mxu0 }
 0x33b   : > { %v3481_v28 = vperm.slane %v9453_v32, 2  ;;  %v3609_v8 = vmul.f32 %v9453_v32, %v9453_v32  ;;  %v3529_v51 = vmul.f32 %v3449_v17, %v9453_v32  ;;  %v3737_v55 = vperm.slane %v9453_v32, 5  ;;  %11922 = vst [vmem:[#allocation87_spill] sm:$0xff] %v9486_v39 }
 0x33c   : > { %v9473_v23 = vpop.f32.mrf.mxu3 }
 0x33d   : > { %v3497_v52 = vmul.f32 %v3481_v28, %v9453_v32  ;;  %v3545_v26 = vmul.f32 %v3481_v28, %v9332_v31  ;;  %v3625_v10 = vadd.f32 %v3609_v8, %v3593_v20  ;;  %v3482_v45 = vperm.slane %v9473_v23, 2  ;;  %v9488_v20 = vpop.f32.mrf.mxu1 }
 0x33e   : > { %v3610_v29 = vmul.f32 %v9473_v23, %v9473_v23  ;;  %11923 = vst [vmem:[#allocation240_spill] sm:$0xff] %v9488_v20  ;;  %v9493_v28 = vmul.f32 %v10615_v11, %v9344_v54  ;;  %v9509_v11 = vmul.f32 %v10618_v50, %v9346_v22  ;;  %v4337_v50 = vld [vmem:[%s9991_s2 + $0x3] ss:$4 sm:$0x3]  ;;  %v3738_v7 = vperm.slane %v9473_v23, 5 }
 0x33f   : > { %v3513_v17 = vsub.f32 %v3465_v5, %v3497_v52  ;;  %v3561_v33 = vadd.f32 %v3545_v26, %v3529_v51  ;;  %4699 = vrcp.f32 %v3625_v10  ;;  %v3498_v8 = vmul.f32 %v3482_v45, %v9473_v23 }
 0x340   : > { %11924 = vst [vmem:[#allocation242_spill] sm:$0xff] %v9493_v28  ;;  %v3546_v15 = vmul.f32 %v3482_v45, %v9334_v25  ;;  %v3626_v53 = vadd.f32 %v3610_v29, %v3594_v44  ;;  %v9499_v5 = vmul.f32 %v9470_v36, %v9470_v36  ;;  %v9504_v26 = vadd.f32 1.0, %v9394_v6  ;;  %v4336_v29 = vld [vmem:[%s9991_s2 + $0x2] ss:$4 sm:$0x3] }
 0x341   : > { %11927 = vst [vmem:[#allocation238_spill] sm:$0xff] %v9509_v11  ;;  %v3530_v44 = vmul.f32 %v3450_v13, %v9473_v23  ;;  %v3721_v45 = vmul.f32 %v3705_v47, %v3513_v17  ;;  %v3753_v51 = vmul.f32 %v3737_v55, %v3561_v33  ;;  %v3817_v35 = vmul.f32 %v3705_v47, %v3561_v33 }
 0x342   : > { %11925 = vst [vmem:[#allocation62_spill] sm:$0xff] %v9499_v5  ;;  %4701 = vrcp.f32 %v3626_v53  ;;  %v3833_v34 = vmul.f32 %v3737_v55, %v3513_v17  ;;  %v3514_v12 = vsub.f32 %v9385_v19, %v3498_v8  ;;  %v11929_v47 = vperm.slane %v9394_v6, 2 }
 0x343   : > { %11926 = vst [vmem:[#allocation254_spill] sm:$0xff] %v9504_v26  ;;  %v3562_v13 = vadd.f32 %v3546_v15, %v3530_v44  ;;  %v9535_v33 = vmul.f32 %v9504_v26, %v9504_v26  ;;  %v9538_v17 = vadd.f32 1.0, %v9396_v16  ;;  %v11932_v15 = vperm.slane %v9396_v16, 2 }
 0x344   : > { %v9531_v55 = vmul.f32 %v11929_v47, %v9394_v6  ;;  %v9546_v20 = vperm.slane %v4336_v29, 0  ;;  %v3769_v39 = vadd.f32 %v3753_v51, %v3721_v45  ;;  %v3849_v47 = vsub.f32 %v3817_v35, %v3833_v34 }
 0x345   : > { %v4700_v52 = vpop.eup %4699  ;;  %11931 = vst [vmem:[#allocation78_spill] sm:$0xff] %v9535_v33  ;;  %v9544_v8 = vmul.f32 %v11932_v15, %v9396_v16  ;;  %v9548_v6 = vperm.slane %v4337_v50, 0  ;;  %v3722_v11 = vmul.f32 %v11934_v40, %v3514_v12  ;;  %v3754_v19 = vmul.f32 %v3738_v7, %v3562_v13 }
 0x346   : > { %11930 = vst [vmem:[#allocation91_spill] sm:$0xff] %v9531_v55  ;;  %v3657_v44 = vmul.f32 %v4700_v52, %v3625_v10  ;;  %v9550_v55 = vperm.slane %v4336_v29, 1  ;;  %v11935_v26 = vmov %v11934_v40  ;;  %v11936_v45 = vperm.slane %v9342_v30, 2 }
 0x347   : > { %11933 = vst [vmem:[#allocation250_spill] sm:$0xff] %v9544_v8  ;;  %v3818_v41 = vmul.f32 %v11935_v26, %v3562_v13  ;;  %v3834_v8 = vmul.f32 %v3738_v7, %v3514_v12  ;;  %v9576_v28 = vperm.slane %v4337_v50, 1 }
 0x348   : > { %v4702_v33 = vpop.eup %4701  ;;  %v3673_v60 = vsub.f32 2.0, %v3657_v44 }
 0x349   : > { %v3658_v10 = vmul.f32 %v4702_v33, %v3626_v53  ;;  %v3850_v5 = vsub.f32 %v3818_v41, %v3834_v8 }
 0x34a   : > { %v3689_v29 = vmul.f32 %v4700_v52, %v3673_v60 }
 0x34b   : > { %v3674_v26 = vsub.f32 2.0, %v3658_v10 }
 0x34c   : > { %v3785_v13 = vperm.slane %v3689_v29, 5 }
 0x34e   : > { %v9556_v15 = vpop.f32.mrf.mxu0  ;;  %v3801_v10 = vmul.f32 %v3785_v13, %v3769_v39  ;;  %v3865_v3 = vmul.f32 %v3849_v47, %v3785_v13  ;;  %v11938_v39 = vperm.slane %v9366_v57, 5 }
 0x34f   : > { %v3479_v51 = vperm.slane %v9556_v15, 2  ;;  %v3607_v34 = vmul.f32 %v9556_v15, %v9556_v15  ;;  %v9561_v35 = vpop.f32.mrf.mxu1  ;;  %v3527_v40 = vmul.f32 %v11936_v45, %v9556_v15  ;;  %v3735_v44 = vperm.slane %v9556_v15, 5 }
 0x350   : > { %v3480_v4 = vperm.slane %v9561_v35, 2  ;;  %v3608_v52 = vmul.f32 %v9561_v35, %v9561_v35  ;;  %v3690_v45 = vmul.f32 %v4702_v33, %v3674_v26  ;;  %v3897_v54 = vrot.slane %v3801_v10, 3 }
 0x351   : > { %v3495_v53 = vmul.f32 %v3479_v51, %v9556_v15  ;;  %v3543_v7 = vmul.f32 %v3479_v51, %v9342_v30  ;;  %v3623_v12 = vadd.f32 %v3607_v34, %v9413_v38  ;;  %v11937_v38 = vperm.slane %v9340_v24, 2 }
 0x352   : > { %v3496_v16 = vmul.f32 %v3480_v4, %v9561_v35  ;;  %v3544_v60 = vmul.f32 %v3480_v4, %v9340_v24  ;;  %v3770_v34 = vadd.f32 %v3754_v19, %v3722_v11  ;;  %v3786_v29 = vperm.slane %v3690_v45, 5 }
 0x353   : > { %v3511_v22 = vsub.f32 %v9409_v63, %v3495_v53  ;;  %v3559_v36 = vadd.f32 %v3543_v7, %v3527_v40  ;;  %4703 = vrcp.f32 %v3623_v12  ;;  %v3528_v51 = vmul.f32 %v11937_v38, %v9561_v35 }
 0x354   : > { %v3512_v4 = vsub.f32 %v9375_v46, %v3496_v16  ;;  %v3961_v61 = vrot.slane %v3865_v3, 3  ;;  %v3624_v63 = vadd.f32 %v3608_v52, %v9379_v56  ;;  %v3802_v40 = vmul.f32 %v3786_v29, %v3770_v34 }
 0x355   : > { %v3560_v33 = vadd.f32 %v3544_v60, %v3528_v51  ;;  %v3866_v26 = vmul.f32 %v3850_v5, %v3786_v29  ;;  %v3719_v50 = vmul.f32 %v11938_v39, %v3511_v22  ;;  %v3751_v47 = vmul.f32 %v3735_v44, %v3559_v36  ;;  %v9590_v5 = vpop.f32.mrf.mxu2 }
 0x356   : > { %v3929_v53 = vsub.f32 %v9332_v31, %v3897_v54  ;;  %v3993_v7 = vsub.f32 %v9453_v32, %v3961_v61  ;;  %v11939_v41 = vmov %v11938_v39  ;;  %4705 = vrcp.f32 %v3624_v63 }
 0x357   : > { %v3815_v11 = vmul.f32 %v11939_v41, %v3559_v36  ;;  %v3898_v3 = vrot.slane %v3802_v40, 3  ;;  %v3962_v16 = vrot.slane %v3866_v26, 3  ;;  %v3831_v19 = vmul.f32 %v3735_v44, %v3511_v22 }
 0x358   : > { %v3736_v56 = vperm.slane %v9561_v35, 5  ;;  %v4014_v8 = vmul.f32 %v9546_v20, %v3929_v53  ;;  %v4035_v13 = vmul.f32 %v9548_v6, %v3993_v7  ;;  %v4116_v31 = vmul.f32 %v9548_v6, %v3929_v53 }
 0x359   : > { %v4704_v46 = vpop.eup %4703  ;;  %v4132_v54 = vmul.f32 %v9546_v20, %v3993_v7  ;;  %v3930_v57 = vsub.f32 %v9334_v25, %v3898_v3  ;;  %v3994_v61 = vsub.f32 %v9473_v23, %v3962_v16  ;;  %v3767_v36 = vadd.f32 %v3751_v47, %v3719_v50 }
 0x35a   : > { %v3655_v32 = vmul.f32 %v4704_v46, %v3623_v12  ;;  %v11940_v22 = vperm.slane %v9354_v14, 5  ;;  %v3752_v60 = vmul.f32 %v3736_v56, %v3560_v33  ;;  %v3485_v10 = vperm.slane %v9590_v5, 2 }
 0x35b   : > { %v4015_v38 = vmul.f32 %v9550_v55, %v3930_v57  ;;  %v4036_v51 = vmul.f32 %v9576_v28, %v3994_v61  ;;  %v4117_v34 = vmul.f32 %v9576_v28, %v3930_v57  ;;  %v4133_v25 = vmul.f32 %v9550_v55, %v3994_v61 }
 0x35c   : > { %v3720_v44 = vmul.f32 %v11940_v22, %v3512_v4  ;;  %v11941_v52 = vmov %v11940_v22  ;;  %v4706_v23 = vpop.eup %4705  ;;  %v4051_v12 = vsub.f32 %v4014_v8, %v4035_v13  ;;  %v4148_v29 = vadd.f32 %v4132_v54, %v4116_v31 }
 0x35d   : > { %v3816_v45 = vmul.f32 %v11941_v52, %v3560_v33  ;;  %v3671_v40 = vsub.f32 2.0, %v3655_v32  ;;  %v3501_v26 = vmul.f32 %v3485_v10, %v9590_v5  ;;  %v4052_v14 = vsub.f32 %v4015_v38, %v4036_v51 }
 0x35e   : > { %v4149_v33 = vadd.f32 %v4133_v25, %v4117_v34  ;;  %v3656_v39 = vmul.f32 %v4706_v23, %v3624_v63  ;;  %v3832_v50 = vmul.f32 %v3736_v56, %v3512_v4  ;;  %v11942_v53 = vperm.slane %v9336_v62, 2 }
 0x35f   : > { %v3687_v47 = vmul.f32 %v4704_v46, %v3671_v40  ;;  %v3549_v41 = vmul.f32 %v3485_v10, %v9336_v62  ;;  %v3613_v3 = vmul.f32 %v9590_v5, %v9590_v5  ;;  %v4082_v16 = vrot.slane %v4052_v14, 6  ;;  %v9619_v46 = vpop.f32.mrf.mxu3 }
 0x360   : > { %v3533_v7 = vmul.f32 %v11942_v53, %v9590_v5  ;;  %v4179_v8 = vrot.slane %v4149_v33, 6  ;;  %v3672_v13 = vsub.f32 2.0, %v3656_v39  ;;  %v3517_v31 = vsub.f32 %v9427_v42, %v3501_v26 }
 0x361   : > { %v3783_v54 = vperm.slane %v3687_v47, 5  ;;  %v3847_v57 = vsub.f32 %v3815_v11, %v3831_v19  ;;  %v3629_v63 = vadd.f32 %v3613_v3, %v9441_v43  ;;  %v3741_v4 = vperm.slane %v9590_v5, 5 }
 0x362   : > { %v4091_v56 = vsel %vm4089_vm1, %v4051_v12, %v4082_v16  ;;  %v4187_v61 = vsel %vm4089_vm1, %v4148_v29, %v4179_v8  ;;  %v3688_v32 = vmul.f32 %v4706_v23, %v3672_v13  ;;  %v3565_v22 = vadd.f32 %v3549_v41, %v3533_v7 }
 0x363   : > { %4107 = vst [vmem:[%s9623_s25 + $0x4] sm:$0xf] %v4091_v56  ;;  %v3799_v42 = vmul.f32 %v3783_v54, %v3767_v36  ;;  %v3863_v52 = vmul.f32 %v3847_v57, %v3783_v54  ;;  %v3768_v11 = vadd.f32 %v3752_v60, %v3720_v44  ;;  %4707 = vrcp.f32 %v3629_v63 }
 0x364   : > { %4371 = vst [vmem:[%s9623_s25 + $0x24] sm:$0xf] %v4187_v61  ;;  %v3784_v43 = vperm.slane %v3688_v32, 5  ;;  %v3848_v19 = vsub.f32 %v3816_v45, %v3832_v50  ;;  %v11943_v10 = vperm.slane %v9400_v18, 5  ;;  %v3486_v51 = vperm.slane %v9619_v46, 2 }
 0x365   : > { %v3895_v34 = vrot.slane %v3799_v42, 3  ;;  %v3959_v25 = vrot.slane %v3863_v52, 3  ;;  %v3837_v23 = vmul.f32 %v3741_v4, %v3517_v31  ;;  %v3614_v12 = vmul.f32 %v9619_v46, %v9619_v46 }
 0x366   : > { %v3725_v38 = vmul.f32 %v11943_v10, %v3517_v31  ;;  %v3800_v29 = vmul.f32 %v3784_v43, %v3768_v11  ;;  %v3864_v40 = vmul.f32 %v3848_v19, %v3784_v43  ;;  %v3757_v36 = vmul.f32 %v3741_v4, %v3565_v22 }
 0x367   : > { %v3502_v44 = vmul.f32 %v3486_v51, %v9619_v46  ;;  %v3927_v60 = vsub.f32 %v9342_v30, %v3895_v34  ;;  %v3991_v45 = vsub.f32 %v9556_v15, %v3959_v25  ;;  %v3550_v26 = vmul.f32 %v3486_v51, %v9338_v21  ;;  %v9650_v4 = vpop.f32.mrf.mxu0 }
 0x368   : > { %v3630_v14 = vadd.f32 %v3614_v12, %v9436_v49  ;;  %v3896_v33 = vrot.slane %v3800_v29, 3  ;;  %v3960_v39 = vrot.slane %v3864_v40, 3  ;;  %v11944_v50 = vmov %v11943_v10  ;;  %v9659_v10 = vpop.f32.mrf.mxu1 }
 0x369   : > { %v3821_v47 = vmul.f32 %v11944_v50, %v3565_v22  ;;  %v11945_v53 = vperm.slane %v9338_v21, 2  ;;  %v4708_v41 = vpop.eup %4707  ;;  %v4012_v3 = vmul.f32 %v9546_v20, %v3927_v60  ;;  %v4033_v30 = vmul.f32 %v9548_v6, %v3991_v45 }
 0x36a   : > { %v4114_v15 = vmul.f32 %v9548_v6, %v3927_v60  ;;  %v4130_v16 = vmul.f32 %v9546_v20, %v3991_v45  ;;  %v3928_v49 = vsub.f32 %v9340_v24, %v3896_v33  ;;  %v3992_v8 = vsub.f32 %v9561_v35, %v3960_v39 }
 0x36b   : > { %v3534_v7 = vmul.f32 %v11945_v53, %v9619_v46  ;;  %v3661_v13 = vmul.f32 %v4708_v41, %v3629_v63  ;;  %v3518_v18 = vsub.f32 %v9432_v0, %v3502_v44  ;;  %v3773_v31 = vadd.f32 %v3757_v36, %v3725_v38 }
 0x36c   : > { %4709 = vrcp.f32 %v3630_v14  ;;  %v3742_v57 = vperm.slane %v9619_v46, 5  ;;  %v4013_v56 = vmul.f32 %v9550_v55, %v3928_v49  ;;  %v4034_v61 = vmul.f32 %v9576_v28, %v3992_v8 }
 0x36d   : > { %v3566_v54 = vadd.f32 %v3550_v26, %v3534_v7  ;;  %v4115_v32 = vmul.f32 %v9576_v28, %v3928_v49  ;;  %v4131_v24 = vmul.f32 %v9550_v55, %v3992_v8  ;;  %v4049_v22 = vsub.f32 %v4012_v3, %v4033_v30 }
 0x36e   : > { %v4146_v35 = vadd.f32 %v4130_v16, %v4114_v15  ;;  %v3677_v63 = vsub.f32 2.0, %v3661_v13  ;;  %v3853_v42 = vsub.f32 %v3821_v47, %v3837_v23  ;;  %v4050_v0 = vsub.f32 %v4013_v56, %v4034_v61 }
 0x36f   : > { %v4147_v52 = vadd.f32 %v4131_v24, %v4115_v32  ;;  %v11946_v11 = vperm.slane %v9392_v37, 5  ;;  %v3483_v19 = vperm.slane %v9650_v4, 2  ;;  %v3758_v51 = vmul.f32 %v3742_v57, %v3566_v54 }
 0x370   : > { %v3693_v38 = vmul.f32 %v4708_v41, %v3677_v63  ;;  %v11947_v34 = vperm.slane %v9350_v1, 2  ;;  %v3611_v12 = vmul.f32 %v9650_v4, %v9650_v4  ;;  %v4081_v23 = vrot.slane %v4050_v0, 6 }
 0x371   : > { %v3726_v43 = vmul.f32 %v11946_v11, %v3518_v18  ;;  %v4178_v29 = vrot.slane %v4147_v52, 6  ;;  %v3499_v40 = vmul.f32 %v3483_v19, %v9650_v4  ;;  %v3547_v36 = vmul.f32 %v3483_v19, %v9350_v1 }
 0x372   : > { %v3531_v25 = vmul.f32 %v11947_v34, %v9650_v4  ;;  %v4710_v44 = vpop.eup %4709  ;;  %v3789_v60 = vperm.slane %v3693_v38, 5  ;;  %v3627_v45 = vadd.f32 %v3611_v12, %v9466_v9  ;;  %v3739_v26 = vperm.slane %v9650_v4, 5 }
 0x373   : > { %v3484_v33 = vperm.slane %v9659_v10, 2  ;;  %v4090_v39 = vsel %vm4089_vm1, %v4049_v22, %v4081_v23  ;;  %v4186_v50 = vsel %vm4089_vm1, %v4146_v35, %v4178_v29  ;;  %v3662_v47 = vmul.f32 %v4710_v44, %v3630_v14 }
 0x374   : > { %v3515_v53 = vsub.f32 %v9459_v2, %v3499_v40  ;;  %4106 = vst [vmem:[%s9623_s25] sm:$0xf] %v4090_v39  ;;  %v3805_v7 = vmul.f32 %v3789_v60, %v3773_v31  ;;  %v3869_v41 = vmul.f32 %v3853_v42, %v3789_v60  ;;  %v3563_v3 = vadd.f32 %v3547_v36, %v3531_v25  ;;  %v9699_v25 = vpop.f32.mrf.mxu2 }
 0x375   : > { %4711 = vrcp.f32 %v3627_v45  ;;  %4370 = vst [vmem:[%s9623_s25 + $0x20] sm:$0xf] %v4186_v50  ;;  %v3678_v30 = vsub.f32 2.0, %v3662_v47  ;;  %v11948_v9 = vmov %v11946_v11  ;;  %v3838_v16 = vmul.f32 %v3742_v57, %v3518_v18 }
 0x376   : > { %v3822_v15 = vmul.f32 %v11948_v9, %v3566_v54  ;;  %v3500_v49 = vmul.f32 %v3484_v33, %v9659_v10  ;;  %v3901_v8 = vrot.slane %v3805_v7, 3  ;;  %v3965_v13 = vrot.slane %v3869_v41, 3 }
 0x377   : > { %v11949_v56 = vperm.slane %v9422_v59, 5  ;;  %v3755_v61 = vmul.f32 %v3739_v26, %v3563_v3  ;;  %v9683_v2 = vmul.f32 %v9538_v17, %v9538_v17  ;;  %v3694_v31 = vmul.f32 %v4710_v44, %v3678_v30 }
 0x378   : > { %v3774_v32 = vadd.f32 %v3758_v51, %v3726_v43  ;;  %v3835_v24 = vmul.f32 %v3739_v26, %v3515_v53  ;;  %v3933_v22 = vsub.f32 %v9336_v62, %v3901_v8  ;;  %v3997_v37 = vsub.f32 %v9590_v5, %v3965_v13  ;;  %v11952_v26 = vld [vmem:[#allocation189_spill] sm:$0xff] }
 0x379   : > { %v3723_v14 = vmul.f32 %v11949_v56, %v3515_v53  ;;  %v11950_v18 = vmov %v11949_v56  ;;  %v3548_v57 = vmul.f32 %v3484_v33, %v9348_v58  ;;  %v3790_v35 = vperm.slane %v3694_v31, 5 }
 0x37a   : > { %v3819_v54 = vmul.f32 %v11950_v18, %v3563_v3  ;;  %v3854_v63 = vsub.f32 %v3822_v15, %v3838_v16  ;;  %v3516_v42 = vsub.f32 %v9447_v48, %v3500_v49  ;;  %v3612_v0 = vmul.f32 %v9659_v10, %v9659_v10  ;;  %v11955_v15 = vld [vmem:[#allocation95_spill] sm:$0xff]  ;;  %v11957_v18 = vld [vmem:[#allocation242_spill] sm:$0xff] }
 0x37b   : > { %v4712_v52 = vpop.eup %4711  ;;  %v4018_v11 = vmul.f32 %v9546_v20, %v3933_v22  ;;  %v4039_v43 = vmul.f32 %v9548_v6, %v3997_v37  ;;  %v3771_v62 = vadd.f32 %v3755_v61, %v3723_v14  ;;  %v11951_v5 = vperm.slane %v9348_v58, 2  ;;  %v11956_v61 = vld [vmem:[#allocation62_spill] sm:$0xff] }
 0x37c   : > { %v3806_v19 = vmul.f32 %v3790_v35, %v3774_v32  ;;  %v3870_v38 = vmul.f32 %v3854_v63, %v3790_v35  ;;  %v3659_v51 = vmul.f32 %v4712_v52, %v3627_v45  ;;  %v3628_v34 = vadd.f32 %v3612_v0, %v9451_v27  ;;  %v9720_v32 = vpop.f32.mrf.mxu3 }
 0x37d   : > { %v3532_v59 = vmul.f32 %v11951_v5, %v9659_v10  ;;  %v4120_v48 = vmul.f32 %v9548_v6, %v3933_v22  ;;  %v4136_v12 = vmul.f32 %v9546_v20, %v3997_v37  ;;  %v3851_v23 = vsub.f32 %v3819_v54, %v3835_v24 }
 0x37e   : > { %v3902_v40 = vrot.slane %v3806_v19, 3  ;;  %v3966_v36 = vrot.slane %v3870_v38, 3  ;;  %v3675_v44 = vsub.f32 2.0, %v3659_v51  ;;  %4713 = vrcp.f32 %v3628_v34 }
 0x37f   : > { %v3564_v29 = vadd.f32 %v3548_v57, %v3532_v59  ;;  %v4055_v60 = vsub.f32 %v4018_v11, %v4039_v43  ;;  %v11953_v33 = vperm.slane %v11952_v26, 5  ;;  %v3740_v45 = vperm.slane %v9659_v10, 5 }
 0x380   : > { %v3489_v27 = vperm.slane %v9699_v25, 2  ;;  %v3934_v50 = vsub.f32 %v9338_v21, %v3902_v40  ;;  %v3998_v47 = vsub.f32 %v9619_v46, %v3966_v36  ;;  %v3691_v53 = vmul.f32 %v4712_v52, %v3675_v44 }
 0x381   : > { %v3724_v39 = vmul.f32 %v11953_v33, %v3516_v42  ;;  %v3617_v7 = vmul.f32 %v9699_v25, %v9699_v25  ;;  %v4152_v41 = vadd.f32 %v4136_v12, %v4120_v48  ;;  %v11954_v3 = vmov %v11953_v33  ;;  %v11959_v48 = vld [vmem:[#allocation207_spill] sm:$0xff]  ;;  %v11960_v33 = vld [vmem:[#allocation16_spill] sm:$0xff] }
 0x382   : > { %v3820_v30 = vmul.f32 %v11954_v3, %v3564_v29  ;;  %v3505_v9 = vmul.f32 %v3489_v27, %v9699_v25  ;;  %v3553_v16 = vmul.f32 %v3489_v27, %v11955_v15  ;;  %v4019_v49 = vmul.f32 %v9550_v55, %v3934_v50  ;;  %v11963_v3 = vld [vmem:[#allocation217_spill] sm:$0xff] }
 0x383   : > { %v4040_v8 = vmul.f32 %v9576_v28, %v3998_v47  ;;  %v4121_v21 = vmul.f32 %v9576_v28, %v3934_v50  ;;  %v4137_v46 = vmul.f32 %v9550_v55, %v3998_v47  ;;  %v3787_v13 = vperm.slane %v3691_v53, 5 }
 0x384   : > { %v3756_v56 = vmul.f32 %v3740_v45, %v3564_v29  ;;  %v3836_v14 = vmul.f32 %v3740_v45, %v3516_v42  ;;  %v3633_v31 = vadd.f32 %v3617_v7, %v11956_v61  ;;  %v4714_v24 = vpop.eup %4713  ;;  %v3521_v54 = vsub.f32 %v11957_v18, %v3505_v9 }
 0x385   : > { %v4056_v22 = vsub.f32 %v4019_v49, %v4040_v8  ;;  %v4153_v37 = vadd.f32 %v4137_v46, %v4121_v21  ;;  %v11958_v57 = vperm.slane %v11955_v15, 2  ;;  %v3803_v63 = vmul.f32 %v3787_v13, %v3771_v62 }
 0x386   : > { %v3867_v0 = vmul.f32 %v3851_v23, %v3787_v13  ;;  %v3660_v52 = vmul.f32 %v4714_v24, %v3628_v34  ;;  %4715 = vrcp.f32 %v3633_v31  ;;  %v3490_v5 = vperm.slane %v9720_v32, 2  ;;  %v11965_v13 = vld [vmem:[#allocation194_spill] sm:$0xff] }
 0x387   : > { %v3537_v35 = vmul.f32 %v11958_v57, %v9699_v25  ;;  %v4084_v11 = vrot.slane %v4056_v22, 6  ;;  %v4181_v42 = vrot.slane %v4153_v37, 6  ;;  %v3899_v59 = vrot.slane %v3803_v63, 3  ;;  %v11966_v37 = vld [vmem:[#allocation238_spill] sm:$0xff] }
 0x388   : > { %v3963_v19 = vrot.slane %v3867_v0, 3  ;;  %v3676_v38 = vsub.f32 2.0, %v3660_v52  ;;  %v3745_v51 = vperm.slane %v9699_v25, 5  ;;  %v3461_v12 = vperm.slane %v11959_v48, 2 }
 0x389   : > { %v3569_v43 = vadd.f32 %v3553_v16, %v3537_v35  ;;  %v9730_v29 = vadd.f32 1.0, %v11959_v48  ;;  %v4093_v62 = vsel %vm4089_vm1, %v4055_v60, %v4084_v11  ;;  %v4189_v34 = vsel %vm4089_vm1, %v4152_v41, %v4181_v42 }
 0x38a   : > { %4109 = vst [vmem:[%s9623_s25 + $0xc] sm:$0xf] %v4093_v62  ;;  %v3931_v23 = vsub.f32 %v9350_v1, %v3899_v59  ;;  %v3995_v40 = vsub.f32 %v9650_v4, %v3963_v19  ;;  %v3692_v36 = vmul.f32 %v4714_v24, %v3676_v38  ;;  %v3772_v44 = vadd.f32 %v3756_v56, %v3724_v39 }
 0x38b   : > { %4373 = vst [vmem:[%s9623_s25 + $0x2c] sm:$0xf] %v4189_v34  ;;  %v3852_v26 = vsub.f32 %v3820_v30, %v3836_v14  ;;  %v11961_v45 = vperm.slane %v11960_v33, 5  ;;  %v3506_v50 = vmul.f32 %v3490_v5, %v9720_v32  ;;  %v3618_v47 = vmul.f32 %v9720_v32, %v9720_v32  ;;  %v9754_v14 = vpop.f32.mrf.mxu0 }
 0x38c   : > { %v4716_v60 = vpop.eup %4715  ;;  %v3761_v53 = vmul.f32 %v3745_v51, %v3569_v43  ;;  %v3841_v1 = vmul.f32 %v3745_v51, %v3521_v54  ;;  %v3554_v4 = vmul.f32 %v3490_v5, %v11963_v3  ;;  %v4016_v39 = vmul.f32 %v9546_v20, %v3931_v23  ;;  %v11967_v51 = vld [vmem:[#allocation241_spill] sm:$0xff] }
 0x38d   : > { %v3729_v27 = vmul.f32 %v11961_v45, %v3521_v54  ;;  %v11962_v7 = vmov %v11961_v45  ;;  %v3788_v9 = vperm.slane %v3692_v36, 5  ;;  %v3665_v30 = vmul.f32 %v4716_v60, %v3633_v31  ;;  %v11969_v36 = vld [vmem:[#allocation211_spill] sm:$0xff] }
 0x38e   : > { %v3825_v41 = vmul.f32 %v11962_v7, %v3569_v43  ;;  %v11964_v16 = vperm.slane %v11963_v3, 2  ;;  %v4037_v8 = vmul.f32 %v9548_v6, %v3995_v40  ;;  %v4118_v21 = vmul.f32 %v9548_v6, %v3931_v23 }
 0x38f   : > { %v4134_v46 = vmul.f32 %v9546_v20, %v3995_v40  ;;  %v3634_v56 = vadd.f32 %v3618_v47, %v11965_v13  ;;  %v3804_v61 = vmul.f32 %v3788_v9, %v3772_v44  ;;  %v3868_v24 = vmul.f32 %v3852_v26, %v3788_v9  ;;  %v11972_v9 = vld [vmem:[#allocation250_spill] sm:$0xff] }
 0x390   : > { %v3538_v49 = vmul.f32 %v11964_v16, %v9720_v32  ;;  %v3681_v22 = vsub.f32 2.0, %v3665_v30  ;;  %v3522_v18 = vsub.f32 %v11966_v37, %v3506_v50  ;;  %v3777_v31 = vadd.f32 %v3761_v53, %v3729_v27 }
 0x391   : > { %4717 = vrcp.f32 %v3634_v56  ;;  %v3746_v57 = vperm.slane %v9720_v32, 5  ;;  %v3900_v35 = vrot.slane %v3804_v61, 3  ;;  %v3964_v63 = vrot.slane %v3868_v24, 3  ;;  %v9779_v61 = vpop.f32.mrf.mxu1  ;;  %v11973_v24 = vld [vmem:[#allocation30_spill] sm:$0xff] }
 0x392   : > { %v3570_v54 = vadd.f32 %v3554_v4, %v3538_v49  ;;  %v3697_v0 = vmul.f32 %v4716_v60, %v3681_v22  ;;  %v3487_v52 = vperm.slane %v9754_v14, 2  ;;  %v4053_v11 = vsub.f32 %v4016_v39, %v4037_v8 }
 0x393   : > { %v4150_v42 = vadd.f32 %v4134_v46, %v4118_v21  ;;  %v3857_v43 = vsub.f32 %v3825_v41, %v3841_v1  ;;  %v3615_v5 = vmul.f32 %v9754_v14, %v9754_v14  ;;  %v3932_v59 = vsub.f32 %v9348_v58, %v3900_v35 }
 0x394   : > { %v3996_v19 = vsub.f32 %v9659_v10, %v3964_v63  ;;  %v3793_v38 = vperm.slane %v3697_v0, 5  ;;  %v11968_v62 = vperm.slane %v11967_v51, 5  ;;  %v3762_v23 = vmul.f32 %v3746_v57, %v3570_v54 }
 0x395   : > { %v3503_v40 = vmul.f32 %v3487_v52, %v9754_v14  ;;  %v3551_v44 = vmul.f32 %v3487_v52, %v11969_v36  ;;  %v3631_v26 = vadd.f32 %v3615_v5, %v9683_v2  ;;  %v4017_v33 = vmul.f32 %v9550_v55, %v3932_v59 }
 0x396   : > { %v3730_v34 = vmul.f32 %v11968_v62, %v3522_v18  ;;  %v4038_v45 = vmul.f32 %v9576_v28, %v3996_v19  ;;  %v4119_v27 = vmul.f32 %v9576_v28, %v3932_v59  ;;  %v4135_v58 = vmul.f32 %v9550_v55, %v3996_v19 }
 0x397   : > { %v4718_v10 = vpop.eup %4717  ;;  %v3809_v50 = vmul.f32 %v3793_v38, %v3777_v31  ;;  %v3873_v47 = vmul.f32 %v3857_v43, %v3793_v38  ;;  %v11970_v60 = vmov %v11968_v62  ;;  %v11971_v7 = vperm.slane %v11969_v36, 2 }
 0x398   : > { %v3826_v53 = vmul.f32 %v11970_v60, %v3570_v54  ;;  %v4054_v1 = vsub.f32 %v4017_v33, %v4038_v45  ;;  %v4151_v2 = vadd.f32 %v4135_v58, %v4119_v27  ;;  %v3666_v4 = vmul.f32 %v4718_v10, %v3634_v56  ;;  %v11974_v27 = vld [vmem:[#allocation87_spill] sm:$0xff]  ;;  %v11975_v60 = vld [vmem:[#allocation78_spill] sm:$0xff] }
 0x399   : > { %v3535_v41 = vmul.f32 %v11971_v7, %v9754_v14  ;;  %4719 = vrcp.f32 %v3631_v26  ;;  %v3842_v39 = vmul.f32 %v3746_v57, %v3522_v18  ;;  %v3519_v30 = vsub.f32 %v11972_v9, %v3503_v40 }
 0x39a   : > { %v3743_v49 = vperm.slane %v9754_v14, 5  ;;  %v4083_v8 = vrot.slane %v4054_v1, 6  ;;  %v4180_v21 = vrot.slane %v4151_v2, 6  ;;  %v3905_v46 = vrot.slane %v3809_v50, 3 }
 0x39b   : > { %v3567_v16 = vadd.f32 %v3551_v44, %v3535_v41  ;;  %v3682_v13 = vsub.f32 2.0, %v3666_v4  ;;  %v3462_v22 = vperm.slane %v11973_v24, 2  ;;  %v9783_v37 = vadd.f32 1.0, %v11973_v24 }
 0x39c   : > { %v3711_v56 = vperm.slane %v9538_v17, 5  ;;  %v3969_v18 = vrot.slane %v3873_v47, 3  ;;  %v9789_v31 = vmul.f32 %v3461_v12, %v11959_v48  ;;  %v4092_v54 = vsel %vm4089_vm1, %v4053_v11, %v4083_v8 }
 0x39d   : > { %v4188_v57 = vsel %vm4089_vm1, %v4150_v42, %v4180_v21  ;;  %v3698_v35 = vmul.f32 %v4718_v10, %v3682_v13  ;;  %v3605_v63 = vmul.f32 %v9730_v29, %v9730_v29  ;;  %4108 = vst [vmem:[%s9623_s25 + $0x8] sm:$0xf] %v4092_v54  ;;  %v3759_v52 = vmul.f32 %v3743_v49, %v3567_v16 }
 0x39e   : > { %v3727_v0 = vmul.f32 %v3711_v56, %v3519_v30  ;;  %v3488_v43 = vperm.slane %v9779_v61, 2  ;;  %4372 = vst [vmem:[%s9623_s25 + $0x28] sm:$0xf] %v4188_v57  ;;  %v3937_v5 = vsub.f32 %v11955_v15, %v3905_v46  ;;  %v3778_v59 = vadd.f32 %v3762_v23, %v3730_v34 }
 0x39f   : > { %v4720_v17 = vpop.eup %4719  ;;  %v3794_v19 = vperm.slane %v3698_v35, 5  ;;  %v3858_v38 = vsub.f32 %v3826_v53, %v3842_v39  ;;  %v3717_v11 = vperm.slane %v9730_v29, 5  ;;  %v4001_v42 = vsub.f32 %v9699_v25, %v3969_v18 }
 0x3a0   : > { %v3663_v51 = vmul.f32 %v4720_v17, %v3631_v26  ;;  %v3823_v62 = vmul.f32 %v3711_v56, %v3567_v16  ;;  %v3839_v33 = vmul.f32 %v3743_v49, %v3519_v30  ;;  %v3616_v45 = vmul.f32 %v9779_v61, %v9779_v61  ;;  %v9807_v26 = vpop.f32.mrf.mxu2  ;;  %v11976_v30 = vld [vmem:[#allocation91_spill] sm:$0xff]  ;;  %v11977_v49 = vld [vmem:[#allocation82_spill] sm:$0xff] }
 0x3a1   : > { %v3810_v40 = vmul.f32 %v3794_v19, %v3778_v59  ;;  %v3874_v44 = vmul.f32 %v3858_v38, %v3794_v19  ;;  %v3459_v58 = vperm.slane %v11974_v27, 2  ;;  %v3775_v50 = vadd.f32 %v3759_v52, %v3727_v0 }
 0x3a2   : > { %v3679_v10 = vsub.f32 2.0, %v3663_v51  ;;  %v3504_v15 = vmul.f32 %v3488_v43, %v9779_v61  ;;  %v4022_v34 = vmul.f32 %v9546_v20, %v3937_v5  ;;  %v3632_v25 = vadd.f32 %v3616_v45, %v11975_v60 }
 0x3a3   : > { %v3906_v23 = vrot.slane %v3810_v40, 3  ;;  %v3970_v47 = vrot.slane %v3874_v44, 3  ;;  %v4043_v53 = vmul.f32 %v9548_v6, %v4001_v42  ;;  %v4124_v7 = vmul.f32 %v9548_v6, %v3937_v5 }
 0x3a4   : > { %v4140_v41 = vmul.f32 %v9546_v20, %v4001_v42  ;;  %v3695_v1 = vmul.f32 %v4720_v17, %v3679_v10  ;;  %v3855_v39 = vsub.f32 %v3823_v62, %v3839_v33  ;;  %4721 = vrcp.f32 %v3632_v25 }
 0x3a5   : > { %v3938_v2 = vsub.f32 %v11963_v3, %v3906_v23  ;;  %v4002_v4 = vsub.f32 %v9720_v32, %v3970_v47  ;;  %v3520_v16 = vsub.f32 %v11976_v30, %v3504_v15  ;;  %v3552_v8 = vmul.f32 %v3488_v43, %v11977_v49 }
 0x3a6   : > { %v3791_v9 = vperm.slane %v3695_v1, 5  ;;  %v3493_v21 = vperm.slane %v9807_v26, 2  ;;  %v4059_v3 = vsub.f32 %v4022_v34, %v4043_v53  ;;  %v11978_v57 = vperm.slane %v11977_v49, 2  ;;  %v9839_v53 = vpop.f32.mrf.mxu3 }
 0x3a7   : > { %v4023_v46 = vmul.f32 %v9550_v55, %v3938_v2  ;;  %v4044_v13 = vmul.f32 %v9576_v28, %v4002_v4  ;;  %v4125_v56 = vmul.f32 %v9576_v28, %v3938_v2  ;;  %v4141_v18 = vmul.f32 %v9550_v55, %v4002_v4 }
 0x3a8   : > { %v3807_v54 = vmul.f32 %v3791_v9, %v3775_v50  ;;  %v3871_v32 = vmul.f32 %v3855_v39, %v3791_v9  ;;  %v3536_v35 = vmul.f32 %v11978_v57, %v9779_v61  ;;  %v4156_v0 = vadd.f32 %v4140_v41, %v4124_v7  ;;  %v11979_v50 = vld [vmem:[#allocation254_spill] sm:$0xff] }
 0x3a9   : > { %v4060_v52 = vsub.f32 %v4023_v46, %v4044_v13  ;;  %v4157_v43 = vadd.f32 %v4141_v18, %v4125_v56  ;;  %v3621_v17 = vmul.f32 %v9807_v26, %v9807_v26  ;;  %v3744_v59 = vperm.slane %v9779_v61, 5 }
 0x3aa   : > { %v3568_v5 = vadd.f32 %v3552_v8, %v3536_v35  ;;  %v3509_v19 = vmul.f32 %v3493_v21, %v9807_v26  ;;  %v3557_v38 = vmul.f32 %v3493_v21, %v11959_v48  ;;  %v4722_v42 = vpop.eup %4721  ;;  %v3903_v40 = vrot.slane %v3807_v54, 3 }
 0x3ab   : > { %v4086_v51 = vrot.slane %v4060_v52, 6  ;;  %v4183_v62 = vrot.slane %v4157_v43, 6  ;;  %v3637_v44 = vadd.f32 %v3621_v17, %v3605_v63  ;;  %v9830_v33 = vadd.f32 1.0, %v11974_v27 }
 0x3ac   : > { %v3967_v45 = vrot.slane %v3871_v32, 3  ;;  %v3664_v10 = vmul.f32 %v4722_v42, %v3632_v25  ;;  %v11980_v15 = vperm.slane %v11979_v50, 5  ;;  %v3541_v60 = vmul.f32 %v3461_v12, %v9807_v26 }
 0x3ad   : > { %v4095_v23 = vsel %vm4089_vm1, %v4059_v3, %v4086_v51  ;;  %v4191_v47 = vsel %vm4089_vm1, %v4156_v0, %v4183_v62  ;;  %4723 = vrcp.f32 %v3637_v44  ;;  %v3760_v63 = vmul.f32 %v3744_v59, %v3568_v5 }
 0x3ae   : > { %v3728_v34 = vmul.f32 %v11980_v15, %v3520_v16  ;;  %4111 = vst [vmem:[%s9623_s25 + $0x14] sm:$0xf] %v4095_v23  ;;  %v11981_v7 = vmov %v11980_v15  ;;  %v3840_v25 = vmul.f32 %v3744_v59, %v3520_v16  ;;  %v3525_v1 = vsub.f32 %v9789_v31, %v3509_v19  ;;  %v9872_v19 = vpop.f32.mrf.mxu0 }
 0x3af   : > { %v3824_v41 = vmul.f32 %v11981_v7, %v3568_v5  ;;  %4375 = vst [vmem:[%s9623_s25 + $0x34] sm:$0xf] %v4191_v47  ;;  %v3935_v2 = vsub.f32 %v11969_v36, %v3903_v40  ;;  %v3680_v4 = vsub.f32 2.0, %v3664_v10  ;;  %v3573_v39 = vadd.f32 %v3557_v38, %v3541_v60 }
 0x3b0   : > { %v3749_v9 = vperm.slane %v9807_v26, 5  ;;  %v3478_v12 = vmul.f32 %v3462_v22, %v11973_v24  ;;  %v3606_v30 = vmul.f32 %v9783_v37, %v9783_v37  ;;  %v3999_v8 = vsub.f32 %v9754_v14, %v3967_v45 }
 0x3b1   : > { %v3494_v16 = vperm.slane %v9839_v53, 2  ;;  %v3718_v31 = vperm.slane %v9783_v37, 5  ;;  %v9859_v36 = vmul.f32 %v3459_v58, %v11974_v27  ;;  %v3696_v21 = vmul.f32 %v4722_v42, %v3680_v4 }
 0x3b2   : > { %v3622_v46 = vmul.f32 %v9839_v53, %v9839_v53  ;;  %v3603_v13 = vmul.f32 %v9830_v33, %v9830_v33  ;;  %v3776_v56 = vadd.f32 %v3760_v63, %v3728_v34  ;;  %v3856_v18 = vsub.f32 %v3824_v41, %v3840_v25 }
 0x3b3   : > { %v3733_v14 = vmul.f32 %v3717_v11, %v3525_v1  ;;  %v4724_v3 = vpop.eup %4723  ;;  %v4020_v37 = vmul.f32 %v9546_v20, %v3935_v2  ;;  %v3792_v54 = vperm.slane %v3696_v21, 5  ;;  %v3765_v32 = vmul.f32 %v3749_v9, %v3573_v39 }
 0x3b4   : > { %v3638_v57 = vadd.f32 %v3622_v46, %v3606_v30  ;;  %v4041_v35 = vmul.f32 %v9548_v6, %v3999_v8  ;;  %v4122_v0 = vmul.f32 %v9548_v6, %v3935_v2  ;;  %v3669_v52 = vmul.f32 %v4724_v3, %v3637_v44 }
 0x3b5   : > { %v3510_v43 = vmul.f32 %v3494_v16, %v9839_v53  ;;  %v3808_v17 = vmul.f32 %v3792_v54, %v3776_v56  ;;  %v3872_v5 = vmul.f32 %v3856_v18, %v3792_v54  ;;  %v3558_v59 = vmul.f32 %v3494_v16, %v11973_v24  ;;  %v9891_v18 = vpop.f32.mrf.mxu1 }
 0x3b6   : > { %4725 = vrcp.f32 %v3638_v57  ;;  %v4138_v38 = vmul.f32 %v9546_v20, %v3999_v8  ;;  %v3685_v42 = vsub.f32 2.0, %v3669_v52  ;;  %v3829_v51 = vmul.f32 %v3717_v11, %v3573_v39 }
 0x3b7   : > { %v3845_v62 = vmul.f32 %v3749_v9, %v3525_v1  ;;  %v3904_v40 = vrot.slane %v3808_v17, 3  ;;  %v3968_v45 = vrot.slane %v3872_v5, 3  ;;  %v3781_v10 = vadd.f32 %v3765_v32, %v3733_v14  ;;  %v11982_v32 = vld [vmem:[#allocation240_spill] sm:$0xff] }
 0x3b8   : > { %v3542_v44 = vmul.f32 %v3462_v22, %v9839_v53  ;;  %v3701_v50 = vmul.f32 %v4724_v3, %v3685_v42  ;;  %v3526_v15 = vsub.f32 %v3478_v12, %v3510_v43  ;;  %v3750_v34 = vperm.slane %v9839_v53, 5 }
 0x3b9   : > { %v3619_v23 = vmul.f32 %v9872_v19, %v9872_v19  ;;  %v4057_v47 = vsub.f32 %v4020_v37, %v4041_v35  ;;  %v3936_v60 = vsub.f32 %v11977_v49, %v3904_v40  ;;  %v4000_v29 = vsub.f32 %v9779_v61, %v3968_v45 }
 0x3ba   : > { %v3574_v11 = vadd.f32 %v3558_v59, %v3542_v44  ;;  %v3797_v63 = vperm.slane %v3701_v50, 5  ;;  %v3861_v7 = vsub.f32 %v3829_v51, %v3845_v62  ;;  %v3491_v41 = vperm.slane %v9872_v19, 2 }
 0x3bb   : > { %v3635_v25 = vadd.f32 %v3619_v23, %v3603_v13  ;;  %v4021_v22 = vmul.f32 %v9550_v55, %v3936_v60  ;;  %v4042_v2 = vmul.f32 %v9576_v28, %v4000_v29  ;;  %v4123_v4 = vmul.f32 %v9576_v28, %v3936_v60 }
 0x3bc   : > { %v4726_v1 = vpop.eup %4725  ;;  %v4139_v39 = vmul.f32 %v9550_v55, %v4000_v29  ;;  %v3734_v12 = vmul.f32 %v3718_v31, %v3526_v15  ;;  %v3846_v49 = vmul.f32 %v3750_v34, %v3526_v15  ;;  %v3766_v8 = vmul.f32 %v3750_v34, %v3574_v11 }
 0x3bd   : > { %v3670_v9 = vmul.f32 %v4726_v1, %v3638_v57  ;;  %4727 = vrcp.f32 %v3635_v25  ;;  %v4058_v61 = vsub.f32 %v4021_v22, %v4042_v2  ;;  %v3830_v16 = vmul.f32 %v3718_v31, %v3574_v11 }
 0x3be   : > { %v4155_v30 = vadd.f32 %v4139_v39, %v4123_v4  ;;  %v3813_v21 = vmul.f32 %v3797_v63, %v3781_v10  ;;  %v3877_v46 = vmul.f32 %v3861_v7, %v3797_v63  ;;  %v3507_v56 = vmul.f32 %v3491_v41, %v9872_v19 }
 0x3bf   : > { %v3686_v13 = vsub.f32 2.0, %v3670_v9  ;;  %v4154_v14 = vadd.f32 %v4138_v38, %v4122_v0  ;;  %v4085_v3 = vrot.slane %v4058_v61, 6  ;;  %v3555_v54 = vmul.f32 %v3491_v41, %v11974_v27 }
 0x3c0   : > { %v4182_v37 = vrot.slane %v4155_v30, 6  ;;  %v3460_v57 = vperm.slane %v11982_v32, 2  ;;  %v9896_v35 = vadd.f32 1.0, %v11982_v32  ;;  %v3539_v52 = vmul.f32 %v3459_v58, %v9872_v19 }
 0x3c1   : > { %v3702_v31 = vmul.f32 %v4726_v1, %v3686_v13  ;;  %v4094_v43 = vsel %vm4089_vm1, %v4057_v47, %v4085_v3  ;;  %v3782_v0 = vadd.f32 %v3766_v8, %v3734_v12  ;;  %v3492_v5 = vperm.slane %v9891_v18, 2 }
 0x3c2   : > { %v4190_v17 = vsel %vm4089_vm1, %v4154_v14, %v4182_v37  ;;  %4110 = vst [vmem:[%s9623_s25 + $0x10] sm:$0xf] %v4094_v43  ;;  %v3909_v38 = vrot.slane %v3813_v21, 3  ;;  %v3973_v42 = vrot.slane %v3877_v46, 3  ;;  %v3862_v51 = vsub.f32 %v3830_v16, %v3846_v49 }
 0x3c3   : > { %v4728_v59 = vpop.eup %4727  ;;  %v3523_v62 = vsub.f32 %v9859_v36, %v3507_v56  ;;  %4374 = vst [vmem:[%s9623_s25 + $0x30] sm:$0xf] %v4190_v17  ;;  %v3798_v40 = vperm.slane %v3702_v31, 5  ;;  %v3571_v45 = vadd.f32 %v3555_v54, %v3539_v52  ;;  %v3620_v58 = vmul.f32 %v9891_v18, %v9891_v18 }
 0x3c4   : > { %v3667_v10 = vmul.f32 %v4728_v59, %v3635_v25  ;;  %v3715_v44 = vperm.slane %v9830_v33, 5  ;;  %v3476_v50 = vmul.f32 %v3460_v57, %v11982_v32  ;;  %v3604_v15 = vmul.f32 %v9896_v35, %v9896_v35 }
 0x3c5   : > { %v3747_v34 = vperm.slane %v9872_v19, 5  ;;  %v3814_v23 = vmul.f32 %v3798_v40, %v3782_v0  ;;  %v3878_v47 = vmul.f32 %v3862_v51, %v3798_v40  ;;  %v3508_v36 = vmul.f32 %v3492_v5, %v9891_v18 }
 0x3c6   : > { %v3683_v60 = vsub.f32 2.0, %v3667_v10  ;;  %v3941_v29 = vsub.f32 %v11959_v48, %v3909_v38  ;;  %v4005_v11 = vsub.f32 %v9807_v26, %v3973_v42  ;;  %v3731_v63 = vmul.f32 %v3715_v44, %v3523_v62 }
 0x3c7   : > { %v3636_v7 = vadd.f32 %v3620_v58, %v3604_v15  ;;  %v3910_v41 = vrot.slane %v3814_v23, 3  ;;  %v3974_v33 = vrot.slane %v3878_v47, 3  ;;  %v3763_v25 = vmul.f32 %v3747_v34, %v3571_v45 }
 0x3c8   : > { %v3827_v1 = vmul.f32 %v3715_v44, %v3571_v45  ;;  %v3699_v22 = vmul.f32 %v4728_v59, %v3683_v60  ;;  %v3843_v2 = vmul.f32 %v3747_v34, %v3523_v62  ;;  %v3556_v4 = vmul.f32 %v3492_v5, %v11982_v32 }
 0x3c9   : > { %4729 = vrcp.f32 %v3636_v7  ;;  %v3942_v39 = vsub.f32 %v11973_v24, %v3910_v41  ;;  %v4006_v9 = vsub.f32 %v9839_v53, %v3974_v33  ;;  %v3524_v12 = vsub.f32 %v3476_v50, %v3508_v36 }
 0x3ca   : > { %v3540_v48 = vmul.f32 %v3460_v57, %v9891_v18  ;;  %v4026_v26 = vmul.f32 %v9546_v20, %v3941_v29  ;;  %v4047_v49 = vmul.f32 %v9548_v6, %v4005_v11  ;;  %v4128_v61 = vmul.f32 %v9548_v6, %v3941_v29 }
 0x3cb   : > { %v4144_v30 = vmul.f32 %v9546_v20, %v4005_v11  ;;  %v4027_v8 = vmul.f32 %v9550_v55, %v3942_v39  ;;  %v4048_v16 = vmul.f32 %v9576_v28, %v4006_v9  ;;  %v4129_v21 = vmul.f32 %v9576_v28, %v3942_v39 }
 0x3cc   : > { %v4145_v24 = vmul.f32 %v9550_v55, %v4006_v9  ;;  %v3795_v53 = vperm.slane %v3699_v22, 5  ;;  %v3572_v46 = vadd.f32 %v3556_v4, %v3540_v48  ;;  %v3716_v13 = vperm.slane %v9896_v35, 5 }
 0x3cd   : > { %v4064_v56 = vsub.f32 %v4027_v8, %v4048_v16  ;;  %v3779_v3 = vadd.f32 %v3763_v25, %v3731_v63  ;;  %v4063_v54 = vsub.f32 %v4026_v26, %v4047_v49  ;;  %v4160_v57 = vadd.f32 %v4144_v30, %v4128_v61 }
 0x3ce   : > { %v4161_v14 = vadd.f32 %v4145_v24, %v4129_v21  ;;  %v3859_v31 = vsub.f32 %v3827_v1, %v3843_v2  ;;  %v3748_v52 = vperm.slane %v9891_v18, 5  ;;  %v3732_v5 = vmul.f32 %v3716_v13, %v3524_v12 }
 0x3cf   : > { %v4730_v37 = vpop.eup %4729  ;;  %v4088_v43 = vrot.slane %v4064_v56, 6  ;;  %v3811_v59 = vmul.f32 %v3795_v53, %v3779_v3  ;;  %v3828_v45 = vmul.f32 %v3716_v13, %v3572_v46 }
 0x3d0   : > { %v4185_v17 = vrot.slane %v4161_v14, 6  ;;  %v3668_v0 = vmul.f32 %v4730_v37, %v3636_v7  ;;  %v3875_v38 = vmul.f32 %v3859_v31, %v3795_v53  ;;  %v3764_v42 = vmul.f32 %v3748_v52, %v3572_v46 }
 0x3d1   : > { %v3844_v51 = vmul.f32 %v3748_v52, %v3524_v12  ;;  %v4097_v35 = vsel %vm4089_vm1, %v4063_v54, %v4088_v43  ;;  %v3907_v58 = vrot.slane %v3811_v59, 3 }
 0x3d2   : > { %v4193_v62 = vsel %vm4089_vm1, %v4160_v57, %v4185_v17  ;;  %v3684_v40 = vsub.f32 2.0, %v3668_v0  ;;  %4113 = vst [vmem:[%s9623_s25 + $0x1c] sm:$0xf] %v4097_v35  ;;  %v3971_v44 = vrot.slane %v3875_v38, 3  ;;  %v3780_v50 = vadd.f32 %v3764_v42, %v3732_v5 }
 0x3d3   : > { %4377 = vst [vmem:[%s9623_s25 + $0x3c] sm:$0xf] %v4193_v62  ;;  %v3860_v34 = vsub.f32 %v3828_v45, %v3844_v51  ;;  %v3939_v60 = vsub.f32 %v11974_v27, %v3907_v58 }
 0x3d4   : > { %v3700_v10 = vmul.f32 %v4730_v37, %v3684_v40  ;;  %v4003_v36 = vsub.f32 %v9872_v19, %v3971_v44 }
 0x3d5   : > { %v4024_v41 = vmul.f32 %v9546_v20, %v3939_v60  ;;  %v4126_v25 = vmul.f32 %v9548_v6, %v3939_v60 }
 0x3d6   : > { %v3796_v15 = vperm.slane %v3700_v10, 5  ;;  %v4045_v33 = vmul.f32 %v9548_v6, %v4003_v36  ;;  %v4142_v1 = vmul.f32 %v9546_v20, %v4003_v36 }
 0x3d8   : > { %v3812_v23 = vmul.f32 %v3796_v15, %v3780_v50  ;;  %v3876_v47 = vmul.f32 %v3860_v34, %v3796_v15  ;;  %v4061_v4 = vsub.f32 %v4024_v41, %v4045_v33  ;;  %v4158_v39 = vadd.f32 %v4142_v1, %v4126_v25 }
 0x3da   : > { %v3908_v29 = vrot.slane %v3812_v23, 3  ;;  %v3972_v11 = vrot.slane %v3876_v47, 3 }
 0x3dc   : > { %v3940_v63 = vsub.f32 %v11982_v32, %v3908_v29  ;;  %v4004_v7 = vsub.f32 %v9891_v18, %v3972_v11 }
 0x3de   : > { %v4025_v27 = vmul.f32 %v9550_v55, %v3940_v63  ;;  %v4046_v19 = vmul.f32 %v9576_v28, %v4004_v7  ;;  %v4127_v22 = vmul.f32 %v9576_v28, %v3940_v63  ;;  %v4143_v32 = vmul.f32 %v9550_v55, %v4004_v7 }
 0x3e0   : > { %v4062_v18 = vsub.f32 %v4025_v27, %v4046_v19  ;;  %v4159_v2 = vadd.f32 %v4143_v32, %v4127_v22 }
 0x3e2   : > { %v4087_v9 = vrot.slane %v4062_v18, 6  ;;  %v4184_v12 = vrot.slane %v4159_v2, 6 }
 0x3e4   : > { %v4096_v48 = vsel %vm4089_vm1, %v4061_v4, %v4087_v9  ;;  %v4192_v6 = vsel %vm4089_vm1, %v4158_v39, %v4184_v12 }
 0x3e5   : > { %4112 = vst [vmem:[%s9623_s25 + $0x18] sm:$0xf] %v4096_v48 }
 0x3e6   : > { %4376 = vst [vmem:[%s9623_s25 + $0x38] sm:$0xf] %v4192_v6 }
 0x3e7   : > { %s4386_s27 = sshll.u32 %s4819_s16, 5  ;;  %s4235_s28 = sshll.u32 %s9623_s25, 4  ;;  %s4236_s28 = int_to_ptr.vmem [resolvable:$true] %s4235_s28 }
 0x3e8   : > { %s4224_s4 = scalar_lea.hbm %s9992_s3, %s4386_s27  ;;  %s4771_s6 = smov 512  }
 0x3e9   : > { %s4237_s5 = sshll.u32 %s4224_s4, 4  ;;  %4387 = sst [smem:[#allocation7]] (%p4836_p5), %s4771_s6  ;;  %s4238_s5 = int_to_ptr.hbm [resolvable:$true] %s4237_s5 }
 0x3ea   : > { %s4772_s7 = smov 1024   ;;  %s4773_s8 = smov 8  }
 0x3eb   : > { %4388 = sst [smem:[#allocation7 + $0x1]] (%p4836_p5), %s4772_s7  ;;  %s4774_s16 = smov 64  }
 0x3ec   : > { %4389 = sst [smem:[#allocation7 + $0x2]] (%p4836_p5), %s4773_s8  ;;  %s4775_s9 = smov 4  }
 0x3ed   : > { %4390 = sst [smem:[#allocation7 + $0x3]] (%p4836_p5), %s4774_s16  ;;  %s4776_s10 = smov [#allocation6]  }
 0x3ee   : > { %4391 = sst [smem:[#allocation7 + $0x4]] (%p4836_p5), %s4774_s16  ;;  %s4777_s11 = smov 0  }
 0x3ef   : > { %4392 = sst [smem:[#allocation7 + $0x5]] (%p4836_p5), %s4775_s9 }
 0x3f0   : > { %4393 = dma.general (%p4836_p5), %s4236_s28, 1024, %s4238_s5, %s4212_s26, %s4776_s10, [#allocation7], %s4777_s11, 0  }
 0x3f1 PF: > { %p4399_p11 = scmp.ge.s32.totalorder %s4768_s15, 2  ;;  %s4265_s17 = sand.u32 1, %s4756_s12  }
 0x3f2   : > { %s4266_s19 = scalar_lea.sflag [#allocation5], %s4265_s17 }
 0x3f3   : > { %p4396_p12 = pnand %p4399_p11, %p4840_p6 }
 0x3f5   : > { %p4397_p13 = pneg %p4396_p12 }
 0x3f7   : > { %4751 = dma.done.wait (%p4397_p13), %s4266_s19, 1024  }
 0x3f8   : > { %4753 = vsyncadd (%p4397_p13), %s4266_s19, 4294966272  ;;  %p13_p0 = scmp.ge.s32.totalorder %s4823_s18, 4   ;;  %s11983_s12 = smov %s4760_s13 }
 0x3f9   : > { %s11984_s13 = smov %s4764_s14  ;;  %s11985_s14 = smov %s4834_s21 }
 0x3fa   : > { %s11986_s15 = smov %s4823_s18  ;;  %15 = sbr.rel (!%p13_p0) target bundleno = 3 (0x3), region = 79 }
 0x3ff   :  { %4272 = vsyncpa [#allocation5], 1 }
 0x400   :  { %4274 = vsyncpa [#allocation5 + $0x1], 1 }

</bundles_post_ra>
